<compile_context>
chip_gen: v5e
topology: v5e:2x2
jax: 0.10.0
libtpu: 0.0.40
codegen_flags: <defaults>
</compile_context>

<pallas_src>
import numpy as np
import jax
import jax.numpy as jnp
from jax.experimental import pallas as pl
from jax.experimental.pallas import tpu as pltpu

C = 16                  # channels produced by both convs
H_IN = W_IN = 48        # input spatial size (module is hard-wired to (1, 48, 48))
W1 = 46                 # conv1 output width (3x3 VALID)
WP1 = 23                # width (= height) after pool1
W2 = 21                 # conv2 output width
WP2 = 10                # width after pool2 (floor)
HP2 = 10                # height after pool2 (floor)

HALF1 = 384             # pooled-width lanes per parity half after conv1 (23*16 padded to 3*128)
HALF2 = 256             # pooled-width lanes per parity half after conv2 (10*16 padded to 2*128)
WPAD1 = HALF1 // C      # 24 pooled-width positions incl. one zero-pad column

_HP = jax.lax.Precision.HIGHEST


def _backbone_kernel(lhs1_ref, m1_ref, b1_ref, m2_ref, b2_ref, o_ref, se_ref, so_ref):
    r3 = o_ref.shape[0]                 # Bb*12 rows, ordered (sample-in-block, q)
    bf = jnp.bfloat16

    # ---- conv1: one fused band matmul over the 3 kernel-row taps (LHS built on host) ----
    h1 = jnp.dot(lhs1_ref[...], m1_ref[...], preferred_element_type=jnp.float32)   # (4*r3, 768)
    h1 = jnp.maximum(h1 + b1_ref[...], 0.0)

    # ---- maxpool1: width = aligned lane-half max, height = aligned row-group max ----
    # (rows of h1 are grouped host-side by conv-output-row mod 4, r3 rows per group)
    wp = jnp.maximum(h1[:, :HALF1], h1[:, HALF1:])                  # (4*r3, 384)
    pe = jnp.maximum(wp[0 * r3:1 * r3], wp[1 * r3:2 * r3])          # pooled rows t = 2q
    po = jnp.maximum(wp[2 * r3:3 * r3], wp[3 * r3:4 * r3])          # pooled rows t = 2q+1

    # ---- stage pe/po so the "+1 pooled row" conv2 taps are plain offset-1 loads ----
    se_ref[0:r3, :] = pe
    so_ref[0:r3, :] = po
    zeros_tail = jnp.zeros((8, HALF1), jnp.float32)
    se_ref[r3:r3 + 8, :] = zeros_tail                               # feeds dropped rows only
    so_ref[r3:r3 + 8, :] = zeros_tail
    pe_b = pe.astype(bf)
    po_b = po.astype(bf)
    pe1_b = se_ref[1:r3 + 1, :].astype(bf)                          # pooled rows t = 2q+2
    po1_b = so_ref[1:r3 + 1, :].astype(bf)                          # pooled rows t = 2q+3

    # ---- conv2: even / odd output rows as one fused band matmul (K = 3*384 = 1152) ----
    lhs2 = jnp.concatenate(
        [jnp.concatenate([pe_b, po_b, pe1_b], axis=1),              # conv2 rows z = 2q
         jnp.concatenate([po_b, pe1_b, po1_b], axis=1)],            # conv2 rows z = 2q+1
        axis=0)                                                     # (2*r3, 1152) bf16
    h2 = jnp.dot(lhs2, m2_ref[...], preferred_element_type=jnp.float32)   # (2*r3, 512)
    h2 = jnp.maximum(h2 + b2_ref[...], 0.0)

    # ---- maxpool2: width = lane-half max, height = even/odd row-group max ----
    o_ref[...] = jnp.maximum(
        jnp.maximum(h2[0:r3, :HALF2], h2[0:r3, HALF2:]),
        jnp.maximum(h2[r3:2 * r3, :HALF2], h2[r3:2 * r3, HALF2:]))


# ----------------------- host-side (deterministic) parameter packing -----------------------

def _pack_conv1(conv1_w):
    # torch (co=16, ci=1, kh=3, kw=3) -> fused 3-row-tap band matrix (3*48, 2*384).
    # Output lanes: [parity (even wo | odd wo)] x [pooled-width idx 0..23 (23 = zero pad)] x [co].
    w = np.transpose(np.asarray(conv1_w, np.float32), (2, 3, 1, 0))      # (kh, kw, 1, co)
    M = np.zeros((3, W_IN, 2 * HALF1), np.float32)
    for dy in range(3):
        for dx in range(3):
            for idx in range(WP1):
                for par in range(2):
                    wo = 2 * idx + par                                   # conv1 output column
                    col = par * HALF1 + idx * C
                    M[dy, wo + dx, col:col + C] += w[dy, dx, 0, :]
    return M.reshape(3 * W_IN, 2 * HALF1)                                # (144, 768)


def _pack_conv2(conv2_w):
    # torch (co=16, ci=16, kh=3, kw=3) -> fused band matrix (3*24*16, 2*256).
    # K rows: [tap dy] x [pooled-width pos j 0..23 (j=23 rows are zero)] x [ci].
    # Output lanes: [parity] x [pooled-width idx 0..15 (10..15 zero pad)] x [co];
    # conv2 column 20 (dropped by the floor pool) is not emitted.
    w = np.transpose(np.asarray(conv2_w, np.float32), (2, 3, 1, 0))      # (kh, kw, ci, co)
    M = np.zeros((3, WPAD1, C, 2 * HALF2), np.float32)
    for dy in range(3):
        for dx in range(3):
            for idx in range(WP2):
                for par in range(2):
                    wo = 2 * idx + par                                   # conv2 output column
                    col = par * HALF2 + idx * C
                    M[dy, wo + dx, :, col:col + C] += w[dy, dx, :, :]
    return M.reshape(3 * WPAD1 * C, 2 * HALF2)                           # (1152, 512)


def _pack_bias(b, half, npos):
    row = np.zeros((1, 2 * half), np.float32)
    b = np.asarray(b, np.float32)
    for par in range(2):
        for idx in range(npos):
            row[0, par * half + idx * C: par * half + idx * C + C] = b
    return row


def tiny_backbone_forward(x, conv1_w, conv1_b, conv2_w, conv2_b, block_b=8):
    """x: (B, 1, 48, 48) float32 NCHW.  Returns (B, 1600) float32 (torch CHW flatten order)."""
    B = x.shape[0]
    assert x.shape == (B, 1, H_IN, W_IN)
    assert H_IN % 4 == 0 and W_IN % 2 == 0          # row-grouping / pooling invariants
    Bp = ((B + block_b - 1) // block_b) * block_b   # pad batch to whole blocks
    nblk = Bp // block_b

    # ---- host-side conv1 LHS: 3 row taps fused (K=144), rows grouped by conv-row mod 4 ----
    xf = jnp.asarray(x, jnp.float32).reshape(B * H_IN, W_IN)
    xpad = jnp.concatenate(
        [xf, jnp.zeros(((Bp - B) * H_IN + 2, W_IN), jnp.float32)], axis=0)
    N = Bp * H_IN
    lhs1 = jnp.concatenate([xpad[0:N], xpad[1:N + 1], xpad[2:N + 2]], axis=1)    # (N, 144)
    lhs1 = lhs1.reshape(nblk, block_b, H_IN // 4, 4, 3 * W_IN)
    lhs1 = jnp.transpose(lhs1, (0, 3, 1, 2, 4)).reshape(N, 3 * W_IN)
    lhs1 = lhs1.astype(jnp.bfloat16)

    m1 = jnp.asarray(_pack_conv1(conv1_w), jnp.bfloat16)       # (144, 768)
    m2 = jnp.asarray(_pack_conv2(conv2_w), jnp.bfloat16)       # (1152, 512)
    b1row = jnp.asarray(_pack_bias(conv1_b, HALF1, WP1))       # (1, 768)
    b2row = jnp.asarray(_pack_bias(conv2_b, HALF2, WP2))       # (1, 512)

    rb_in = block_b * H_IN            # 384 LHS rows / block into conv1 (4 row groups of Bb*12)
    rb_out = block_b * (H_IN // 4)    # 96 output rows / block (12 per sample, 10 valid)

    out = pl.pallas_call(
        _backbone_kernel,
        out_shape=jax.ShapeDtypeStruct((Bp * (H_IN // 4), HALF2), jnp.float32),
        grid=(nblk,),
        in_specs=[
            pl.BlockSpec((rb_in, 3 * W_IN), lambda i: (i, 0)),           # grouped conv1 LHS
            pl.BlockSpec((3 * W_IN, 2 * HALF1), lambda i: (0, 0)),       # conv1 fused bands
            pl.BlockSpec((1, 2 * HALF1), lambda i: (0, 0)),              # conv1 bias row
            pl.BlockSpec((3 * WPAD1 * C, 2 * HALF2), lambda i: (0, 0)),  # conv2 fused bands
            pl.BlockSpec((1, 2 * HALF2), lambda i: (0, 0)),              # conv2 bias row
        ],
        out_specs=pl.BlockSpec((rb_out, HALF2), lambda i: (i, 0)),
        scratch_shapes=[
            pltpu.VMEM((rb_out + 8, HALF1), jnp.float32),                # pe staging (+1 taps)
            pltpu.VMEM((rb_out + 8, HALF1), jnp.float32),                # po staging
        ],
        compiler_params=pltpu.CompilerParams(
            dimension_semantics=("parallel",),
            vmem_limit_bytes=32 * 1024 * 1024,
        ),
    )(lhs1, m1, b1row, m2, b2row)

    # drop pad rows (u=10,11), pad lanes (160..255) and pad samples; reorder to torch flatten.
    feats = out.reshape(Bp, H_IN // 4, HALF2)[:B, :HP2, :WP2 * C]        # (B, 10, 160)
    feats = feats.reshape(B, HP2, WP2, C)
    feats = jnp.transpose(feats, (0, 3, 1, 2))                           # (B, C, H, W)
    return feats.reshape(B, C * HP2 * WP2)                               # (B, 1600)


def reference_forward(x, conv1_w, conv1_b, conv2_w, conv2_b):
    """Plain-JAX f32 reference reproducing the PyTorch forward (NCHW, HIGHEST precision)."""
    B = x.shape[0]
    dn = ('NCHW', 'OIHW', 'NCHW')
    y = jax.lax.conv_general_dilated(x, conv1_w, (1, 1), 'VALID',
                                     dimension_numbers=dn, precision=_HP)
    y = jnp.maximum(y + conv1_b[None, :, None, None], 0.0)
    y = jnp.max(y.reshape(B, C, WP1, 2, WP1, 2), axis=(3, 5))
    y = jax.lax.conv_general_dilated(y, conv2_w, (1, 1), 'VALID',
                                     dimension_numbers=dn, precision=_HP)
    y = jnp.maximum(y + conv2_b[None, :, None, None], 0.0)
    y = y[:, :, :2 * HP2, :2 * WP2]
    y = jnp.max(y.reshape(B, C, HP2, 2, WP2, 2), axis=(3, 5))
    return y.reshape(B, -1)


if __name__ == "__main__":
    key = jax.random.PRNGKey(0)
    k1, k2, k3, k4, kx = jax.random.split(key, 5)

    B = 10  # pads to 16 -> grid of 2 blocks (exercises padding + keeps both v7x TCs busy)
    conv1_w = jax.random.normal(k1, (16, 1, 3, 3), jnp.float32) * 0.2
    conv1_b = jax.random.normal(k2, (16,), jnp.float32) * 0.1
    conv2_w = jax.random.normal(k3, (16, 16, 3, 3), jnp.float32) * 0.1
    conv2_b = jax.random.normal(k4, (16,), jnp.float32) * 0.1
    x = jax.random.normal(kx, (B, 1, 48, 48), jnp.float32)

    out = tiny_backbone_forward(x, conv1_w, conv1_b, conv2_w, conv2_b)
    out = jax.block_until_ready(out)
    assert out.shape == (B, 1600), out.shape

    ref = jax.block_until_ready(reference_forward(x, conv1_w, conv1_b, conv2_w, conv2_b))
    # bf16 MXU inputs (f32 accumulation) vs. f32 HIGHEST reference -> bf16-level tolerance.
    np.testing.assert_allclose(np.asarray(out), np.asarray(ref), rtol=2e-2, atol=2e-2)

    print("KERNEL_OK")
</pallas_src>

<mosaic_0001>
module attributes {stable_mosaic.version = 11 : i64} {
  func.func @_backbone_kernel(%arg0: i32, %arg1: memref<384x144xbf16, #tpu.memory_space<vmem>>, %arg2: memref<144x768xbf16, #tpu.memory_space<vmem>>, %arg3: memref<1x768xf32, #tpu.memory_space<vmem>>, %arg4: memref<1152x512xbf16, #tpu.memory_space<vmem>>, %arg5: memref<1x512xf32, #tpu.memory_space<vmem>>, %arg6: memref<96x256xf32, #tpu.memory_space<vmem>>, %arg7: memref<104x384xf32, #tpu.memory_space<vmem>>, %arg8: memref<104x384xf32, #tpu.memory_space<vmem>>) attributes {dimension_semantics = [#tpu.dimension_semantics<parallel>], iteration_bounds = array<i64: 2>, scalar_prefetch = 0 : i64, scratch_operands = 2 : i64, tpu.core_type = #tpu.core_type<tc>, window_params = [{transform_indices = @transform_0, window_bounds = array<i64: 384, 144>}, {pipeline_mode = #tpu.pipeline_mode<synchronous>, transform_indices = @transform_1, window_bounds = array<i64: 144, 768>}, {pipeline_mode = #tpu.pipeline_mode<synchronous>, transform_indices = @transform_2, window_bounds = array<i64: 1, 768>}, {pipeline_mode = #tpu.pipeline_mode<synchronous>, transform_indices = @transform_3, window_bounds = array<i64: 1152, 512>}, {pipeline_mode = #tpu.pipeline_mode<synchronous>, transform_indices = @transform_4, window_bounds = array<i64: 1, 512>}, {transform_indices = @transform_5, window_bounds = array<i64: 96, 256>}]} {
    %c0 = arith.constant 0 : index
    %c0_0 = arith.constant 0 : index
    %0 = vector.load %arg1[%c0, %c0_0] : memref<384x144xbf16, #tpu.memory_space<vmem>>, vector<384x144xbf16>
    %c0_1 = arith.constant 0 : index
    %c0_2 = arith.constant 0 : index
    %1 = vector.load %arg2[%c0_1, %c0_2] : memref<144x768xbf16, #tpu.memory_space<vmem>>, vector<144x768xbf16>
    %cst = arith.constant dense<0.000000e+00> : vector<384x768xf32>
    %2 = tpu.matmul %0, %1, %cst {dimension_numbers = #tpu.dot_dimension_numbers<[1], [0], [0], [1], [0, 0, 1, 1], [], []>} : vector<384x144xbf16>, vector<144x768xbf16>, vector<384x768xf32> -> vector<384x768xf32>
    %c0_3 = arith.constant 0 : index
    %c0_4 = arith.constant 0 : index
    %3 = vector.load %arg3[%c0_3, %c0_4] : memref<1x768xf32, #tpu.memory_space<vmem>>, vector<1x768xf32>
    %4 = vector.broadcast %3 : vector<1x768xf32> to vector<384x768xf32>
    %5 = arith.addf %2, %4 : vector<384x768xf32>
    %cst_5 = arith.constant 0.000000e+00 : f32
    %6 = vector.broadcast %cst_5 : f32 to vector<384x768xf32>
    %7 = arith.maximumf %5, %6 : vector<384x768xf32>
    %8 = vector.extract_strided_slice %7 {offsets = [0, 0], sizes = [384, 384], strides = [1, 1]} : vector<384x768xf32> to vector<384x384xf32>
    %9 = vector.extract_strided_slice %7 {offsets = [0, 384], sizes = [384, 384], strides = [1, 1]} : vector<384x768xf32> to vector<384x384xf32>
    %10 = arith.maximumf %8, %9 : vector<384x384xf32>
    %11 = vector.extract_strided_slice %10 {offsets = [0, 0], sizes = [96, 384], strides = [1, 1]} : vector<384x384xf32> to vector<96x384xf32>
    %12 = vector.extract_strided_slice %10 {offsets = [96, 0], sizes = [96, 384], strides = [1, 1]} : vector<384x384xf32> to vector<96x384xf32>
    %13 = arith.maximumf %11, %12 : vector<96x384xf32>
    %14 = vector.extract_strided_slice %10 {offsets = [192, 0], sizes = [96, 384], strides = [1, 1]} : vector<384x384xf32> to vector<96x384xf32>
    %15 = vector.extract_strided_slice %10 {offsets = [288, 0], sizes = [96, 384], strides = [1, 1]} : vector<384x384xf32> to vector<96x384xf32>
    %16 = arith.maximumf %14, %15 : vector<96x384xf32>
    %c0_6 = arith.constant 0 : index
    %c0_7 = arith.constant 0 : index
    %17 = vector.load %arg7[%c0_6, %c0_7] : memref<104x384xf32, #tpu.memory_space<vmem>>, vector<96x384xf32>
    tpu.vector_store %arg7[%c0_6, %c0_7], %13 {strides = array<i32>} : memref<104x384xf32, #tpu.memory_space<vmem>>, vector<96x384xf32>,
    %c0_8 = arith.constant 0 : index
    %c0_9 = arith.constant 0 : index
    %18 = vector.load %arg8[%c0_8, %c0_9] : memref<104x384xf32, #tpu.memory_space<vmem>>, vector<96x384xf32>
    tpu.vector_store %arg8[%c0_8, %c0_9], %16 {strides = array<i32>} : memref<104x384xf32, #tpu.memory_space<vmem>>, vector<96x384xf32>,
    %cst_10 = arith.constant 0.000000e+00 : f32
    %19 = vector.broadcast %cst_10 : f32 to vector<8x384xf32>
    %c96 = arith.constant 96 : index
    %c0_11 = arith.constant 0 : index
    %20 = vector.load %arg7[%c96, %c0_11] : memref<104x384xf32, #tpu.memory_space<vmem>>, vector<8x384xf32>
    tpu.vector_store %arg7[%c96, %c0_11], %19 {strides = array<i32>} : memref<104x384xf32, #tpu.memory_space<vmem>>, vector<8x384xf32>,
    %c96_12 = arith.constant 96 : index
    %c0_13 = arith.constant 0 : index
    %21 = vector.load %arg8[%c96_12, %c0_13] : memref<104x384xf32, #tpu.memory_space<vmem>>, vector<8x384xf32>
    tpu.vector_store %arg8[%c96_12, %c0_13], %19 {strides = array<i32>} : memref<104x384xf32, #tpu.memory_space<vmem>>, vector<8x384xf32>,
    %22 = arith.truncf %13 : vector<96x384xf32> to vector<96x384xbf16>
    %23 = arith.truncf %16 : vector<96x384xf32> to vector<96x384xbf16>
    %c1 = arith.constant 1 : index
    %c0_14 = arith.constant 0 : index
    %24 = vector.load %arg7[%c1, %c0_14] : memref<104x384xf32, #tpu.memory_space<vmem>>, vector<96x384xf32>
    %25 = arith.truncf %24 : vector<96x384xf32> to vector<96x384xbf16>
    %c1_15 = arith.constant 1 : index
    %c0_16 = arith.constant 0 : index
    %26 = vector.load %arg8[%c1_15, %c0_16] : memref<104x384xf32, #tpu.memory_space<vmem>>, vector<96x384xf32>
    %27 = arith.truncf %26 : vector<96x384xf32> to vector<96x384xbf16>
    %28 = tpu.concatenate %22, %23, %25 in 1 : vector<96x384xbf16>, vector<96x384xbf16>, vector<96x384xbf16> -> vector<96x1152xbf16>
    %29 = tpu.concatenate %23, %25, %27 in 1 : vector<96x384xbf16>, vector<96x384xbf16>, vector<96x384xbf16> -> vector<96x1152xbf16>
    %30 = tpu.concatenate %28, %29 in 0 : vector<96x1152xbf16>, vector<96x1152xbf16> -> vector<192x1152xbf16>
    %c0_17 = arith.constant 0 : index
    %c0_18 = arith.constant 0 : index
    %31 = vector.load %arg4[%c0_17, %c0_18] : memref<1152x512xbf16, #tpu.memory_space<vmem>>, vector<1152x512xbf16>
    %cst_19 = arith.constant dense<0.000000e+00> : vector<192x512xf32>
    %32 = tpu.matmul %30, %31, %cst_19 {dimension_numbers = #tpu.dot_dimension_numbers<[1], [0], [0], [1], [0, 0, 1, 1], [], []>} : vector<192x1152xbf16>, vector<1152x512xbf16>, vector<192x512xf32> -> vector<192x512xf32>
    %c0_20 = arith.constant 0 : index
    %c0_21 = arith.constant 0 : index
    %33 = vector.load %arg5[%c0_20, %c0_21] : memref<1x512xf32, #tpu.memory_space<vmem>>, vector<1x512xf32>
    %34 = vector.broadcast %33 : vector<1x512xf32> to vector<192x512xf32>
    %35 = arith.addf %32, %34 : vector<192x512xf32>
    %cst_22 = arith.constant 0.000000e+00 : f32
    %36 = vector.broadcast %cst_22 : f32 to vector<192x512xf32>
    %37 = arith.maximumf %35, %36 : vector<192x512xf32>
    %38 = vector.extract_strided_slice %37 {offsets = [0, 0], sizes = [96, 256], strides = [1, 1]} : vector<192x512xf32> to vector<96x256xf32>
    %39 = vector.extract_strided_slice %37 {offsets = [0, 256], sizes = [96, 256], strides = [1, 1]} : vector<192x512xf32> to vector<96x256xf32>
    %40 = arith.maximumf %38, %39 : vector<96x256xf32>
    %41 = vector.extract_strided_slice %37 {offsets = [96, 0], sizes = [96, 256], strides = [1, 1]} : vector<192x512xf32> to vector<96x256xf32>
    %42 = vector.extract_strided_slice %37 {offsets = [96, 256], sizes = [96, 256], strides = [1, 1]} : vector<192x512xf32> to vector<96x256xf32>
    %43 = arith.maximumf %41, %42 : vector<96x256xf32>
    %44 = arith.maximumf %40, %43 : vector<96x256xf32>
    %c0_23 = arith.constant 0 : index
    %c0_24 = arith.constant 0 : index
    %45 = vector.load %arg6[%c0_23, %c0_24] : memref<96x256xf32, #tpu.memory_space<vmem>>, vector<96x256xf32>
    tpu.vector_store %arg6[%c0_23, %c0_24], %44 {strides = array<i32>} : memref<96x256xf32, #tpu.memory_space<vmem>>, vector<96x256xf32>,
    return
  }
  func.func @transform_0(%arg0: i32) -> (i32, i32) {
    %c0_i32 = arith.constant 0 : i32
    %c0_i32_0 = arith.constant 0 : i32
    return %arg0, %c0_i32 : i32, i32
  }
  func.func @transform_1(%arg0: i32) -> (i32, i32) {
    %c0_i32 = arith.constant 0 : i32
    %c0_i32_0 = arith.constant 0 : i32
    %c0_i32_1 = arith.constant 0 : i32
    return %c0_i32, %c0_i32_0 : i32, i32
  }
  func.func @transform_2(%arg0: i32) -> (i32, i32) {
    %c0_i32 = arith.constant 0 : i32
    %c0_i32_0 = arith.constant 0 : i32
    %c0_i32_1 = arith.constant 0 : i32
    return %c0_i32, %c0_i32_0 : i32, i32
  }
  func.func @transform_3(%arg0: i32) -> (i32, i32) {
    %c0_i32 = arith.constant 0 : i32
    %c0_i32_0 = arith.constant 0 : i32
    %c0_i32_1 = arith.constant 0 : i32
    return %c0_i32, %c0_i32_0 : i32, i32
  }
  func.func @transform_4(%arg0: i32) -> (i32, i32) {
    %c0_i32 = arith.constant 0 : i32
    %c0_i32_0 = arith.constant 0 : i32
    %c0_i32_1 = arith.constant 0 : i32
    return %c0_i32, %c0_i32_0 : i32, i32
  }
  func.func @transform_5(%arg0: i32) -> (i32, i32) {
    %c0_i32 = arith.constant 0 : i32
    %c0_i32_0 = arith.constant 0 : i32
    return %arg0, %c0_i32 : i32, i32
  }
}

</mosaic_0001>

<bundles_post_ra>
// kernel: tpu_custom_call.1
= control target key start
LH: loop header
LB: loop body
LE: loop exit
PB: predicated region body
PF: predicated region fallthrough
CT: control target
= control target key end

     0   :  { %s14956_s0 = inlined_call_operand.vmem [shape: bf16[768,144], index: 0, kind: input, shape index: {}]   ;;  %s14957_s1 = inlined_call_operand.hbm [shape: bf16[144,768], index: 1, kind: input, shape index: {}]   ;;  %s14958_s2 = inlined_call_operand.hbm [shape: f32[1,768], index: 2, kind: input, shape index: {}]   ;;  %s14959_s3 = inlined_call_operand.hbm [shape: bf16[1152,512], index: 3, kind: input, shape index: {}]   ;;  %s14960_s4 = inlined_call_operand.hbm [shape: f32[1,512], index: 4, kind: input, shape index: {}]   ;;  %s14961_s5 = inlined_call_operand.hbm [shape: f32[192,256], index: 5, kind: output, shape index: {}]  }
   0x1   :  { %15216 = sst [smem:[#allocation140_spill]] %s14957_s1 }
   0x2   :  { %15217 = sst [smem:[#allocation141_spill]] %s14958_s2 }
   0x3   :  { %10 = vsyncpa [#allocation5], 0 }
   0x4   :  { %11 = vsyncpa [#allocation8], 0 }
   0x5   :  { %12 = vsyncpa [#allocation11], 0 }
   0x6   :  { %13 = vsyncpa [#allocation6], 0 }
   0x7   :  { %15 = vsyncpa [#allocation6 + $0x1], 0  ;;  %s10993_s18 = smov 0   ;;  %s10995_s19 = smov 0  }
   0x8   :  { %s10997_s20 = smov 0   ;;  %s10999_s21 = smov 0  }
   0x9 LB: > { %s11014_s22 = sadd.s32 4294967295, %s10950_s21   ;;  %s8523_s23 = sadd.s32 4294967294, %s10950_s21   ;;  %s10950_s21 = sphi %s10999_s21, %s15918_s21   ;;  %s10946_s20 = sphi %s10997_s20, %s15917_s20   ;;  %s10942_s19 = sphi %s10995_s19, %s15916_s19   ;;  %s10938_s18 = sphi %s10993_s18, %s15915_s18  }
   0xa   : > { %s11018_s24 = sadd.s32 1, %s10950_s21   ;;  %s138_s25 = sadd.s32 1, %s10946_s20 }
   0xb   : > { %s135_s26 = ssub.s32 %s10950_s21, %s11018_s24  ;;  %p148_p0 = scmp.ne.s32.totalorder %s10946_s20, %s10942_s19 }
   0xc   : > { %p136_p1 = scmp.eq.s32.totalorder %s135_s26, 0  ;;  %p149_p2 = scmp.eq.s32.totalorder %s11014_s22, 1 }
   0xd   : > { %p154_p3 = scmp.ne.s32.totalorder %s10942_s19, %s10938_s18  ;;  %p155_p4 = scmp.eq.s32.totalorder %s8523_s23, 1 }
   0xe   : > { %s11029_s27 = scalar_select %p136_p1, %s10946_s20, %s138_s25  }
   0xf   : > { %p11031_p5 = por %p149_p2, %p148_p0  ;;  %p11035_p6 = por %p155_p4, %p154_p3 }
  0x10   : > { %p8524_p7 = scmp.ge.s32.totalorder %s10950_s21, 1  ;;  %p162_p8 = scmp.lt.s32.totalorder %s10950_s21, 3 }
  0x11   : > { %p10675_p9 = scmp.eq.s32.totalorder %s11014_s22, 0  ;;  %s15221_s2 = sld [smem:[#allocation141_spill]] }
  0x12   : > { %p11042_p10 = pnand %p8524_p7, %p162_p8  ;;  %s10952_s9 = smov [#allocation7]  }
  0x13   : > { %s190_s10 = sshll.u32 %s10952_s9, 4  ;;  %s15222_s1 = sld [smem:[#allocation140_spill]]  ;;  %s191_s10 = int_to_ptr.vmem [resolvable:$true] %s190_s10 }
  0x14   : > { %p10658_p11 = pneg %p11042_p10  ;;  %s10953_s15 = smov [#allocation4]  }
  0x15   : > { %s175_s16 = sshll.u32 %s10953_s15, 4  ;;  %s10954_s17 = smov 384   ;;  %s176_s16 = int_to_ptr.vmem [resolvable:$true] %s175_s16 }
  0x16   : > { %p11056_p12 = pnand %p10675_p9, %p10658_p11  ;;  %s10955_s23 = smov 24  }
  0x17   : > { %s188_s8 = sshll.u32 %s15221_s2, 4  ;;  %s199_s6 = sshll.u32 %s14959_s3, 4  ;;  %s189_s8 = int_to_ptr.hbm [resolvable:$true] %s188_s8  ;;  %s200_s6 = int_to_ptr.hbm [resolvable:$true] %s199_s6 }
  0x18   : > { %10664 = dma.hbm_to_vmem [thread:$0]  (!%p11056_p12), %s189_s8, 96, %s191_s10, [#allocation8]  }
  0x19   : > { %s173_s13 = sshll.u32 %s15222_s1, 4  ;;  %s10956_s7 = smov [#allocation9]   ;;  %s174_s13 = int_to_ptr.hbm [resolvable:$true] %s173_s13 }
  0x1a   : > { %10661 = dma.hbm_to_vmem [thread:$0]  (!%p11056_p12), %s174_s13, 6912, %s176_s16, [#allocation5], %s10954_s17, %s10954_s17, %s10955_s23  }
  0x1b   : > { %s201_s9 = sshll.u32 %s10956_s7, 4  ;;  %s214_s15 = sshll.u32 %s14960_s4, 4  ;;  %s202_s9 = int_to_ptr.vmem [resolvable:$true] %s201_s9  ;;  %s215_s15 = int_to_ptr.hbm [resolvable:$true] %s214_s15 }
  0x1c   : > { %s10957_s1 = smov 256   ;;  %s10958_s8 = smov 16  }
  0x1d   : > { %10667 = dma.hbm_to_vmem [thread:$0]  (!%p11056_p12), %s200_s6, 36864, %s202_s9, [#allocation8], %s10957_s1, %s10957_s1, %s10958_s8  }
  0x1e   : > { %s10959_s10 = smov [#allocation10]   ;;  %239 = sbr.rel (%p11042_p10) target bundleno = 3125 (0xc35), region = 40 }
  0x1f   : > { %s216_s2 = sshll.u32 %s10959_s10, 4  ;;  %s217_s2 = int_to_ptr.vmem [resolvable:$true] %s216_s2 }
  0x20   : > { %10670 = dma.hbm_to_vmem [thread:$0]  (!%p11056_p12), %s215_s15, 64, %s217_s2, [#allocation11]  }
  0x23   : > { %10921 = dma.done.wait (%p10675_p9), [#allocation5], 6912  }
  0x24   : > { %10923 = vsyncadd (%p10675_p9), [#allocation5], 4294960384 }
  0x25   : > { %10925 = dma.done.wait (%p10675_p9), [#allocation8], 36960  }
  0x26   : > { %10927 = vsyncadd (%p10675_p9), [#allocation8], 4294930336 }
  0x27   : > { %10929 = dma.done.wait (%p10675_p9), [#allocation11], 64  }
  0x28   : > { %10931 = vsyncadd (%p10675_p9), [#allocation11], 4294967232  ;;  %s284_s1 = smul.u32 48, %s11014_s22  ;;  %vm895_vm0 = vcmask 130048   ;;  %v8899_v0 = vld [vmem:[#allocation4 + $0x150] sm:$0xf] }
  0x29   : > { %v10339_v1 = vld [vmem:[#allocation4 + $0x164] sm:$0xf0]  ;;  %v8923_v2 = vld [vmem:[#allocation4 + $0x180] sm:$0xf]  ;;  %v10345_v4 = vld [vmem:[#allocation4 + $0x194] sm:$0xf0] }
  0x2a   : > { %p285_p13 = scmp.lt.s32.totalorder %s284_s1, 95  ;;  %v8900_v3 = vor.u32 %v10339_v1, %v8899_v0  ;;  %v10336_v5 = vld [vmem:[#allocation4 + $0x154] sm:$0xf]  ;;  %v8901_v6 = vld [vmem:[#allocation4 + $0x168] sm:$0xf0]  ;;  %v8924_v7 = vor.u32 %v10345_v4, %v8923_v2  ;;  %s281_s16 = sand.u32 1, %s10942_s19  }
  0x2b   : > { %v8904_v8 = vor.u32 %v10336_v5, %v8901_v6  ;;  %v10342_v9 = vld [vmem:[#allocation4 + $0x184] sm:$0xf]  ;;  %v8925_v10 = vld [vmem:[#allocation4 + $0x198] sm:$0xf0]  ;;  %v8931_v14 = vld [vmem:[#allocation4 + $0x188] sm:$0xf] }
  0x2c   : > { %s15920_s1 = smov (!%p285_p13, %s284_s1), 95  ;;  %968 = vmatpush.bf16.msra.mxu0 %v8900_v3  ;;  %v8928_v12 = vor.u32 %v10342_v9, %v8925_v10  ;;  %v10346_v15 = vld [vmem:[#allocation4 + $0x19c] sm:$0xf0]  ;;  %1104 = vmatpush.bf16.msra.mxu1 %v8924_v7  ;;  %v10333_v19 = vld [vmem:[#allocation4 + $0x134] sm:$0xf0]  ;;  %s10639_s17 = smul.u32 192, %s281_s16 }
  0x2d   : > { %s10245_s2 = sshll.u32 %s15920_s1, 3  ;;  %1226 = vmatpush.bf16.msra.mxu2 %v8904_v8  ;;  %v8932_v17 = vor.u32 %v10346_v15, %v8931_v14  ;;  %v8875_v18 = vld [vmem:[#allocation4 + $0x120] sm:$0xf]  ;;  %v10330_v20 = vld [vmem:[#allocation4 + $0x124] sm:$0xf]  ;;  %s10638_s25 = smul.u32 192, %s11014_s22 }
  0x2e   : > { %s11092_s14 = scalar_lea.vmem %s14956_s0, %s10245_s2  ;;  %1362 = vmatpush.bf16.msra.mxu3 %v8928_v12  ;;  %v8876_v21 = vor.u32 %v10333_v19, %v8875_v18  ;;  %v8877_v22 = vld [vmem:[#allocation4 + $0x138] sm:$0xf0]  ;;  %v8907_v23 = vld [vmem:[#allocation4 + $0x158] sm:$0xf]  ;;  %v10340_v24 = vld [vmem:[#allocation4 + $0x16c] sm:$0xf0] }
  0x2f   : > { %v10246_v11 = vld [vmem:[%s11092_s14 + $0x4] sm:$0xf]  ;;  %v8541_v13 = vld [vmem:[%s11092_s14 + $0x8] sm:$0xf0]  ;;  %v8880_v25 = vor.u32 %v10330_v20, %v8877_v22  ;;  %v8908_v26 = vor.u32 %v10340_v24, %v8907_v23  ;;  %v8851_v27 = vld [vmem:[#allocation4 + $0xf0] sm:$0xf]  ;;  %s8416_s7 = scalar_lea.hbm %s14961_s5, %s10638_s25 }
  0x30   : > { %v11096_v16 = vor.u32 %v10246_v11, %v8541_v13  ;;  %v10327_v28 = vld [vmem:[#allocation4 + $0x104] sm:$0xf0]  ;;  %v10324_v29 = vld [vmem:[#allocation4 + $0xf4] sm:$0xf]  ;;  %969 = vmatpush.bf16.msra.mxu0 %v8876_v21  ;;  %v8853_v31 = vld [vmem:[#allocation4 + $0x108] sm:$0xf0] }
  0x31   : > { %v8852_v30 = vor.u32 %v10327_v28, %v8851_v27  ;;  %1227 = vmatpush.bf16.msra.mxu2 %v8880_v25  ;;  %v8856_v32 = vor.u32 %v10324_v29, %v8853_v31  ;;  %v8827_v33 = vld [vmem:[#allocation4 + $0xc0] sm:$0xf]  ;;  %v10321_v34 = vld [vmem:[#allocation4 + $0xd4] sm:$0xf0]  ;;  %1484 = vmatpush.bf16.msrb.mxu1 %v8908_v26  ;;  %v10318_v35 = vld [vmem:[#allocation4 + $0xc4] sm:$0xf] }
  0x32   : > { %1620 = vmatpush.bf16.msrb.mxu3 %v8932_v17  ;;  %8945 = vmatmul.msk.bf16.vlgmr.msra.gmra.mxu1 %vm895_vm0, %v11096_v16  ;;  %v8829_v36 = vld [vmem:[#allocation4 + $0xd8] sm:$0xf0]  ;;  %v8828_v37 = vor.u32 %v10321_v34, %v8827_v33  ;;  %v8803_v39 = vld [vmem:[#allocation4 + $0x90] sm:$0xf]  ;;  %v10315_v40 = vld [vmem:[#allocation4 + $0xa4] sm:$0xf0] }
  0x33   : > { %8969 = vmatmul.msk.bf16.vlgmr.msra.gmra.mxu3 %vm895_vm0, %v11096_v16  ;;  %v8832_v38 = vor.u32 %v10318_v35, %v8829_v36  ;;  %v10312_v41 = vld [vmem:[#allocation4 + $0x94] sm:$0xf]  ;;  %v8805_v42 = vld [vmem:[#allocation4 + $0xa8] sm:$0xf0]  ;;  %v8804_v43 = vor.u32 %v10315_v40, %v8803_v39  ;;  %v10248_v44 = vld [vmem:[%s11092_s14 + $0x14] sm:$0xf] }
  0x34   : > { %970 = vmatpush.bf16.msra.mxu0 %v8852_v30  ;;  %v8808_v45 = vor.u32 %v10312_v41, %v8805_v42  ;;  %v8549_v46 = vld [vmem:[%s11092_s14 + $0x18] sm:$0xf0]  ;;  %v8779_v47 = vld [vmem:[#allocation4 + $0x60] sm:$0xf]  ;;  %v10309_v48 = vld [vmem:[#allocation4 + $0x74] sm:$0xf0] }
  0x35   : > { %1228 = vmatpush.bf16.msra.mxu2 %v8856_v32  ;;  %v10306_v49 = vld [vmem:[#allocation4 + $0x64] sm:$0xf]  ;;  %v8781_v50 = vld [vmem:[#allocation4 + $0x78] sm:$0xf0]  ;;  %v11104_v51 = vor.u32 %v10248_v44, %v8549_v46  ;;  %v8780_v52 = vor.u32 %v10309_v48, %v8779_v47  ;;  %v8755_v54 = vld [vmem:[#allocation4 + $0x30] sm:$0xf] }
  0x36   : > { %v8784_v53 = vor.u32 %v10306_v49, %v8781_v50  ;;  %v10303_v55 = vld [vmem:[#allocation4 + $0x44] sm:$0xf0]  ;;  %v10300_v56 = vld [vmem:[#allocation4 + $0x34] sm:$0xf]  ;;  %v8757_v57 = vld [vmem:[#allocation4 + $0x48] sm:$0xf0] }
  0x37   : > { %v8756_v58 = vor.u32 %v10303_v55, %v8755_v54  ;;  %v8731_v59 = vld [vmem:[#allocation4] sm:$0xf]  ;;  %v8760_v60 = vor.u32 %v10300_v56, %v8757_v57  ;;  %v10297_v61 = vld [vmem:[#allocation4 + $0x14] sm:$0xf0]  ;;  %v8883_v62 = vld [vmem:[#allocation4 + $0x128] sm:$0xf] }
  0x38   : > { %971 = vmatpush.bf16.msra.mxu0 %v8828_v37  ;;  %v10334_v63 = vld [vmem:[#allocation4 + $0x13c] sm:$0xf0]  ;;  %v10294_v0 = vld [vmem:[#allocation4 + $0x4] sm:$0xf]  ;;  %v8733_v1 = vld [vmem:[#allocation4 + $0x18] sm:$0xf0]  ;;  %v8732_v5 = vor.u32 %v10297_v61, %v8731_v59 }
  0x39   : > { %1229 = vmatpush.bf16.msra.mxu2 %v8832_v38  ;;  %v8884_v2 = vor.u32 %v10334_v63, %v8883_v62  ;;  %v10343_v3 = vld [vmem:[#allocation4 + $0x18c] sm:$0xf]  ;;  %v8933_v4 = vld [vmem:[#allocation4 + $0x1a0] sm:$0xf0]  ;;  %v8539_v6 = vld [vmem:[%s11092_s14] sm:$0xf]  ;;  %v8736_v8 = vor.u32 %v10294_v0, %v8733_v1 }
  0x3a   : > { %v10247_v7 = vld [vmem:[%s11092_s14 + $0x4] sm:$0xf0]  ;;  %v8936_v9 = vor.u32 %v10343_v3, %v8933_v4  ;;  %v10250_v11 = vld [vmem:[%s11092_s14 + $0x24] sm:$0xf]  ;;  %v8557_v12 = vld [vmem:[%s11092_s14 + $0x28] sm:$0xf0] }
  0x3b   : > { %1485 = vmatpush.bf16.msrb.mxu1 %v8884_v2  ;;  %v11112_v10 = vor.u32 %v10247_v7, %v8539_v6  ;;  %v11118_v13 = vor.u32 %v10250_v11, %v8557_v12  ;;  %v10337_v14 = vld [vmem:[#allocation4 + $0x15c] sm:$0xf]  ;;  %v8909_v15 = vld [vmem:[#allocation4 + $0x170] sm:$0xf0]  ;;  %v8547_v18 = vld [vmem:[%s11092_s14 + $0x10] sm:$0xf] }
  0x3c   : > { %972 = vmatpush.bf16.msra.mxu0 %v8804_v43  ;;  %v8912_v17 = vor.u32 %v10337_v14, %v8909_v15  ;;  %v10249_v19 = vld [vmem:[%s11092_s14 + $0x14] sm:$0xf0]  ;;  %v10252_v21 = vld [vmem:[%s11092_s14 + $0x34] sm:$0xf]  ;;  %v8565_v22 = vld [vmem:[%s11092_s14 + $0x38] sm:$0xf0] }
  0x3d   : > { %1230 = vmatpush.bf16.msra.mxu2 %v8808_v45  ;;  %15224 = vst [vmem:[#allocation17_spill] sm:$0xff] %v11118_v13  ;;  %v11126_v20 = vor.u32 %v10249_v19, %v8547_v18  ;;  %v11132_v23 = vor.u32 %v10252_v21, %v8565_v22  ;;  %v8555_v24 = vld [vmem:[%s11092_s14 + $0x20] sm:$0xf]  ;;  %v10251_v25 = vld [vmem:[%s11092_s14 + $0x24] sm:$0xf0]  ;;  %s14548_s23 = scalar_lea.vmem [#allocation12], %s10639_s17 }
  0x3e   : > { %v11140_v26 = vor.u32 %v10251_v25, %v8555_v24  ;;  %v10254_v27 = vld [vmem:[%s11092_s14 + $0x44] sm:$0xf]  ;;  %v8573_v28 = vld [vmem:[%s11092_s14 + $0x48] sm:$0xf0]  ;;  %v8859_v30 = vld [vmem:[#allocation4 + $0xf8] sm:$0xf] }
  0x3f   : > { %v11146_v29 = vor.u32 %v10254_v27, %v8573_v28  ;;  %v10328_v31 = vld [vmem:[#allocation4 + $0x10c] sm:$0xf0]  ;;  %v8563_v33 = vld [vmem:[%s11092_s14 + $0x30] sm:$0xf]  ;;  %v10253_v34 = vld [vmem:[%s11092_s14 + $0x34] sm:$0xf0] }
  0x40   : > { %973 = vmatpush.bf16.msra.mxu0 %v8780_v52  ;;  %v8860_v32 = vor.u32 %v10328_v31, %v8859_v30  ;;  %v11154_v35 = vor.u32 %v10253_v34, %v8563_v33  ;;  %v10256_v36 = vld [vmem:[%s11092_s14 + $0x54] sm:$0xf]  ;;  %v8581_v37 = vld [vmem:[%s11092_s14 + $0x58] sm:$0xf0]  ;;  %v8571_v42 = vld [vmem:[%s11092_s14 + $0x40] sm:$0xf] }
  0x41   : > { %1231 = vmatpush.bf16.msra.mxu2 %v8784_v53  ;;  %v11160_v38 = vor.u32 %v10256_v36, %v8581_v37  ;;  %v10331_v39 = vld [vmem:[#allocation4 + $0x12c] sm:$0xf]  ;;  %v8885_v40 = vld [vmem:[#allocation4 + $0x140] sm:$0xf0]  ;;  %v10255_v43 = vld [vmem:[%s11092_s14 + $0x44] sm:$0xf0] }
  0x42   : > { %8946 = vmatmul.msk.bf16.gmra.mxu1 %vm895_vm0, %v11104_v51  ;;  %v8888_v41 = vor.u32 %v10331_v39, %v8885_v40  ;;  %v11168_v44 = vor.u32 %v10255_v43, %v8571_v42  ;;  %v10258_v45 = vld [vmem:[%s11092_s14 + $0x64] sm:$0xf]  ;;  %v8589_v46 = vld [vmem:[%s11092_s14 + $0x68] sm:$0xf0]  ;;  %v8579_v48 = vld [vmem:[%s11092_s14 + $0x50] sm:$0xf] }
  0x43   : > { %8970 = vmatmul.msk.bf16.gmra.mxu3 %vm895_vm0, %v11104_v51  ;;  %1486 = vmatpush.bf16.msrb.mxu1 %v8860_v32  ;;  %15225 = vst [vmem:[#allocation18_spill] sm:$0xff] %v11160_v38  ;;  %v11174_v47 = vor.u32 %v10258_v45, %v8589_v46  ;;  %v10257_v49 = vld [vmem:[%s11092_s14 + $0x54] sm:$0xf0]  ;;  %v10260_v52 = vld [vmem:[%s11092_s14 + $0x74] sm:$0xf]  ;;  %s8417_s9 = sshll.u32 %s14548_s23, 4  ;;  %s8418_s9 = int_to_ptr.vmem [resolvable:$true] %s8417_s9 }
  0x44   : > { %974 = vmatpush.bf16.msra.mxu0 %v8756_v58  ;;  %v11182_v50 = vor.u32 %v10257_v49, %v8579_v48  ;;  %v8597_v53 = vld [vmem:[%s11092_s14 + $0x78] sm:$0xf0]  ;;  %v8587_v55 = vld [vmem:[%s11092_s14 + $0x60] sm:$0xf]  ;;  %v10259_v56 = vld [vmem:[%s11092_s14 + $0x64] sm:$0xf0] }
  0x45   : > { %1232 = vmatpush.bf16.msra.mxu2 %v8760_v60  ;;  %15226 = vst [vmem:[#allocation19_spill] sm:$0xff] %v11174_v47  ;;  %v11188_v54 = vor.u32 %v10260_v52, %v8597_v53  ;;  %v8835_v57 = vld [vmem:[#allocation4 + $0xc8] sm:$0xf]  ;;  %v10322_v58 = vld [vmem:[#allocation4 + $0xdc] sm:$0xf0]  ;;  %v11196_v60 = vor.u32 %v10259_v56, %v8587_v55  ;;  %s8419_s11 = sshll.u32 %s8416_s7, 4  ;;  %s8420_s11 = int_to_ptr.hbm [resolvable:$true] %s8419_s11 }
  0x46   : > { %v8836_v59 = vor.u32 %v10322_v58, %v8835_v57  ;;  %v10262_v61 = vld [vmem:[%s11092_s14 + $0x84] sm:$0xf]  ;;  %v8605_v62 = vld [vmem:[%s11092_s14 + $0x88] sm:$0xf0]  ;;  %v10261_v6 = vld [vmem:[%s11092_s14 + $0x74] sm:$0xf0] }
  0x47   : > { %v11202_v63 = vor.u32 %v10262_v61, %v8605_v62  ;;  %v10325_v1 = vld [vmem:[#allocation4 + $0xfc] sm:$0xf]  ;;  %v8861_v2 = vld [vmem:[#allocation4 + $0x110] sm:$0xf0]  ;;  %v8613_v11 = vld [vmem:[%s11092_s14 + $0x98] sm:$0xf0] }
  0x48   : > { %975 = vmatpush.bf16.msra.mxu0 %v8732_v5  ;;  %1487 = vmatpush.bf16.msrb.mxu1 %v8836_v59  ;;  %v8864_v3 = vor.u32 %v10325_v1, %v8861_v2  ;;  %v8595_v5 = vld [vmem:[%s11092_s14 + $0x70] sm:$0xf]  ;;  %v8603_v19 = vld [vmem:[%s11092_s14 + $0x80] sm:$0xf]  ;;  %v10263_v21 = vld [vmem:[%s11092_s14 + $0x84] sm:$0xf0] }
  0x49   : > { %1233 = vmatpush.bf16.msra.mxu2 %v8736_v8  ;;  %v11210_v8 = vor.u32 %v10261_v6, %v8595_v5  ;;  %v11226_v25 = vor.u32 %v10263_v21, %v8603_v19  ;;  %v10266_v30 = vld [vmem:[%s11092_s14 + $0xa4] sm:$0xf]  ;;  %v8621_v31 = vld [vmem:[%s11092_s14 + $0xa8] sm:$0xf0]  ;;  %v8611_v48 = vld [vmem:[%s11092_s14 + $0x90] sm:$0xf] }
  0x4a   : > { %v11237_v36 = vor.u32 %v10266_v30, %v8621_v31  ;;  %v10265_v49 = vld [vmem:[%s11092_s14 + $0x94] sm:$0xf0]  ;;  %v8811_v53 = vld [vmem:[#allocation4 + $0x98] sm:$0xf]  ;;  %v10316_v55 = vld [vmem:[#allocation4 + $0xac] sm:$0xf0] }
  0x4b   : > { %976 = vmatmul.bf16.vlgmr.msra.gmra.mxu0 %v11112_v10  ;;  %v8812_v56 = vor.u32 %v10316_v55, %v8811_v53  ;;  %v11251_v58 = vor.u32 %v10265_v49, %v8611_v48  ;;  %v8629_v1 = vld [vmem:[%s11092_s14 + $0xb8] sm:$0xf0]  ;;  %v8619_v30 = vld [vmem:[%s11092_s14 + $0xa0] sm:$0xf]  ;;  %v10267_v31 = vld [vmem:[%s11092_s14 + $0xa4] sm:$0xf0] }
  0x4c   : > { %1234 = vmatmul.bf16.vlgmr.msra.gmra.mxu2 %v11112_v10  ;;  %1742 = vmatpush.bf16.msrb.mxu0 %v8912_v17  ;;  %v395_v17 = vld [vmem:[#allocation7] sm:$0x3f]  ;;  %v8637_v55 = vld [vmem:[%s11092_s14 + $0xc8] sm:$0xf0]  ;;  %vm3554_vm1 = vsmask.f32 7424 }
  0x4d   : > { %1878 = vmatpush.bf16.msrb.mxu2 %v8936_v9  ;;  %v10264_v9 = vld [vmem:[%s11092_s14 + $0x94] sm:$0xf]  ;;  %v11224_v24 = vperm.slane %v395_v17, 0  ;;  %v11235_v34 = vperm.slane %v395_v17, 1  ;;  %1488 = vmatpush.bf16.msrb.mxu1 %v8812_v56  ;;  %v10270_v53 = vld [vmem:[%s11092_s14 + $0xc4] sm:$0xf] }
  0x4e   : > { %v11216_v14 = vor.u32 %v10264_v9, %v8613_v11  ;;  %v8837_v9 = vld [vmem:[#allocation4 + $0xe0] sm:$0xf0]  ;;  %s8404_s22 = scalar_lea.sflag [#allocation6], %s281_s16  ;;  %s10890_s12 = sshra.s32 %s8420_s11, 4  ;;  %s10891_s12 = int_to_ptr.hbm [resolvable:$true] %s10890_s12 }
  0x4f   : > { %s10892_s15 = scalar_lea.hbm %s10891_s12, 192  ;;  %s10896_s1 = scalar_lea.hbm %s14961_s5, 384 }
  0x50   : > { %1743 = vmatpush.bf16.msrb.mxu0 %v8888_v41  ;;  %p10893_p0 = scmp.ne.s32.totalorder %s10891_s12, %s10892_s15  ;;  %p10897_p3 = scmp.lt.s32.totalorder %s10891_s12, %s14961_s5 }
  0x51   : > { %p10898_p4 = scmp.lt.s32.totalorder %s10896_s1, %s10892_s15 }
  0x52   : > { %8947 = vmatmul.msk.bf16.gmra.mxu1 %vm895_vm0, %v11118_v13  ;;  %p10894_p1 = pnand %p10893_p0, %p11031_p5 }
  0x53   : > { %8971 = vmatmul.msk.bf16.gmra.mxu3 %vm895_vm0, %v11118_v13  ;;  %p10899_p7 = por %p10898_p4, %p10897_p3 }
  0x54   : > { %1744 = vmatpush.bf16.msrb.mxu0 %v8864_v3  ;;  %p10895_p2 = pneg %p10894_p1 }
  0x56   : > { %p10900_p8 = pnand %p10899_p7, %p10895_p2 }
  0x5b   : > { %981 = vmatmul.bf16.gmra.mxu0 %v11126_v20 }
  0x5c   : > { %1239 = vmatmul.bf16.gmra.mxu2 %v11126_v20 }
  0x62   : > { %8948 = vmatmul.msk.bf16.gmra.mxu1 %vm895_vm0, %v11132_v23 }
  0x63   : > { %8972 = vmatmul.msk.bf16.gmra.mxu3 %vm895_vm0, %v11132_v23 }
  0x6b   : > { %986 = vmatmul.bf16.gmra.mxu0 %v11140_v26 }
  0x6c   : > { %1244 = vmatmul.bf16.gmra.mxu2 %v11140_v26 }
  0x72   : > { %8949 = vmatmul.msk.bf16.gmra.mxu1 %vm895_vm0, %v11146_v29 }
  0x73   : > { %8973 = vmatmul.msk.bf16.gmra.mxu3 %vm895_vm0, %v11146_v29 }
  0x7b   : > { %991 = vmatmul.bf16.gmra.mxu0 %v11154_v35 }
  0x7c   : > { %1249 = vmatmul.bf16.gmra.mxu2 %v11154_v35 }
  0x82   : > { %8950 = vmatmul.msk.bf16.gmra.mxu1 %vm895_vm0, %v11160_v38 }
  0x83   : > { %8974 = vmatmul.msk.bf16.gmra.mxu3 %vm895_vm0, %v11160_v38 }
  0x8b   : > { %996 = vmatmul.bf16.gmra.mxu0 %v11168_v44 }
  0x8c   : > { %1254 = vmatmul.bf16.gmra.mxu2 %v11168_v44 }
  0x92   : > { %8951 = vmatmul.msk.bf16.gmra.mxu1 %vm895_vm0, %v11174_v47 }
  0x93   : > { %8975 = vmatmul.msk.bf16.gmra.mxu3 %vm895_vm0, %v11174_v47 }
  0x9b   : > { %1001 = vmatmul.bf16.gmra.mxu0 %v11182_v50 }
  0x9c   : > { %1259 = vmatmul.bf16.gmra.mxu2 %v11182_v50 }
  0xa2   : > { %8952 = vmatmul.msk.bf16.gmra.mxu1 %vm895_vm0, %v11188_v54 }
  0xa3   : > { %8976 = vmatmul.msk.bf16.gmra.mxu3 %vm895_vm0, %v11188_v54 }
  0xab   : > { %1006 = vmatmul.bf16.gmra.mxu0 %v11196_v60 }
  0xac   : > { %1264 = vmatmul.bf16.gmra.mxu2 %v11196_v60 }
  0xaf   : > { %v1106_v0 = vpop.f32.mrf.mxu1 }
  0xb2   : > { %8953 = vmatmul.msk.bf16.gmra.mxu1 %vm895_vm0, %v11202_v63 }
  0xb3   : > { %8977 = vmatmul.msk.bf16.gmra.mxu3 %vm895_vm0, %v11202_v63 }
  0xb6   : > { %v1364_v4 = vpop.f32.mrf.mxu3 }
  0xb7   : > { %v1108_v7 = vpop.f32.mrf.mxu1 }
  0xbb   : > { %1011 = vmatmul.bf16.gmra.mxu0 %v11210_v8 }
  0xbc   : > { %1269 = vmatmul.bf16.gmra.mxu2 %v11210_v8 }
  0xbe   : > { %v1366_v12 = vpop.f32.mrf.mxu3 }
  0xbf   : > { %v1111_v15 = vpop.f32.mrf.mxu1 }
  0xc2   : > { %8954 = vmatmul.msk.bf16.gmra.mxu1 %vm895_vm0, %v11216_v14 }
  0xc3   : > { %8978 = vmatmul.msk.bf16.gmra.mxu3 %vm895_vm0, %v11216_v14 }
  0xc6   : > { %v1369_v18 = vpop.f32.mrf.mxu3 }
  0xc7   : > { %v1113_v22 = vpop.f32.mrf.mxu1 }
  0xc8   : > { %v977_v27 = vpop.f32.mrf.mxu0 }
  0xc9   : > { %v978_v28 = vadd.f32 %v977_v27, %v11224_v24 }
  0xcb   : > { %v11231_v32 = vadd.f32 %v1106_v0, %v978_v28  ;;  %1016 = vmatmul.bf16.gmra.mxu0 %v11226_v25  ;;  %v10268_v0 = vld [vmem:[%s11092_s14 + $0xb4] sm:$0xf] }
  0xcc   : > { %1274 = vmatmul.bf16.gmra.mxu2 %v11226_v25  ;;  %v11263_v5 = vor.u32 %v10268_v0, %v8629_v1 }
  0xce   : > { %v1371_v33 = vpop.f32.mrf.mxu3  ;;  %15229 = vst [vmem:[#allocation22_spill] sm:$0xff] %v11263_v5 }
  0xcf   : > { %v1116_v37 = vpop.f32.mrf.mxu1  ;;  %v1235_v39 = vpop.f32.mrf.mxu2 }
  0xd0   : > { %v1236_v40 = vadd.f32 %v1235_v39, %v11235_v34  ;;  %v979_v41 = vpop.f32.mrf.mxu0 }
  0xd1   : > { %v980_v42 = vadd.f32 %v979_v41, %v11224_v24  ;;  %v11277_v41 = vor.u32 %v10267_v31, %v8619_v30 }
  0xd2   : > { %8955 = vmatmul.msk.bf16.gmra.mxu1 %vm895_vm0, %v11237_v36  ;;  %v11245_v43 = vadd.f32 %v1364_v4, %v1236_v40 }
  0xd3   : > { %8979 = vmatmul.msk.bf16.gmra.mxu3 %vm895_vm0, %v11237_v36  ;;  %v11247_v45 = vadd.f32 %v1108_v7, %v980_v42  ;;  %v10319_v7 = vld [vmem:[#allocation4 + $0xcc] sm:$0xf] }
  0xd4   : > { %15227 = vst [vmem:[#allocation20_spill] sm:$0xff] %v11245_v43  ;;  %v8840_v11 = vor.u32 %v10319_v7, %v8837_v9  ;;  %v8627_v9 = vld [vmem:[%s11092_s14 + $0xb0] sm:$0xf] }
  0xd6   : > { %v1374_v46 = vpop.f32.mrf.mxu3  ;;  %1745 = vmatpush.bf16.msrb.mxu0 %v8840_v11  ;;  %v10269_v11 = vld [vmem:[%s11092_s14 + $0xb4] sm:$0xf0] }
  0xd7   : > { %v1118_v52 = vpop.f32.mrf.mxu1  ;;  %v1237_v57 = vpop.f32.mrf.mxu2 }
  0xd8   : > { %v1238_v59 = vadd.f32 %v1237_v57, %v11235_v34  ;;  %v982_v61 = vpop.f32.mrf.mxu0  ;;  %v11289_v57 = vor.u32 %v10270_v53, %v8637_v55 }
  0xd9   : > { %v983_v62 = vadd.f32 %v982_v61, %v11224_v24 }
  0xda   : > { %v11257_v2 = vadd.f32 %v1366_v12, %v1238_v59  ;;  %15232 = vst [vmem:[#allocation25_spill] sm:$0xff] %v11289_v57 }
  0xdb   : > { %v11259_v3 = vadd.f32 %v1111_v15, %v983_v62  ;;  %1021 = vmatmul.bf16.gmra.mxu0 %v11251_v58 }
  0xdc   : > { %15228 = vst [vmem:[#allocation21_spill] sm:$0xff] %v11257_v2  ;;  %1279 = vmatmul.bf16.gmra.mxu2 %v11251_v58  ;;  %v8661_v2 = vld [vmem:[%s11092_s14 + $0xf8] sm:$0xf0] }
  0xde   : > { %v1376_v4 = vpop.f32.mrf.mxu3 }
  0xdf   : > { %v1121_v6 = vpop.f32.mrf.mxu1  ;;  %v1240_v17 = vpop.f32.mrf.mxu2 }
  0xe0   : > { %v1241_v19 = vadd.f32 %v1240_v17, %v11235_v34  ;;  %v984_v12 = vpop.f32.mrf.mxu0 }
  0xe1   : > { %v985_v15 = vadd.f32 %v984_v12, %v11224_v24  ;;  %v11303_v12 = vor.u32 %v10269_v11, %v8627_v9  ;;  %v8635_v9 = vld [vmem:[%s11092_s14 + $0xc0] sm:$0xf]  ;;  %v10271_v11 = vld [vmem:[%s11092_s14 + $0xc4] sm:$0xf0] }
  0xe2   : > { %8956 = vmatmul.msk.bf16.gmra.mxu1 %vm895_vm0, %v11263_v5  ;;  %v11271_v21 = vadd.f32 %v1369_v18, %v1241_v19 }
  0xe3   : > { %8980 = vmatmul.msk.bf16.gmra.mxu3 %vm895_vm0, %v11263_v5  ;;  %v11273_v27 = vadd.f32 %v1113_v22, %v985_v15  ;;  %15234 = vst [vmem:[#allocation27_spill] sm:$0xff] %v11303_v12 }
  0xe4   : > { %15230 = vst [vmem:[#allocation23_spill] sm:$0xff] %v11271_v21  ;;  %v10276_v21 = vld [vmem:[%s11092_s14 + $0xf4] sm:$0xf] }
  0xe6   : > { %v1379_v28 = vpop.f32.mrf.mxu3 }
  0xe7   : > { %v1123_v39 = vpop.f32.mrf.mxu1  ;;  %v1242_v40 = vpop.f32.mrf.mxu2 }
  0xe8   : > { %v1243_v42 = vadd.f32 %v1242_v40, %v11235_v34  ;;  %v987_v48 = vpop.f32.mrf.mxu0  ;;  %v10272_v40 = vld [vmem:[%s11092_s14 + $0xd4] sm:$0xf] }
  0xe9   : > { %v988_v49 = vadd.f32 %v987_v48, %v11224_v24 }
  0xea   : > { %v11283_v56 = vadd.f32 %v1371_v33, %v1243_v42  ;;  %v8645_v42 = vld [vmem:[%s11092_s14 + $0xd8] sm:$0xf0] }
  0xeb   : > { %v11285_v18 = vadd.f32 %v1116_v37, %v988_v49  ;;  %1026 = vmatmul.bf16.gmra.mxu0 %v11277_v41  ;;  %v11315_v49 = vor.u32 %v10272_v40, %v8645_v42  ;;  %v11329_v42 = vor.u32 %v10271_v11, %v8635_v9 }
  0xec   : > { %15231 = vst [vmem:[#allocation24_spill] sm:$0xff] %v11283_v56  ;;  %1284 = vmatmul.bf16.gmra.mxu2 %v11277_v41 }
  0xed   : > { %15236 = vst [vmem:[#allocation29_spill] sm:$0xff] %v11315_v49 }
  0xee   : > { %v1381_v22 = vpop.f32.mrf.mxu3  ;;  %15238 = vst [vmem:[#allocation31_spill] sm:$0xff] %v11329_v42 }
  0xef   : > { %v1126_v59 = vpop.f32.mrf.mxu1  ;;  %v1245_v61 = vpop.f32.mrf.mxu2 }
  0xf0   : > { %v1246_v62 = vadd.f32 %v1245_v61, %v11235_v34  ;;  %v989_v33 = vpop.f32.mrf.mxu0 }
  0xf1   : > { %v990_v37 = vadd.f32 %v989_v33, %v11224_v24 }
  0xf2   : > { %8957 = vmatmul.msk.bf16.gmra.mxu1 %vm895_vm0, %v11289_v57  ;;  %v11297_v0 = vadd.f32 %v1374_v46, %v1246_v62 }
  0xf3   : > { %8981 = vmatmul.msk.bf16.gmra.mxu3 %vm895_vm0, %v11289_v57  ;;  %v11299_v1 = vadd.f32 %v1118_v52, %v990_v37 }
  0xf4   : > { %15233 = vst [vmem:[#allocation26_spill] sm:$0xff] %v11297_v0 }
  0xf6   : > { %v1384_v7 = vpop.f32.mrf.mxu3 }
  0xf7   : > { %v1128_v17 = vpop.f32.mrf.mxu1  ;;  %v1247_v19 = vpop.f32.mrf.mxu2 }
  0xf8   : > { %v1248_v15 = vadd.f32 %v1247_v19, %v11235_v34  ;;  %v992_v30 = vpop.f32.mrf.mxu0 }
  0xf9   : > { %v993_v31 = vadd.f32 %v992_v30, %v11224_v24  ;;  %v10310_v30 = vld [vmem:[#allocation4 + $0x7c] sm:$0xf0] }
  0xfa   : > { %v11309_v48 = vadd.f32 %v1376_v4, %v1248_v15  ;;  %v8787_v15 = vld [vmem:[#allocation4 + $0x68] sm:$0xf] }
  0xfb   : > { %v11311_v46 = vadd.f32 %v1121_v6, %v993_v31  ;;  %1031 = vmatmul.bf16.gmra.mxu0 %v11303_v12  ;;  %v8788_v31 = vor.u32 %v10310_v30, %v8787_v15  ;;  %v10313_v15 = vld [vmem:[#allocation4 + $0x9c] sm:$0xf]  ;;  %v8813_v30 = vld [vmem:[#allocation4 + $0xb0] sm:$0xf0] }
  0xfc   : > { %15235 = vst [vmem:[#allocation28_spill] sm:$0xff] %v11309_v48  ;;  %1289 = vmatmul.bf16.gmra.mxu2 %v11303_v12 }
  0xfd   : > { %1489 = vmatpush.bf16.msrb.mxu1 %v8788_v31  ;;  %v8816_v31 = vor.u32 %v10313_v15, %v8813_v30  ;;  %v10273_v15 = vld [vmem:[%s11092_s14 + $0xd4] sm:$0xf0] }
  0xfe   : > { %v1386_v52 = vpop.f32.mrf.mxu3 }
  0xff   : > { %v1131_v53 = vpop.f32.mrf.mxu1  ;;  %v1250_v55 = vpop.f32.mrf.mxu2  ;;  %1746 = vmatpush.bf16.msrb.mxu0 %v8816_v31 }
 0x100   : > { %v1251_v61 = vadd.f32 %v1250_v55, %v11235_v34  ;;  %v994_v4 = vpop.f32.mrf.mxu0 }
 0x101   : > { %v995_v6 = vadd.f32 %v994_v4, %v11224_v24  ;;  %v8653_v4 = vld [vmem:[%s11092_s14 + $0xe8] sm:$0xf0] }
 0x102   : > { %8958 = vmatmul.msk.bf16.gmra.mxu1 %vm895_vm0, %v11315_v49  ;;  %v11323_v62 = vadd.f32 %v1379_v28, %v1251_v61  ;;  %v10274_v61 = vld [vmem:[%s11092_s14 + $0xe4] sm:$0xf] }
 0x103   : > { %8982 = vmatmul.msk.bf16.gmra.mxu3 %vm895_vm0, %v11315_v49  ;;  %v11325_v33 = vadd.f32 %v1123_v39, %v995_v6  ;;  %v11341_v9 = vor.u32 %v10274_v61, %v8653_v4  ;;  %v8643_v4 = vld [vmem:[%s11092_s14 + $0xd0] sm:$0xf] }
 0x104   : > { %15237 = vst [vmem:[#allocation30_spill] sm:$0xff] %v11323_v62 }
 0x105   : > { %15241 = vst [vmem:[#allocation34_spill] sm:$0xff] %v11341_v9 }
 0x106   : > { %v1389_v37 = vpop.f32.mrf.mxu3 }
 0x107   : > { %v1133_v19 = vpop.f32.mrf.mxu1  ;;  %v1252_v40 = vpop.f32.mrf.mxu2 }
 0x108   : > { %v1253_v55 = vadd.f32 %v1252_v40, %v11235_v34  ;;  %v997_v48 = vpop.f32.mrf.mxu0 }
 0x109   : > { %v998_v28 = vadd.f32 %v997_v48, %v11224_v24 }
 0x10a   : > { %v11335_v39 = vadd.f32 %v1381_v22, %v1253_v55 }
 0x10b   : > { %v11337_v6 = vadd.f32 %v1126_v59, %v998_v28  ;;  %1036 = vmatmul.bf16.gmra.mxu0 %v11329_v42 }
 0x10c   : > { %15239 = vst [vmem:[#allocation32_spill] sm:$0xff] %v11335_v39  ;;  %1294 = vmatmul.bf16.gmra.mxu2 %v11329_v42  ;;  %v11355_v39 = vor.u32 %v10273_v15, %v8643_v4  ;;  %v10275_v15 = vld [vmem:[%s11092_s14 + $0xe4] sm:$0xf0] }
 0x10d   : > { %15240 = vst [vmem:[#allocation33_spill] sm:$0xff] %v11337_v6 }
 0x10e   : > { %v1391_v62 = vpop.f32.mrf.mxu3  ;;  %15244 = vst [vmem:[#allocation37_spill] sm:$0xff] %v11355_v39 }
 0x10f   : > { %v1136_v11 = vpop.f32.mrf.mxu1  ;;  %v1255_v48 = vpop.f32.mrf.mxu2 }
 0x110   : > { %v1256_v40 = vadd.f32 %v1255_v48, %v11235_v34  ;;  %v999_v22 = vpop.f32.mrf.mxu0 }
 0x111   : > { %v1000_v59 = vadd.f32 %v999_v22, %v11224_v24 }
 0x112   : > { %8959 = vmatmul.msk.bf16.gmra.mxu1 %vm895_vm0, %v11341_v9  ;;  %v11349_v55 = vadd.f32 %v1384_v7, %v1256_v40  ;;  %v11367_v40 = vor.u32 %v10276_v21, %v8661_v2  ;;  %v8651_v21 = vld [vmem:[%s11092_s14 + $0xe0] sm:$0xf] }
 0x113   : > { %8983 = vmatmul.msk.bf16.gmra.mxu3 %vm895_vm0, %v11341_v9  ;;  %v11351_v28 = vadd.f32 %v1128_v17, %v1000_v59 }
 0x114   : > { %15242 = vst [vmem:[#allocation35_spill] sm:$0xff] %v11349_v55 }
 0x115   : > { %15243 = vst [vmem:[#allocation36_spill] sm:$0xff] %v11351_v28  ;;  %v10278_v28 = vld [vmem:[%s11092_s14 + $0x104] sm:$0xf] }
 0x116   : > { %v1394_v61 = vpop.f32.mrf.mxu3  ;;  %15247 = vst [vmem:[#allocation40_spill] sm:$0xff] %v11367_v40 }
 0x117   : > { %v1138_v30 = vpop.f32.mrf.mxu1  ;;  %v1257_v48 = vpop.f32.mrf.mxu2 }
 0x118   : > { %v1258_v0 = vadd.f32 %v1257_v48, %v11235_v34  ;;  %v1002_v56 = vpop.f32.mrf.mxu0 }
 0x119   : > { %v1003_v31 = vadd.f32 %v1002_v56, %v11224_v24 }
 0x11a   : > { %v11361_v43 = vadd.f32 %v1386_v52, %v1258_v0 }
 0x11b   : > { %v11363_v7 = vadd.f32 %v1131_v53, %v1003_v31  ;;  %1041 = vmatmul.bf16.gmra.mxu0 %v11355_v39 }
 0x11c   : > { %15245 = vst [vmem:[#allocation38_spill] sm:$0xff] %v11361_v43  ;;  %1299 = vmatmul.bf16.gmra.mxu2 %v11355_v39 }
 0x11d   : > { %15246 = vst [vmem:[#allocation39_spill] sm:$0xff] %v11363_v7 }
 0x11e   : > { %v1396_v17 = vpop.f32.mrf.mxu3 }
 0x11f   : > { %v1141_v22 = vpop.f32.mrf.mxu1  ;;  %v1260_v59 = vpop.f32.mrf.mxu2 }
 0x120   : > { %v1261_v4 = vadd.f32 %v1260_v59, %v11235_v34  ;;  %v1004_v56 = vpop.f32.mrf.mxu0  ;;  %v11381_v59 = vor.u32 %v10275_v15, %v8651_v21 }
 0x121   : > { %v1005_v0 = vadd.f32 %v1004_v56, %v11224_v24 }
 0x122   : > { %8960 = vmatmul.msk.bf16.gmra.mxu1 %vm895_vm0, %v11367_v40  ;;  %v11375_v52 = vadd.f32 %v1389_v37, %v1261_v4  ;;  %15250 = vst [vmem:[#allocation43_spill] sm:$0xff] %v11381_v59 }
 0x123   : > { %8984 = vmatmul.msk.bf16.gmra.mxu3 %vm895_vm0, %v11367_v40  ;;  %v11377_v53 = vadd.f32 %v1133_v19, %v1005_v0  ;;  %v8669_v40 = vld [vmem:[%s11092_s14 + $0x108] sm:$0xf0] }
 0x124   : > { %15248 = vst [vmem:[#allocation41_spill] sm:$0xff] %v11375_v52  ;;  %v11393_v4 = vor.u32 %v10278_v28, %v8669_v40  ;;  %v10277_v40 = vld [vmem:[%s11092_s14 + $0xf4] sm:$0xf0] }
 0x125   : > { %15249 = vst [vmem:[#allocation42_spill] sm:$0xff] %v11377_v53 }
 0x126   : > { %v1399_v2 = vpop.f32.mrf.mxu3  ;;  %15253 = vst [vmem:[#allocation46_spill] sm:$0xff] %v11393_v4 }
 0x127   : > { %v1143_v48 = vpop.f32.mrf.mxu1  ;;  %v1262_v31 = vpop.f32.mrf.mxu2 }
 0x128   : > { %v1263_v43 = vadd.f32 %v1262_v31, %v11235_v34  ;;  %v1007_v55 = vpop.f32.mrf.mxu0  ;;  %v8763_v31 = vld [vmem:[#allocation4 + $0x38] sm:$0xf] }
 0x129   : > { %v1008_v7 = vadd.f32 %v1007_v55, %v11224_v24 }
 0x12a   : > { %v11387_v6 = vadd.f32 %v1391_v62, %v1263_v43 }
 0x12b   : > { %v11389_v37 = vadd.f32 %v1136_v11, %v1008_v7  ;;  %1046 = vmatmul.bf16.gmra.mxu0 %v11381_v59  ;;  %v8659_v7 = vld [vmem:[%s11092_s14 + $0xf0] sm:$0xf] }
 0x12c   : > { %15251 = vst [vmem:[#allocation44_spill] sm:$0xff] %v11387_v6  ;;  %1304 = vmatmul.bf16.gmra.mxu2 %v11381_v59 }
 0x12d   : > { %15252 = vst [vmem:[#allocation45_spill] sm:$0xff] %v11389_v37  ;;  %v11407_v37 = vor.u32 %v10277_v40, %v8659_v7  ;;  %v10307_v40 = vld [vmem:[#allocation4 + $0x6c] sm:$0xf] }
 0x12e   : > { %v1401_v19 = vpop.f32.mrf.mxu3 }
 0x12f   : > { %v1146_v56 = vpop.f32.mrf.mxu1  ;;  %v1265_v0 = vpop.f32.mrf.mxu2  ;;  %15256 = vst [vmem:[#allocation49_spill] sm:$0xff] %v11407_v37 }
 0x130   : > { %v1266_v21 = vadd.f32 %v1265_v0, %v11235_v34  ;;  %v1009_v43 = vpop.f32.mrf.mxu0  ;;  %v10304_v0 = vld [vmem:[#allocation4 + $0x4c] sm:$0xf0] }
 0x131   : > { %v1010_v62 = vadd.f32 %v1009_v43, %v11224_v24  ;;  %v8764_v6 = vor.u32 %v10304_v0, %v8763_v31  ;;  %v8677_v43 = vld [vmem:[%s11092_s14 + $0x118] sm:$0xf0] }
 0x132   : > { %8961 = vmatmul.msk.bf16.gmra.mxu1 %vm895_vm0, %v11393_v4  ;;  %v11401_v11 = vadd.f32 %v1394_v61, %v1266_v21  ;;  %v10280_v21 = vld [vmem:[%s11092_s14 + $0x114] sm:$0xf] }
 0x133   : > { %8985 = vmatmul.msk.bf16.gmra.mxu3 %vm895_vm0, %v11393_v4  ;;  %v11403_v55 = vadd.f32 %v1138_v30, %v1010_v62  ;;  %1490 = vmatpush.bf16.msrb.mxu1 %v8764_v6  ;;  %v11419_v7 = vor.u32 %v10280_v21, %v8677_v43  ;;  %v8789_v6 = vld [vmem:[#allocation4 + $0x80] sm:$0xf0]  ;;  %v8667_v43 = vld [vmem:[%s11092_s14 + $0x100] sm:$0xf] }
 0x134   : > { %15254 = vst [vmem:[#allocation47_spill] sm:$0xff] %v11401_v11  ;;  %v8792_v31 = vor.u32 %v10307_v40, %v8789_v6  ;;  %v10279_v40 = vld [vmem:[%s11092_s14 + $0x104] sm:$0xf0] }
 0x135   : > { %15255 = vst [vmem:[#allocation48_spill] sm:$0xff] %v11403_v55 }
 0x136   : > { %v1404_v28 = vpop.f32.mrf.mxu3  ;;  %15259 = vst [vmem:[#allocation52_spill] sm:$0xff] %v11419_v7  ;;  %1747 = vmatpush.bf16.msrb.mxu0 %v8792_v31 }
 0x137   : > { %v1148_v15 = vpop.f32.mrf.mxu1  ;;  %v1267_v52 = vpop.f32.mrf.mxu2 }
 0x138   : > { %v1268_v4 = vadd.f32 %v1267_v52, %v11235_v34  ;;  %v1012_v53 = vpop.f32.mrf.mxu0 }
 0x139   : > { %v1013_v61 = vadd.f32 %v1012_v53, %v11224_v24 }
 0x13a   : > { %v11413_v30 = vadd.f32 %v1396_v17, %v1268_v4 }
 0x13b   : > { %v11415_v62 = vadd.f32 %v1141_v22, %v1013_v61  ;;  %1051 = vmatmul.bf16.gmra.mxu0 %v11407_v37 }
 0x13c   : > { %15257 = vst [vmem:[#allocation50_spill] sm:$0xff] %v11413_v30  ;;  %1309 = vmatmul.bf16.gmra.mxu2 %v11407_v37  ;;  %v11433_v30 = vor.u32 %v10279_v40, %v8667_v43  ;;  %v10282_v37 = vld [vmem:[%s11092_s14 + $0x124] sm:$0xf]  ;;  %v10281_v40 = vld [vmem:[%s11092_s14 + $0x114] sm:$0xf0] }
 0x13d   : > { %15258 = vst [vmem:[#allocation51_spill] sm:$0xff] %v11415_v62 }
 0x13e   : > { %v1406_v11 = vpop.f32.mrf.mxu3  ;;  %15262 = vst [vmem:[#allocation55_spill] sm:$0xff] %v11433_v30 }
 0x13f   : > { %v1151_v52 = vpop.f32.mrf.mxu1  ;;  %v1270_v53 = vpop.f32.mrf.mxu2 }
 0x140   : > { %v1271_v0 = vadd.f32 %v1270_v53, %v11235_v34  ;;  %v1014_v17 = vpop.f32.mrf.mxu0 }
 0x141   : > { %v1015_v22 = vadd.f32 %v1014_v17, %v11224_v24 }
 0x142   : > { %8962 = vmatmul.msk.bf16.gmra.mxu1 %vm895_vm0, %v11419_v7  ;;  %v11427_v4 = vadd.f32 %v1399_v2, %v1271_v0 }
 0x143   : > { %8986 = vmatmul.msk.bf16.gmra.mxu3 %vm895_vm0, %v11419_v7  ;;  %v11429_v61 = vadd.f32 %v1143_v48, %v1015_v22  ;;  %v8685_v7 = vld [vmem:[%s11092_s14 + $0x128] sm:$0xf0] }
 0x144   : > { %15260 = vst [vmem:[#allocation53_spill] sm:$0xff] %v11427_v4  ;;  %v11445_v0 = vor.u32 %v10282_v37, %v8685_v7  ;;  %v8675_v7 = vld [vmem:[%s11092_s14 + $0x110] sm:$0xf] }
 0x145   : > { %15261 = vst [vmem:[#allocation54_spill] sm:$0xff] %v11429_v61  ;;  %v10284_v61 = vld [vmem:[%s11092_s14 + $0x134] sm:$0xf] }
 0x146   : > { %v1409_v21 = vpop.f32.mrf.mxu3  ;;  %15265 = vst [vmem:[#allocation58_spill] sm:$0xff] %v11445_v0 }
 0x147   : > { %v1153_v6 = vpop.f32.mrf.mxu1  ;;  %v1272_v53 = vpop.f32.mrf.mxu2 }
 0x148   : > { %v1273_v62 = vadd.f32 %v1272_v53, %v11235_v34  ;;  %v1017_v55 = vpop.f32.mrf.mxu0 }
 0x149   : > { %v1018_v31 = vadd.f32 %v1017_v55, %v11224_v24 }
 0x14a   : > { %v11439_v9 = vadd.f32 %v1401_v19, %v1273_v62 }
 0x14b   : > { %v11441_v2 = vadd.f32 %v1146_v56, %v1018_v31  ;;  %1056 = vmatmul.bf16.gmra.mxu0 %v11433_v30 }
 0x14c   : > { %15263 = vst [vmem:[#allocation56_spill] sm:$0xff] %v11439_v9  ;;  %1314 = vmatmul.bf16.gmra.mxu2 %v11433_v30 }
 0x14d   : > { %15264 = vst [vmem:[#allocation57_spill] sm:$0xff] %v11441_v2 }
 0x14e   : > { %v1411_v48 = vpop.f32.mrf.mxu3 }
 0x14f   : > { %v1156_v17 = vpop.f32.mrf.mxu1  ;;  %v1275_v22 = vpop.f32.mrf.mxu2 }
 0x150   : > { %v1276_v43 = vadd.f32 %v1275_v22, %v11235_v34  ;;  %v1019_v19 = vpop.f32.mrf.mxu0  ;;  %v11459_v22 = vor.u32 %v10281_v40, %v8675_v7 }
 0x151   : > { %v1020_v56 = vadd.f32 %v1019_v19, %v11224_v24 }
 0x152   : > { %8963 = vmatmul.msk.bf16.gmra.mxu1 %vm895_vm0, %v11445_v0  ;;  %v11453_v55 = vadd.f32 %v1404_v28, %v1276_v43  ;;  %15268 = vst [vmem:[#allocation61_spill] sm:$0xff] %v11459_v22 }
 0x153   : > { %8987 = vmatmul.msk.bf16.gmra.mxu3 %vm895_vm0, %v11445_v0  ;;  %v11455_v62 = vadd.f32 %v1148_v15, %v1020_v56  ;;  %v8693_v0 = vld [vmem:[%s11092_s14 + $0x138] sm:$0xf0] }
 0x154   : > { %15266 = vst [vmem:[#allocation59_spill] sm:$0xff] %v11453_v55  ;;  %v11471_v43 = vor.u32 %v10284_v61, %v8693_v0  ;;  %v10283_v0 = vld [vmem:[%s11092_s14 + $0x124] sm:$0xf0] }
 0x155   : > { %15267 = vst [vmem:[#allocation60_spill] sm:$0xff] %v11455_v62 }
 0x156   : > { %v1414_v37 = vpop.f32.mrf.mxu3  ;;  %15271 = vst [vmem:[#allocation64_spill] sm:$0xff] %v11471_v43 }
 0x157   : > { %v1158_v53 = vpop.f32.mrf.mxu1  ;;  %v1277_v31 = vpop.f32.mrf.mxu2 }
 0x158   : > { %v1278_v9 = vadd.f32 %v1277_v31, %v11235_v34  ;;  %v1022_v4 = vpop.f32.mrf.mxu0  ;;  %v8739_v31 = vld [vmem:[#allocation4 + $0x8] sm:$0xf] }
 0x159   : > { %v1023_v2 = vadd.f32 %v1022_v4, %v11224_v24 }
 0x15a   : > { %v11465_v30 = vadd.f32 %v1406_v11, %v1278_v9 }
 0x15b   : > { %v11467_v28 = vadd.f32 %v1151_v52, %v1023_v2  ;;  %1061 = vmatmul.bf16.gmra.mxu0 %v11459_v22  ;;  %v8683_v2 = vld [vmem:[%s11092_s14 + $0x120] sm:$0xf] }
 0x15c   : > { %15269 = vst [vmem:[#allocation62_spill] sm:$0xff] %v11465_v30  ;;  %1319 = vmatmul.bf16.gmra.mxu2 %v11459_v22 }
 0x15d   : > { %15270 = vst [vmem:[#allocation63_spill] sm:$0xff] %v11467_v28  ;;  %v11485_v28 = vor.u32 %v10283_v0, %v8683_v2  ;;  %v10301_v0 = vld [vmem:[#allocation4 + $0x3c] sm:$0xf] }
 0x15e   : > { %v1416_v15 = vpop.f32.mrf.mxu3 }
 0x15f   : > { %v1161_v19 = vpop.f32.mrf.mxu1  ;;  %v1280_v56 = vpop.f32.mrf.mxu2  ;;  %15274 = vst [vmem:[#allocation67_spill] sm:$0xff] %v11485_v28 }
 0x160   : > { %v1281_v7 = vadd.f32 %v1280_v56, %v11235_v34  ;;  %v1024_v9 = vpop.f32.mrf.mxu0  ;;  %v10298_v56 = vld [vmem:[#allocation4 + $0x1c] sm:$0xf0] }
 0x161   : > { %v1025_v11 = vadd.f32 %v1024_v9, %v11224_v24  ;;  %v8740_v30 = vor.u32 %v10298_v56, %v8739_v31  ;;  %v8701_v9 = vld [vmem:[%s11092_s14 + $0x148] sm:$0xf0] }
 0x162   : > { %8964 = vmatmul.msk.bf16.gmra.mxu1 %vm895_vm0, %v11471_v43  ;;  %v11479_v52 = vadd.f32 %v1409_v21, %v1281_v7  ;;  %v10286_v7 = vld [vmem:[%s11092_s14 + $0x144] sm:$0xf] }
 0x163   : > { %8988 = vmatmul.msk.bf16.gmra.mxu3 %vm895_vm0, %v11471_v43  ;;  %v11481_v4 = vadd.f32 %v1153_v6, %v1025_v11  ;;  %1491 = vmatpush.bf16.msrb.mxu1 %v8740_v30  ;;  %v11497_v2 = vor.u32 %v10286_v7, %v8701_v9  ;;  %v8765_v30 = vld [vmem:[#allocation4 + $0x50] sm:$0xf0]  ;;  %v8691_v9 = vld [vmem:[%s11092_s14 + $0x130] sm:$0xf] }
 0x164   : > { %15272 = vst [vmem:[#allocation65_spill] sm:$0xff] %v11479_v52  ;;  %v8768_v31 = vor.u32 %v10301_v0, %v8765_v30  ;;  %v10285_v0 = vld [vmem:[%s11092_s14 + $0x134] sm:$0xf0] }
 0x165   : > { %15273 = vst [vmem:[#allocation66_spill] sm:$0xff] %v11481_v4 }
 0x166   : > { %v1419_v61 = vpop.f32.mrf.mxu3  ;;  %15277 = vst [vmem:[#allocation70_spill] sm:$0xff] %v11497_v2  ;;  %1748 = vmatpush.bf16.msrb.mxu0 %v8768_v31 }
 0x167   : > { %v1163_v40 = vpop.f32.mrf.mxu1  ;;  %v1282_v55 = vpop.f32.mrf.mxu2 }
 0x168   : > { %v1283_v43 = vadd.f32 %v1282_v55, %v11235_v34  ;;  %v1027_v62 = vpop.f32.mrf.mxu0 }
 0x169   : > { %v1028_v21 = vadd.f32 %v1027_v62, %v11224_v24 }
 0x16a   : > { %v11491_v6 = vadd.f32 %v1411_v48, %v1283_v43 }
 0x16b   : > { %v11493_v11 = vadd.f32 %v1156_v17, %v1028_v21  ;;  %1066 = vmatmul.bf16.gmra.mxu0 %v11485_v28 }
 0x16c   : > { %15275 = vst [vmem:[#allocation68_spill] sm:$0xff] %v11491_v6  ;;  %1324 = vmatmul.bf16.gmra.mxu2 %v11485_v28  ;;  %v11511_v6 = vor.u32 %v10285_v0, %v8691_v9  ;;  %v10288_v28 = vld [vmem:[%s11092_s14 + $0x154] sm:$0xf]  ;;  %v10287_v0 = vld [vmem:[%s11092_s14 + $0x144] sm:$0xf0] }
 0x16d   : > { %15276 = vst [vmem:[#allocation69_spill] sm:$0xff] %v11493_v11 }
 0x16e   : > { %v1421_v52 = vpop.f32.mrf.mxu3  ;;  %15280 = vst [vmem:[#allocation73_spill] sm:$0xff] %v11511_v6 }
 0x16f   : > { %v1166_v55 = vpop.f32.mrf.mxu1  ;;  %v1285_v62 = vpop.f32.mrf.mxu2 }
 0x170   : > { %v1286_v56 = vadd.f32 %v1285_v62, %v11235_v34  ;;  %v1029_v48 = vpop.f32.mrf.mxu0 }
 0x171   : > { %v1030_v17 = vadd.f32 %v1029_v48, %v11224_v24 }
 0x172   : > { %8965 = vmatmul.msk.bf16.gmra.mxu1 %vm895_vm0, %v11497_v2  ;;  %v11505_v43 = vadd.f32 %v1414_v37, %v1286_v56 }
 0x173   : > { %8989 = vmatmul.msk.bf16.gmra.mxu3 %vm895_vm0, %v11497_v2  ;;  %v11507_v21 = vadd.f32 %v1158_v53, %v1030_v17  ;;  %v8709_v2 = vld [vmem:[%s11092_s14 + $0x158] sm:$0xf0] }
 0x174   : > { %15278 = vst [vmem:[#allocation71_spill] sm:$0xff] %v11505_v43  ;;  %v11523_v56 = vor.u32 %v10288_v28, %v8709_v2  ;;  %v8699_v2 = vld [vmem:[%s11092_s14 + $0x140] sm:$0xf] }
 0x175   : > { %15279 = vst [vmem:[#allocation72_spill] sm:$0xff] %v11507_v21  ;;  %v10290_v21 = vld [vmem:[%s11092_s14 + $0x164] sm:$0xf] }
 0x176   : > { %v1424_v7 = vpop.f32.mrf.mxu3  ;;  %15283 = vst [vmem:[#allocation76_spill] sm:$0xff] %v11523_v56 }
 0x177   : > { %v1168_v30 = vpop.f32.mrf.mxu1  ;;  %v1287_v62 = vpop.f32.mrf.mxu2 }
 0x178   : > { %v1288_v11 = vadd.f32 %v1287_v62, %v11235_v34  ;;  %v1032_v4 = vpop.f32.mrf.mxu0 }
 0x179   : > { %v1033_v31 = vadd.f32 %v1032_v4, %v11224_v24 }
 0x17a   : > { %v11517_v22 = vadd.f32 %v1416_v15, %v1288_v11 }
 0x17b   : > { %v11519_v37 = vadd.f32 %v1161_v19, %v1033_v31  ;;  %1071 = vmatmul.bf16.gmra.mxu0 %v11511_v6 }
 0x17c   : > { %15281 = vst [vmem:[#allocation74_spill] sm:$0xff] %v11517_v22  ;;  %1329 = vmatmul.bf16.gmra.mxu2 %v11511_v6 }
 0x17d   : > { %15282 = vst [vmem:[#allocation75_spill] sm:$0xff] %v11519_v37 }
 0x17e   : > { %v1426_v53 = vpop.f32.mrf.mxu3 }
 0x17f   : > { %v1171_v48 = vpop.f32.mrf.mxu1  ;;  %v1290_v17 = vpop.f32.mrf.mxu2 }
 0x180   : > { %v1291_v9 = vadd.f32 %v1290_v17, %v11235_v34  ;;  %v1034_v15 = vpop.f32.mrf.mxu0  ;;  %v11537_v17 = vor.u32 %v10287_v0, %v8699_v2 }
 0x181   : > { %v1035_v19 = vadd.f32 %v1034_v15, %v11224_v24 }
 0x182   : > { %8966 = vmatmul.msk.bf16.gmra.mxu1 %vm895_vm0, %v11523_v56  ;;  %v11531_v4 = vadd.f32 %v1419_v61, %v1291_v9  ;;  %15286 = vst [vmem:[#allocation79_spill] sm:$0xff] %v11537_v17 }
 0x183   : > { %8990 = vmatmul.msk.bf16.gmra.mxu3 %vm895_vm0, %v11523_v56  ;;  %v11533_v11 = vadd.f32 %v1163_v40, %v1035_v19  ;;  %v8717_v56 = vld [vmem:[%s11092_s14 + $0x168] sm:$0xf0] }
 0x184   : > { %15284 = vst [vmem:[#allocation77_spill] sm:$0xff] %v11531_v4  ;;  %v11549_v9 = vor.u32 %v10290_v21, %v8717_v56  ;;  %v10289_v56 = vld [vmem:[%s11092_s14 + $0x154] sm:$0xf0] }
 0x185   : > { %15285 = vst [vmem:[#allocation78_spill] sm:$0xff] %v11533_v11  ;;  %v10341_v11 = vld [vmem:[#allocation4 + $0x174] sm:$0xf0] }
 0x186   : > { %v1429_v28 = vpop.f32.mrf.mxu3  ;;  %15289 = vst [vmem:[#allocation82_spill] sm:$0xff] %v11549_v9 }
 0x187   : > { %v1173_v62 = vpop.f32.mrf.mxu1  ;;  %v1292_v31 = vpop.f32.mrf.mxu2 }
 0x188   : > { %v1293_v22 = vadd.f32 %v1292_v31, %v11235_v34  ;;  %v1037_v43 = vpop.f32.mrf.mxu0  ;;  %v8939_v31 = vld [vmem:[#allocation4 + $0x190] sm:$0xf] }
 0x189   : > { %v1038_v37 = vadd.f32 %v1037_v43, %v11224_v24 }
 0x18a   : > { %v11543_v15 = vadd.f32 %v1421_v52, %v1293_v22 }
 0x18b   : > { %v11545_v61 = vadd.f32 %v1166_v55, %v1038_v37  ;;  %1076 = vmatmul.bf16.gmra.mxu0 %v11537_v17  ;;  %v8707_v37 = vld [vmem:[%s11092_s14 + $0x150] sm:$0xf] }
 0x18c   : > { %15287 = vst [vmem:[#allocation80_spill] sm:$0xff] %v11543_v15  ;;  %1334 = vmatmul.bf16.gmra.mxu2 %v11537_v17 }
 0x18d   : > { %15288 = vst [vmem:[#allocation81_spill] sm:$0xff] %v11545_v61  ;;  %v8915_v61 = vld [vmem:[#allocation4 + $0x160] sm:$0xf] }
 0x18e   : > { %v1431_v40 = vpop.f32.mrf.mxu3  ;;  %v8916_v17 = vor.u32 %v10341_v11, %v8915_v61 }
 0x18f   : > { %v1176_v19 = vpop.f32.mrf.mxu1  ;;  %v1295_v2 = vpop.f32.mrf.mxu2 }
 0x190   : > { %v1296_v0 = vadd.f32 %v1295_v2, %v11235_v34  ;;  %v1039_v43 = vpop.f32.mrf.mxu0  ;;  %v10347_v2 = vld [vmem:[#allocation4 + $0x1a4] sm:$0xf0]  ;;  %2000 = vmatpush.bf16.msra.mxu1 %v8916_v17  ;;  %v8741_v17 = vld [vmem:[#allocation4 + $0x20] sm:$0xf0] }
 0x191   : > { %v1040_v22 = vadd.f32 %v1039_v43, %v11224_v24  ;;  %v8940_v4 = vor.u32 %v10347_v2, %v8939_v31  ;;  %v10292_v43 = vld [vmem:[%s11092_s14 + $0x174] sm:$0xf] }
 0x192   : > { %8967 = vmatmul.msk.bf16.gmra.mxu1 %vm895_vm0, %v11549_v9  ;;  %v11557_v52 = vadd.f32 %v1424_v7, %v1296_v0 }
 0x193   : > { %8991 = vmatmul.msk.bf16.gmra.mxu3 %vm895_vm0, %v11549_v9  ;;  %v11559_v55 = vadd.f32 %v1168_v30, %v1040_v22  ;;  %v11563_v9 = vor.u32 %v10289_v56, %v8707_v37  ;;  %v8725_v22 = vld [vmem:[%s11092_s14 + $0x178] sm:$0xf0] }
 0x194   : > { %15290 = vst [vmem:[#allocation83_spill] sm:$0xff] %v11557_v52  ;;  %2136 = vmatpush.bf16.msra.mxu3 %v8940_v4  ;;  %v11575_v11 = vor.u32 %v10292_v43, %v8725_v22  ;;  %v10295_v4 = vld [vmem:[#allocation4 + $0xc] sm:$0xf]  ;;  %v10291_v43 = vld [vmem:[%s11092_s14 + $0x164] sm:$0xf0] }
 0x195   : > { %15291 = vst [vmem:[#allocation84_spill] sm:$0xff] %v11559_v55  ;;  %v8744_v61 = vor.u32 %v10295_v4, %v8741_v17 }
 0x196   : > { %v1434_v21 = vpop.f32.mrf.mxu3  ;;  %15292 = vst [vmem:[#allocation85_spill] sm:$0xff] %v11563_v9 }
 0x197   : > { %v1178_v15 = vpop.f32.mrf.mxu1  ;;  %v1297_v6 = vpop.f32.mrf.mxu2  ;;  %15295 = vst [vmem:[#allocation88_spill] sm:$0xff] %v11575_v11  ;;  %1749 = vmatpush.bf16.msrb.mxu0 %v8744_v61 }
 0x198   : > { %v1298_v7 = vadd.f32 %v1297_v6, %v11235_v34  ;;  %v1042_v30 = vpop.f32.mrf.mxu0 }
 0x199   : > { %v1043_v0 = vadd.f32 %v1042_v30, %v11224_v24 }
 0x19a   : > { %v11569_v52 = vadd.f32 %v1426_v53, %v1298_v7 }
 0x19b   : > { %v11571_v55 = vadd.f32 %v1171_v48, %v1043_v0  ;;  %1081 = vmatmul.bf16.gmra.mxu0 %v11563_v9  ;;  %v8715_v0 = vld [vmem:[%s11092_s14 + $0x160] sm:$0xf] }
 0x19c   : > { %15293 = vst [vmem:[#allocation86_spill] sm:$0xff] %v11569_v52  ;;  %1339 = vmatmul.bf16.gmra.mxu2 %v11563_v9  ;;  %v11589_v17 = vor.u32 %v10291_v43, %v8715_v0 }
 0x19d   : > { %15294 = vst [vmem:[#allocation87_spill] sm:$0xff] %v11571_v55 }
 0x19e   : > { %v1436_v31 = vpop.f32.mrf.mxu3  ;;  %15298 = vst [vmem:[#allocation91_spill] sm:$0xff] %v11589_v17 }
 0x19f   : > { %v1181_v6 = vpop.f32.mrf.mxu1  ;;  %v1300_v37 = vpop.f32.mrf.mxu2 }
 0x1a0   : > { %v1301_v56 = vadd.f32 %v1300_v37, %v11235_v34  ;;  %v1044_v53 = vpop.f32.mrf.mxu0 }
 0x1a1   : > { %v1045_v48 = vadd.f32 %v1044_v53, %v11224_v24 }
 0x1a2   : > { %8968 = vmatmul.msk.bf16.gmra.mxu1 %vm895_vm0, %v11575_v11  ;;  %v11583_v2 = vadd.f32 %v1429_v28, %v1301_v56 }
 0x1a3   : > { %8992 = vmatmul.msk.bf16.gmra.mxu3 %vm895_vm0, %v11575_v11  ;;  %v11585_v7 = vadd.f32 %v1173_v62, %v1045_v48 }
 0x1a4   : > { %15296 = vst [vmem:[#allocation89_spill] sm:$0xff] %v11583_v2 }
 0x1a5   : > { %15297 = vst [vmem:[#allocation90_spill] sm:$0xff] %v11585_v7 }
 0x1a6   : > { %v1439_v30 = vpop.f32.mrf.mxu3 }
 0x1a7   : > { %v1183_v22 = vpop.f32.mrf.mxu1  ;;  %v1302_v4 = vpop.f32.mrf.mxu2 }
 0x1a8   : > { %v1303_v37 = vadd.f32 %v1302_v4, %v11235_v34  ;;  %v1047_v52 = vpop.f32.mrf.mxu0  ;;  %v8723_v4 = vld [vmem:[%s11092_s14 + $0x170] sm:$0xf] }
 0x1a9   : > { %v1048_v61 = vadd.f32 %v1047_v52, %v11224_v24 }
 0x1aa   : > { %v11593_v55 = vadd.f32 %v1431_v40, %v1303_v37  ;;  %v10293_v37 = vld [vmem:[%s11092_s14 + $0x174] sm:$0xf0] }
 0x1ab   : > { %v11595_v28 = vadd.f32 %v1176_v19, %v1048_v61  ;;  %1086 = vmatmul.bf16.gmra.mxu0 %v11589_v17  ;;  %v11610_v2 = vor.u32 %v10293_v37, %v8723_v4  ;;  %v8891_v4 = vld [vmem:[#allocation4 + $0x130] sm:$0xf]  ;;  %v10335_v37 = vld [vmem:[#allocation4 + $0x144] sm:$0xf0] }
 0x1ac   : > { %15299 = vst [vmem:[#allocation92_spill] sm:$0xff] %v11593_v55  ;;  %1344 = vmatmul.bf16.gmra.mxu2 %v11589_v17 }
 0x1ad   : > { %15300 = vst [vmem:[#allocation93_spill] sm:$0xff] %v11595_v28 }
 0x1ae   : > { %v1441_v62 = vpop.f32.mrf.mxu3  ;;  %15303 = vst [vmem:[#allocation96_spill] sm:$0xff] %v11610_v2 }
 0x1af   : > { %v1186_v56 = vpop.f32.mrf.mxu1  ;;  %v1305_v53 = vpop.f32.mrf.mxu2 }
 0x1b0   : > { %v1306_v48 = vadd.f32 %v1305_v53, %v11235_v34  ;;  %v1049_v0 = vpop.f32.mrf.mxu0 }
 0x1b1   : > { %v1050_v40 = vadd.f32 %v1049_v0, %v11224_v24 }
 0x1b2   : > { %1492 = vmatmul.bf16.vlgmr.msrb.gmra.mxu1 %v11112_v10  ;;  %v11604_v52 = vadd.f32 %v1434_v21, %v1306_v48 }
 0x1b3   : > { %8993 = vmatmul.msk.bf16.vlgmr.msrb.gmra.mxu3 %vm895_vm0, %v11096_v16  ;;  %v11606_v19 = vadd.f32 %v1178_v15, %v1050_v40 }
 0x1b4   : > { %15301 = vst [vmem:[#allocation94_spill] sm:$0xff] %v11604_v52 }
 0x1b5   : > { %15302 = vst [vmem:[#allocation95_spill] sm:$0xff] %v11606_v19 }
 0x1b6   : > { %v1444_v43 = vpop.f32.mrf.mxu3 }
 0x1b7   : > { %v1188_v61 = vpop.f32.mrf.mxu1  ;;  %v1307_v55 = vpop.f32.mrf.mxu2 }
 0x1b8   : > { %v1308_v53 = vadd.f32 %v1307_v55, %v11235_v34  ;;  %v1052_v28 = vpop.f32.mrf.mxu0 }
 0x1b9   : > { %v1053_v7 = vadd.f32 %v1052_v28, %v11224_v24 }
 0x1ba   : > { %v11614_v11 = vadd.f32 %v1436_v31, %v1308_v53  ;;  %v8892_v53 = vor.u32 %v10335_v37, %v8891_v4  ;;  %v10338_v4 = vld [vmem:[#allocation4 + $0x164] sm:$0xf] }
 0x1bb   : > { %v11616_v17 = vadd.f32 %v1181_v6, %v1053_v7  ;;  %1091 = vmatmul.bf16.gmra.mxu0 %v11610_v2 }
 0x1bc   : > { %15304 = vst [vmem:[#allocation97_spill] sm:$0xff] %v11614_v11  ;;  %1349 = vmatmul.bf16.gmra.mxu2 %v11610_v2  ;;  %2001 = vmatpush.bf16.msra.mxu1 %v8892_v53 }
 0x1bd   : > { %15305 = vst [vmem:[#allocation98_spill] sm:$0xff] %v11616_v17 }
 0x1be   : > { %v1446_v15 = vpop.f32.mrf.mxu3 }
 0x1bf   : > { %v1191_v21 = vpop.f32.mrf.mxu1  ;;  %v1310_v48 = vpop.f32.mrf.mxu2 }
 0x1c0   : > { %v1311_v0 = vadd.f32 %v1310_v48, %v11235_v34  ;;  %v1054_v40 = vpop.f32.mrf.mxu0 }
 0x1c1   : > { %v1055_v55 = vadd.f32 %v1054_v40, %v11224_v24  ;;  %v8941_v40 = vld [vmem:[#allocation4 + $0x1a8] sm:$0xf0] }
 0x1c2   : > { %1497 = vmatmul.bf16.gmra.mxu1 %v11126_v20  ;;  %v11625_v31 = vadd.f32 %v1439_v30, %v1311_v0  ;;  %v10344_v0 = vld [vmem:[#allocation4 + $0x194] sm:$0xf] }
 0x1c3   : > { %8994 = vmatmul.msk.bf16.gmra.mxu3 %vm895_vm0, %v11104_v51  ;;  %v11627_v6 = vadd.f32 %v1183_v22, %v1055_v55  ;;  %v8944_v55 = vor.u32 %v10344_v0, %v8941_v40 }
 0x1c4   : > { %15306 = vst [vmem:[#allocation99_spill] sm:$0xff] %v11625_v31 }
 0x1c5   : > { %2394 = vmatpush.bf16.msra.mxu2 %v8944_v55 }
 0x1c6   : > { %v1449_v7 = vpop.f32.mrf.mxu3 }
 0x1c7   : > { %v1193_v28 = vpop.f32.mrf.mxu1  ;;  %v1312_v11 = vpop.f32.mrf.mxu2 }
 0x1c8   : > { %v1313_v48 = vadd.f32 %v1312_v11, %v11235_v34  ;;  %v1057_v52 = vpop.f32.mrf.mxu0  ;;  %v8917_v11 = vld [vmem:[#allocation4 + $0x178] sm:$0xf0] }
 0x1c9   : > { %v1058_v17 = vadd.f32 %v1057_v52, %v11224_v24  ;;  %v8920_v53 = vor.u32 %v10338_v4, %v8917_v11 }
 0x1ca   : > { %v11631_v19 = vadd.f32 %v1441_v62, %v1313_v48 }
 0x1cb   : > { %v11633_v2 = vadd.f32 %v1186_v56, %v1058_v17  ;;  %1750 = vmatmul.bf16.vlgmr.msrb.gmra.mxu0 %v11112_v10 }
 0x1cc   : > { %15307 = vst [vmem:[#allocation100_spill] sm:$0xff] %v11631_v19  ;;  %9017 = vmatmul.msk.bf16.vlgmr.msrb.gmra.mxu2 %vm895_vm0, %v11096_v16  ;;  %2258 = vmatpush.bf16.msra.mxu0 %v8920_v53 }
 0x1cd   : > { %15308 = vst [vmem:[#allocation101_spill] sm:$0xff] %v11633_v2 }
 0x1ce   : > { %v1451_v30 = vpop.f32.mrf.mxu3 }
 0x1cf   : > { %v1196_v22 = vpop.f32.mrf.mxu1  ;;  %v1315_v37 = vpop.f32.mrf.mxu2 }
 0x1d0   : > { %v1316_v52 = vadd.f32 %v1315_v37, %v11235_v34  ;;  %v1059_v17 = vpop.f32.mrf.mxu0 }
 0x1d1   : > { %v1060_v62 = vadd.f32 %v1059_v17, %v11224_v24 }
 0x1d2   : > { %1502 = vmatmul.bf16.gmra.mxu1 %v11140_v26  ;;  %v11643_v56 = vadd.f32 %v1444_v43, %v1316_v52 }
 0x1d3   : > { %8995 = vmatmul.msk.bf16.gmra.mxu3 %vm895_vm0, %v11118_v13  ;;  %v11645_v48 = vadd.f32 %v1188_v61, %v1060_v62 }
 0x1d4   : > { %15309 = vst [vmem:[#allocation102_spill] sm:$0xff] %v11643_v56 }
 0x1d5   : > { %15310 = vst [vmem:[#allocation103_spill] sm:$0xff] %v11645_v48 }
 0x1d6   : > { %v1454_v0 = vpop.f32.mrf.mxu3 }
 0x1d7   : > { %v1198_v40 = vpop.f32.mrf.mxu1  ;;  %v1317_v19 = vpop.f32.mrf.mxu2 }
 0x1d8   : > { %v1318_v4 = vadd.f32 %v1317_v19, %v11235_v34  ;;  %v1062_v11 = vpop.f32.mrf.mxu0 }
 0x1d9   : > { %v1063_v37 = vadd.f32 %v1062_v11, %v11224_v24 }
 0x1da   : > { %v11649_v31 = vadd.f32 %v1446_v15, %v1318_v4 }
 0x1db   : > { %v11651_v55 = vadd.f32 %v1191_v21, %v1063_v37  ;;  %1755 = vmatmul.bf16.gmra.mxu0 %v11126_v20 }
 0x1dc   : > { %15311 = vst [vmem:[#allocation104_spill] sm:$0xff] %v11649_v31  ;;  %9018 = vmatmul.msk.bf16.gmra.mxu2 %vm895_vm0, %v11104_v51 }
 0x1dd   : > { %15312 = vst [vmem:[#allocation105_spill] sm:$0xff] %v11651_v55 }
 0x1de   : > { %v1456_v17 = vpop.f32.mrf.mxu3 }
 0x1df   : > { %v1201_v43 = vpop.f32.mrf.mxu1  ;;  %v1320_v61 = vpop.f32.mrf.mxu2 }
 0x1e0   : > { %v1321_v53 = vadd.f32 %v1320_v61, %v11235_v34  ;;  %v1064_v19 = vpop.f32.mrf.mxu0 }
 0x1e1   : > { %v1065_v15 = vadd.f32 %v1064_v19, %v11224_v24 }
 0x1e2   : > { %1507 = vmatmul.bf16.gmra.mxu1 %v11154_v35  ;;  %v11661_v21 = vadd.f32 %v1449_v7, %v1321_v53 }
 0x1e3   : > { %8996 = vmatmul.msk.bf16.gmra.mxu3 %vm895_vm0, %v11132_v23  ;;  %v11663_v52 = vadd.f32 %v1193_v28, %v1065_v15 }
 0x1e4   : > { %15313 = vst [vmem:[#allocation106_spill] sm:$0xff] %v11661_v21 }
 0x1e5   : > { %15314 = vst [vmem:[#allocation107_spill] sm:$0xff] %v11663_v52 }
 0x1e6   : > { %v1459_v62 = vpop.f32.mrf.mxu3 }
 0x1e7   : > { %v1203_v4 = vpop.f32.mrf.mxu1  ;;  %v1322_v11 = vpop.f32.mrf.mxu2 }
 0x1e8   : > { %v1323_v37 = vadd.f32 %v1322_v11, %v11235_v34  ;;  %v1067_v31 = vpop.f32.mrf.mxu0 }
 0x1e9   : > { %v1068_v61 = vadd.f32 %v1067_v31, %v11224_v24 }
 0x1ea   : > { %v11667_v56 = vadd.f32 %v1451_v30, %v1323_v37  ;;  %v8867_v37 = vld [vmem:[#allocation4 + $0x100] sm:$0xf] }
 0x1eb   : > { %v11669_v55 = vadd.f32 %v1196_v22, %v1068_v61  ;;  %1760 = vmatmul.bf16.gmra.mxu0 %v11140_v26  ;;  %v10329_v61 = vld [vmem:[#allocation4 + $0x114] sm:$0xf0] }
 0x1ec   : > { %15315 = vst [vmem:[#allocation108_spill] sm:$0xff] %v11667_v56  ;;  %9019 = vmatmul.msk.bf16.gmra.mxu2 %vm895_vm0, %v11118_v13  ;;  %v8868_v56 = vor.u32 %v10329_v61, %v8867_v37 }
 0x1ed   : > { %15316 = vst [vmem:[#allocation109_spill] sm:$0xff] %v11669_v55 }
 0x1ee   : > { %v1461_v48 = vpop.f32.mrf.mxu3  ;;  %2002 = vmatpush.bf16.msra.mxu1 %v8868_v56 }
 0x1ef   : > { %v1206_v7 = vpop.f32.mrf.mxu1  ;;  %v1325_v28 = vpop.f32.mrf.mxu2 }
 0x1f0   : > { %v1326_v53 = vadd.f32 %v1325_v28, %v11235_v34  ;;  %v1069_v19 = vpop.f32.mrf.mxu0 }
 0x1f1   : > { %v1070_v31 = vadd.f32 %v1069_v19, %v11224_v24  ;;  %v8893_v19 = vld [vmem:[#allocation4 + $0x148] sm:$0xf0] }
 0x1f2   : > { %1512 = vmatmul.bf16.gmra.mxu1 %v11168_v44  ;;  %v11679_v30 = vadd.f32 %v1454_v0, %v1326_v53  ;;  %v10332_v53 = vld [vmem:[#allocation4 + $0x134] sm:$0xf] }
 0x1f3   : > { %8997 = vmatmul.msk.bf16.gmra.mxu3 %vm895_vm0, %v11146_v29  ;;  %v11681_v22 = vadd.f32 %v1198_v40, %v1070_v31  ;;  %v8896_v31 = vor.u32 %v10332_v53, %v8893_v19 }
 0x1f4   : > { %15317 = vst [vmem:[#allocation110_spill] sm:$0xff] %v11679_v30 }
 0x1f5   : > { %2259 = vmatpush.bf16.msra.mxu0 %v8896_v31 }
 0x1f6   : > { %v1464_v15 = vpop.f32.mrf.mxu3 }
 0x1f7   : > { %v1208_v11 = vpop.f32.mrf.mxu1  ;;  %v1327_v21 = vpop.f32.mrf.mxu2 }
 0x1f8   : > { %v1328_v28 = vadd.f32 %v1327_v21, %v11235_v34  ;;  %v1072_v55 = vpop.f32.mrf.mxu0 }
 0x1f9   : > { %v1073_v52 = vadd.f32 %v1072_v55, %v11224_v24 }
 0x1fa   : > { %v11685_v2 = vadd.f32 %v1456_v17, %v1328_v28 }
 0x1fb   : > { %v11687_v13 = vadd.f32 %v1201_v43, %v1073_v52  ;;  %1765 = vmatmul.bf16.gmra.mxu0 %v11154_v35 }
 0x1fc   : > { %15318 = vst [vmem:[#allocation111_spill] sm:$0xff] %v11685_v2  ;;  %9020 = vmatmul.msk.bf16.gmra.mxu2 %vm895_vm0, %v11132_v23 }
 0x1fd   : > { %15319 = vst [vmem:[#allocation112_spill] sm:$0xff] %v11687_v13 }
 0x1fe   : > { %v1466_v0 = vpop.f32.mrf.mxu3 }
 0x1ff   : > { %v1211_v40 = vpop.f32.mrf.mxu1  ;;  %v1330_v37 = vpop.f32.mrf.mxu2 }
 0x200   : > { %v1331_v21 = vadd.f32 %v1330_v37, %v11235_v34  ;;  %v1074_v56 = vpop.f32.mrf.mxu0 }
 0x201   : > { %v1075_v55 = vadd.f32 %v1074_v56, %v11224_v24 }
 0x202   : > { %1517 = vmatmul.bf16.gmra.mxu1 %v11182_v50  ;;  %v11697_v17 = vadd.f32 %v1459_v62, %v1331_v21 }
 0x203   : > { %8998 = vmatmul.msk.bf16.gmra.mxu3 %vm895_vm0, %v11160_v38  ;;  %v11699_v43 = vadd.f32 %v1203_v4, %v1075_v55 }
 0x204   : > { %15320 = vst [vmem:[#allocation113_spill] sm:$0xff] %v11697_v17 }
 0x205   : > { %15321 = vst [vmem:[#allocation114_spill] sm:$0xff] %v11699_v43 }
 0x206   : > { %v1469_v52 = vpop.f32.mrf.mxu3 }
 0x207   : > { %v1213_v61 = vpop.f32.mrf.mxu1  ;;  %v1332_v28 = vpop.f32.mrf.mxu2 }
 0x208   : > { %v1333_v53 = vadd.f32 %v1332_v28, %v11235_v34  ;;  %v1077_v19 = vpop.f32.mrf.mxu0 }
 0x209   : > { %v1078_v37 = vadd.f32 %v1077_v19, %v11224_v24 }
 0x20a   : > { %v11703_v2 = vadd.f32 %v1461_v48, %v1333_v53 }
 0x20b   : > { %v11705_v31 = vadd.f32 %v1206_v7, %v1078_v37  ;;  %1770 = vmatmul.bf16.gmra.mxu0 %v11168_v44 }
 0x20c   : > { %15322 = vst [vmem:[#allocation115_spill] sm:$0xff] %v11703_v2  ;;  %9021 = vmatmul.msk.bf16.gmra.mxu2 %vm895_vm0, %v11146_v29 }
 0x20d   : > { %15323 = vst [vmem:[#allocation116_spill] sm:$0xff] %v11705_v31 }
 0x20e   : > { %v1471_v30 = vpop.f32.mrf.mxu3 }
 0x20f   : > { %v1216_v62 = vpop.f32.mrf.mxu1  ;;  %v1335_v4 = vpop.f32.mrf.mxu2 }
 0x210   : > { %v1336_v21 = vadd.f32 %v1335_v4, %v11235_v34  ;;  %v1079_v56 = vpop.f32.mrf.mxu0 }
 0x211   : > { %v1080_v48 = vadd.f32 %v1079_v56, %v11224_v24 }
 0x212   : > { %1522 = vmatmul.bf16.gmra.mxu1 %v11196_v60  ;;  %v11715_v7 = vadd.f32 %v1464_v15, %v1336_v21 }
 0x213   : > { %8999 = vmatmul.msk.bf16.gmra.mxu3 %vm895_vm0, %v11174_v47  ;;  %v11717_v55 = vadd.f32 %v1208_v11, %v1080_v48 }
 0x214   : > { %15324 = vst [vmem:[#allocation117_spill] sm:$0xff] %v11715_v7 }
 0x215   : > { %15325 = vst [vmem:[#allocation118_spill] sm:$0xff] %v11717_v55 }
 0x216   : > { %v1474_v28 = vpop.f32.mrf.mxu3 }
 0x217   : > { %v1218_v53 = vpop.f32.mrf.mxu1  ;;  %v1337_v19 = vpop.f32.mrf.mxu2 }
 0x218   : > { %v1338_v37 = vadd.f32 %v1337_v19, %v11235_v34  ;;  %v1082_v2 = vpop.f32.mrf.mxu0 }
 0x219   : > { %v1083_v4 = vadd.f32 %v1082_v2, %v11224_v24 }
 0x21a   : > { %v11721_v17 = vadd.f32 %v1466_v0, %v1338_v37 }
 0x21b   : > { %v11723_v31 = vadd.f32 %v1211_v40, %v1083_v4  ;;  %1775 = vmatmul.bf16.gmra.mxu0 %v11182_v50  ;;  %v8843_v4 = vld [vmem:[#allocation4 + $0xd0] sm:$0xf] }
 0x21c   : > { %15326 = vst [vmem:[#allocation119_spill] sm:$0xff] %v11721_v17  ;;  %9022 = vmatmul.msk.bf16.gmra.mxu2 %vm895_vm0, %v11160_v38  ;;  %v10323_v17 = vld [vmem:[#allocation4 + $0xe4] sm:$0xf0] }
 0x21d   : > { %15327 = vst [vmem:[#allocation120_spill] sm:$0xff] %v11723_v31  ;;  %v8844_v31 = vor.u32 %v10323_v17, %v8843_v4  ;;  %v8869_v17 = vld [vmem:[#allocation4 + $0x118] sm:$0xf0] }
 0x21e   : > { %v1476_v43 = vpop.f32.mrf.mxu3 }
 0x21f   : > { %v1221_v15 = vpop.f32.mrf.mxu1  ;;  %v1340_v11 = vpop.f32.mrf.mxu2  ;;  %2003 = vmatpush.bf16.msra.mxu1 %v8844_v31 }
 0x220   : > { %v1341_v21 = vadd.f32 %v1340_v11, %v11235_v34  ;;  %v1084_v56 = vpop.f32.mrf.mxu0 }
 0x221   : > { %v1085_v2 = vadd.f32 %v1084_v56, %v11224_v24 }
 0x222   : > { %1527 = vmatmul.bf16.gmra.mxu1 %v11210_v8  ;;  %v11733_v0 = vadd.f32 %v1469_v52, %v1341_v21 }
 0x223   : > { %9000 = vmatmul.msk.bf16.gmra.mxu3 %vm895_vm0, %v11188_v54  ;;  %v11735_v40 = vadd.f32 %v1213_v61, %v1085_v2  ;;  %v10727_v61 = vld [vmem:[#allocation7] sm:$0x3f] }
 0x224   : > { %15328 = vst [vmem:[#allocation121_spill] sm:$0xff] %v11733_v0  ;;  %v11746_v21 = vperm.slane %v10727_v61, 2 }
 0x225   : > { %15329 = vst [vmem:[#allocation122_spill] sm:$0xff] %v11735_v40 }
 0x226   : > { %v1479_v48 = vpop.f32.mrf.mxu3 }
 0x227   : > { %v1223_v19 = vpop.f32.mrf.mxu1  ;;  %v1342_v37 = vpop.f32.mrf.mxu2 }
 0x228   : > { %v1343_v7 = vadd.f32 %v1342_v37, %v11235_v34  ;;  %v1087_v11 = vpop.f32.mrf.mxu0  ;;  %v10326_v37 = vld [vmem:[#allocation4 + $0x104] sm:$0xf] }
 0x229   : > { %v1088_v55 = vadd.f32 %v1087_v11, %v11224_v24  ;;  %v8872_v31 = vor.u32 %v10326_v37, %v8869_v17 }
 0x22a   : > { %v11739_v13 = vadd.f32 %v1471_v30, %v1343_v7 }
 0x22b   : > { %v11741_v38 = vadd.f32 %v1216_v62, %v1088_v55  ;;  %1780 = vmatmul.bf16.gmra.mxu0 %v11196_v60 }
 0x22c   : > { %15330 = vst [vmem:[#allocation123_spill] sm:$0xff] %v11739_v13  ;;  %9023 = vmatmul.msk.bf16.gmra.mxu2 %vm895_vm0, %v11174_v47  ;;  %2260 = vmatpush.bf16.msra.mxu0 %v8872_v31 }
 0x22d   : > { %15331 = vst [vmem:[#allocation124_spill] sm:$0xff] %v11741_v38 }
 0x22e   : > { %v1481_v52 = vpop.f32.mrf.mxu3 }
 0x22f   : > { %v1493_v56 = vpop.f32.mrf.mxu1  ;;  %v1345_v2 = vpop.f32.mrf.mxu2 }
 0x230   : > { %v1346_v4 = vadd.f32 %v1345_v2, %v11235_v34  ;;  %v1089_v30 = vpop.f32.mrf.mxu0  ;;  %v1494_v62 = vadd.f32 %v1493_v56, %v11746_v21 }
 0x231   : > { %v1090_v7 = vadd.f32 %v1089_v30, %v11224_v24 }
 0x232   : > { %1532 = vmatmul.bf16.gmra.mxu1 %v11226_v25  ;;  %v11754_v55 = vadd.f32 %v1474_v28, %v1346_v4 }
 0x233   : > { %9001 = vmatmul.msk.bf16.gmra.mxu3 %vm895_vm0, %v11202_v63  ;;  %v11756_v11 = vadd.f32 %v1218_v53, %v1090_v7 }
 0x234   : > { %15332 = vst [vmem:[#allocation125_spill] sm:$0xff] %v11754_v55 }
 0x236   : > { %v1622_v13 = vpop.f32.mrf.mxu3 }
 0x237   : > { %v11758_v0 = vadd.f32 %v1622_v13, %v1494_v62  ;;  %v1495_v2 = vpop.f32.mrf.mxu1  ;;  %v1347_v38 = vpop.f32.mrf.mxu2 }
 0x238   : > { %v1348_v40 = vadd.f32 %v1347_v38, %v11235_v34  ;;  %v1092_v37 = vpop.f32.mrf.mxu0  ;;  %v1496_v47 = vadd.f32 %v1495_v2, %v11746_v21 }
 0x239   : > { %v1093_v56 = vadd.f32 %v1092_v37, %v11224_v24 }
 0x23a   : > { %v11762_v17 = vadd.f32 %v1476_v43, %v1348_v40 }
 0x23b   : > { %v11765_v30 = vadd.f32 %v1221_v15, %v1093_v56  ;;  %1785 = vmatmul.bf16.gmra.mxu0 %v11210_v8 }
 0x23c   : > { %15333 = vst [vmem:[#allocation126_spill] sm:$0xff] %v11762_v17  ;;  %9024 = vmatmul.msk.bf16.gmra.mxu2 %vm895_vm0, %v11188_v54 }
 0x23e   : > { %v1624_v28 = vpop.f32.mrf.mxu3 }
 0x23f   : > { %v11770_v13 = vadd.f32 %v1624_v28, %v1496_v47  ;;  %v1498_v53 = vpop.f32.mrf.mxu1  ;;  %v1350_v4 = vpop.f32.mrf.mxu2  ;;  %v11785_v28 = vperm.slane %v10727_v61, 3 }
 0x240   : > { %v1351_v38 = vadd.f32 %v1350_v4, %v11235_v34  ;;  %v1094_v43 = vpop.f32.mrf.mxu0  ;;  %v1499_v40 = vadd.f32 %v1498_v53, %v11746_v21 }
 0x241   : > { %15334 = vst [vmem:[#allocation127_spill] sm:$0xff] %v11770_v13  ;;  %v1095_v15 = vadd.f32 %v1094_v43, %v11224_v24 }
 0x242   : > { %1537 = vmatmul.bf16.gmra.mxu1 %v11251_v58  ;;  %v11778_v31 = vadd.f32 %v1479_v48, %v1351_v38 }
 0x243   : > { %9002 = vmatmul.msk.bf16.gmra.mxu3 %vm895_vm0, %v11216_v14  ;;  %v11780_v62 = vadd.f32 %v1223_v19, %v1095_v15 }
 0x244   : > { %15335 = vst [vmem:[#allocation128_spill] sm:$0xff] %v11778_v31  ;;  %v2522_v31 = vmax.f32 %v11247_v45, 0.0  ;;  %v8845_v45 = vld [vmem:[#allocation4 + $0xe8] sm:$0xf0] }
 0x246   : > { %v1627_v47 = vpop.f32.mrf.mxu3 }
 0x247   : > { %v11782_v7 = vadd.f32 %v1627_v47, %v1499_v40  ;;  %v1500_v2 = vpop.f32.mrf.mxu1  ;;  %v1352_v37 = vpop.f32.mrf.mxu2  ;;  %v2516_v40 = vmax.f32 %v11231_v32, 0.0 }
 0x248   : > { %v1353_v56 = vadd.f32 %v1352_v37, %v11235_v34  ;;  %v1751_v4 = vpop.f32.mrf.mxu0  ;;  %v1501_v17 = vadd.f32 %v1500_v2, %v11746_v21 }
 0x249   : > { %15336 = vst [vmem:[#allocation129_spill] sm:$0xff] %v11782_v7  ;;  %v1752_v24 = vadd.f32 %v1751_v4, %v11785_v28  ;;  %v10305_v7 = vld [vmem:[#allocation4 + $0x54] sm:$0xf0] }
 0x24a   : > { %v11787_v53 = vadd.f32 %v1481_v52, %v1353_v56 }
 0x24b   : > { %1790 = vmatmul.bf16.gmra.mxu0 %v11226_v25 }
 0x24c   : > { %15337 = vst [vmem:[#allocation130_spill] sm:$0xff] %v11787_v53  ;;  %9025 = vmatmul.msk.bf16.gmra.mxu2 %vm895_vm0, %v11202_v63 }
 0x24e   : > { %v1629_v48 = vpop.f32.mrf.mxu3 }
 0x24f   : > { %v11794_v19 = vadd.f32 %v1629_v48, %v1501_v17  ;;  %v1503_v38 = vpop.f32.mrf.mxu1  ;;  %v1880_v43 = vpop.f32.mrf.mxu2  ;;  %v10317_v48 = vld [vmem:[#allocation4 + $0xb4] sm:$0xf0] }
 0x250   : > { %v1881_v34 = vadd.f32 %v1880_v43, %v1752_v24  ;;  %v1753_v61 = vpop.f32.mrf.mxu0  ;;  %v1504_v52 = vadd.f32 %v1503_v38, %v11746_v21  ;;  %v8819_v24 = vld [vmem:[#allocation4 + $0xa0] sm:$0xf] }
 0x251   : > { %15338 = vst [vmem:[#allocation131_spill] sm:$0xff] %v11794_v19  ;;  %v1754_v2 = vadd.f32 %v1753_v61, %v11785_v28  ;;  %v8820_v38 = vor.u32 %v10317_v48, %v8819_v24 }
 0x252   : > { %1542 = vmatmul.bf16.gmra.mxu1 %v11277_v41  ;;  %v2519_v15 = vmax.f32 %v1881_v34, 0.0 }
 0x253   : > { %9003 = vmatmul.msk.bf16.gmra.mxu3 %vm895_vm0, %v11237_v36  ;;  %2004 = vmatpush.bf16.msra.mxu1 %v8820_v38 }
 0x254   : > { %v11801_v47 = vmax.f32 %v2516_v40, %v2519_v15 }
 0x256   : > { %v1632_v17 = vpop.f32.mrf.mxu3 }
 0x257   : > { %v11804_v37 = vadd.f32 %v1632_v17, %v1504_v52  ;;  %v1505_v56 = vpop.f32.mrf.mxu1  ;;  %v1882_v4 = vpop.f32.mrf.mxu2  ;;  %v10320_v17 = vld [vmem:[#allocation4 + $0xd4] sm:$0xf] }
 0x258   : > { %v1883_v43 = vadd.f32 %v1882_v4, %v1754_v2  ;;  %v1756_v53 = vpop.f32.mrf.mxu0  ;;  %v1506_v32 = vadd.f32 %v1505_v56, %v11746_v21  ;;  %v8848_v24 = vor.u32 %v10320_v17, %v8845_v45 }
 0x259   : > { %15339 = vst [vmem:[#allocation132_spill] sm:$0xff] %v11804_v37  ;;  %v1757_v61 = vadd.f32 %v1756_v53, %v11785_v28 }
 0x25a   : > { %v2525_v55 = vmax.f32 %v1883_v43, 0.0  ;;  %2261 = vmatpush.bf16.msra.mxu0 %v8848_v24 }
 0x25b   : > { %1795 = vmatmul.bf16.gmra.mxu0 %v11251_v58 }
 0x25c   : > { %v11809_v34 = vmax.f32 %v2522_v31, %v2525_v55  ;;  %9026 = vmatmul.msk.bf16.gmra.mxu2 %vm895_vm0, %v11216_v14  ;;  %v2528_v31 = vmax.f32 %v11259_v3, 0.0 }
 0x25e   : > { %v1634_v52 = vpop.f32.mrf.mxu3 }
 0x25f   : > { %v11814_v40 = vadd.f32 %v1634_v52, %v1506_v32  ;;  %v1508_v15 = vpop.f32.mrf.mxu1  ;;  %v1885_v2 = vpop.f32.mrf.mxu2 }
 0x260   : > { %v1886_v4 = vadd.f32 %v1885_v2, %v1757_v61  ;;  %v1758_v56 = vpop.f32.mrf.mxu0  ;;  %v1509_v55 = vadd.f32 %v1508_v15, %v11746_v21  ;;  %v2534_v15 = vmax.f32 %v11273_v27, 0.0 }
 0x261   : > { %15340 = vst [vmem:[#allocation133_spill] sm:$0xff] %v11814_v40  ;;  %v1759_v43 = vadd.f32 %v1758_v56, %v11785_v28 }
 0x262   : > { %1547 = vmatmul.bf16.gmra.mxu1 %v11303_v12  ;;  %v2531_v53 = vmax.f32 %v1886_v4, 0.0 }
 0x263   : > { %9004 = vmatmul.msk.bf16.gmra.mxu3 %vm895_vm0, %v11263_v5 }
 0x264   : > { %v11821_v48 = vmax.f32 %v2528_v31, %v2531_v53 }
 0x266   : > { %v1637_v38 = vpop.f32.mrf.mxu3 }
 0x267   : > { %v11824_v32 = vadd.f32 %v1637_v38, %v1509_v55  ;;  %v1510_v61 = vpop.f32.mrf.mxu1  ;;  %v1887_v52 = vpop.f32.mrf.mxu2  ;;  %v2540_v38 = vmax.f32 %v11285_v18, 0.0 }
 0x268   : > { %v1888_v2 = vadd.f32 %v1887_v52, %v1759_v43  ;;  %v1761_v17 = vpop.f32.mrf.mxu0  ;;  %v1511_v40 = vadd.f32 %v1510_v61, %v11746_v21 }
 0x269   : > { %15341 = vst [vmem:[#allocation134_spill] sm:$0xff] %v11824_v32  ;;  %v1762_v4 = vadd.f32 %v1761_v17, %v11785_v28  ;;  %v2558_v32 = vmax.f32 %v11325_v33, 0.0  ;;  %v8821_v33 = vld [vmem:[#allocation4 + $0xb8] sm:$0xf0] }
 0x26a   : > { %v2537_v45 = vmax.f32 %v1888_v2, 0.0 }
 0x26b   : > { %1800 = vmatmul.bf16.gmra.mxu0 %v11277_v41 }
 0x26c   : > { %v11829_v3 = vmax.f32 %v2534_v15, %v2537_v45  ;;  %9027 = vmatmul.msk.bf16.gmra.mxu2 %vm895_vm0, %v11237_v36 }
 0x26e   : > { %v1639_v24 = vpop.f32.mrf.mxu3 }
 0x26f   : > { %v11834_v56 = vadd.f32 %v1639_v24, %v1511_v40  ;;  %v1513_v55 = vpop.f32.mrf.mxu1  ;;  %v1890_v31 = vpop.f32.mrf.mxu2 }
 0x270   : > { %v1891_v53 = vadd.f32 %v1890_v31, %v1762_v4  ;;  %v1763_v27 = vpop.f32.mrf.mxu0  ;;  %v1514_v43 = vadd.f32 %v1513_v55, %v11746_v21  ;;  %v2546_v31 = vmax.f32 %v11299_v1, 0.0 }
 0x271   : > { %15342 = vst [vmem:[#allocation135_spill] sm:$0xff] %v11834_v56  ;;  %v1764_v2 = vadd.f32 %v1763_v27, %v11785_v28 }
 0x272   : > { %1552 = vmatmul.bf16.gmra.mxu1 %v11329_v42  ;;  %v2543_v61 = vmax.f32 %v1891_v53, 0.0 }
 0x273   : > { %9005 = vmatmul.msk.bf16.gmra.mxu3 %vm895_vm0, %v11289_v57 }
 0x274   : > { %v11841_v52 = vmax.f32 %v2540_v38, %v2543_v61 }
 0x276   : > { %v1642_v40 = vpop.f32.mrf.mxu3 }
 0x277   : > { %v11844_v17 = vadd.f32 %v1642_v40, %v1514_v43  ;;  %v1515_v15 = vpop.f32.mrf.mxu1  ;;  %v1892_v45 = vpop.f32.mrf.mxu2 }
 0x278   : > { %v1893_v4 = vadd.f32 %v1892_v45, %v1764_v2  ;;  %v1766_v24 = vpop.f32.mrf.mxu0  ;;  %v1516_v56 = vadd.f32 %v1515_v15, %v11746_v21  ;;  %v2552_v15 = vmax.f32 %v11311_v46, 0.0 }
 0x279   : > { %15343 = vst [vmem:[#allocation136_spill] sm:$0xff] %v11844_v17  ;;  %v1767_v53 = vadd.f32 %v1766_v24, %v11785_v28 }
 0x27a   : > { %v2549_v55 = vmax.f32 %v1893_v4, 0.0 }
 0x27b   : > { %1805 = vmatmul.bf16.gmra.mxu0 %v11303_v12  ;;  %v15362_v12 = vld [vmem:[#allocation48_spill] sm:$0xff] }
 0x27c   : > { %v11849_v18 = vmax.f32 %v2546_v31, %v2549_v55  ;;  %9028 = vmatmul.msk.bf16.gmra.mxu2 %vm895_vm0, %v11263_v5  ;;  %v2594_v13 = vmax.f32 %v15362_v12, 0.0 }
 0x27e   : > { %v1644_v38 = vpop.f32.mrf.mxu3 }
 0x27f   : > { %v11854_v27 = vadd.f32 %v1644_v38, %v1516_v56  ;;  %v1518_v43 = vpop.f32.mrf.mxu1  ;;  %v1895_v61 = vpop.f32.mrf.mxu2  ;;  %v8795_v38 = vld [vmem:[#allocation4 + $0x70] sm:$0xf] }
 0x280   : > { %v1896_v2 = vadd.f32 %v1895_v61, %v1767_v53  ;;  %v1768_v1 = vpop.f32.mrf.mxu0  ;;  %v1519_v40 = vadd.f32 %v1518_v43, %v11746_v21  ;;  %v10311_v61 = vld [vmem:[#allocation4 + $0x84] sm:$0xf0] }
 0x281   : > { %15344 = vst [vmem:[#allocation137_spill] sm:$0xff] %v11854_v27  ;;  %v1769_v24 = vadd.f32 %v1768_v1, %v11785_v28  ;;  %v8796_v43 = vor.u32 %v10311_v61, %v8795_v38 }
 0x282   : > { %1557 = vmatmul.bf16.gmra.mxu1 %v11355_v39  ;;  %v2555_v45 = vmax.f32 %v1896_v2, 0.0 }
 0x283   : > { %9006 = vmatmul.msk.bf16.gmra.mxu3 %vm895_vm0, %v11315_v49  ;;  %2005 = vmatpush.bf16.msra.mxu1 %v8796_v43 }
 0x284   : > { %v11861_v4 = vmax.f32 %v2552_v15, %v2555_v45 }
 0x286   : > { %v1647_v56 = vpop.f32.mrf.mxu3 }
 0x287   : > { %v11864_v31 = vadd.f32 %v1647_v56, %v1519_v40  ;;  %v1520_v55 = vpop.f32.mrf.mxu1  ;;  %v1897_v53 = vpop.f32.mrf.mxu2  ;;  %v10314_v56 = vld [vmem:[#allocation4 + $0xa4] sm:$0xf] }
 0x288   : > { %v1898_v27 = vadd.f32 %v1897_v53, %v1769_v24  ;;  %v1771_v17 = vpop.f32.mrf.mxu0  ;;  %v1521_v46 = vadd.f32 %v1520_v55, %v11746_v21  ;;  %v8824_v53 = vor.u32 %v10314_v56, %v8821_v33  ;;  %v15350_v33 = vld [vmem:[#allocation36_spill] sm:$0xff] }
 0x289   : > { %15345 = vst [vmem:[#allocation138_spill] sm:$0xff] %v11864_v31  ;;  %v1772_v1 = vadd.f32 %v1771_v17, %v11785_v28  ;;  %v15348_v17 = vld [vmem:[#allocation33_spill] sm:$0xff] }
 0x28a   : > { %v2561_v37 = vmax.f32 %v1898_v27, 0.0  ;;  %v2564_v38 = vmax.f32 %v15348_v17, 0.0  ;;  %2262 = vmatpush.bf16.msra.mxu0 %v8824_v53 }
 0x28b   : > { %1810 = vmatmul.bf16.gmra.mxu0 %v11329_v42 }
 0x28c   : > { %v11869_v2 = vmax.f32 %v2558_v32, %v2561_v37  ;;  %9029 = vmatmul.msk.bf16.gmra.mxu2 %vm895_vm0, %v11289_v57  ;;  %v15347_v32 = vld [vmem:[#allocation34_spill] sm:$0xff] }
 0x28e   : > { %v1649_v40 = vpop.f32.mrf.mxu3 }
 0x28f   : > { %v11874_v15 = vadd.f32 %v1649_v40, %v1521_v46  ;;  %v1523_v45 = vpop.f32.mrf.mxu1  ;;  %v1900_v24 = vpop.f32.mrf.mxu2 }
 0x290   : > { %v1901_v27 = vadd.f32 %v1900_v24, %v1772_v1  ;;  %v1773_v55 = vpop.f32.mrf.mxu0  ;;  %v1524_v37 = vadd.f32 %v1523_v45, %v11746_v21  ;;  %v2570_v45 = vmax.f32 %v15350_v33, 0.0 }
 0x291   : > { %15346 = vst [vmem:[#allocation139_spill] sm:$0xff] %v11874_v15  ;;  %v1774_v46 = vadd.f32 %v1773_v55, %v11785_v28 }
 0x292   : > { %1562 = vmatmul.bf16.gmra.mxu1 %v11381_v59  ;;  %v2567_v61 = vmax.f32 %v1901_v27, 0.0 }
 0x293   : > { %9007 = vmatmul.msk.bf16.gmra.mxu3 %vm895_vm0, %v15347_v32 }
 0x294   : > { %v11881_v43 = vmax.f32 %v2564_v38, %v2567_v61 }
 0x296   : > { %v1652_v40 = vpop.f32.mrf.mxu3 }
 0x297   : > { %v11884_v15 = vadd.f32 %v1652_v40, %v1524_v37  ;;  %v1525_v1 = vpop.f32.mrf.mxu1  ;;  %v1902_v24 = vpop.f32.mrf.mxu2 }
 0x298   : > { %v1903_v31 = vadd.f32 %v1902_v24, %v1774_v46  ;;  %v1776_v56 = vpop.f32.mrf.mxu0  ;;  %v1526_v42 = vadd.f32 %v1525_v1, %v11746_v21  ;;  %v15352_v46 = vld [vmem:[#allocation49_spill] sm:$0xff]  ;;  %v15353_v1 = vld [vmem:[#allocation40_spill] sm:$0xff] }
 0x299   : > { %15349 = vst [vmem:[#allocation33_spill] sm:$0xff] %v11884_v15  ;;  %v1777_v53 = vadd.f32 %v1776_v56, %v11785_v28 }
 0x29a   : > { %v2573_v57 = vmax.f32 %v1903_v31, 0.0 }
 0x29b   : > { %1815 = vmatmul.bf16.gmra.mxu0 %v11355_v39 }
 0x29c   : > { %v11889_v27 = vmax.f32 %v2570_v45, %v2573_v57  ;;  %9030 = vmatmul.msk.bf16.gmra.mxu2 %vm895_vm0, %v11315_v49  ;;  %v15354_v57 = vld [vmem:[#allocation39_spill] sm:$0xff]  ;;  %v15356_v49 = vld [vmem:[#allocation42_spill] sm:$0xff] }
 0x29d   : > { %v2576_v24 = vmax.f32 %v15354_v57, 0.0  ;;  %v2582_v39 = vmax.f32 %v15356_v49, 0.0 }
 0x29e   : > { %v1654_v17 = vpop.f32.mrf.mxu3 }
 0x29f   : > { %v11894_v55 = vadd.f32 %v1654_v17, %v1526_v42  ;;  %v1528_v37 = vpop.f32.mrf.mxu1  ;;  %v1905_v38 = vpop.f32.mrf.mxu2 }
 0x2a0   : > { %v1906_v61 = vadd.f32 %v1905_v38, %v1777_v53  ;;  %v1778_v31 = vpop.f32.mrf.mxu0  ;;  %v1529_v40 = vadd.f32 %v1528_v37, %v11746_v21 }
 0x2a1   : > { %15351 = vst [vmem:[#allocation36_spill] sm:$0xff] %v11894_v55  ;;  %v1779_v45 = vadd.f32 %v1778_v31, %v11785_v28 }
 0x2a2   : > { %1567 = vmatmul.bf16.gmra.mxu1 %v15352_v46  ;;  %v2579_v56 = vmax.f32 %v1906_v61, 0.0 }
 0x2a3   : > { %9008 = vmatmul.msk.bf16.gmra.mxu3 %vm895_vm0, %v15353_v1 }
 0x2a4   : > { %v11901_v33 = vmax.f32 %v2576_v24, %v2579_v56 }
 0x2a6   : > { %v1657_v42 = vpop.f32.mrf.mxu3 }
 0x2a7   : > { %v11904_v17 = vadd.f32 %v1657_v42, %v1529_v40  ;;  %v1530_v55 = vpop.f32.mrf.mxu1  ;;  %v1907_v53 = vpop.f32.mrf.mxu2  ;;  %v15358_v42 = vld [vmem:[#allocation55_spill] sm:$0xff] }
 0x2a8   : > { %v1908_v38 = vadd.f32 %v1907_v53, %v1779_v45  ;;  %v1781_v15 = vpop.f32.mrf.mxu0  ;;  %v1531_v19 = vadd.f32 %v1530_v55, %v11746_v21  ;;  %v15359_v53 = vld [vmem:[#allocation46_spill] sm:$0xff] }
 0x2a9   : > { %15355 = vst [vmem:[#allocation49_spill] sm:$0xff] %v11904_v17  ;;  %v1782_v61 = vadd.f32 %v1781_v15, %v11785_v28 }
 0x2aa   : > { %v2585_v37 = vmax.f32 %v1908_v38, 0.0 }
 0x2ab   : > { %1820 = vmatmul.bf16.gmra.mxu0 %v11381_v59 }
 0x2ac   : > { %v11909_v57 = vmax.f32 %v2582_v39, %v2585_v37  ;;  %9031 = vmatmul.msk.bf16.gmra.mxu2 %vm895_vm0, %v15347_v32  ;;  %v15360_v39 = vld [vmem:[#allocation45_spill] sm:$0xff] }
 0x2ad   : > { %v2588_v38 = vmax.f32 %v15360_v39, 0.0 }
 0x2ae   : > { %v1659_v24 = vpop.f32.mrf.mxu3 }
 0x2af   : > { %v11914_v31 = vadd.f32 %v1659_v24, %v1531_v19  ;;  %v1533_v40 = vpop.f32.mrf.mxu1  ;;  %v1910_v56 = vpop.f32.mrf.mxu2 }
 0x2b0   : > { %v1911_v45 = vadd.f32 %v1910_v56, %v1782_v61  ;;  %v1783_v49 = vpop.f32.mrf.mxu0  ;;  %v1534_v55 = vadd.f32 %v1533_v40, %v11746_v21  ;;  %v8771_v40 = vld [vmem:[#allocation4 + $0x40] sm:$0xf] }
 0x2b1   : > { %15357 = vst [vmem:[#allocation40_spill] sm:$0xff] %v11914_v31  ;;  %v1784_v17 = vadd.f32 %v1783_v49, %v11785_v28  ;;  %v8772_v5 = vor.u32 %v10305_v7, %v8771_v40 }
 0x2b2   : > { %1572 = vmatmul.bf16.gmra.mxu1 %v15358_v42  ;;  %v2591_v15 = vmax.f32 %v1911_v45, 0.0 }
 0x2b3   : > { %9009 = vmatmul.msk.bf16.gmra.mxu3 %vm895_vm0, %v15359_v53  ;;  %2006 = vmatpush.bf16.msra.mxu1 %v8772_v5  ;;  %v8797_v5 = vld [vmem:[#allocation4 + $0x88] sm:$0xf0] }
 0x2b4   : > { %v2840_v37 = vmax.f32 %v2588_v38, %v2591_v15 }
 0x2b6   : > { %v1662_v32 = vpop.f32.mrf.mxu3  ;;  %v2948_v61 = vmax.f32 %v11801_v47, %v2840_v37  ;;  %v10308_v37 = vld [vmem:[#allocation4 + $0x74] sm:$0xf] }
 0x2b7   : > { %v11922_v19 = vadd.f32 %v1662_v32, %v1534_v55  ;;  %v1535_v24 = vpop.f32.mrf.mxu1  ;;  %v1912_v56 = vpop.f32.mrf.mxu2 }
 0x2b8   : > { %3020 = vst [vmem:[#allocation2 + $0xb0] sm:$0xff] %v2948_v61  ;;  %v1913_v31 = vadd.f32 %v1912_v56, %v1784_v17  ;;  %v1786_v59 = vpop.f32.mrf.mxu0  ;;  %v1536_v45 = vadd.f32 %v1535_v24, %v11746_v21  ;;  %v8800_v24 = vor.u32 %v10308_v37, %v8797_v5  ;;  %v15366_v61 = vld [vmem:[#allocation51_spill] sm:$0xff] }
 0x2b9   : > { %15361 = vst [vmem:[#allocation39_spill] sm:$0xff] %v11922_v19  ;;  %v1787_v49 = vadd.f32 %v1786_v59, %v11785_v28  ;;  %v15365_v59 = vld [vmem:[#allocation52_spill] sm:$0xff]  ;;  %v2600_v56 = vmax.f32 %v15366_v61, 0.0 }
 0x2ba   : > { %v2597_v39 = vmax.f32 %v1913_v31, 0.0  ;;  %v15364_v31 = vld [vmem:[#allocation61_spill] sm:$0xff]  ;;  %2263 = vmatpush.bf16.msra.mxu0 %v8800_v24 }
 0x2bb   : > { %1825 = vmatmul.bf16.gmra.mxu0 %v15352_v46 }
 0x2bc   : > { %v2843_v32 = vmax.f32 %v2594_v13, %v2597_v39  ;;  %9032 = vmatmul.msk.bf16.gmra.mxu2 %vm895_vm0, %v15353_v1 }
 0x2be   : > { %v1664_v55 = vpop.f32.mrf.mxu3  ;;  %v2951_v7 = vmax.f32 %v11809_v34, %v2843_v32 }
 0x2bf   : > { %v11931_v47 = vadd.f32 %v1664_v55, %v1536_v45  ;;  %v1538_v17 = vpop.f32.mrf.mxu1  ;;  %v1915_v38 = vpop.f32.mrf.mxu2 }
 0x2c0   : > { %3023 = vst [vmem:[#allocation2 + $0x48] sm:$0xff] %v2951_v7  ;;  %v1916_v12 = vadd.f32 %v1915_v38, %v1787_v49  ;;  %v1788_v15 = vpop.f32.mrf.mxu0  ;;  %v1539_v13 = vadd.f32 %v1538_v17, %v11746_v21 }
 0x2c1   : > { %15363 = vst [vmem:[#allocation42_spill] sm:$0xff] %v11931_v47  ;;  %v1789_v34 = vadd.f32 %v1788_v15, %v11785_v28  ;;  %v15368_v47 = vld [vmem:[#allocation54_spill] sm:$0xff] }
 0x2c2   : > { %1577 = vmatmul.bf16.gmra.mxu1 %v15364_v31  ;;  %v2603_v40 = vmax.f32 %v1916_v12, 0.0  ;;  %v2606_v19 = vmax.f32 %v15368_v47, 0.0 }
 0x2c3   : > { %9010 = vmatmul.msk.bf16.gmra.mxu3 %vm895_vm0, %v15365_v59 }
 0x2c4   : > { %v2846_v39 = vmax.f32 %v2600_v56, %v2603_v40  ;;  %v15370_v40 = vld [vmem:[#allocation67_spill] sm:$0xff] }
 0x2c6   : > { %v1667_v45 = vpop.f32.mrf.mxu3  ;;  %v2954_v55 = vmax.f32 %v11821_v48, %v2846_v39 }
 0x2c7   : > { %v11940_v32 = vadd.f32 %v1667_v45, %v1539_v13  ;;  %v1540_v49 = vpop.f32.mrf.mxu1  ;;  %v1917_v7 = vpop.f32.mrf.mxu2  ;;  %v15372_v45 = vld [vmem:[#allocation57_spill] sm:$0xff] }
 0x2c8   : > { %3026 = vst [vmem:[#allocation2 + $0xf8] sm:$0xff] %v2954_v55  ;;  %v1918_v17 = vadd.f32 %v1917_v7, %v1789_v34  ;;  %v1791_v38 = vpop.f32.mrf.mxu0  ;;  %v1541_v5 = vadd.f32 %v1540_v49, %v11746_v21  ;;  %v2612_v49 = vmax.f32 %v15372_v45, 0.0 }
 0x2c9   : > { %15367 = vst [vmem:[#allocation55_spill] sm:$0xff] %v11940_v32  ;;  %v1792_v15 = vadd.f32 %v1791_v38, %v11785_v28 }
 0x2ca   : > { %v2609_v37 = vmax.f32 %v1918_v17, 0.0 }
 0x2cb   : > { %1830 = vmatmul.bf16.gmra.mxu0 %v15358_v42 }
 0x2cc   : > { %v2849_v12 = vmax.f32 %v2606_v19, %v2609_v37  ;;  %9033 = vmatmul.msk.bf16.gmra.mxu2 %vm895_vm0, %v15359_v53  ;;  %v15371_v19 = vld [vmem:[#allocation58_spill] sm:$0xff] }
 0x2ce   : > { %v1669_v24 = vpop.f32.mrf.mxu3  ;;  %v2957_v61 = vmax.f32 %v11829_v3, %v2849_v12 }
 0x2cf   : > { %v11949_v13 = vadd.f32 %v1669_v24, %v1541_v5  ;;  %v1543_v48 = vpop.f32.mrf.mxu1  ;;  %v1920_v56 = vpop.f32.mrf.mxu2 }
 0x2d0   : > { %3029 = vst [vmem:[#allocation2 + $0x108] sm:$0xff] %v2957_v61  ;;  %v1921_v47 = vadd.f32 %v1920_v56, %v1792_v15  ;;  %v1793_v39 = vpop.f32.mrf.mxu0  ;;  %v1544_v34 = vadd.f32 %v1543_v48, %v11746_v21  ;;  %v15374_v48 = vld [vmem:[#allocation60_spill] sm:$0xff] }
 0x2d1   : > { %15369 = vst [vmem:[#allocation46_spill] sm:$0xff] %v11949_v13  ;;  %v1794_v17 = vadd.f32 %v1793_v39, %v11785_v28  ;;  %v2618_v61 = vmax.f32 %v15374_v48, 0.0 }
 0x2d2   : > { %1582 = vmatmul.bf16.gmra.mxu1 %v15370_v40  ;;  %v2615_v55 = vmax.f32 %v1921_v47, 0.0 }
 0x2d3   : > { %9011 = vmatmul.msk.bf16.gmra.mxu3 %vm895_vm0, %v15371_v19 }
 0x2d4   : > { %v2852_v7 = vmax.f32 %v2612_v49, %v2615_v55 }
 0x2d6   : > { %v1672_v38 = vpop.f32.mrf.mxu3  ;;  %v2960_v5 = vmax.f32 %v11841_v52, %v2852_v7 }
 0x2d7   : > { %v11958_v37 = vadd.f32 %v1672_v38, %v1544_v34  ;;  %v1545_v3 = vpop.f32.mrf.mxu1  ;;  %v1922_v12 = vpop.f32.mrf.mxu2 }
 0x2d8   : > { %3032 = vst [vmem:[#allocation2 + $0xc0] sm:$0xff] %v2960_v5  ;;  %v1923_v15 = vadd.f32 %v1922_v12, %v1794_v17  ;;  %v1796_v24 = vpop.f32.mrf.mxu0  ;;  %v1546_v13 = vadd.f32 %v1545_v3, %v11746_v21  ;;  %v15376_v17 = vld [vmem:[#allocation73_spill] sm:$0xff]  ;;  %v15377_v5 = vld [vmem:[#allocation64_spill] sm:$0xff]  ;;  %v15378_v12 = vld [vmem:[#allocation63_spill] sm:$0xff] }
 0x2d9   : > { %15373 = vst [vmem:[#allocation45_spill] sm:$0xff] %v11958_v37  ;;  %v1797_v39 = vadd.f32 %v1796_v24, %v11785_v28  ;;  %v15380_v37 = vld [vmem:[#allocation66_spill] sm:$0xff] }
 0x2da   : > { %v2621_v56 = vmax.f32 %v1923_v15, 0.0  ;;  %v2624_v15 = vmax.f32 %v15378_v12, 0.0  ;;  %v2630_v32 = vmax.f32 %v15380_v37, 0.0 }
 0x2db   : > { %1835 = vmatmul.bf16.gmra.mxu0 %v15364_v31 }
 0x2dc   : > { %v2855_v47 = vmax.f32 %v2618_v61, %v2621_v56  ;;  %9034 = vmatmul.msk.bf16.gmra.mxu2 %vm895_vm0, %v15365_v59 }
 0x2de   : > { %v1674_v45 = vpop.f32.mrf.mxu3  ;;  %v2963_v49 = vmax.f32 %v11849_v18, %v2855_v47 }
 0x2df   : > { %v11967_v34 = vadd.f32 %v1674_v45, %v1546_v13  ;;  %v1548_v52 = vpop.f32.mrf.mxu1  ;;  %v1925_v55 = vpop.f32.mrf.mxu2 }
 0x2e0   : > { %3035 = vst [vmem:[#allocation2 + $0x20] sm:$0xff] %v2963_v49  ;;  %v1926_v7 = vadd.f32 %v1925_v55, %v1797_v39  ;;  %v1798_v38 = vpop.f32.mrf.mxu0  ;;  %v1549_v3 = vadd.f32 %v1548_v52, %v11746_v21  ;;  %v8747_v52 = vld [vmem:[#allocation4 + $0x10] sm:$0xf]  ;;  %v10299_v55 = vld [vmem:[#allocation4 + $0x24] sm:$0xf0] }
 0x2e1   : > { %15375 = vst [vmem:[#allocation48_spill] sm:$0xff] %v11967_v34  ;;  %v1799_v13 = vadd.f32 %v1798_v38, %v11785_v28  ;;  %v8748_v34 = vor.u32 %v10299_v55, %v8747_v52 }
 0x2e2   : > { %1587 = vmatmul.bf16.gmra.mxu1 %v15376_v17  ;;  %v2627_v24 = vmax.f32 %v1926_v7, 0.0 }
 0x2e3   : > { %9012 = vmatmul.msk.bf16.gmra.mxu3 %vm895_vm0, %v15377_v5  ;;  %2007 = vmatpush.bf16.msra.mxu1 %v8748_v34  ;;  %v8773_v34 = vld [vmem:[#allocation4 + $0x58] sm:$0xf0] }
 0x2e4   : > { %v2858_v48 = vmax.f32 %v2624_v15, %v2627_v24 }
 0x2e6   : > { %v1677_v61 = vpop.f32.mrf.mxu3  ;;  %v2966_v47 = vmax.f32 %v11861_v4, %v2858_v48 }
 0x2e7   : > { %v11976_v56 = vadd.f32 %v1677_v61, %v1549_v3  ;;  %v1550_v18 = vpop.f32.mrf.mxu1  ;;  %v1927_v39 = vpop.f32.mrf.mxu2  ;;  %v15382_v61 = vld [vmem:[#allocation79_spill] sm:$0xff] }
 0x2e8   : > { %3038 = vst [vmem:[#allocation2 + $0x90] sm:$0xff] %v2966_v47  ;;  %v1928_v45 = vadd.f32 %v1927_v39, %v1799_v13  ;;  %v1801_v49 = vpop.f32.mrf.mxu0  ;;  %v1551_v7 = vadd.f32 %v1550_v18, %v11746_v21  ;;  %v10302_v47 = vld [vmem:[#allocation4 + $0x44] sm:$0xf] }
 0x2e9   : > { %15379 = vst [vmem:[#allocation61_spill] sm:$0xff] %v11976_v56  ;;  %v1802_v3 = vadd.f32 %v1801_v49, %v11785_v28  ;;  %v15383_v39 = vld [vmem:[#allocation70_spill] sm:$0xff]  ;;  %v15384_v49 = vld [vmem:[#allocation69_spill] sm:$0xff] }
 0x2ea   : > { %v2633_v12 = vmax.f32 %v1928_v45, 0.0  ;;  %v8776_v45 = vor.u32 %v10302_v47, %v8773_v34  ;;  %v2636_v52 = vmax.f32 %v15384_v49, 0.0 }
 0x2eb   : > { %1840 = vmatmul.bf16.gmra.mxu0 %v15370_v40 }
 0x2ec   : > { %v2861_v38 = vmax.f32 %v2630_v32, %v2633_v12  ;;  %9035 = vmatmul.msk.bf16.gmra.mxu2 %vm895_vm0, %v15371_v19  ;;  %2264 = vmatpush.bf16.msra.mxu0 %v8776_v45 }
 0x2ee   : > { %v1679_v15 = vpop.f32.mrf.mxu3  ;;  %v2969_v48 = vmax.f32 %v11869_v2, %v2861_v38 }
 0x2ef   : > { %v11985_v4 = vadd.f32 %v1679_v15, %v1551_v7  ;;  %v1553_v24 = vpop.f32.mrf.mxu1  ;;  %v1930_v13 = vpop.f32.mrf.mxu2 }
 0x2f0   : > { %3041 = vst [vmem:[#allocation2 + $0xd8] sm:$0xff] %v2969_v48  ;;  %v1931_v37 = vadd.f32 %v1930_v13, %v1802_v3  ;;  %v1803_v18 = vpop.f32.mrf.mxu0  ;;  %v1554_v32 = vadd.f32 %v1553_v24, %v11746_v21 }
 0x2f1   : > { %15381 = vst [vmem:[#allocation52_spill] sm:$0xff] %v11985_v4  ;;  %v1804_v2 = vadd.f32 %v1803_v18, %v11785_v28  ;;  %v15386_v4 = vld [vmem:[#allocation72_spill] sm:$0xff] }
 0x2f2   : > { %1592 = vmatmul.bf16.gmra.mxu1 %v15382_v61  ;;  %v2639_v55 = vmax.f32 %v1931_v37, 0.0  ;;  %v2642_v56 = vmax.f32 %v15386_v4, 0.0 }
 0x2f3   : > { %9013 = vmatmul.msk.bf16.gmra.mxu3 %vm895_vm0, %v15383_v39 }
 0x2f4   : > { %v2864_v12 = vmax.f32 %v2636_v52, %v2639_v55 }
 0x2f6   : > { %v1682_v7 = vpop.f32.mrf.mxu3  ;;  %v2972_v15 = vmax.f32 %v11881_v43, %v2864_v12 }
 0x2f7   : > { %v11994_v38 = vadd.f32 %v1682_v7, %v1554_v32  ;;  %v1555_v3 = vpop.f32.mrf.mxu1  ;;  %v1932_v48 = vpop.f32.mrf.mxu2 }
 0x2f8   : > { %3044 = vst [vmem:[#allocation2 + $0x110] sm:$0xff] %v2972_v15  ;;  %v1933_v24 = vadd.f32 %v1932_v48, %v1804_v2  ;;  %v1806_v13 = vpop.f32.mrf.mxu0  ;;  %v1556_v34 = vadd.f32 %v1555_v3, %v11746_v21  ;;  %v15389_v2 = vld [vmem:[#allocation75_spill] sm:$0xff] }
 0x2f9   : > { %15385 = vst [vmem:[#allocation51_spill] sm:$0xff] %v11994_v38  ;;  %v1807_v18 = vadd.f32 %v1806_v13, %v11785_v28  ;;  %v2648_v7 = vmax.f32 %v15389_v2, 0.0 }
 0x2fa   : > { %v2645_v47 = vmax.f32 %v1933_v24, 0.0 }
 0x2fb   : > { %1845 = vmatmul.bf16.gmra.mxu0 %v15376_v17 }
 0x2fc   : > { %v2867_v37 = vmax.f32 %v2642_v56, %v2645_v47  ;;  %9036 = vmatmul.msk.bf16.gmra.mxu2 %vm895_vm0, %v15377_v5  ;;  %v15388_v56 = vld [vmem:[#allocation76_spill] sm:$0xff] }
 0x2fe   : > { %v1684_v45 = vpop.f32.mrf.mxu3  ;;  %v2975_v49 = vmax.f32 %v11889_v27, %v2867_v37 }
 0x2ff   : > { %v12003_v32 = vadd.f32 %v1684_v45, %v1556_v34  ;;  %v1558_v43 = vpop.f32.mrf.mxu1  ;;  %v1935_v52 = vpop.f32.mrf.mxu2  ;;  %v15391_v45 = vld [vmem:[#allocation78_spill] sm:$0xff] }
 0x300   : > { %3047 = vst [vmem:[#allocation2 + $0x60] sm:$0xff] %v2975_v49  ;;  %v1936_v4 = vadd.f32 %v1935_v52, %v1807_v18  ;;  %v1808_v55 = vpop.f32.mrf.mxu0  ;;  %v1559_v12 = vadd.f32 %v1558_v43, %v11746_v21  ;;  %v2654_v43 = vmax.f32 %v15391_v45, 0.0 }
 0x301   : > { %15387 = vst [vmem:[#allocation54_spill] sm:$0xff] %v12003_v32  ;;  %v1809_v48 = vadd.f32 %v1808_v55, %v11785_v28 }
 0x302   : > { %1597 = vmatmul.bf16.gmra.mxu1 %v11563_v9  ;;  %v2651_v3 = vmax.f32 %v1936_v4, 0.0 }
 0x303   : > { %9014 = vmatmul.msk.bf16.gmra.mxu3 %vm895_vm0, %v15388_v56 }
 0x304   : > { %v2870_v15 = vmax.f32 %v2648_v7, %v2651_v3 }
 0x306   : > { %v1687_v24 = vpop.f32.mrf.mxu3  ;;  %v2978_v47 = vmax.f32 %v11901_v33, %v2870_v15 }
 0x307   : > { %v12012_v13 = vadd.f32 %v1687_v24, %v1559_v12  ;;  %v1560_v27 = vpop.f32.mrf.mxu1  ;;  %v1937_v34 = vpop.f32.mrf.mxu2 }
 0x308   : > { %3050 = vst [vmem:[#allocation2 + $0xe0] sm:$0xff] %v2978_v47  ;;  %v1938_v37 = vadd.f32 %v1937_v34, %v1809_v48  ;;  %v1811_v18 = vpop.f32.mrf.mxu0  ;;  %v1561_v52 = vadd.f32 %v1560_v27, %v11746_v21  ;;  %v15393_v48 = vld [vmem:[#allocation91_spill] sm:$0xff]  ;;  %v15394_v47 = vld [vmem:[#allocation82_spill] sm:$0xff]  ;;  %v15395_v34 = vld [vmem:[#allocation81_spill] sm:$0xff] }
 0x309   : > { %15390 = vst [vmem:[#allocation67_spill] sm:$0xff] %v12012_v13  ;;  %v1812_v55 = vadd.f32 %v1811_v18, %v11785_v28 }
 0x30a   : > { %v2657_v49 = vmax.f32 %v1938_v37, 0.0  ;;  %v2660_v37 = vmax.f32 %v15395_v34, 0.0 }
 0x30b   : > { %1850 = vmatmul.bf16.gmra.mxu0 %v15382_v61 }
 0x30c   : > { %v2873_v4 = vmax.f32 %v2654_v43, %v2657_v49  ;;  %9037 = vmatmul.msk.bf16.gmra.mxu2 %vm895_vm0, %v15383_v39 }
 0x30e   : > { %v1689_v2 = vpop.f32.mrf.mxu3  ;;  %v2981_v7 = vmax.f32 %v11909_v57, %v2873_v4 }
 0x30f   : > { %v12021_v12 = vadd.f32 %v1689_v2, %v1561_v52  ;;  %v1563_v33 = vpop.f32.mrf.mxu1  ;;  %v1940_v3 = vpop.f32.mrf.mxu2 }
 0x310   : > { %3053 = vst [vmem:[#allocation2 + $0xf0] sm:$0xff] %v2981_v7  ;;  %v1941_v15 = vadd.f32 %v1940_v3, %v1812_v55  ;;  %v1813_v24 = vpop.f32.mrf.mxu0  ;;  %v1564_v27 = vadd.f32 %v1563_v33, %v11746_v21  ;;  %v15397_v7 = vld [vmem:[#allocation84_spill] sm:$0xff] }
 0x311   : > { %15392 = vst [vmem:[#allocation58_spill] sm:$0xff] %v12021_v12  ;;  %v1814_v43 = vadd.f32 %v1813_v24, %v11785_v28  ;;  %v2666_v3 = vmax.f32 %v15397_v7, 0.0 }
 0x312   : > { %1602 = vmatmul.bf16.gmra.mxu1 %v15393_v48  ;;  %v2663_v18 = vmax.f32 %v1941_v15, 0.0 }
 0x313   : > { %9015 = vmatmul.msk.bf16.gmra.mxu3 %vm895_vm0, %v15394_v47 }
 0x314   : > { %v12029_v45 = vmax.f32 %v2660_v37, %v2663_v18 }
 0x316   : > { %v1692_v49 = vpop.f32.mrf.mxu3 }
 0x317   : > { %v12032_v57 = vadd.f32 %v1692_v49, %v1564_v27  ;;  %v1565_v52 = vpop.f32.mrf.mxu1  ;;  %v1942_v4 = vpop.f32.mrf.mxu2  ;;  %v8749_v49 = vld [vmem:[#allocation4 + $0x28] sm:$0xf0] }
 0x318   : > { %v1943_v55 = vadd.f32 %v1942_v4, %v1814_v43  ;;  %v1816_v2 = vpop.f32.mrf.mxu0  ;;  %v1566_v12 = vadd.f32 %v1565_v52, %v11746_v21  ;;  %v10296_v43 = vld [vmem:[#allocation4 + $0x14] sm:$0xf] }
 0x319   : > { %15396 = vst [vmem:[#allocation57_spill] sm:$0xff] %v12032_v57  ;;  %v1817_v15 = vadd.f32 %v1816_v2, %v11785_v28  ;;  %v8752_v7 = vor.u32 %v10296_v43, %v8749_v49  ;;  %v15401_v2 = vld [vmem:[#allocation87_spill] sm:$0xff]  ;;  %v15403_v49 = vld [vmem:[#allocation90_spill] sm:$0xff] }
 0x31a   : > { %v2669_v33 = vmax.f32 %v1943_v55, 0.0  ;;  %v15399_v55 = vld [vmem:[#allocation96_spill] sm:$0xff]  ;;  %v2672_v57 = vmax.f32 %v15401_v2, 0.0 }
 0x31b   : > { %1855 = vmatmul.bf16.gmra.mxu0 %v11563_v9 }
 0x31c   : > { %v12037_v34 = vmax.f32 %v2666_v3, %v2669_v33  ;;  %9038 = vmatmul.msk.bf16.gmra.mxu2 %vm895_vm0, %v15388_v56  ;;  %v15400_v33 = vld [vmem:[#allocation88_spill] sm:$0xff]  ;;  %2265 = vmatpush.bf16.msra.mxu0 %v8752_v7 }
 0x31e   : > { %v1694_v37 = vpop.f32.mrf.mxu3 }
 0x31f   : > { %v12042_v24 = vadd.f32 %v1694_v37, %v1566_v12  ;;  %v1568_v27 = vpop.f32.mrf.mxu1  ;;  %v1945_v18 = vpop.f32.mrf.mxu2 }
 0x320   : > { %v1946_v4 = vadd.f32 %v1945_v18, %v1817_v15  ;;  %v1818_v52 = vpop.f32.mrf.mxu0  ;;  %v1569_v3 = vadd.f32 %v1568_v27, %v11746_v21  ;;  %v2678_v27 = vmax.f32 %v15403_v49, 0.0 }
 0x321   : > { %15398 = vst [vmem:[#allocation60_spill] sm:$0xff] %v12042_v24  ;;  %v1819_v37 = vadd.f32 %v1818_v52, %v11785_v28 }
 0x322   : > { %1607 = vmatmul.bf16.gmra.mxu1 %v15399_v55  ;;  %v2675_v13 = vmax.f32 %v1946_v4, 0.0 }
 0x323   : > { %9016 = vmatmul.msk.bf16.gmra.mxu3 %vm895_vm0, %v15400_v33 }
 0x324   : > { %v12049_v12 = vmax.f32 %v2672_v57, %v2675_v13 }
 0x326   : > { %v1697_v24 = vpop.f32.mrf.mxu3 }
 0x327   : > { %v12052_v32 = vadd.f32 %v1697_v24, %v1569_v3  ;;  %v1570_v15 = vpop.f32.mrf.mxu1  ;;  %v1947_v18 = vpop.f32.mrf.mxu2 }
 0x328   : > { %v1948_v38 = vadd.f32 %v1947_v18, %v1819_v37  ;;  %v1821_v43 = vpop.f32.mrf.mxu0  ;;  %v1571_v9 = vadd.f32 %v1570_v15, %v11746_v21 }
 0x329   : > { %15402 = vst [vmem:[#allocation73_spill] sm:$0xff] %v12052_v32  ;;  %v1822_v13 = vadd.f32 %v1821_v43, %v11785_v28 }
 0x32a   : > { %v2681_v56 = vmax.f32 %v1948_v38, 0.0 }
 0x32b   : > { %1860 = vmatmul.bf16.gmra.mxu0 %v15393_v48 }
 0x32c   : > { %v12057_v4 = vmax.f32 %v2678_v27, %v2681_v56  ;;  %9039 = vmatmul.msk.bf16.gmra.mxu2 %vm895_vm0, %v15394_v47  ;;  %v15405_v56 = vld [vmem:[#allocation93_spill] sm:$0xff] }
 0x32d   : > { %v2684_v37 = vmax.f32 %v15405_v56, 0.0 }
 0x32e   : > { %v1699_v57 = vpop.f32.mrf.mxu3 }
 0x32f   : > { %v12062_v24 = vadd.f32 %v1699_v57, %v1571_v9  ;;  %v1573_v52 = vpop.f32.mrf.mxu1  ;;  %v1950_v7 = vpop.f32.mrf.mxu2 }
 0x330   : > { %v1951_v3 = vadd.f32 %v1950_v7, %v1822_v13  ;;  %v1823_v38 = vpop.f32.mrf.mxu0  ;;  %v1574_v2 = vadd.f32 %v1573_v52, %v11746_v21 }
 0x331   : > { %15404 = vst [vmem:[#allocation64_spill] sm:$0xff] %v12062_v24  ;;  %v1824_v43 = vadd.f32 %v1823_v38, %v11785_v28  ;;  %v15407_v24 = vld [vmem:[#allocation95_spill] sm:$0xff] }
 0x332   : > { %2008 = vmatmul.bf16.vlgmr.msra.gmra.mxu1 %v11112_v10  ;;  %v2687_v15 = vmax.f32 %v1951_v3, 0.0  ;;  %v2690_v32 = vmax.f32 %v15407_v24, 0.0 }
 0x333   : > { %9041 = vmatmul.msk.bf16.vlgmr.msra.gmra.mxu3 %vm895_vm0, %v11096_v16 }
 0x334   : > { %v12069_v18 = vmax.f32 %v2684_v37, %v2687_v15 }
 0x336   : > { %v1702_v9 = vpop.f32.mrf.mxu3 }
 0x337   : > { %v12072_v49 = vadd.f32 %v1702_v9, %v1574_v2  ;;  %v1575_v27 = vpop.f32.mrf.mxu1  ;;  %v1952_v13 = vpop.f32.mrf.mxu2 }
 0x338   : > { %v1953_v57 = vadd.f32 %v1952_v13, %v1824_v43  ;;  %v1826_v7 = vpop.f32.mrf.mxu0  ;;  %v1576_v47 = vadd.f32 %v1575_v27, %v11746_v21 }
 0x339   : > { %15406 = vst [vmem:[#allocation63_spill] sm:$0xff] %v12072_v49  ;;  %v1827_v3 = vadd.f32 %v1826_v7, %v11785_v28 }
 0x33a   : > { %v2693_v52 = vmax.f32 %v1953_v57, 0.0 }
 0x33b   : > { %1865 = vmatmul.bf16.gmra.mxu0 %v15399_v55  ;;  %v2702_v55 = vmax.f32 %v11627_v6, 0.0 }
 0x33c   : > { %v12077_v56 = vmax.f32 %v2690_v32, %v2693_v52  ;;  %9040 = vmatmul.msk.bf16.gmra.mxu2 %vm895_vm0, %v15400_v33  ;;  %v15409_v32 = vld [vmem:[#allocation98_spill] sm:$0xff] }
 0x33d   : > { %v2696_v27 = vmax.f32 %v15409_v32, 0.0 }
 0x33e   : > { %v1704_v37 = vpop.f32.mrf.mxu3 }
 0x33f   : > { %v12082_v38 = vadd.f32 %v1704_v37, %v1576_v47  ;;  %v1578_v2 = vpop.f32.mrf.mxu1  ;;  %v1955_v15 = vpop.f32.mrf.mxu2 }
 0x340   : > { %v1956_v43 = vadd.f32 %v1955_v15, %v1827_v3  ;;  %v1828_v24 = vpop.f32.mrf.mxu0  ;;  %v1579_v9 = vadd.f32 %v1578_v2, %v11746_v21  ;;  %v9331_v15 = vld [vmem:[#allocation9 + $0x1e0] sm:$0xf] }
 0x341   : > { %15408 = vst [vmem:[#allocation66_spill] sm:$0xff] %v12082_v38  ;;  %v1829_v7 = vadd.f32 %v1828_v24, %v11785_v28  ;;  %v10410_v38 = vld [vmem:[#allocation9 + $0x1ec] sm:$0xf0] }
 0x342   : > { %2013 = vmatmul.bf16.gmra.mxu1 %v11126_v20  ;;  %v2699_v13 = vmax.f32 %v1956_v43, 0.0  ;;  %v9332_v2 = vor.u32 %v10410_v38, %v9331_v15 }
 0x343   : > { %9042 = vmatmul.msk.bf16.gmra.mxu3 %vm895_vm0, %v11104_v51 }
 0x344   : > { %v12089_v57 = vmax.f32 %v2696_v27, %v2699_v13  ;;  %5796 = vmatpush.bf16.msrb.mxu3 %v9332_v2  ;;  %v9203_v27 = vld [vmem:[#allocation9 + $0xe0] sm:$0xf]  ;;  %v10378_v13 = vld [vmem:[#allocation9 + $0xec] sm:$0xf0]  ;;  %v15412_v2 = vld [vmem:[#allocation17_spill] sm:$0xff] }
 0x346   : > { %v1707_v47 = vpop.f32.mrf.mxu3 }
 0x347   : > { %v12092_v52 = vadd.f32 %v1707_v47, %v1579_v9  ;;  %v1580_v37 = vpop.f32.mrf.mxu1  ;;  %v1957_v3 = vpop.f32.mrf.mxu2  ;;  %v10474_v47 = vld [vmem:[#allocation9 + $0x3ec] sm:$0xf0] }
 0x348   : > { %v1958_v49 = vadd.f32 %v1957_v3, %v1829_v7  ;;  %v1831_v33 = vpop.f32.mrf.mxu0  ;;  %v1581_v43 = vadd.f32 %v1580_v37, %v11746_v21  ;;  %v9587_v7 = vld [vmem:[#allocation9 + $0x3e0] sm:$0xf] }
 0x349   : > { %15410 = vst [vmem:[#allocation79_spill] sm:$0xff] %v12092_v52  ;;  %v1832_v24 = vadd.f32 %v1831_v33, %v11785_v28  ;;  %v9588_v3 = vor.u32 %v10474_v47, %v9587_v7 }
 0x34a   : > { %v2705_v48 = vmax.f32 %v1958_v49, 0.0  ;;  %v9204_v49 = vor.u32 %v10378_v13, %v9203_v27 }
 0x34b   : > { %2266 = vmatmul.bf16.vlgmr.msra.gmra.mxu0 %v11112_v10  ;;  %v9459_v10 = vld [vmem:[#allocation9 + $0x2e0] sm:$0xf]  ;;  %5934 = vmatpush.bf16.msrb.mxu2 %v9588_v3 }
 0x34c   : > { %v12097_v32 = vmax.f32 %v2702_v55, %v2705_v48  ;;  %9065 = vmatmul.msk.bf16.vlgmr.msra.gmra.mxu2 %vm895_vm0, %v11096_v16  ;;  %5727 = vmatpush.bf16.msrb.mxu1 %v9204_v49  ;;  %v10442_v48 = vld [vmem:[#allocation9 + $0x2ec] sm:$0xf0] }
 0x34d   : > { %v9460_v15 = vor.u32 %v10442_v48, %v9459_v10  ;;  %v15415_v48 = vld [vmem:[#allocation103_spill] sm:$0xff] }
 0x34e   : > { %v1709_v9 = vpop.f32.mrf.mxu3 }
 0x34f   : > { %v12102_v38 = vadd.f32 %v1709_v9, %v1581_v43  ;;  %v1583_v6 = vpop.f32.mrf.mxu1  ;;  %v1960_v37 = vpop.f32.mrf.mxu2  ;;  %v15413_v43 = vld [vmem:[#allocation101_spill] sm:$0xff]  ;;  %5865 = vmatpush.bf16.msrb.mxu0 %v9460_v15 }
 0x350   : > { %v1961_v55 = vadd.f32 %v1960_v37, %v1832_v24  ;;  %v1833_v33 = vpop.f32.mrf.mxu0  ;;  %v1584_v16 = vadd.f32 %v1583_v6, %v11746_v21  ;;  %v2708_v9 = vmax.f32 %v15413_v43, 0.0  ;;  %v2714_v6 = vmax.f32 %v15415_v48, 0.0 }
 0x351   : > { %15411 = vst [vmem:[#allocation70_spill] sm:$0xff] %v12102_v38  ;;  %v1834_v7 = vadd.f32 %v1833_v33, %v11785_v28 }
 0x352   : > { %2018 = vmatmul.bf16.gmra.mxu1 %v11140_v26  ;;  %v2711_v27 = vmax.f32 %v1961_v55, 0.0 }
 0x353   : > { %9043 = vmatmul.msk.bf16.gmra.mxu3 %vm895_vm0, %v15412_v2 }
 0x354   : > { %v12109_v13 = vmax.f32 %v2708_v9, %v2711_v27 }
 0x356   : > { %v1712_v49 = vpop.f32.mrf.mxu3 }
 0x357   : > { %v12112_v24 = vadd.f32 %v1712_v49, %v1584_v16  ;;  %v1585_v47 = vpop.f32.mrf.mxu1  ;;  %v1962_v37 = vpop.f32.mrf.mxu2 }
 0x358   : > { %v1963_v3 = vadd.f32 %v1962_v37, %v1834_v7  ;;  %v1836_v10 = vpop.f32.mrf.mxu0  ;;  %v1586_v52 = vadd.f32 %v1585_v47, %v11746_v21 }
 0x359   : > { %15414 = vst [vmem:[#allocation69_spill] sm:$0xff] %v12112_v24  ;;  %v1837_v15 = vadd.f32 %v1836_v10, %v11785_v28  ;;  %v2738_v24 = vmax.f32 %v11681_v22, 0.0 }
 0x35a   : > { %v2717_v38 = vmax.f32 %v1963_v3, 0.0 }
 0x35b   : > { %2271 = vmatmul.bf16.gmra.mxu0 %v11126_v20  ;;  %v15417_v20 = vld [vmem:[#allocation105_spill] sm:$0xff] }
 0x35c   : > { %v12117_v55 = vmax.f32 %v2714_v6, %v2717_v38  ;;  %9066 = vmatmul.msk.bf16.gmra.mxu2 %vm895_vm0, %v11104_v51  ;;  %v2720_v38 = vmax.f32 %v15417_v20, 0.0 }
 0x35e   : > { %v1714_v43 = vpop.f32.mrf.mxu3 }
 0x35f   : > { %v12122_v33 = vadd.f32 %v1714_v43, %v1586_v52  ;;  %v1588_v16 = vpop.f32.mrf.mxu1  ;;  %v1965_v9 = vpop.f32.mrf.mxu2  ;;  %v15419_v43 = vld [vmem:[#allocation107_spill] sm:$0xff] }
 0x360   : > { %v1966_v27 = vadd.f32 %v1965_v9, %v1837_v15  ;;  %v1838_v7 = vpop.f32.mrf.mxu0  ;;  %v1589_v49 = vadd.f32 %v1588_v16, %v11746_v21  ;;  %v2726_v9 = vmax.f32 %v15419_v43, 0.0 }
 0x361   : > { %15416 = vst [vmem:[#allocation72_spill] sm:$0xff] %v12122_v33  ;;  %v1839_v51 = vadd.f32 %v1838_v7, %v11785_v28 }
 0x362   : > { %2023 = vmatmul.bf16.gmra.mxu1 %v11154_v35  ;;  %v2723_v47 = vmax.f32 %v1966_v27, 0.0 }
 0x363   : > { %9044 = vmatmul.msk.bf16.gmra.mxu3 %vm895_vm0, %v11132_v23 }
 0x364   : > { %v12129_v37 = vmax.f32 %v2720_v38, %v2723_v47 }
 0x366   : > { %v1717_v52 = vpop.f32.mrf.mxu3 }
 0x367   : > { %v12132_v3 = vadd.f32 %v1717_v52, %v1589_v49  ;;  %v1590_v10 = vpop.f32.mrf.mxu1  ;;  %v1967_v48 = vpop.f32.mrf.mxu2 }
 0x368   : > { %v1968_v6 = vadd.f32 %v1967_v48, %v1839_v51  ;;  %v1841_v15 = vpop.f32.mrf.mxu0  ;;  %v1591_v33 = vadd.f32 %v1590_v10, %v11746_v21 }
 0x369   : > { %15418 = vst [vmem:[#allocation75_spill] sm:$0xff] %v12132_v3  ;;  %v1842_v27 = vadd.f32 %v1841_v15, %v11785_v28 }
 0x36a   : > { %v2729_v16 = vmax.f32 %v1968_v6, 0.0 }
 0x36b   : > { %2276 = vmatmul.bf16.gmra.mxu0 %v11140_v26  ;;  %v15421_v26 = vld [vmem:[#allocation109_spill] sm:$0xff] }
 0x36c   : > { %v12137_v20 = vmax.f32 %v2726_v9, %v2729_v16  ;;  %9067 = vmatmul.msk.bf16.gmra.mxu2 %vm895_vm0, %v15412_v2  ;;  %v2732_v48 = vmax.f32 %v15421_v26, 0.0 }
 0x36e   : > { %v1719_v38 = vpop.f32.mrf.mxu3 }
 0x36f   : > { %v12142_v7 = vadd.f32 %v1719_v38, %v1591_v33  ;;  %v1593_v49 = vpop.f32.mrf.mxu1  ;;  %v1970_v47 = vpop.f32.mrf.mxu2 }
 0x370   : > { %v1971_v51 = vadd.f32 %v1970_v47, %v1842_v27  ;;  %v1843_v52 = vpop.f32.mrf.mxu0  ;;  %v1594_v10 = vadd.f32 %v1593_v49, %v11746_v21  ;;  %v9315_v49 = vld [vmem:[#allocation9 + $0x1c0] sm:$0xf] }
 0x371   : > { %15420 = vst [vmem:[#allocation78_spill] sm:$0xff] %v12142_v7  ;;  %v1844_v43 = vadd.f32 %v1843_v52, %v11785_v28  ;;  %v10406_v7 = vld [vmem:[#allocation9 + $0x1cc] sm:$0xf0] }
 0x372   : > { %2028 = vmatmul.bf16.gmra.mxu1 %v11168_v44  ;;  %v2735_v6 = vmax.f32 %v1971_v51, 0.0  ;;  %v9316_v3 = vor.u32 %v10406_v7, %v9315_v49 }
 0x373   : > { %9045 = vmatmul.msk.bf16.gmra.mxu3 %vm895_vm0, %v11146_v29 }
 0x374   : > { %v2912_v15 = vmax.f32 %v2732_v48, %v2735_v6  ;;  %5797 = vmatpush.bf16.msrb.mxu3 %v9316_v3  ;;  %v10374_v3 = vld [vmem:[#allocation9 + $0xcc] sm:$0xf0] }
 0x376   : > { %v1722_v2 = vpop.f32.mrf.mxu3  ;;  %v2984_v16 = vmax.f32 %v12029_v45, %v2912_v15 }
 0x377   : > { %v12150_v33 = vadd.f32 %v1722_v2, %v1594_v10  ;;  %v1595_v9 = vpop.f32.mrf.mxu1  ;;  %v1972_v27 = vpop.f32.mrf.mxu2  ;;  %v15423_v2 = vld [vmem:[#allocation18_spill] sm:$0xff] }
 0x378   : > { %3056 = vst [vmem:[#allocation3 + $0xa8] sm:$0xff] %v2984_v16  ;;  %v1973_v38 = vadd.f32 %v1972_v27, %v1844_v43  ;;  %v1846_v47 = vpop.f32.mrf.mxu0  ;;  %v1596_v51 = vadd.f32 %v1595_v9, %v11746_v21  ;;  %v10470_v16 = vld [vmem:[#allocation9 + $0x3cc] sm:$0xf0]  ;;  %v9443_v27 = vld [vmem:[#allocation9 + $0x2c0] sm:$0xf] }
 0x379   : > { %v1847_v10 = vadd.f32 %v1846_v47, %v11785_v28 }
 0x37a   : > { %v2741_v26 = vmax.f32 %v1973_v38, 0.0  ;;  %v15424_v38 = vld [vmem:[#allocation112_spill] sm:$0xff] }
 0x37b   : > { %2281 = vmatmul.bf16.gmra.mxu0 %v11154_v35  ;;  %v9187_v35 = vld [vmem:[#allocation9 + $0xc0] sm:$0xf]  ;;  %v2744_v47 = vmax.f32 %v15424_v38, 0.0 }
 0x37c   : > { %v2915_v52 = vmax.f32 %v2738_v24, %v2741_v26  ;;  %9068 = vmatmul.msk.bf16.gmra.mxu2 %vm895_vm0, %v11132_v23  ;;  %v9188_v9 = vor.u32 %v10374_v3, %v9187_v35  ;;  %v9571_v23 = vld [vmem:[#allocation9 + $0x3c0] sm:$0xf]  ;;  %v10438_v26 = vld [vmem:[#allocation9 + $0x2cc] sm:$0xf0] }
 0x37d   : > { %v9572_v49 = vor.u32 %v10470_v16, %v9571_v23 }
 0x37e   : > { %v1724_v48 = vpop.f32.mrf.mxu3  ;;  %v2987_v7 = vmax.f32 %v12037_v34, %v2915_v52  ;;  %5728 = vmatpush.bf16.msrb.mxu1 %v9188_v9 }
 0x37f   : > { %v12159_v45 = vadd.f32 %v1724_v48, %v1596_v51  ;;  %v1598_v6 = vpop.f32.mrf.mxu1  ;;  %v1975_v15 = vpop.f32.mrf.mxu2  ;;  %v9444_v51 = vor.u32 %v10438_v26, %v9443_v27  ;;  %5935 = vmatpush.bf16.msrb.mxu2 %v9572_v49 }
 0x380   : > { %3059 = vst [vmem:[#allocation3 + $0x90] sm:$0xff] %v2987_v7  ;;  %v1976_v22 = vadd.f32 %v1975_v15, %v1847_v10  ;;  %v1848_v43 = vpop.f32.mrf.mxu0  ;;  %v1599_v24 = vadd.f32 %v1598_v6, %v11746_v21 }
 0x381   : > { %15422 = vst [vmem:[#allocation81_spill] sm:$0xff] %v12159_v45  ;;  %v1849_v10 = vadd.f32 %v1848_v43, %v11785_v28  ;;  %5866 = vmatpush.bf16.msrb.mxu0 %v9444_v51 }
 0x382   : > { %2033 = vmatmul.bf16.gmra.mxu1 %v11182_v50  ;;  %v2747_v34 = vmax.f32 %v1976_v22, 0.0  ;;  %v15426_v22 = vld [vmem:[#allocation114_spill] sm:$0xff] }
 0x383   : > { %9046 = vmatmul.msk.bf16.gmra.mxu3 %vm895_vm0, %v15423_v2  ;;  %v2750_v23 = vmax.f32 %v15426_v22, 0.0 }
 0x384   : > { %v2918_v52 = vmax.f32 %v2744_v47, %v2747_v34 }
 0x386   : > { %v1727_v48 = vpop.f32.mrf.mxu3  ;;  %v2990_v15 = vmax.f32 %v12049_v12, %v2918_v52  ;;  %v15428_v52 = vld [vmem:[#allocation19_spill] sm:$0xff] }
 0x387   : > { %v12168_v6 = vadd.f32 %v1727_v48, %v1599_v24  ;;  %v1600_v7 = vpop.f32.mrf.mxu1  ;;  %v1977_v35 = vpop.f32.mrf.mxu2 }
 0x388   : > { %3062 = vst [vmem:[#allocation3 + $0xe8] sm:$0xff] %v2990_v15  ;;  %v1978_v3 = vadd.f32 %v1977_v35, %v1849_v10  ;;  %v1851_v38 = vpop.f32.mrf.mxu0  ;;  %v1601_v9 = vadd.f32 %v1600_v7, %v11746_v21  ;;  %v15429_v10 = vld [vmem:[#allocation116_spill] sm:$0xff] }
 0x389   : > { %15425 = vst [vmem:[#allocation84_spill] sm:$0xff] %v12168_v6  ;;  %v1852_v27 = vadd.f32 %v1851_v38, %v11785_v28  ;;  %v2756_v48 = vmax.f32 %v15429_v10, 0.0 }
 0x38a   : > { %v2753_v16 = vmax.f32 %v1978_v3, 0.0 }
 0x38b   : > { %2286 = vmatmul.bf16.gmra.mxu0 %v11168_v44 }
 0x38c   : > { %v2921_v43 = vmax.f32 %v2750_v23, %v2753_v16  ;;  %9069 = vmatmul.msk.bf16.gmra.mxu2 %vm895_vm0, %v11146_v29 }
 0x38e   : > { %v1729_v24 = vpop.f32.mrf.mxu3  ;;  %v2993_v34 = vmax.f32 %v12057_v4, %v2921_v43 }
 0x38f   : > { %v12177_v47 = vadd.f32 %v1729_v24, %v1601_v9  ;;  %v1603_v12 = vpop.f32.mrf.mxu1  ;;  %v1980_v49 = vpop.f32.mrf.mxu2  ;;  %v15431_v9 = vld [vmem:[#allocation118_spill] sm:$0xff] }
 0x390   : > { %3065 = vst [vmem:[#allocation3 + $0x8] sm:$0xff] %v2993_v34  ;;  %v1981_v26 = vadd.f32 %v1980_v49, %v1852_v27  ;;  %v1853_v51 = vpop.f32.mrf.mxu0  ;;  %v1604_v44 = vadd.f32 %v1603_v12, %v11746_v21  ;;  %v2762_v43 = vmax.f32 %v15431_v9, 0.0 }
 0x391   : > { %15427 = vst [vmem:[#allocation87_spill] sm:$0xff] %v12177_v47  ;;  %v1854_v15 = vadd.f32 %v1853_v51, %v11785_v28 }
 0x392   : > { %2038 = vmatmul.bf16.gmra.mxu1 %v11196_v60  ;;  %v2759_v7 = vmax.f32 %v1981_v26, 0.0 }
 0x393   : > { %9047 = vmatmul.msk.bf16.gmra.mxu3 %vm895_vm0, %v15428_v52 }
 0x394   : > { %v2924_v29 = vmax.f32 %v2756_v48, %v2759_v7  ;;  %v15433_v7 = vld [vmem:[#allocation120_spill] sm:$0xff] }
 0x396   : > { %v1732_v35 = vpop.f32.mrf.mxu3  ;;  %v2996_v38 = vmax.f32 %v12069_v18, %v2924_v29  ;;  %v2768_v29 = vmax.f32 %v15433_v7, 0.0 }
 0x397   : > { %v12186_v3 = vadd.f32 %v1732_v35, %v1604_v44  ;;  %v1605_v4 = vpop.f32.mrf.mxu1  ;;  %v1982_v22 = vpop.f32.mrf.mxu2 }
 0x398   : > { %3068 = vst [vmem:[#allocation3 + $0x78] sm:$0xff] %v2996_v38  ;;  %v1983_v23 = vadd.f32 %v1982_v22, %v1854_v15  ;;  %v1856_v16 = vpop.f32.mrf.mxu0  ;;  %v1606_v24 = vadd.f32 %v1605_v4, %v11746_v21 }
 0x399   : > { %15430 = vst [vmem:[#allocation90_spill] sm:$0xff] %v12186_v3  ;;  %v1857_v34 = vadd.f32 %v1856_v16, %v11785_v28  ;;  %v15466_v3 = vld [vmem:[#allocation47_spill] sm:$0xff] }
 0x39a   : > { %v2765_v27 = vmax.f32 %v1983_v23, 0.0 }
 0x39b   : > { %2291 = vmatmul.bf16.gmra.mxu0 %v11182_v50 }
 0x39c   : > { %v2927_v12 = vmax.f32 %v2762_v43, %v2765_v27  ;;  %9070 = vmatmul.msk.bf16.gmra.mxu2 %vm895_vm0, %v15423_v2  ;;  %v9299_v43 = vld [vmem:[#allocation9 + $0x1a0] sm:$0xf]  ;;  %v10402_v27 = vld [vmem:[#allocation9 + $0x1ac] sm:$0xf0] }
 0x39e   : > { %v1734_v49 = vpop.f32.mrf.mxu3  ;;  %v2999_v51 = vmax.f32 %v12077_v56, %v2927_v12 }
 0x39f   : > { %v12195_v26 = vadd.f32 %v1734_v49, %v1606_v24  ;;  %v1608_v18 = vpop.f32.mrf.mxu1  ;;  %v1985_v44 = vpop.f32.mrf.mxu2  ;;  %v15435_v24 = vld [vmem:[#allocation122_spill] sm:$0xff]  ;;  %v9300_v49 = vor.u32 %v10402_v27, %v9299_v43 }
 0x3a0   : > { %3071 = vst [vmem:[#allocation3 + $0x38] sm:$0xff] %v2999_v51  ;;  %v1986_v10 = vadd.f32 %v1985_v44, %v1857_v34  ;;  %v1858_v48 = vpop.f32.mrf.mxu0  ;;  %v1609_v50 = vadd.f32 %v1608_v18, %v11746_v21  ;;  %v2774_v12 = vmax.f32 %v15435_v24, 0.0  ;;  %v10434_v27 = vld [vmem:[#allocation9 + $0x2ac] sm:$0xf0] }
 0x3a1   : > { %15432 = vst [vmem:[#allocation93_spill] sm:$0xff] %v12195_v26  ;;  %v1859_v35 = vadd.f32 %v1858_v48, %v11785_v28  ;;  %5798 = vmatpush.bf16.msrb.mxu3 %v9300_v49  ;;  %v12215_v48 = vld [vmem:[#allocation7] sm:$0x3f] }
 0x3a2   : > { %2043 = vmatmul.bf16.gmra.mxu1 %v11210_v8  ;;  %v2771_v15 = vmax.f32 %v1986_v10, 0.0 }
 0x3a3   : > { %9048 = vmatmul.msk.bf16.gmra.mxu3 %vm895_vm0, %v11188_v54 }
 0x3a4   : > { %v2930_v2 = vmax.f32 %v2768_v29, %v2771_v15 }
 0x3a6   : > { %v1737_v4 = vpop.f32.mrf.mxu3  ;;  %v3002_v22 = vmax.f32 %v12089_v57, %v2930_v2  ;;  %v9171_v2 = vld [vmem:[#allocation9 + $0xa0] sm:$0xf] }
 0x3a7   : > { %v12204_v38 = vadd.f32 %v1737_v4, %v1609_v50  ;;  %v1610_v56 = vpop.f32.mrf.mxu1  ;;  %v1987_v23 = vpop.f32.mrf.mxu2  ;;  %v12218_v50 = vperm.slane %v12215_v48, 4 }
 0x3a8   : > { %3074 = vst [vmem:[#allocation3 + $0x128] sm:$0xff] %v3002_v22  ;;  %v1988_v16 = vadd.f32 %v1987_v23, %v1859_v35  ;;  %v1861_v9 = vpop.f32.mrf.mxu0  ;;  %v1611_v18 = vadd.f32 %v1610_v56, %v11746_v21  ;;  %v10370_v35 = vld [vmem:[#allocation9 + $0xac] sm:$0xf0]  ;;  %v9555_v56 = vld [vmem:[#allocation9 + $0x3a0] sm:$0xf] }
 0x3a9   : > { %15434 = vst [vmem:[#allocation95_spill] sm:$0xff] %v12204_v38  ;;  %v1862_v44 = vadd.f32 %v1861_v9, %v11785_v28  ;;  %v9172_v4 = vor.u32 %v10370_v35, %v9171_v2  ;;  %v10466_v22 = vld [vmem:[#allocation9 + $0x3ac] sm:$0xf0]  ;;  %v9427_v23 = vld [vmem:[#allocation9 + $0x2a0] sm:$0xf] }
 0x3aa   : > { %v2777_v34 = vmax.f32 %v1988_v16, 0.0  ;;  %v15437_v16 = vld [vmem:[#allocation124_spill] sm:$0xff]  ;;  %v9556_v43 = vor.u32 %v10466_v22, %v9555_v56  ;;  %v9428_v24 = vor.u32 %v10434_v27, %v9427_v23  ;;  %v10426_v38 = vld [vmem:[#allocation9 + $0x26c] sm:$0xf0] }
 0x3ab   : > { %2296 = vmatmul.bf16.gmra.mxu0 %v11196_v60  ;;  %v2780_v9 = vmax.f32 %v15437_v16, 0.0  ;;  %5729 = vmatpush.bf16.msrb.mxu1 %v9172_v4  ;;  %v2786_v4 = vmax.f32 %v11756_v11, 0.0 }
 0x3ac   : > { %v2933_v51 = vmax.f32 %v2774_v12, %v2777_v34  ;;  %9071 = vmatmul.msk.bf16.gmra.mxu2 %vm895_vm0, %v15428_v52  ;;  %5867 = vmatpush.bf16.msrb.mxu0 %v9428_v24 }
 0x3ad   : > { %5936 = vmatpush.bf16.msrb.mxu2 %v9556_v43 }
 0x3ae   : > { %v1739_v10 = vpop.f32.mrf.mxu3  ;;  %v3005_v21 = vmax.f32 %v12097_v32, %v2933_v51 }
 0x3af   : > { %v12213_v57 = vadd.f32 %v1739_v10, %v1611_v18  ;;  %v2009_v7 = vpop.f32.mrf.mxu1  ;;  %v1990_v29 = vpop.f32.mrf.mxu2  ;;  %v15438_v10 = vld [vmem:[#allocation20_spill] sm:$0xff] }
 0x3b0   : > { %3077 = vst [vmem:[#allocation3 + $0x110] sm:$0xff] %v3005_v21  ;;  %v1991_v60 = vadd.f32 %v1990_v29, %v1862_v44  ;;  %v1863_v15 = vpop.f32.mrf.mxu0  ;;  %v2010_v52 = vadd.f32 %v2009_v7, %v12218_v50  ;;  %v2517_v7 = vmax.f32 %v15438_v10, 0.0 }
 0x3b1   : > { %15436 = vst [vmem:[#allocation98_spill] sm:$0xff] %v12213_v57  ;;  %v1864_v34 = vadd.f32 %v1863_v15, %v11785_v28 }
 0x3b2   : > { %2048 = vmatmul.bf16.gmra.mxu1 %v11226_v25  ;;  %v2783_v32 = vmax.f32 %v1991_v60, 0.0 }
 0x3b3   : > { %9049 = vmatmul.msk.bf16.gmra.mxu3 %vm895_vm0, %v11202_v63 }
 0x3b4   : > { %v2936_v12 = vmax.f32 %v2780_v9, %v2783_v32  ;;  %v15439_v32 = vld [vmem:[#allocation21_spill] sm:$0xff] }
 0x3b5   : > { %v2523_v43 = vmax.f32 %v15439_v32, 0.0  ;;  %v15441_v32 = vld [vmem:[#allocation24_spill] sm:$0xff] }
 0x3b6   : > { %v2138_v49 = vpop.f32.mrf.mxu3  ;;  %v3008_v44 = vmax.f32 %v12109_v13, %v2936_v12 }
 0x3b7   : > { %v2139_v18 = vadd.f32 %v2138_v49, %v2010_v52  ;;  %v2011_v51 = vpop.f32.mrf.mxu1  ;;  %v1992_v29 = vpop.f32.mrf.mxu2 }
 0x3b8   : > { %3080 = vst [vmem:[#allocation3 + $0x20] sm:$0xff] %v3008_v44  ;;  %v1993_v60 = vadd.f32 %v1992_v29, %v1864_v34  ;;  %v1866_v2 = vpop.f32.mrf.mxu0  ;;  %v2012_v15 = vadd.f32 %v2011_v51, %v12218_v50 }
 0x3b9   : > { %v2520_v21 = vmax.f32 %v2139_v18, 0.0  ;;  %v1867_v22 = vadd.f32 %v1866_v2, %v11785_v28 }
 0x3ba   : > { %v2789_v56 = vmax.f32 %v1993_v60, 0.0 }
 0x3bb   : > { %v12229_v35 = vmax.f32 %v2517_v7, %v2520_v21  ;;  %2301 = vmatmul.bf16.gmra.mxu0 %v11210_v8  ;;  %v15440_v21 = vld [vmem:[#allocation23_spill] sm:$0xff] }
 0x3bc   : > { %v2939_v52 = vmax.f32 %v2786_v4, %v2789_v56  ;;  %9072 = vmatmul.msk.bf16.gmra.mxu2 %vm895_vm0, %v11188_v54  ;;  %v2792_v54 = vmax.f32 %v11765_v30, 0.0  ;;  %v2529_v29 = vmax.f32 %v15440_v21, 0.0  ;;  %v12250_v56 = vperm.slane %v12215_v48, 5 }
 0x3be   : > { %v2140_v13 = vpop.f32.mrf.mxu3  ;;  %v3011_v9 = vmax.f32 %v12117_v55, %v2939_v52  ;;  %v2798_v52 = vmax.f32 %v11780_v62, 0.0 }
 0x3bf   : > { %v2141_v23 = vadd.f32 %v2140_v13, %v2012_v15  ;;  %v2014_v16 = vpop.f32.mrf.mxu1  ;;  %v1995_v11 = vpop.f32.mrf.mxu2 }
 0x3c0   : > { %3083 = vst [vmem:[#allocation3 + $0x108] sm:$0xff] %v3011_v9  ;;  %v1996_v24 = vadd.f32 %v1995_v11, %v1867_v22  ;;  %v1868_v8 = vpop.f32.mrf.mxu0  ;;  %v2015_v34 = vadd.f32 %v2014_v16, %v12218_v50 }
 0x3c1   : > { %v2526_v27 = vmax.f32 %v2141_v23, 0.0  ;;  %v1869_v18 = vadd.f32 %v1868_v8, %v11785_v28 }
 0x3c2   : > { %2053 = vmatmul.bf16.gmra.mxu1 %v11251_v58  ;;  %v2795_v49 = vmax.f32 %v1996_v24, 0.0 }
 0x3c3   : > { %v12240_v12 = vmax.f32 %v2523_v43, %v2526_v27  ;;  %9050 = vmatmul.msk.bf16.gmra.mxu3 %vm895_vm0, %v11216_v14  ;;  %v2535_v43 = vmax.f32 %v15441_v32, 0.0 }
 0x3c4   : > { %v2942_v55 = vmax.f32 %v2792_v54, %v2795_v49 }
 0x3c6   : > { %v2143_v51 = vpop.f32.mrf.mxu3  ;;  %v3014_v7 = vmax.f32 %v12129_v37, %v2942_v55 }
 0x3c7   : > { %v2144_v44 = vadd.f32 %v2143_v51, %v2015_v34  ;;  %v2016_v10 = vpop.f32.mrf.mxu1  ;;  %v1997_v2 = vpop.f32.mrf.mxu2  ;;  %v15442_v51 = vld [vmem:[#allocation26_spill] sm:$0xff] }
 0x3c8   : > { %3086 = vst [vmem:[#allocation3 + $0x88] sm:$0xff] %v3014_v7  ;;  %v1998_v4 = vadd.f32 %v1997_v2, %v1869_v18  ;;  %v2267_v15 = vpop.f32.mrf.mxu0  ;;  %v2017_v22 = vadd.f32 %v2016_v10, %v12218_v50  ;;  %v9283_v2 = vld [vmem:[#allocation9 + $0x180] sm:$0xf] }
 0x3c9   : > { %v2532_v60 = vmax.f32 %v2144_v44, 0.0  ;;  %v2268_v13 = vadd.f32 %v2267_v15, %v12250_v56  ;;  %v2541_v44 = vmax.f32 %v15442_v51, 0.0  ;;  %v15443_v15 = vld [vmem:[#allocation127_spill] sm:$0xff]  ;;  %v9411_v51 = vld [vmem:[#allocation9 + $0x280] sm:$0xf] }
 0x3ca   : > { %v2801_v28 = vmax.f32 %v1998_v4, 0.0  ;;  %v10398_v4 = vld [vmem:[#allocation9 + $0x18c] sm:$0xf0] }
 0x3cb   : > { %v12252_v30 = vmax.f32 %v2529_v29, %v2532_v60  ;;  %2306 = vmatmul.bf16.gmra.mxu0 %v11226_v25 }
 0x3cc   : > { %v2945_v37 = vmax.f32 %v2798_v52, %v2801_v28  ;;  %9073 = vmatmul.msk.bf16.gmra.mxu2 %vm895_vm0, %v11202_v63  ;;  %v2518_v63 = vmax.f32 %v11758_v0, 0.0  ;;  %v2524_v0 = vmax.f32 %v15443_v15, 0.0  ;;  %v9284_v28 = vor.u32 %v10398_v4, %v9283_v2 }
 0x3ce   : > { %v2145_v23 = vpop.f32.mrf.mxu3  ;;  %v3017_v9 = vmax.f32 %v12137_v20, %v2945_v37  ;;  %5799 = vmatpush.bf16.msrb.mxu3 %v9284_v28  ;;  %v15448_v28 = vld [vmem:[#allocation30_spill] sm:$0xff] }
 0x3cf   : > { %v2146_v16 = vadd.f32 %v2145_v23, %v2017_v22  ;;  %v2019_v48 = vpop.f32.mrf.mxu1  ;;  %v2396_v62 = vpop.f32.mrf.mxu2 }
 0x3d0   : > { %3089 = vst [vmem:[#allocation3 + $0x10] sm:$0xff] %v3017_v9  ;;  %v2397_v11 = vadd.f32 %v2396_v62, %v2268_v13  ;;  %v2269_v25 = vpop.f32.mrf.mxu0  ;;  %v2020_v8 = vadd.f32 %v2019_v48, %v12218_v50  ;;  %v10366_v48 = vld [vmem:[#allocation9 + $0x8c] sm:$0xf0]  ;;  %v9539_v9 = vld [vmem:[#allocation9 + $0x380] sm:$0xf] }
 0x3d1   : > { %v2538_v27 = vmax.f32 %v2146_v16, 0.0  ;;  %v2270_v54 = vadd.f32 %v2269_v25, %v12250_v56  ;;  %v9155_v16 = vld [vmem:[#allocation9 + $0x80] sm:$0xf]  ;;  %v10462_v62 = vld [vmem:[#allocation9 + $0x38c] sm:$0xf0] }
 0x3d2   : > { %2058 = vmatmul.bf16.gmra.mxu1 %v11277_v41  ;;  %v2521_v34 = vmax.f32 %v2397_v11, 0.0  ;;  %v9540_v11 = vor.u32 %v10462_v62, %v9539_v9  ;;  %v15444_v25 = vld [vmem:[#allocation28_spill] sm:$0xff] }
 0x3d3   : > { %v12263_v24 = vmax.f32 %v2535_v43, %v2538_v27  ;;  %9051 = vmatmul.msk.bf16.gmra.mxu3 %vm895_vm0, %v11237_v36  ;;  %v9156_v27 = vor.u32 %v10366_v48, %v9155_v16 }
 0x3d4   : > { %v12269_v20 = vmax.f32 %v2518_v63, %v2521_v34  ;;  %5937 = vmatpush.bf16.msrb.mxu2 %v9540_v11 }
 0x3d5   : > { %5730 = vmatpush.bf16.msrb.mxu1 %v9156_v27 }
 0x3d6   : > { %v2148_v49 = vpop.f32.mrf.mxu3 }
 0x3d7   : > { %v2149_v55 = vadd.f32 %v2148_v49, %v2020_v8  ;;  %v2021_v18 = vpop.f32.mrf.mxu1  ;;  %v2398_v7 = vpop.f32.mrf.mxu2  ;;  %v2547_v8 = vmax.f32 %v15444_v25, 0.0 }
 0x3d8   : > { %v2399_v21 = vadd.f32 %v2398_v7, %v2270_v54  ;;  %v2272_v29 = vpop.f32.mrf.mxu0  ;;  %v2022_v22 = vadd.f32 %v2021_v18, %v12218_v50  ;;  %v15445_v54 = vld [vmem:[#allocation27_spill] sm:$0xff]  ;;  %v15446_v18 = vld [vmem:[#allocation22_spill] sm:$0xff] }
 0x3d9   : > { %v2544_v10 = vmax.f32 %v2149_v55, 0.0  ;;  %v2273_v13 = vadd.f32 %v2272_v29, %v12250_v56 }
 0x3da   : > { %v2527_v52 = vmax.f32 %v2399_v21, 0.0 }
 0x3db   : > { %v12273_v60 = vmax.f32 %v2541_v44, %v2544_v10  ;;  %2311 = vmatmul.bf16.gmra.mxu0 %v11251_v58  ;;  %v10430_v44 = vld [vmem:[#allocation9 + $0x28c] sm:$0xf0]  ;;  %v15447_v10 = vld [vmem:[#allocation129_spill] sm:$0xff] }
 0x3dc   : > { %v12278_v37 = vmax.f32 %v2524_v0, %v2527_v52  ;;  %9074 = vmatmul.msk.bf16.gmra.mxu2 %vm895_vm0, %v11216_v14  ;;  %v2530_v7 = vmax.f32 %v15447_v10, 0.0  ;;  %v9412_v29 = vor.u32 %v10430_v44, %v9411_v51  ;;  %v15451_v10 = vld [vmem:[#allocation31_spill] sm:$0xff] }
 0x3de   : > { %v2150_v23 = vpop.f32.mrf.mxu3  ;;  %5868 = vmatpush.bf16.msrb.mxu0 %v9412_v29  ;;  %v15452_v29 = vld [vmem:[#allocation25_spill] sm:$0xff] }
 0x3df   : > { %v2151_v32 = vadd.f32 %v2150_v23, %v2022_v22  ;;  %v2024_v43 = vpop.f32.mrf.mxu1  ;;  %v2401_v63 = vpop.f32.mrf.mxu2  ;;  %v2553_v22 = vmax.f32 %v15448_v28, 0.0 }
 0x3e0   : > { %v2402_v34 = vadd.f32 %v2401_v63, %v2273_v13  ;;  %v2274_v49 = vpop.f32.mrf.mxu0  ;;  %v2025_v55 = vadd.f32 %v2024_v43, %v12218_v50 }
 0x3e1   : > { %v2550_v58 = vmax.f32 %v2151_v32, 0.0  ;;  %v2275_v4 = vadd.f32 %v2274_v49, %v12250_v56  ;;  %v15449_v32 = vld [vmem:[#allocation131_spill] sm:$0xff] }
 0x3e2   : > { %2063 = vmatmul.bf16.gmra.mxu1 %v15445_v54  ;;  %v2533_v21 = vmax.f32 %v2402_v34, 0.0  ;;  %v2536_v43 = vmax.f32 %v15449_v32, 0.0  ;;  %v15450_v34 = vld [vmem:[#allocation32_spill] sm:$0xff] }
 0x3e3   : > { %v12285_v14 = vmax.f32 %v2547_v8, %v2550_v58  ;;  %9052 = vmatmul.msk.bf16.gmra.mxu3 %vm895_vm0, %v15446_v18  ;;  %v2559_v49 = vmax.f32 %v15450_v34, 0.0 }
 0x3e4   : > { %v12291_v2 = vmax.f32 %v2530_v7, %v2533_v21 }
 0x3e6   : > { %v2153_v15 = vpop.f32.mrf.mxu3 }
 0x3e7   : > { %v2154_v0 = vadd.f32 %v2153_v15, %v2025_v55  ;;  %v2026_v52 = vpop.f32.mrf.mxu1  ;;  %v2403_v23 = vpop.f32.mrf.mxu2 }
 0x3e8   : > { %v2404_v16 = vadd.f32 %v2403_v23, %v2275_v4  ;;  %v2277_v48 = vpop.f32.mrf.mxu0  ;;  %v2027_v62 = vadd.f32 %v2026_v52, %v12218_v50  ;;  %v15453_v4 = vld [vmem:[#allocation132_spill] sm:$0xff]  ;;  %v15454_v23 = vld [vmem:[#allocation35_spill] sm:$0xff] }
 0x3e9   : > { %v2556_v13 = vmax.f32 %v2154_v0, 0.0  ;;  %v2278_v25 = vadd.f32 %v2277_v48, %v12250_v56  ;;  %v2542_v15 = vmax.f32 %v15453_v4, 0.0 }
 0x3ea   : > { %v2539_v27 = vmax.f32 %v2404_v16, 0.0  ;;  %v2565_v16 = vmax.f32 %v15454_v23, 0.0  ;;  %v15459_v23 = vld [vmem:[#allocation134_spill] sm:$0xff] }
 0x3eb   : > { %v12295_v9 = vmax.f32 %v2553_v22, %v2556_v13  ;;  %2316 = vmatmul.bf16.gmra.mxu0 %v11277_v41 }
 0x3ec   : > { %v12300_v11 = vmax.f32 %v2536_v43, %v2539_v27  ;;  %9075 = vmatmul.msk.bf16.gmra.mxu2 %vm895_vm0, %v11237_v36 }
 0x3ee   : > { %v2155_v8 = vpop.f32.mrf.mxu3 }
 0x3ef   : > { %v2156_v58 = vadd.f32 %v2155_v8, %v2027_v62  ;;  %v2029_v63 = vpop.f32.mrf.mxu1  ;;  %v2406_v51 = vpop.f32.mrf.mxu2 }
 0x3f0   : > { %v2407_v44 = vadd.f32 %v2406_v51, %v2278_v25  ;;  %v2279_v7 = vpop.f32.mrf.mxu0  ;;  %v2030_v41 = vadd.f32 %v2029_v63, %v12218_v50  ;;  %v15455_v25 = vld [vmem:[#allocation133_spill] sm:$0xff] }
 0x3f1   : > { %v2562_v55 = vmax.f32 %v2156_v58, 0.0  ;;  %v2280_v52 = vadd.f32 %v2279_v7, %v12250_v56  ;;  %v2548_v8 = vmax.f32 %v15455_v25, 0.0  ;;  %v15456_v7 = vld [vmem:[#allocation38_spill] sm:$0xff] }
 0x3f2   : > { %2068 = vmatmul.bf16.gmra.mxu1 %v15451_v10  ;;  %v2545_v36 = vmax.f32 %v2407_v44, 0.0 }
 0x3f3   : > { %v12307_v21 = vmax.f32 %v2559_v49, %v2562_v55  ;;  %9053 = vmatmul.msk.bf16.gmra.mxu3 %vm895_vm0, %v15452_v29 }
 0x3f4   : > { %v12313_v0 = vmax.f32 %v2542_v15, %v2545_v36 }
 0x3f6   : > { %v2158_v28 = vpop.f32.mrf.mxu3 }
 0x3f7   : > { %v2159_v22 = vadd.f32 %v2158_v28, %v2030_v41  ;;  %v2031_v13 = vpop.f32.mrf.mxu1  ;;  %v2408_v32 = vpop.f32.mrf.mxu2  ;;  %v2571_v41 = vmax.f32 %v15456_v7, 0.0  ;;  %v15461_v7 = vld [vmem:[#allocation135_spill] sm:$0xff] }
 0x3f8   : > { %v2409_v43 = vadd.f32 %v2408_v32, %v2280_v52  ;;  %v2282_v27 = vpop.f32.mrf.mxu0  ;;  %v2032_v63 = vadd.f32 %v2031_v13, %v12218_v50  ;;  %v15457_v52 = vld [vmem:[#allocation37_spill] sm:$0xff] }
 0x3f9   : > { %v2568_v48 = vmax.f32 %v2159_v22, 0.0  ;;  %v2283_v49 = vadd.f32 %v2282_v27, %v12250_v56  ;;  %v15458_v13 = vld [vmem:[#allocation29_spill] sm:$0xff] }
 0x3fa   : > { %v2551_v58 = vmax.f32 %v2409_v43, 0.0 }
 0x3fb   : > { %v12317_v62 = vmax.f32 %v2565_v16, %v2568_v48  ;;  %2321 = vmatmul.bf16.gmra.mxu0 %v15445_v54  ;;  %v2554_v16 = vmax.f32 %v15459_v23, 0.0 }
 0x3fc   : > { %v12322_v34 = vmax.f32 %v2548_v8, %v2551_v58  ;;  %9076 = vmatmul.msk.bf16.gmra.mxu2 %vm895_vm0, %v15446_v18  ;;  %v15460_v8 = vld [vmem:[#allocation41_spill] sm:$0xff] }
 0x3fd   : > { %v2577_v58 = vmax.f32 %v15460_v8, 0.0  ;;  %v9267_v8 = vld [vmem:[#allocation9 + $0x160] sm:$0xf] }
 0x3fe   : > { %v2160_v55 = vpop.f32.mrf.mxu3 }
 0x3ff   : > { %v2161_v51 = vadd.f32 %v2160_v55, %v2032_v63  ;;  %v2034_v44 = vpop.f32.mrf.mxu1  ;;  %v2411_v15 = vpop.f32.mrf.mxu2 }
 0x400   : > { %v2412_v36 = vadd.f32 %v2411_v15, %v2283_v49  ;;  %v2284_v28 = vpop.f32.mrf.mxu0  ;;  %v2035_v54 = vadd.f32 %v2034_v44, %v12218_v50 }
 0x401   : > { %v2574_v4 = vmax.f32 %v2161_v51, 0.0  ;;  %v2285_v32 = vadd.f32 %v2284_v28, %v12250_v56 }
 0x402   : > { %2073 = vmatmul.bf16.gmra.mxu1 %v15457_v52  ;;  %v2557_v18 = vmax.f32 %v2412_v36, 0.0 }
 0x403   : > { %v12329_v22 = vmax.f32 %v2571_v41, %v2574_v4  ;;  %9054 = vmatmul.msk.bf16.gmra.mxu3 %vm895_vm0, %v15458_v13  ;;  %v2560_v41 = vmax.f32 %v15461_v7, 0.0  ;;  %v10362_v7 = vld [vmem:[#allocation9 + $0x6c] sm:$0xf0] }
 0x404   : > { %v12335_v48 = vmax.f32 %v2554_v16, %v2557_v18  ;;  %v15462_v18 = vld [vmem:[#allocation44_spill] sm:$0xff] }
 0x406   : > { %v2163_v43 = vpop.f32.mrf.mxu3 }
 0x407   : > { %v2164_v27 = vadd.f32 %v2163_v43, %v2035_v54  ;;  %v2036_v25 = vpop.f32.mrf.mxu1  ;;  %v2413_v49 = vpop.f32.mrf.mxu2 }
 0x408   : > { %v2414_v55 = vadd.f32 %v2413_v49, %v2285_v32  ;;  %v2287_v51 = vpop.f32.mrf.mxu0  ;;  %v2037_v15 = vadd.f32 %v2036_v25, %v12218_v50  ;;  %v2583_v32 = vmax.f32 %v15462_v18, 0.0  ;;  %v15463_v25 = vld [vmem:[#allocation43_spill] sm:$0xff] }
 0x409   : > { %v2580_v63 = vmax.f32 %v2164_v27, 0.0  ;;  %v2288_v28 = vadd.f32 %v2287_v51, %v12250_v56  ;;  %v9523_v51 = vld [vmem:[#allocation9 + $0x360] sm:$0xf] }
 0x40a   : > { %v2563_v4 = vmax.f32 %v2414_v55, 0.0  ;;  %v9139_v55 = vld [vmem:[#allocation9 + $0x60] sm:$0xf] }
 0x40b   : > { %v12339_v44 = vmax.f32 %v2577_v58, %v2580_v63  ;;  %2326 = vmatmul.bf16.gmra.mxu0 %v15451_v10  ;;  %v10394_v58 = vld [vmem:[#allocation9 + $0x16c] sm:$0xf0] }
 0x40c   : > { %v12344_v36 = vmax.f32 %v2560_v41, %v2563_v4  ;;  %9077 = vmatmul.msk.bf16.gmra.mxu2 %vm895_vm0, %v15452_v29  ;;  %v9268_v49 = vor.u32 %v10394_v58, %v9267_v8  ;;  %v15464_v4 = vld [vmem:[#allocation34_spill] sm:$0xff] }
 0x40e   : > { %v2165_v54 = vpop.f32.mrf.mxu3  ;;  %5800 = vmatpush.bf16.msrb.mxu3 %v9268_v49 }
 0x40f   : > { %v2166_v23 = vadd.f32 %v2165_v54, %v2037_v15  ;;  %v2039_v16 = vpop.f32.mrf.mxu1  ;;  %v2416_v27 = vpop.f32.mrf.mxu2  ;;  %v9140_v15 = vor.u32 %v10362_v7, %v9139_v55  ;;  %v10458_v54 = vld [vmem:[#allocation9 + $0x36c] sm:$0xf0]  ;;  %v2589_v55 = vmax.f32 %v15466_v3, 0.0 }
 0x410   : > { %v2417_v63 = vadd.f32 %v2416_v27, %v2288_v28  ;;  %v2289_v10 = vpop.f32.mrf.mxu0  ;;  %v2040_v29 = vadd.f32 %v2039_v16, %v12218_v50  ;;  %v9524_v28 = vor.u32 %v10458_v54, %v9523_v51  ;;  %v9395_v16 = vld [vmem:[#allocation9 + $0x260] sm:$0xf]  ;;  %v15467_v51 = vld [vmem:[#allocation137_spill] sm:$0xff] }
 0x411   : > { %v2586_v43 = vmax.f32 %v2166_v23, 0.0  ;;  %v15465_v23 = vld [vmem:[#allocation136_spill] sm:$0xff]  ;;  %5731 = vmatpush.bf16.msrb.mxu1 %v9140_v15  ;;  %v2290_v8 = vadd.f32 %v2289_v10, %v12250_v56  ;;  %v9396_v26 = vor.u32 %v10426_v38, %v9395_v16  ;;  %v15469_v16 = vld [vmem:[#allocation138_spill] sm:$0xff] }
 0x412   : > { %2078 = vmatmul.bf16.gmra.mxu1 %v15463_v25  ;;  %v2566_v18 = vmax.f32 %v15465_v23, 0.0  ;;  %v2569_v57 = vmax.f32 %v2417_v63, 0.0  ;;  %5938 = vmatpush.bf16.msrb.mxu2 %v9524_v28 }
 0x413   : > { %v12351_v41 = vmax.f32 %v2583_v32, %v2586_v43  ;;  %9055 = vmatmul.msk.bf16.gmra.mxu3 %vm895_vm0, %v15464_v4  ;;  %5869 = vmatpush.bf16.msrb.mxu0 %v9396_v26 }
 0x414   : > { %v12357_v27 = vmax.f32 %v2566_v18, %v2569_v57  ;;  %v2572_v57 = vmax.f32 %v15467_v51, 0.0  ;;  %v15468_v18 = vld [vmem:[#allocation50_spill] sm:$0xff] }
 0x415   : > { %v2595_v28 = vmax.f32 %v15468_v18, 0.0 }
 0x416   : > { %v2168_v58 = vpop.f32.mrf.mxu3 }
 0x417   : > { %v2169_v32 = vadd.f32 %v2168_v58, %v2040_v29  ;;  %v2041_v43 = vpop.f32.mrf.mxu1  ;;  %v2418_v47 = vpop.f32.mrf.mxu2 }
 0x418   : > { %v2419_v23 = vadd.f32 %v2418_v47, %v2290_v8  ;;  %v2292_v63 = vpop.f32.mrf.mxu0  ;;  %v2042_v54 = vadd.f32 %v2041_v43, %v12218_v50 }
 0x419   : > { %v2592_v7 = vmax.f32 %v2169_v32, 0.0  ;;  %v2293_v38 = vadd.f32 %v2292_v63, %v12250_v56 }
 0x41a   : > { %v2575_v15 = vmax.f32 %v2419_v23, 0.0 }
 0x41b   : > { %v2841_v49 = vmax.f32 %v2589_v55, %v2592_v7  ;;  %2331 = vmatmul.bf16.gmra.mxu0 %v15457_v52  ;;  %v2578_v55 = vmax.f32 %v15469_v16, 0.0 }
 0x41c   : > { %v12365_v29 = vmax.f32 %v2572_v57, %v2575_v15  ;;  %9078 = vmatmul.msk.bf16.gmra.mxu2 %vm895_vm0, %v15458_v13  ;;  %v10729_v13 = vld [vmem:[#allocation2 + $0xb0] sm:$0xff]  ;;  %v10730_v15 = vld [vmem:[#allocation2 + $0x48] sm:$0xff] }
 0x41d   : > { %v2949_v10 = vmax.f32 %v12229_v35, %v2841_v49 }
 0x41e   : > { %v2170_v3 = vpop.f32.mrf.mxu3 }
 0x41f   : > { %3021 = vst [vmem:[#allocation2 + $0xd0] sm:$0xff] %v2949_v10  ;;  %v2171_v47 = vadd.f32 %v2170_v3, %v2042_v54  ;;  %v2044_v26 = vpop.f32.mrf.mxu1  ;;  %v2421_v58 = vpop.f32.mrf.mxu2  ;;  %v3098_v7 = vpack.c.bf16 %v2949_v10, %v10729_v13 }
 0x420   : > { %v2422_v35 = vadd.f32 %v2421_v58, %v2293_v38  ;;  %v2294_v32 = vpop.f32.mrf.mxu0  ;;  %v2045_v43 = vadd.f32 %v2044_v26, %v12218_v50 }
 0x421   : > { %v2598_v8 = vmax.f32 %v2171_v47, 0.0  ;;  %v2295_v51 = vadd.f32 %v2294_v32, %v12250_v56  ;;  %v15470_v47 = vld [vmem:[#allocation53_spill] sm:$0xff]  ;;  %v3300_v18 = vunpack.c.l.b16 %v3098_v7 }
 0x422   : > { %2083 = vmatmul.bf16.gmra.mxu1 %v15352_v46  ;;  %v2581_v23 = vmax.f32 %v2422_v35, 0.0  ;;  %v2601_v26 = vmax.f32 %v15470_v47, 0.0  ;;  %v3149_v47 = vld [vmem:[#allocation2 + $0x48] sm:$0xff] }
 0x423   : > { %v2844_v52 = vmax.f32 %v2595_v28, %v2598_v8  ;;  %9056 = vmatmul.msk.bf16.gmra.mxu3 %vm895_vm0, %v15353_v1  ;;  %v3301_v28 = vunpack.c.h.b16 %v3098_v7  ;;  %v3146_v7 = vld [vmem:[#allocation2 + $0xb0] sm:$0xfe] }
 0x424   : > { %v12377_v49 = vmax.f32 %v2578_v55, %v2581_v23  ;;  %v15473_v23 = vld [vmem:[#allocation139_spill] sm:$0xff] }
 0x425   : > { %v2952_v63 = vmax.f32 %v12240_v12, %v2844_v52 }
 0x426   : > { %v2173_v57 = vpop.f32.mrf.mxu3  ;;  %v3147_v13 = vld [vmem:[#allocation2 + $0xd0] sm:$0xfe] }
 0x427   : > { %3024 = vst [vmem:[#allocation2 + $0x120] sm:$0xff] %v2952_v63  ;;  %v3100_v54 = vpack.c.bf16 %v2952_v63, %v10730_v15  ;;  %v2174_v38 = vadd.f32 %v2173_v57, %v2045_v43  ;;  %v2046_v3 = vpop.f32.mrf.mxu1  ;;  %v2423_v35 = vpop.f32.mrf.mxu2  ;;  %v2584_v63 = vmax.f32 %v15473_v23, 0.0  ;;  %v15477_v23 = vld [vmem:[#allocation33_spill] sm:$0xff] }
 0x428   : > { %v2424_v16 = vadd.f32 %v2423_v35, %v2295_v51  ;;  %v2297_v12 = vpop.f32.mrf.mxu0  ;;  %v2047_v15 = vadd.f32 %v2046_v3, %v12218_v50  ;;  %v15476_v3 = vld [vmem:[#allocation56_spill] sm:$0xff] }
 0x429   : > { %v3303_v8 = vunpack.c.l.b16 %v3100_v54  ;;  %v3304_v58 = vunpack.c.h.b16 %v3100_v54  ;;  %v2604_v10 = vmax.f32 %v2174_v38, 0.0  ;;  %v2298_v51 = vadd.f32 %v2297_v12, %v12250_v56 }
 0x42a   : > { %v2587_v43 = vmax.f32 %v2424_v16, 0.0 }
 0x42b   : > { %v2847_v52 = vmax.f32 %v2601_v26, %v2604_v10  ;;  %v12381_v55 = vpack.c.b16 %v3303_v8, %v3300_v18  ;;  %v12383_v32 = vpack.c.b16 %v3304_v58, %v3301_v28  ;;  %2336 = vmatmul.bf16.gmra.mxu0 %v15463_v25  ;;  %v12394_v18 = vpack.c.bf16 %v3147_v13, %v3146_v7 }
 0x42c   : > { %v12389_v54 = vmax.f32 %v2584_v63, %v2587_v43  ;;  %9079 = vmatmul.msk.bf16.gmra.mxu2 %vm895_vm0, %v15464_v4  ;;  %v2607_v25 = vmax.f32 %v15476_v3, 0.0  ;;  %v2590_v63 = vmax.f32 %v15477_v23, 0.0  ;;  %v10731_v43 = vld [vmem:[#allocation2 + $0xf8] sm:$0xff]  ;;  %v10732_v3 = vld [vmem:[#allocation2 + $0x108] sm:$0xff] }
 0x42d   : > { %15471 = vst [vmem:[#allocation17_spill] sm:$0xff] %v12381_v55  ;;  %v2955_v57 = vmax.f32 %v12252_v30, %v2847_v52  ;;  %v3495_v12 = vunpack.c.h.b16 %v12394_v18 }
 0x42e   : > { %15472 = vst [vmem:[#allocation101_spill] sm:$0xff] %v12383_v32  ;;  %v2175_v38 = vpop.f32.mrf.mxu3  ;;  %v3150_v26 = vld [vmem:[#allocation2 + $0x120] sm:$0xff] }
 0x42f   : > { %15474 = vst [vmem:[#allocation103_spill] sm:$0xff] %v12394_v18  ;;  %v2176_v28 = vadd.f32 %v2175_v38, %v2047_v15  ;;  %v2049_v30 = vpop.f32.mrf.mxu1  ;;  %v12396_v8 = vpack.c.bf16 %v3150_v26, %v3149_v47  ;;  %v2426_v10 = vpop.f32.mrf.mxu2  ;;  %v3102_v15 = vpack.c.bf16 %v2955_v57, %v10731_v43 }
 0x430   : > { %3027 = vst [vmem:[#allocation2 + $0x100] sm:$0xff] %v2955_v57  ;;  %v2427_v35 = vadd.f32 %v2426_v10, %v2298_v51  ;;  %v2299_v16 = vpop.f32.mrf.mxu0  ;;  %v2050_v13 = vadd.f32 %v2049_v30, %v12218_v50  ;;  %v15478_v10 = vld [vmem:[#allocation59_spill] sm:$0xff] }
 0x431   : > { %15475 = vst [vmem:[#allocation105_spill] sm:$0xff] %v12396_v8  ;;  %v2610_v58 = vmax.f32 %v2176_v28, 0.0  ;;  %v3498_v4 = vunpack.c.h.b16 %v12396_v8  ;;  %v2300_v26 = vadd.f32 %v2299_v16, %v12250_v56  ;;  %v2613_v18 = vmax.f32 %v15478_v10, 0.0  ;;  %v3152_v10 = vld [vmem:[#allocation2 + $0xf8] sm:$0xff] }
 0x432   : > { %2088 = vmatmul.bf16.gmra.mxu1 %v15358_v42  ;;  %v2593_v7 = vmax.f32 %v2427_v35, 0.0  ;;  %v3306_v8 = vunpack.c.l.b16 %v3102_v15  ;;  %v3307_v57 = vunpack.c.h.b16 %v3102_v15 }
 0x433   : > { %v2850_v52 = vmax.f32 %v2607_v25, %v2610_v58  ;;  %9057 = vmatmul.msk.bf16.gmra.mxu3 %vm895_vm0, %v15359_v53  ;;  %v12406_v38 = vpack.c.b16 %v3498_v4, %v3495_v12 }
 0x434   : > { %v2842_v47 = vmax.f32 %v2590_v63, %v2593_v7 }
 0x435   : > { %v2958_v51 = vmax.f32 %v12263_v24, %v2850_v52 }
 0x436   : > { %v2178_v28 = vpop.f32.mrf.mxu3  ;;  %v2950_v23 = vmax.f32 %v12269_v20, %v2842_v47 }
 0x437   : > { %3030 = vst [vmem:[#allocation2 + $0xe8] sm:$0xff] %v2958_v51  ;;  %v3104_v25 = vpack.c.bf16 %v2958_v51, %v10732_v3  ;;  %v2179_v30 = vadd.f32 %v2178_v28, %v2050_v13  ;;  %v2051_v58 = vpop.f32.mrf.mxu1  ;;  %v2428_v12 = vpop.f32.mrf.mxu2  ;;  %v3153_v16 = vld [vmem:[#allocation2 + $0x100] sm:$0xff] }
 0x438   : > { %3022 = vst [vmem:[#allocation2 + $0x10] sm:$0xff] %v2950_v23  ;;  %v2429_v24 = vadd.f32 %v2428_v12, %v2300_v26  ;;  %v2302_v52 = vpop.f32.mrf.mxu0  ;;  %v15481_v13 = vld [vmem:[#allocation36_spill] sm:$0xff]  ;;  %v2052_v15 = vadd.f32 %v2051_v58, %v12218_v50  ;;  %v12420_v47 = vpack.c.bf16 %v3153_v16, %v3152_v10  ;;  %v15484_v58 = vld [vmem:[#allocation62_spill] sm:$0xff] }
 0x439   : > { %v2616_v35 = vmax.f32 %v2179_v30, 0.0  ;;  %v3309_v4 = vunpack.c.l.b16 %v3104_v25  ;;  %v3310_v43 = vunpack.c.h.b16 %v3104_v25  ;;  %v2596_v28 = vmax.f32 %v15481_v13, 0.0 }
 0x43a   : > { %v2599_v3 = vmax.f32 %v2429_v24, 0.0  ;;  %15482 = vst [vmem:[#allocation18_spill] sm:$0xff] %v12420_v47  ;;  %v2303_v25 = vadd.f32 %v2302_v52, %v12250_v56  ;;  %v15486_v24 = vld [vmem:[#allocation49_spill] sm:$0xff] }
 0x43b   : > { %v2853_v63 = vmax.f32 %v2613_v18, %v2616_v35  ;;  %v12412_v7 = vpack.c.b16 %v3309_v4, %v3306_v8  ;;  %v12414_v51 = vpack.c.b16 %v3310_v43, %v3307_v57  ;;  %2341 = vmatmul.bf16.gmra.mxu0 %v15352_v46  ;;  %v3155_v8 = vld [vmem:[#allocation2 + $0x108] sm:$0xff]  ;;  %v3099_v57 = vpack.c.bf16 %v2950_v23, %v2950_v23 }
 0x43c   : > { %v2845_v26 = vmax.f32 %v2596_v28, %v2599_v3  ;;  %9080 = vmatmul.msk.bf16.gmra.mxu2 %vm895_vm0, %v15353_v1  ;;  %v2619_v4 = vmax.f32 %v15484_v58, 0.0  ;;  %v15485_v46 = vld [vmem:[#allocation65_spill] sm:$0xff]  ;;  %v2602_v16 = vmax.f32 %v15486_v24, 0.0  ;;  %v9251_v28 = vld [vmem:[#allocation9 + $0x140] sm:$0xf]  ;;  %v3501_v3 = vunpack.c.h.b16 %v12420_v47 }
 0x43d   : > { %15479 = vst [vmem:[#allocation107_spill] sm:$0xff] %v12412_v7  ;;  %v2961_v20 = vmax.f32 %v12273_v60, %v2853_v63  ;;  %v10390_v1 = vld [vmem:[#allocation9 + $0x14c] sm:$0xf0]  ;;  %v3570_v23 = vshll.u32 %v12406_v38, 16  ;;  %v3302_v58 = vunpack.c.l.b16 %v3099_v57 }
 0x43e   : > { %15480 = vst [vmem:[#allocation109_spill] sm:$0xff] %v12414_v51  ;;  %v2180_v18 = vpop.f32.mrf.mxu3  ;;  %v3156_v30 = vld [vmem:[#allocation2 + $0xe8] sm:$0xff]  ;;  %v2953_v52 = vmax.f32 %v12278_v37, %v2845_v26  ;;  %v10733_v26 = vld [vmem:[#allocation2 + $0xc0] sm:$0xff] }
 0x43f   : > { %3033 = vst [vmem:[#allocation2 + $0x68] sm:$0xff] %v2961_v20  ;;  %v2181_v35 = vadd.f32 %v2180_v18, %v2052_v15  ;;  %v2054_v12 = vpop.f32.mrf.mxu1  ;;  %v12425_v60 = vpack.c.bf16 %v3156_v30, %v3155_v8  ;;  %v2431_v13 = vpop.f32.mrf.mxu2  ;;  %v9252_v8 = vor.u32 %v10390_v1, %v9251_v28  ;;  %v3572_v1 = vrot.slane %v3570_v23, 1 }
 0x440   : > { %3025 = vst [vmem:[#allocation2 + $0x38] sm:$0xff] %v2953_v52  ;;  %v3101_v10 = vpack.c.bf16 %v2953_v52, %v2953_v52  ;;  %v2432_v15 = vadd.f32 %v2431_v13, %v2303_v25  ;;  %v2304_v18 = vpop.f32.mrf.mxu0  ;;  %v2055_v37 = vadd.f32 %v2054_v12, %v12218_v50  ;;  %v9123_v25 = vld [vmem:[#allocation9 + $0x40] sm:$0xf]  ;;  %v10358_v52 = vld [vmem:[#allocation9 + $0x4c] sm:$0xf0] }
 0x441   : > { %15483 = vst [vmem:[#allocation112_spill] sm:$0xff] %v12425_v60  ;;  %v2622_v63 = vmax.f32 %v2181_v35, 0.0  ;;  %v3504_v30 = vunpack.c.h.b16 %v12425_v60  ;;  %v3106_v35 = vpack.c.bf16 %v2961_v20, %v10733_v26  ;;  %5801 = vmatpush.bf16.msrb.mxu3 %v9252_v8  ;;  %v2305_v57 = vadd.f32 %v2304_v18, %v12250_v56  ;;  %v10454_v12 = vld [vmem:[#allocation9 + $0x34c] sm:$0xf0] }
 0x442   : > { %2093 = vmatmul.bf16.gmra.mxu1 %v15364_v31  ;;  %v3305_v43 = vunpack.c.l.b16 %v3101_v10  ;;  %v2605_v47 = vmax.f32 %v2432_v15, 0.0  ;;  %v10734_v15 = vld [vmem:[#allocation2 + $0x20] sm:$0xff]  ;;  %v3568_v18 = vshrl.u32 %v12406_v38, 16 }
 0x443   : > { %v2856_v24 = vmax.f32 %v2619_v4, %v2622_v63  ;;  %9058 = vmatmul.msk.bf16.gmra.mxu3 %vm895_vm0, %v15365_v59  ;;  %v12438_v13 = vpack.c.b16 %v3504_v30, %v3501_v3  ;;  %v9124_v4 = vor.u32 %v10358_v52, %v9123_v25  ;;  %v9507_v63 = vld [vmem:[#allocation9 + $0x340] sm:$0xf]  ;;  %v3312_v26 = vunpack.c.l.b16 %v3106_v35 }
 0x444   : > { %v12442_v60 = vpack.c.b16 %v3305_v43, %v3302_v58  ;;  %v2848_v6 = vmax.f32 %v2602_v16, %v2605_v47  ;;  %v9508_v20 = vor.u32 %v10454_v12, %v9507_v63  ;;  %v3313_v16 = vunpack.c.h.b16 %v3106_v35 }
 0x445   : > { %v2964_v28 = vmax.f32 %v12285_v14, %v2856_v24  ;;  %v3575_v10 = vshll.u32 %v12438_v13, 16  ;;  %5732 = vmatpush.bf16.msrb.mxu1 %v9124_v4  ;;  %v9379_v14 = vld [vmem:[#allocation9 + $0x240] sm:$0xf]  ;;  %v10422_v24 = vld [vmem:[#allocation9 + $0x24c] sm:$0xf0]  ;;  %v15488_v4 = vmax.f32 %v15485_v46, 0.0 }
 0x446   : > { %15487 = vst [vmem:[#allocation114_spill] sm:$0xff] %v12442_v60  ;;  %v2183_v45 = vpop.f32.mrf.mxu3  ;;  %v2956_v23 = vmax.f32 %v12291_v2, %v2848_v6  ;;  %5939 = vmatpush.bf16.msrb.mxu2 %v9508_v20  ;;  %v9380_v43 = vor.u32 %v10422_v24, %v9379_v14  ;;  %v3159_v2 = vld [vmem:[#allocation2 + $0x68] sm:$0xff]  ;;  %v3158_v46 = vld [vmem:[#allocation2 + $0xc0] sm:$0xff] }
 0x447   : > { %3036 = vst [vmem:[#allocation2 + $0x18] sm:$0xff] %v2964_v28  ;;  %v3108_v8 = vpack.c.bf16 %v2964_v28, %v10734_v15  ;;  %v2184_v3 = vadd.f32 %v2183_v45, %v2055_v37  ;;  %v2056_v30 = vpop.f32.mrf.mxu1  ;;  %v12447_v47 = vrot.slane %v3575_v10, 1  ;;  %v2433_v25 = vpop.f32.mrf.mxu2  ;;  %v3573_v28 = vor.u32 %v3572_v1, %v3568_v18  ;;  %v15491_v20 = vld [vmem:[#allocation40_spill] sm:$0xff] }
 0x448   : > { %3028 = vst [vmem:[#allocation2 + $0x80] sm:$0xff] %v2956_v23  ;;  %v2434_v45 = vadd.f32 %v2433_v25, %v2305_v57  ;;  %v2307_v37 = vpop.f32.mrf.mxu0  ;;  %5870 = vmatpush.bf16.msrb.mxu0 %v9380_v43  ;;  %v2608_v10 = vmax.f32 %v15491_v20, 0.0  ;;  %v3161_v24 = vld [vmem:[#allocation2 + $0x20] sm:$0xff]  ;;  %v3103_v43 = vpack.c.bf16 %v2956_v23, %v2956_v23 }
 0x449   : > { %v2628_v58 = vmax.f32 %v2184_v3, 0.0  ;;  %v3315_v52 = vunpack.c.l.b16 %v3108_v8  ;;  %v3316_v63 = vunpack.c.h.b16 %v3108_v8  ;;  %v12458_v15 = vsel %vm3554_vm1, %v3573_v28, %v12447_v47 }
 0x44a   : > { %v2611_v35 = vmax.f32 %v2434_v45, 0.0  ;;  %15492 = vst [vmem:[#allocation118_spill] sm:$0xff] %v12458_v15  ;;  %v2057_v8 = vadd.f32 %v2056_v30, %v12218_v50  ;;  %v2308_v3 = vadd.f32 %v2307_v37, %v12250_v56  ;;  %v15493_v30 = vld [vmem:[#allocation68_spill] sm:$0xff]  ;;  %v15540_v15 = vld [vmem:[#allocation58_spill] sm:$0xff] }
 0x44b   : > { %v2859_v38 = vmax.f32 %v15488_v4, %v2628_v58  ;;  %v12451_v12 = vpack.c.b16 %v3315_v52, %v3312_v26  ;;  %v12453_v6 = vpack.c.b16 %v3316_v63, %v3313_v16  ;;  %2346 = vmatmul.bf16.gmra.mxu0 %v15358_v42  ;;  %v12466_v26 = vpack.c.bf16 %v3159_v2, %v3158_v46  ;;  %v15494_v4 = vld [vmem:[#allocation39_spill] sm:$0xff] }
 0x44c   : > { %v2851_v1 = vmax.f32 %v2608_v10, %v2611_v35  ;;  %9081 = vmatmul.msk.bf16.gmra.mxu2 %vm895_vm0, %v15359_v53  ;;  %v2631_v25 = vmax.f32 %v15493_v30, 0.0  ;;  %v3308_v2 = vunpack.c.l.b16 %v3103_v43  ;;  %v10735_v10 = vld [vmem:[#allocation2 + $0x90] sm:$0xff]  ;;  %v10736_v30 = vld [vmem:[#allocation2 + $0xd8] sm:$0xff] }
 0x44d   : > { %15489 = vst [vmem:[#allocation19_spill] sm:$0xff] %v12451_v12  ;;  %v2967_v57 = vmax.f32 %v12295_v9, %v2859_v38  ;;  %v3507_v28 = vunpack.c.h.b16 %v12466_v26  ;;  %v2614_v38 = vmax.f32 %v15494_v4, 0.0 }
 0x44e   : > { %15490 = vst [vmem:[#allocation116_spill] sm:$0xff] %v12453_v6  ;;  %v2185_v14 = vpop.f32.mrf.mxu3  ;;  %v3162_v18 = vld [vmem:[#allocation2 + $0x18] sm:$0xff]  ;;  %v2959_v42 = vmax.f32 %v12300_v11, %v2851_v1 }
 0x44f   : > { %3039 = vst [vmem:[#allocation2 + $0xa0] sm:$0xff] %v2967_v57  ;;  %v2186_v16 = vadd.f32 %v2185_v14, %v2057_v8  ;;  %v2059_v9 = vpop.f32.mrf.mxu1  ;;  %v12468_v58 = vpack.c.bf16 %v3162_v18, %v3161_v24  ;;  %v2436_v63 = vpop.f32.mrf.mxu2  ;;  %v3110_v35 = vpack.c.bf16 %v2967_v57, %v10735_v10 }
 0x450   : > { %3031 = vst [vmem:[#allocation2 + $0x28] sm:$0xff] %v2959_v42  ;;  %v3105_v45 = vpack.c.bf16 %v2959_v42, %v2959_v42  ;;  %v2437_v37 = vadd.f32 %v2436_v63, %v2308_v3  ;;  %v2309_v53 = vpop.f32.mrf.mxu0  ;;  %v2060_v11 = vadd.f32 %v2059_v9, %v12218_v50  ;;  %v15496_v9 = vld [vmem:[#allocation71_spill] sm:$0xff] }
 0x451   : > { %v2634_v52 = vmax.f32 %v2186_v16, 0.0  ;;  %v3510_v23 = vunpack.c.h.b16 %v12468_v58  ;;  %v2310_v24 = vadd.f32 %v2309_v53, %v12250_v56  ;;  %v2637_v42 = vmax.f32 %v15496_v9, 0.0 }
 0x452   : > { %2098 = vmatmul.bf16.gmra.mxu1 %v15370_v40  ;;  %v3311_v8 = vunpack.c.l.b16 %v3105_v45  ;;  %v2617_v46 = vmax.f32 %v2437_v37, 0.0  ;;  %v3318_v63 = vunpack.c.l.b16 %v3110_v35  ;;  %v3319_v53 = vunpack.c.h.b16 %v3110_v35 }
 0x453   : > { %v2862_v20 = vmax.f32 %v2631_v25, %v2634_v52  ;;  %9059 = vmatmul.msk.bf16.gmra.mxu3 %vm895_vm0, %v15371_v19  ;;  %v12479_v1 = vpack.c.b16 %v3510_v23, %v3507_v28 }
 0x454   : > { %v2854_v14 = vmax.f32 %v2614_v38, %v2617_v46  ;;  %v12483_v16 = vpack.c.b16 %v3311_v8, %v3308_v2 }
 0x455   : > { %v2970_v3 = vmax.f32 %v12307_v21, %v2862_v20  ;;  %v3603_v43 = vshll.u32 %v12479_v1, 16  ;;  %v3599_v21 = vshrl.u32 %v12438_v13, 16 }
 0x456   : > { %v2188_v18 = vpop.f32.mrf.mxu3  ;;  %15495 = vst [vmem:[#allocation120_spill] sm:$0xff] %v12483_v16  ;;  %v2962_v45 = vmax.f32 %v12313_v0, %v2854_v14  ;;  %v3165_v0 = vld [vmem:[#allocation2 + $0xa0] sm:$0xff] }
 0x457   : > { %3042 = vst [vmem:[#allocation2 + $0x40] sm:$0xff] %v2970_v3  ;;  %v3112_v25 = vpack.c.bf16 %v2970_v3, %v10736_v30  ;;  %v2189_v57 = vadd.f32 %v2188_v18, %v2060_v11  ;;  %v2061_v52 = vpop.f32.mrf.mxu1  ;;  %v12489_v37 = vrot.slane %v3603_v43, 1  ;;  %v2438_v23 = vpop.f32.mrf.mxu2  ;;  %v3601_v10 = vor.u32 %v3599_v21, %v12447_v47  ;;  %v15499_v3 = vld [vmem:[#allocation42_spill] sm:$0xff] }
 0x458   : > { %3034 = vst [vmem:[#allocation2 + $0x118] sm:$0xff] %v2962_v45  ;;  %v2439_v2 = vadd.f32 %v2438_v23, %v2310_v24  ;;  %v2312_v20 = vpop.f32.mrf.mxu0  ;;  %v2620_v13 = vmax.f32 %v15499_v3, 0.0  ;;  %v2062_v24 = vadd.f32 %v2061_v52, %v12218_v50  ;;  %v3164_v47 = vld [vmem:[#allocation2 + $0x90] sm:$0xff]  ;;  %v10960_v43 = vmov 0.0  }
 0x459   : > { %v2640_v28 = vmax.f32 %v2189_v57, 0.0  ;;  %v3321_v4 = vunpack.c.l.b16 %v3112_v25  ;;  %v3322_v38 = vunpack.c.h.b16 %v3112_v25  ;;  %v12499_v35 = vsel %vm3554_vm1, %v3601_v10, %v12489_v37  ;;  %3092 = vst [vmem:[#allocation2 + $0xa8] sm:$0xff] %v10960_v43  ;;  %v3167_v25 = vld [vmem:[#allocation2 + $0xd8] sm:$0xff] }
 0x45a   : > { %v2623_v14 = vmax.f32 %v2439_v2, 0.0  ;;  %15500 = vst [vmem:[#allocation20_spill] sm:$0xff] %v12499_v35 }
 0x45b   : > { %v2865_v8 = vmax.f32 %v2637_v42, %v2640_v28  ;;  %v12492_v11 = vpack.c.b16 %v3321_v4, %v3318_v63  ;;  %v12494_v46 = vpack.c.b16 %v3322_v38, %v3319_v53  ;;  %2351 = vmatmul.bf16.gmra.mxu0 %v15364_v31  ;;  %v2313_v42 = vadd.f32 %v2312_v20, %v12250_v56  ;;  %v15501_v28 = vld [vmem:[#allocation74_spill] sm:$0xff] }
 0x45c   : > { %v2857_v9 = vmax.f32 %v2620_v13, %v2623_v14  ;;  %9082 = vmatmul.msk.bf16.gmra.mxu2 %vm895_vm0, %v15365_v59  ;;  %v12507_v63 = vpack.c.bf16 %v3165_v0, %v3164_v47  ;;  %3093 = vst [vmem:[#allocation2] sm:$0xff] %v10960_v43  ;;  %v2643_v23 = vmax.f32 %v15501_v28, 0.0  ;;  %v10737_v14 = vld [vmem:[#allocation2 + $0x110] sm:$0xff] }
 0x45d   : > { %15497 = vst [vmem:[#allocation122_spill] sm:$0xff] %v12492_v11  ;;  %v2973_v18 = vmax.f32 %v12317_v62, %v2865_v8  ;;  %v3107_v62 = vpack.c.bf16 %v2962_v45, %v2962_v45  ;;  %v15502_v8 = vld [vmem:[#allocation55_spill] sm:$0xff] }
 0x45e   : > { %15498 = vst [vmem:[#allocation124_spill] sm:$0xff] %v12494_v46  ;;  %v2190_v30 = vpop.f32.mrf.mxu3  ;;  %v3168_v57 = vld [vmem:[#allocation2 + $0x40] sm:$0xff]  ;;  %v2965_v53 = vmax.f32 %v12322_v34, %v2857_v9  ;;  %v3513_v45 = vunpack.c.h.b16 %v12507_v63  ;;  %v2626_v0 = vmax.f32 %v15502_v8, 0.0 }
 0x45f   : > { %3045 = vst [vmem:[#allocation2 + $0x8] sm:$0xff] %v2973_v18  ;;  %v2191_v52 = vadd.f32 %v2190_v30, %v2062_v24  ;;  %v2064_v21 = vpop.f32.mrf.mxu1  ;;  %v12509_v31 = vpack.c.bf16 %v3168_v57, %v3167_v25  ;;  %v2441_v38 = vpop.f32.mrf.mxu2  ;;  %v3314_v3 = vunpack.c.l.b16 %v3107_v62  ;;  %v3114_v24 = vpack.c.bf16 %v2973_v18, %v10737_v14 }
 0x460   : > { %3094 = vst [vmem:[#allocation2 + $0x58] sm:$0xff] %v10960_v43  ;;  %v3109_v59 = vpack.c.bf16 %v2965_v53, %v2965_v53  ;;  %v2442_v2 = vadd.f32 %v2441_v38, %v2313_v42  ;;  %v2314_v20 = vpop.f32.mrf.mxu0  ;;  %v2065_v13 = vadd.f32 %v2064_v21, %v12218_v50 }
 0x461   : > { %v2646_v4 = vmax.f32 %v2191_v52, 0.0  ;;  %3095 = vst [vmem:[#allocation3 + $0x30] sm:$0xff] %v10960_v43  ;;  %v3516_v10 = vunpack.c.h.b16 %v12509_v31  ;;  %v2315_v57 = vadd.f32 %v2314_v20, %v12250_v56  ;;  %v3325_v20 = vunpack.c.h.b16 %v3114_v24 }
 0x462   : > { %3037 = vst [vmem:[#allocation2 + $0xc8] sm:$0xff] %v2965_v53  ;;  %2103 = vmatmul.bf16.gmra.mxu1 %v15376_v17  ;;  %v3317_v47 = vunpack.c.l.b16 %v3109_v59  ;;  %v2629_v9 = vmax.f32 %v2442_v2, 0.0  ;;  %v15504_v53 = vld [vmem:[#allocation77_spill] sm:$0xff] }
 0x463   : > { %v2868_v34 = vmax.f32 %v2643_v23, %v2646_v4  ;;  %9060 = vmatmul.msk.bf16.gmra.mxu3 %vm895_vm0, %v15377_v5  ;;  %3096 = vst [vmem:[#allocation3 + $0x48] sm:$0xff] %v10960_v43  ;;  %v12520_v42 = vpack.c.b16 %v3516_v10, %v3513_v45  ;;  %v2649_v28 = vmax.f32 %v15504_v53, 0.0  ;;  %v10738_v23 = vld [vmem:[#allocation2 + $0x60] sm:$0xff] }
 0x464   : > { %3097 = vst [vmem:[#allocation3 + $0x80] sm:$0xff] %v10960_v43  ;;  %v2860_v25 = vmax.f32 %v2626_v0, %v2629_v9  ;;  %v12524_v52 = vpack.c.b16 %v3317_v47, %v3314_v3  ;;  %v3324_v43 = vunpack.c.l.b16 %v3114_v24  ;;  %v10386_v24 = vld [vmem:[#allocation9 + $0x12c] sm:$0xf0] }
 0x465   : > { %v2976_v30 = vmax.f32 %v12329_v22, %v2868_v34  ;;  %v3627_v21 = vshll.u32 %v12520_v42, 16  ;;  %v3623_v22 = vshrl.u32 %v12479_v1, 16 }
 0x466   : > { %v2193_v62 = vpop.f32.mrf.mxu3  ;;  %15503 = vst [vmem:[#allocation21_spill] sm:$0xff] %v12524_v52  ;;  %v2968_v59 = vmax.f32 %v12335_v48, %v2860_v25  ;;  %v3171_v48 = vld [vmem:[#allocation2 + $0x8] sm:$0xff] }
 0x467   : > { %3048 = vst [vmem:[#allocation2 + $0x128] sm:$0xff] %v2976_v30  ;;  %v3116_v18 = vpack.c.bf16 %v2976_v30, %v10738_v23  ;;  %v2194_v4 = vadd.f32 %v2193_v62, %v2065_v13  ;;  %v2066_v38 = vpop.f32.mrf.mxu1  ;;  %v12530_v2 = vrot.slane %v3627_v21, 1  ;;  %v2443_v10 = vpop.f32.mrf.mxu2  ;;  %v3625_v14 = vor.u32 %v3623_v22, %v12489_v37  ;;  %v15507_v30 = vld [vmem:[#allocation46_spill] sm:$0xff]  ;;  %v9235_v62 = vld [vmem:[#allocation9 + $0x120] sm:$0xf] }
 0x468   : > { %3040 = vst [vmem:[#allocation2 + $0x88] sm:$0xff] %v2968_v59  ;;  %v2444_v3 = vadd.f32 %v2443_v10, %v2315_v57  ;;  %v2317_v34 = vpop.f32.mrf.mxu0  ;;  %v2632_v1 = vmax.f32 %v15507_v30, 0.0  ;;  %v2067_v53 = vadd.f32 %v2066_v38, %v12218_v50  ;;  %v9236_v37 = vor.u32 %v10386_v24, %v9235_v62  ;;  %v15510_v30 = vld [vmem:[#allocation45_spill] sm:$0xff]  ;;  %v10739_v24 = vld [vmem:[#allocation2 + $0xe0] sm:$0xff] }
 0x469   : > { %v2652_v45 = vmax.f32 %v2194_v4, 0.0  ;;  %v3327_v8 = vunpack.c.l.b16 %v3116_v18  ;;  %v3328_v0 = vunpack.c.h.b16 %v3116_v18  ;;  %v12540_v21 = vsel %vm3554_vm1, %v3625_v14, %v12530_v2 }
 0x46a   : > { %v2635_v25 = vmax.f32 %v2444_v3, 0.0  ;;  %15508 = vst [vmem:[#allocation26_spill] sm:$0xff] %v12540_v21  ;;  %v2318_v18 = vadd.f32 %v2317_v34, %v12250_v56  ;;  %5802 = vmatpush.bf16.msrb.mxu3 %v9236_v37 }
 0x46b   : > { %v2871_v47 = vmax.f32 %v2649_v28, %v2652_v45  ;;  %v12533_v13 = vpack.c.b16 %v3327_v8, %v3324_v43  ;;  %v12535_v9 = vpack.c.b16 %v3328_v0, %v3325_v20  ;;  %2356 = vmatmul.bf16.gmra.mxu0 %v15370_v40  ;;  %v3170_v28 = vld [vmem:[#allocation2 + $0x110] sm:$0xff]  ;;  %v3173_v43 = vld [vmem:[#allocation2 + $0x60] sm:$0xff]  ;;  %v3111_v45 = vpack.c.bf16 %v2968_v59, %v2968_v59 }
 0x46c   : > { %v2863_v23 = vmax.f32 %v2632_v1, %v2635_v25  ;;  %9083 = vmatmul.msk.bf16.gmra.mxu2 %vm895_vm0, %v15371_v19  ;;  %v12548_v20 = vpack.c.bf16 %v3171_v48, %v3170_v28  ;;  %v15509_v8 = vld [vmem:[#allocation80_spill] sm:$0xff]  ;;  %v2638_v1 = vmax.f32 %v15510_v30, 0.0 }
 0x46d   : > { %15505 = vst [vmem:[#allocation23_spill] sm:$0xff] %v12533_v13  ;;  %v2979_v57 = vmax.f32 %v12339_v44, %v2871_v47  ;;  %v2655_v0 = vmax.f32 %v15509_v8, 0.0  ;;  %v3320_v25 = vunpack.c.l.b16 %v3111_v45  ;;  %v9363_v45 = vld [vmem:[#allocation9 + $0x220] sm:$0xf] }
 0x46e   : > { %15506 = vst [vmem:[#allocation24_spill] sm:$0xff] %v12535_v9  ;;  %v2195_v4 = vpop.f32.mrf.mxu3  ;;  %v3174_v22 = vld [vmem:[#allocation2 + $0x128] sm:$0xff]  ;;  %v2971_v40 = vmax.f32 %v12344_v36, %v2863_v23  ;;  %v3519_v59 = vunpack.c.h.b16 %v12548_v20 }
 0x46f   : > { %3051 = vst [vmem:[#allocation2 + $0x50] sm:$0xff] %v2979_v57  ;;  %v2196_v44 = vadd.f32 %v2195_v4, %v2067_v53  ;;  %v2069_v10 = vpop.f32.mrf.mxu1  ;;  %v12550_v38 = vpack.c.bf16 %v3174_v22, %v3173_v43  ;;  %v2446_v34 = vpop.f32.mrf.mxu2  ;;  %v3118_v53 = vpack.c.bf16 %v2979_v57, %v10739_v24  ;;  %v9107_v23 = vld [vmem:[#allocation9 + $0x20] sm:$0xf]  ;;  %v10740_v57 = vld [vmem:[#allocation2 + $0xf0] sm:$0xff] }
 0x470   : > { %3043 = vst [vmem:[#allocation2 + $0xb8] sm:$0xff] %v2971_v40  ;;  %v3113_v14 = vpack.c.bf16 %v2971_v40, %v2971_v40  ;;  %v2447_v19 = vadd.f32 %v2446_v34, %v2318_v18  ;;  %v2319_v47 = vpop.f32.mrf.mxu0  ;;  %v2070_v36 = vadd.f32 %v2069_v10, %v12218_v50  ;;  %v10354_v18 = vld [vmem:[#allocation9 + $0x2c] sm:$0xf0] }
 0x471   : > { %v2658_v3 = vmax.f32 %v2196_v44, 0.0  ;;  %v3522_v48 = vunpack.c.h.b16 %v12550_v38  ;;  %v9108_v22 = vor.u32 %v10354_v18, %v9107_v23  ;;  %v9491_v44 = vld [vmem:[#allocation9 + $0x320] sm:$0xf]  ;;  %v10450_v40 = vld [vmem:[#allocation9 + $0x32c] sm:$0xf0]  ;;  %v2320_v10 = vadd.f32 %v2319_v47, %v12250_v56 }
 0x472   : > { %2108 = vmatmul.bf16.gmra.mxu1 %v15382_v61  ;;  %v3323_v37 = vunpack.c.l.b16 %v3113_v14  ;;  %v2641_v28 = vmax.f32 %v2447_v19, 0.0  ;;  %v10418_v34 = vld [vmem:[#allocation9 + $0x22c] sm:$0xf0]  ;;  %v3330_v24 = vunpack.c.l.b16 %v3118_v53  ;;  %v3331_v23 = vunpack.c.h.b16 %v3118_v53 }
 0x473   : > { %v2874_v62 = vmax.f32 %v2655_v0, %v2658_v3  ;;  %9061 = vmatmul.msk.bf16.gmra.mxu3 %vm895_vm0, %v15383_v39  ;;  %v12561_v4 = vpack.c.b16 %v3522_v48, %v3519_v59  ;;  %v9492_v3 = vor.u32 %v10450_v40, %v9491_v44  ;;  %5733 = vmatpush.bf16.msrb.mxu1 %v9108_v22  ;;  %v3647_v22 = vshrl.u32 %v12520_v42, 16 }
 0x474   : > { %v2866_v8 = vmax.f32 %v2638_v1, %v2641_v28  ;;  %v12565_v30 = vpack.c.b16 %v3323_v37, %v3320_v25  ;;  %v9364_v48 = vor.u32 %v10418_v34, %v9363_v45 }
 0x475   : > { %v2982_v43 = vmax.f32 %v12351_v41, %v2874_v62  ;;  %v15512_v41 = vld [vmem:[#allocation83_spill] sm:$0xff]  ;;  %5940 = vmatpush.bf16.msrb.mxu2 %v9492_v3  ;;  %v3651_v37 = vshll.u32 %v12561_v4, 16 }
 0x476   : > { %v2198_v0 = vpop.f32.mrf.mxu3  ;;  %15511 = vst [vmem:[#allocation127_spill] sm:$0xff] %v12565_v30  ;;  %v2661_v62 = vmax.f32 %v15512_v41, 0.0  ;;  %v2974_v1 = vmax.f32 %v12357_v27, %v2866_v8  ;;  %5871 = vmatpush.bf16.msrb.mxu0 %v9364_v48  ;;  %v3177_v44 = vld [vmem:[#allocation2 + $0x50] sm:$0xff]  ;;  %v3182_v27 = vld [vmem:[#allocation2 + $0xa8] sm:$0x1] }
 0x477   : > { %3054 = vst [vmem:[#allocation2 + $0x78] sm:$0xff] %v2982_v43  ;;  %v3120_v14 = vpack.c.bf16 %v2982_v43, %v10740_v57  ;;  %v2199_v19 = vadd.f32 %v2198_v0, %v2070_v36  ;;  %v2071_v59 = vpop.f32.mrf.mxu1  ;;  %v2448_v28 = vpop.f32.mrf.mxu2  ;;  %v3183_v8 = vld [vmem:[#allocation2] sm:$0x1]  ;;  %v15515_v0 = vld [vmem:[#allocation48_spill] sm:$0xff] }
 0x478   : > { %3046 = vst [vmem:[#allocation2 + $0x98] sm:$0xff] %v2974_v1  ;;  %v2449_v43 = vadd.f32 %v2448_v28, %v2320_v10  ;;  %v2322_v36 = vpop.f32.mrf.mxu0  ;;  %v2644_v3 = vmax.f32 %v15515_v0, 0.0  ;;  %v3176_v57 = vld [vmem:[#allocation2 + $0xe0] sm:$0xff]  ;;  %v2072_v10 = vadd.f32 %v2071_v59, %v12218_v50  ;;  %v15520_v0 = vld [vmem:[#allocation85_spill] sm:$0xff] }
 0x479   : > { %v2664_v47 = vmax.f32 %v2199_v19, 0.0  ;;  %v3333_v18 = vunpack.c.l.b16 %v3120_v14  ;;  %v3334_v25 = vunpack.c.h.b16 %v3120_v14  ;;  %v3649_v14 = vor.u32 %v3647_v22, %v12530_v2 }
 0x47a   : > { %v2647_v34 = vmax.f32 %v2449_v43, 0.0  ;;  %v3653_v19 = vrot.slane %v3651_v37, 1  ;;  %v12581_v42 = vpack.c.bf16 %v3177_v44, %v3176_v57  ;;  %v2323_v41 = vadd.f32 %v2322_v36, %v12250_v56  ;;  %v15519_v37 = vld [vmem:[#allocation86_spill] sm:$0xff] }
 0x47b   : > { %v12571_v40 = vmax.f32 %v2661_v62, %v2664_v47  ;;  %v12573_v45 = vpack.c.b16 %v3333_v18, %v3330_v24  ;;  %v12575_v53 = vpack.c.b16 %v3334_v25, %v3331_v23  ;;  %2361 = vmatmul.bf16.gmra.mxu0 %v15376_v17  ;;  %v3179_v24 = vld [vmem:[#allocation2 + $0xf0] sm:$0xff]  ;;  %v12586_v47 = vpack.c.bf16 %v3183_v8, %v3182_v27 }
 0x47c   : > { %15516 = vst [vmem:[#allocation22_spill] sm:$0xff] %v12581_v42  ;;  %v2869_v48 = vmax.f32 %v2644_v3, %v2647_v34  ;;  %9084 = vmatmul.msk.bf16.gmra.mxu2 %vm895_vm0, %v15377_v5  ;;  %v12589_v2 = vsel %vm3554_vm1, %v3649_v14, %v3653_v19  ;;  %v3115_v17 = vpack.c.bf16 %v2974_v1, %v2974_v1  ;;  %v2667_v43 = vmax.f32 %v15519_v37, 0.0  ;;  %v15521_v1 = vld [vmem:[#allocation76_spill] sm:$0xff] }
 0x47d   : > { %15513 = vst [vmem:[#allocation28_spill] sm:$0xff] %v12573_v45  ;;  %v3525_v5 = vunpack.c.h.b16 %v12581_v42  ;;  %v3531_v34 = vunpack.c.h.b16 %v12586_v47 }
 0x47e   : > { %15514 = vst [vmem:[#allocation27_spill] sm:$0xff] %v12575_v53  ;;  %v2200_v62 = vpop.f32.mrf.mxu3  ;;  %v3180_v23 = vld [vmem:[#allocation2 + $0x78] sm:$0xff]  ;;  %v2977_v25 = vmax.f32 %v12365_v29, %v2869_v48 }
 0x47f   : > { %15517 = vst [vmem:[#allocation129_spill] sm:$0xff] %v12586_v47  ;;  %v2201_v28 = vadd.f32 %v2200_v62, %v2072_v10  ;;  %v2074_v59 = vpop.f32.mrf.mxu1  ;;  %v12591_v18 = vpack.c.bf16 %v3180_v23, %v3179_v24  ;;  %v2451_v44 = vpop.f32.mrf.mxu2  ;;  %v15522_v10 = vld [vmem:[#allocation61_spill] sm:$0xff]  ;;  %v3326_v62 = vunpack.c.l.b16 %v3115_v17 }
 0x480   : > { %15518 = vst [vmem:[#allocation30_spill] sm:$0xff] %v12589_v2  ;;  %v3117_v27 = vpack.c.bf16 %v2977_v25, %v2977_v25  ;;  %v2452_v8 = vadd.f32 %v2451_v44, %v2323_v41  ;;  %v2324_v3 = vpop.f32.mrf.mxu0  ;;  %v2075_v29 = vadd.f32 %v2074_v59, %v12218_v50  ;;  %v2650_v48 = vmax.f32 %v15522_v10, 0.0 }
 0x481   : > { %v2670_v36 = vmax.f32 %v2201_v28, 0.0  ;;  %v3528_v22 = vunpack.c.h.b16 %v12591_v18  ;;  %3049 = vst [vmem:[#allocation2 + $0x130] sm:$0xff] %v2977_v25  ;;  %v3671_v41 = vshrl.u32 %v12561_v4, 16  ;;  %v3552_v25 = vpack.c.b16 %v3531_v34, %v3531_v34 }
 0x482   : > { %2113 = vmatmul.bf16.gmra.mxu1 %v15520_v0  ;;  %v3329_v24 = vunpack.c.l.b16 %v3117_v27  ;;  %v2653_v23 = vmax.f32 %v2452_v8, 0.0  ;;  %v2325_v44 = vadd.f32 %v2324_v3, %v12250_v56  ;;  %v15524_v27 = vld [vmem:[#allocation89_spill] sm:$0xff] }
 0x483   : > { %v12599_v57 = vmax.f32 %v2667_v43, %v2670_v36  ;;  %9062 = vmatmul.msk.bf16.gmra.mxu3 %vm895_vm0, %v15521_v1  ;;  %v3549_v14 = vpack.c.b16 %v3528_v22, %v3525_v5  ;;  %v3673_v21 = vor.u32 %v3671_v41, %v3653_v19  ;;  %v3699_v5 = vshll.u32 %v3552_v25, 16  ;;  %v15526_v19 = vld [vmem:[#allocation52_spill] sm:$0xff] }
 0x484   : > { %v2872_v37 = vmax.f32 %v2650_v48, %v2653_v23  ;;  %v12607_v36 = vpack.c.b16 %v3329_v24, %v3326_v62  ;;  %v2673_v8 = vmax.f32 %v15524_v27, 0.0  ;;  %v2656_v23 = vmax.f32 %v15526_v19, 0.0  ;;  %v9219_v25 = vld [vmem:[#allocation9 + $0x100] sm:$0xf] }
 0x485   : > { %v3675_v28 = vshll.u32 %v3549_v14, 16  ;;  %v3695_v17 = vshrl.u32 %v3549_v14, 16  ;;  %v3701_v24 = vrot.slane %v3699_v5, 1 }
 0x486   : > { %v2203_v43 = vpop.f32.mrf.mxu3  ;;  %15523 = vst [vmem:[#allocation131_spill] sm:$0xff] %v12607_v36  ;;  %v2980_v22 = vmax.f32 %v12377_v49, %v2872_v37 }
 0x487   : > { %v2204_v59 = vadd.f32 %v2203_v43, %v2075_v29  ;;  %v2076_v2 = vpop.f32.mrf.mxu1  ;;  %v3677_v35 = vrot.slane %v3675_v28, 1  ;;  %v2453_v4 = vpop.f32.mrf.mxu2  ;;  %v9091_v28 = vld [vmem:[#allocation9] sm:$0xf] }
 0x488   : > { %3052 = vst [vmem:[#allocation2 + $0x70] sm:$0xff] %v2980_v22  ;;  %v2454_v3 = vadd.f32 %v2453_v4, %v2325_v44  ;;  %v2327_v48 = vpop.f32.mrf.mxu0  ;;  %v2077_v14 = vadd.f32 %v2076_v2, %v12218_v50 }
 0x489   : > { %v2676_v10 = vmax.f32 %v2204_v59, 0.0  ;;  %v12612_v34 = vsel %vm3554_vm1, %v3673_v21, %v3677_v35  ;;  %v3697_v62 = vor.u32 %v3695_v17, %v3677_v35  ;;  %v10350_v21 = vld [vmem:[#allocation9 + $0xc] sm:$0xf0]  ;;  %v2328_v44 = vadd.f32 %v2327_v48, %v12250_v56 }
 0x48a   : > { %15525 = vst [vmem:[#allocation32_spill] sm:$0xff] %v12612_v34  ;;  %v2659_v41 = vmax.f32 %v2454_v3, 0.0  ;;  %v9092_v43 = vor.u32 %v10350_v21, %v9091_v28  ;;  %v10382_v59 = vld [vmem:[#allocation9 + $0x10c] sm:$0xf0] }
 0x48b   : > { %v12614_v29 = vmax.f32 %v2673_v8, %v2676_v10  ;;  %v12618_v49 = vsel %vm3554_vm1, %v3697_v62, %v3701_v24  ;;  %2366 = vmatmul.bf16.gmra.mxu0 %v15382_v61  ;;  %v9220_v27 = vor.u32 %v10382_v59, %v9219_v25  ;;  %v3119_v8 = vpack.c.bf16 %v2980_v22, %v2980_v22  ;;  %v15528_v61 = vld [vmem:[#allocation92_spill] sm:$0xff]  ;;  %v15529_v24 = vld [vmem:[#allocation91_spill] sm:$0xff] }
 0x48c   : > { %15527 = vst [vmem:[#allocation31_spill] sm:$0xff] %v12618_v49  ;;  %v2875_v37 = vmax.f32 %v2656_v23, %v2659_v41  ;;  %9085 = vmatmul.msk.bf16.gmra.mxu2 %vm895_vm0, %v15383_v39  ;;  %5734 = vmatpush.bf16.msrb.mxu1 %v9092_v43  ;;  %v2679_v10 = vmax.f32 %v15528_v61, 0.0  ;;  %v15530_v41 = vld [vmem:[#allocation82_spill] sm:$0xff] }
 0x48d   : > { %5803 = vmatpush.bf16.msrb.mxu3 %v9220_v27 }
 0x48e   : > { %v2205_v35 = vpop.f32.mrf.mxu3  ;;  %v2983_v2 = vmax.f32 %v12389_v54, %v2875_v37  ;;  %v15531_v54 = vld [vmem:[#allocation51_spill] sm:$0xff] }
 0x48f   : > { %v2206_v5 = vadd.f32 %v2205_v35, %v2077_v14  ;;  %v2079_v17 = vpop.f32.mrf.mxu1  ;;  %v2456_v3 = vpop.f32.mrf.mxu2  ;;  %v2662_v22 = vmax.f32 %v15531_v54, 0.0  ;;  %v3332_v14 = vunpack.c.l.b16 %v3119_v8  ;;  %v15534_v8 = vld [vmem:[#allocation54_spill] sm:$0xff] }
 0x490   : > { %3055 = vst [vmem:[#allocation2 + $0x30] sm:$0xff] %v2983_v2  ;;  %v3121_v48 = vpack.c.bf16 %v2983_v2, %v2983_v2  ;;  %v2457_v62 = vadd.f32 %v2456_v3, %v2328_v44  ;;  %v2329_v39 = vpop.f32.mrf.mxu0  ;;  %v2080_v23 = vadd.f32 %v2079_v17, %v12218_v50  ;;  %v2668_v3 = vmax.f32 %v15534_v8, 0.0  ;;  %v10414_v8 = vld [vmem:[#allocation9 + $0x20c] sm:$0xf0] }
 0x491   : > { %v2682_v4 = vmax.f32 %v2206_v5, 0.0  ;;  %v2330_v37 = vadd.f32 %v2329_v39, %v12250_v56  ;;  %v15533_v5 = vld [vmem:[#allocation94_spill] sm:$0xff] }
 0x492   : > { %2118 = vmatmul.bf16.gmra.mxu1 %v15529_v24  ;;  %v3335_v28 = vunpack.c.l.b16 %v3121_v48  ;;  %v2665_v21 = vmax.f32 %v2457_v62, 0.0  ;;  %v2685_v27 = vmax.f32 %v15533_v5, 0.0 }
 0x493   : > { %v12628_v19 = vmax.f32 %v2679_v10, %v2682_v4  ;;  %9063 = vmatmul.msk.bf16.gmra.mxu3 %vm895_vm0, %v15530_v41 }
 0x494   : > { %v12634_v25 = vmax.f32 %v2662_v22, %v2665_v21  ;;  %v12637_v35 = vpack.c.b16 %v3335_v28, %v3332_v14  ;;  %v9475_v22 = vld [vmem:[#allocation9 + $0x300] sm:$0xf]  ;;  %v10446_v14 = vld [vmem:[#allocation9 + $0x30c] sm:$0xf0] }
 0x496   : > { %v2208_v44 = vpop.f32.mrf.mxu3  ;;  %15532 = vst [vmem:[#allocation25_spill] sm:$0xff] %v12637_v35 }
 0x497   : > { %v2209_v43 = vadd.f32 %v2208_v44, %v2080_v23  ;;  %v2081_v59 = vpop.f32.mrf.mxu1  ;;  %v2458_v2 = vpop.f32.mrf.mxu2  ;;  %v15535_v44 = vld [vmem:[#allocation97_spill] sm:$0xff] }
 0x498   : > { %v2459_v61 = vadd.f32 %v2458_v2, %v2330_v37  ;;  %v2332_v10 = vpop.f32.mrf.mxu0  ;;  %v2082_v62 = vadd.f32 %v2081_v59, %v12218_v50  ;;  %v9476_v37 = vor.u32 %v10446_v14, %v9475_v22 }
 0x499   : > { %v2688_v17 = vmax.f32 %v2209_v43, 0.0  ;;  %v2333_v23 = vadd.f32 %v2332_v10, %v12250_v56  ;;  %v2691_v43 = vmax.f32 %v15535_v44, 0.0  ;;  %v15537_v10 = vld [vmem:[#allocation88_spill] sm:$0xff]  ;;  %v15539_v44 = vld [vmem:[#allocation99_spill] sm:$0xff] }
 0x49a   : > { %v2671_v48 = vmax.f32 %v2459_v61, 0.0  ;;  %5941 = vmatpush.bf16.msrb.mxu2 %v9476_v37 }
 0x49b   : > { %v12640_v4 = vmax.f32 %v2685_v27, %v2688_v17  ;;  %2371 = vmatmul.bf16.gmra.mxu0 %v15520_v0  ;;  %v15536_v0 = vld [vmem:[#allocation96_spill] sm:$0xff] }
 0x49c   : > { %v12645_v39 = vmax.f32 %v2668_v3, %v2671_v48  ;;  %9086 = vmatmul.msk.bf16.gmra.mxu2 %vm895_vm0, %v15521_v1  ;;  %v9347_v1 = vld [vmem:[#allocation9 + $0x200] sm:$0xf]  ;;  %v15538_v3 = vld [vmem:[#allocation67_spill] sm:$0xff] }
 0x49d   : > { %v2674_v48 = vmax.f32 %v15538_v3, 0.0  ;;  %v2680_v3 = vmax.f32 %v15540_v15, 0.0 }
 0x49e   : > { %v2210_v54 = vpop.f32.mrf.mxu3 }
 0x49f   : > { %v2211_v28 = vadd.f32 %v2210_v54, %v2082_v62  ;;  %v2084_v21 = vpop.f32.mrf.mxu1  ;;  %v2461_v27 = vpop.f32.mrf.mxu2  ;;  %v9348_v54 = vor.u32 %v10414_v8, %v9347_v1 }
 0x4a0   : > { %v2462_v59 = vadd.f32 %v2461_v27, %v2333_v23  ;;  %v2334_v17 = vpop.f32.mrf.mxu0  ;;  %v2085_v61 = vadd.f32 %v2084_v21, %v12218_v50 }
 0x4a1   : > { %v2694_v5 = vmax.f32 %v2211_v28, 0.0  ;;  %v2335_v23 = vadd.f32 %v2334_v17, %v12250_v56  ;;  %5872 = vmatpush.bf16.msrb.mxu0 %v9348_v54  ;;  %v15541_v54 = vld [vmem:[#allocation100_spill] sm:$0xff] }
 0x4a2   : > { %2123 = vmatmul.bf16.gmra.mxu1 %v15536_v0  ;;  %v2677_v62 = vmax.f32 %v2462_v59, 0.0 }
 0x4a3   : > { %v12652_v2 = vmax.f32 %v2691_v43, %v2694_v5  ;;  %9064 = vmatmul.msk.bf16.gmra.mxu3 %vm895_vm0, %v15537_v10  ;;  %v2697_v43 = vmax.f32 %v15539_v44, 0.0 }
 0x4a4   : > { %v12658_v22 = vmax.f32 %v2674_v48, %v2677_v62 }
 0x4a6   : > { %v2213_v14 = vpop.f32.mrf.mxu3 }
 0x4a7   : > { %v2214_v28 = vadd.f32 %v2213_v14, %v2085_v61  ;;  %v2086_v37 = vpop.f32.mrf.mxu1  ;;  %v2463_v5 = vpop.f32.mrf.mxu2 }
 0x4a8   : > { %v2464_v27 = vadd.f32 %v2463_v5, %v2335_v23  ;;  %v2337_v49 = vpop.f32.mrf.mxu0  ;;  %v2087_v1 = vadd.f32 %v2086_v37, %v12218_v50  ;;  %v2703_v23 = vmax.f32 %v15541_v54, 0.0 }
 0x4a9   : > { %v2700_v21 = vmax.f32 %v2214_v28, 0.0  ;;  %v2338_v61 = vadd.f32 %v2337_v49, %v12250_v56  ;;  %v15542_v49 = vld [vmem:[#allocation57_spill] sm:$0xff] }
 0x4aa   : > { %v2683_v59 = vmax.f32 %v2464_v27, 0.0 }
 0x4ab   : > { %v12662_v34 = vmax.f32 %v2697_v43, %v2700_v21  ;;  %2376 = vmatmul.bf16.gmra.mxu0 %v15529_v24  ;;  %v2686_v43 = vmax.f32 %v15542_v49, 0.0 }
 0x4ac   : > { %v12667_v17 = vmax.f32 %v2680_v3, %v2683_v59  ;;  %9087 = vmatmul.msk.bf16.gmra.mxu2 %vm895_vm0, %v15530_v41 }
 0x4ae   : > { %v2215_v8 = vpop.f32.mrf.mxu3 }
 0x4af   : > { %v2216_v48 = vadd.f32 %v2215_v8, %v2087_v1  ;;  %v2089_v62 = vpop.f32.mrf.mxu1  ;;  %v2466_v28 = vpop.f32.mrf.mxu2  ;;  %v15543_v1 = vld [vmem:[#allocation102_spill] sm:$0xff] }
 0x4b0   : > { %v2467_v15 = vadd.f32 %v2466_v28, %v2338_v61  ;;  %v2339_v37 = vpop.f32.mrf.mxu0  ;;  %v2090_v24 = vadd.f32 %v2089_v62, %v12218_v50  ;;  %v2709_v61 = vmax.f32 %v15543_v1, 0.0  ;;  %v15544_v62 = vld [vmem:[#allocation60_spill] sm:$0xff] }
 0x4b1   : > { %v2706_v14 = vmax.f32 %v2216_v48, 0.0  ;;  %v2340_v5 = vadd.f32 %v2339_v37, %v12250_v56  ;;  %v2692_v28 = vmax.f32 %v15544_v62, 0.0 }
 0x4b2   : > { %5735 = vmatmul.bf16.vlgmr.msrb.gmra.mxu1 %v12381_v55  ;;  %v2689_v21 = vmax.f32 %v2467_v15, 0.0 }
 0x4b3   : > { %v12674_v44 = vmax.f32 %v2703_v23, %v2706_v14  ;;  %5804 = vmatmul.bf16.vlgmr.msrb.gmra.mxu3 %v12383_v32 }
 0x4b4   : > { %v12679_v41 = vmax.f32 %v2686_v43, %v2689_v21 }
 0x4b6   : > { %v2218_v27 = vpop.f32.mrf.mxu3 }
 0x4b7   : > { %v2219_v3 = vadd.f32 %v2218_v27, %v2090_v24  ;;  %v2091_v59 = vpop.f32.mrf.mxu1  ;;  %v2468_v48 = vpop.f32.mrf.mxu2 }
 0x4b8   : > { %v2469_v54 = vadd.f32 %v2468_v48, %v2340_v5  ;;  %v2342_v23 = vpop.f32.mrf.mxu0  ;;  %v2092_v15 = vadd.f32 %v2091_v59, %v12218_v50  ;;  %v15545_v5 = vld [vmem:[#allocation104_spill] sm:$0xff] }
 0x4b9   : > { %v2712_v8 = vmax.f32 %v2219_v3, 0.0  ;;  %v2343_v37 = vadd.f32 %v2342_v23, %v12250_v56  ;;  %v2715_v27 = vmax.f32 %v15545_v5, 0.0 }
 0x4ba   : > { %v2695_v32 = vmax.f32 %v2469_v54, 0.0 }
 0x4bb   : > { %v12683_v14 = vmax.f32 %v2709_v61, %v2712_v8  ;;  %2381 = vmatmul.bf16.gmra.mxu0 %v15536_v0  ;;  %v15546_v0 = vld [vmem:[#allocation73_spill] sm:$0xff] }
 0x4bc   : > { %v12688_v49 = vmax.f32 %v2692_v28, %v2695_v32  ;;  %9088 = vmatmul.msk.bf16.gmra.mxu2 %vm895_vm0, %v15537_v10  ;;  %v2698_v48 = vmax.f32 %v15546_v0, 0.0 }
 0x4be   : > { %v2220_v24 = vpop.f32.mrf.mxu3 }
 0x4bf   : > { %v2221_v43 = vadd.f32 %v2220_v24, %v2092_v15  ;;  %v2094_v21 = vpop.f32.mrf.mxu1  ;;  %v2471_v1 = vpop.f32.mrf.mxu2 }
 0x4c0   : > { %v2472_v61 = vadd.f32 %v2471_v1, %v2343_v37  ;;  %v2344_v59 = vpop.f32.mrf.mxu0  ;;  %v2095_v32 = vadd.f32 %v2094_v21, %v12218_v50  ;;  %v15547_v37 = vld [vmem:[#allocation106_spill] sm:$0xff]  ;;  %v15548_v21 = vld [vmem:[#allocation64_spill] sm:$0xff] }
 0x4c1   : > { %v2718_v3 = vmax.f32 %v2221_v43, 0.0  ;;  %v2345_v23 = vadd.f32 %v2344_v59, %v12250_v56  ;;  %v2721_v24 = vmax.f32 %v15547_v37, 0.0 }
 0x4c2   : > { %5740 = vmatmul.bf16.gmra.mxu1 %v12412_v7  ;;  %v2701_v54 = vmax.f32 %v2472_v61, 0.0 }
 0x4c3   : > { %v12695_v8 = vmax.f32 %v2715_v27, %v2718_v3  ;;  %5809 = vmatmul.bf16.gmra.mxu3 %v12414_v51  ;;  %v2704_v51 = vmax.f32 %v15548_v21, 0.0  ;;  %v9715_v21 = vld [vmem:[#allocation9 + $0x4e0] sm:$0xf] }
 0x4c4   : > { %v12700_v10 = vmax.f32 %v2698_v48, %v2701_v54 }
 0x4c6   : > { %v2223_v62 = vpop.f32.mrf.mxu3 }
 0x4c7   : > { %v2224_v28 = vadd.f32 %v2223_v62, %v2095_v32  ;;  %v2096_v15 = vpop.f32.mrf.mxu1  ;;  %v2473_v5 = vpop.f32.mrf.mxu2  ;;  %v15549_v62 = vld [vmem:[#allocation108_spill] sm:$0xff] }
 0x4c8   : > { %v2474_v27 = vadd.f32 %v2473_v5, %v2345_v23  ;;  %v2347_v3 = vpop.f32.mrf.mxu0  ;;  %v2097_v61 = vadd.f32 %v2096_v15, %v12218_v50 }
 0x4c9   : > { %v2724_v43 = vmax.f32 %v2224_v28, 0.0  ;;  %v2348_v59 = vadd.f32 %v2347_v3, %v12250_v56  ;;  %v2727_v28 = vmax.f32 %v15549_v62, 0.0 }
 0x4ca   : > { %v2707_v7 = vmax.f32 %v2474_v27, 0.0 }
 0x4cb   : > { %v12704_v1 = vmax.f32 %v2721_v24, %v2724_v43  ;;  %5873 = vmatmul.bf16.vlgmr.msrb.gmra.mxu0 %v12442_v60  ;;  %v9843_v24 = vld [vmem:[#allocation9 + $0x5e0] sm:$0xf]  ;;  %v10538_v43 = vld [vmem:[#allocation9 + $0x5ec] sm:$0xf0] }
 0x4cc   : > { %v12709_v0 = vmax.f32 %v2704_v51, %v2707_v7  ;;  %v9844_v15 = vor.u32 %v10538_v43, %v9843_v24  ;;  %v10506_v60 = vld [vmem:[#allocation9 + $0x4ec] sm:$0xf0]  ;;  %v10099_v7 = vld [vmem:[#allocation9 + $0x7e0] sm:$0xf] }
 0x4ce   : > { %v2225_v32 = vpop.f32.mrf.mxu3  ;;  %6072 = vmatpush.bf16.msra.mxu3 %v9844_v15  ;;  %v15552_v15 = vld [vmem:[#allocation66_spill] sm:$0xff] }
 0x4cf   : > { %v2226_v48 = vadd.f32 %v2225_v32, %v2097_v61  ;;  %v2099_v54 = vpop.f32.mrf.mxu1  ;;  %v2476_v37 = vpop.f32.mrf.mxu2  ;;  %v9716_v61 = vor.u32 %v10506_v60, %v9715_v21  ;;  %v10602_v32 = vld [vmem:[#allocation9 + $0x7ec] sm:$0xf0] }
 0x4d0   : > { %v2477_v5 = vadd.f32 %v2476_v37, %v2348_v59  ;;  %v2349_v27 = vpop.f32.mrf.mxu0  ;;  %v2100_v3 = vadd.f32 %v2099_v54, %v12218_v50  ;;  %v10100_v59 = vor.u32 %v10602_v32, %v10099_v7  ;;  %v2716_v7 = vmax.f32 %v15552_v15, 0.0 }
 0x4d1   : > { %v2730_v23 = vmax.f32 %v2226_v48, 0.0  ;;  %v15550_v48 = vld [vmem:[#allocation63_spill] sm:$0xff]  ;;  %6003 = vmatpush.bf16.msra.mxu1 %v9716_v61  ;;  %v2350_v24 = vadd.f32 %v2349_v27, %v12250_v56 }
 0x4d2   : > { %5745 = vmatmul.bf16.gmra.mxu1 %v12451_v12  ;;  %v2710_v62 = vmax.f32 %v15550_v48, 0.0  ;;  %v2713_v55 = vmax.f32 %v2477_v5, 0.0  ;;  %6210 = vmatpush.bf16.msra.mxu2 %v10100_v59  ;;  %v15551_v12 = vld [vmem:[#allocation110_spill] sm:$0xff]  ;;  %v9971_v48 = vld [vmem:[#allocation9 + $0x6e0] sm:$0xf]  ;;  %v15553_v59 = vld [vmem:[#allocation111_spill] sm:$0xff] }
 0x4d3   : > { %v12714_v51 = vmax.f32 %v2727_v28, %v2730_v23  ;;  %5814 = vmatmul.bf16.gmra.mxu3 %v12453_v6  ;;  %v2733_v54 = vmax.f32 %v15551_v12, 0.0  ;;  %v10570_v5 = vld [vmem:[#allocation9 + $0x6ec] sm:$0xf0] }
 0x4d4   : > { %v12719_v37 = vmax.f32 %v2710_v62, %v2713_v55  ;;  %v9972_v55 = vor.u32 %v10570_v5, %v9971_v48  ;;  %v10741_v48 = vld [vmem:[#allocation3 + $0xa8] sm:$0xff] }
 0x4d6   : > { %v2228_v43 = vpop.f32.mrf.mxu3  ;;  %6141 = vmatpush.bf16.msra.mxu0 %v9972_v55 }
 0x4d7   : > { %v2229_v28 = vadd.f32 %v2228_v43, %v2100_v3  ;;  %v2101_v23 = vpop.f32.mrf.mxu1  ;;  %v2478_v6 = vpop.f32.mrf.mxu2 }
 0x4d8   : > { %v2479_v60 = vadd.f32 %v2478_v6, %v2350_v24  ;;  %v2352_v21 = vpop.f32.mrf.mxu0  ;;  %v2102_v27 = vadd.f32 %v2101_v23, %v12218_v50  ;;  %v2739_v24 = vmax.f32 %v15553_v59, 0.0 }
 0x4d9   : > { %v2736_v47 = vmax.f32 %v2229_v28, 0.0  ;;  %v2353_v12 = vadd.f32 %v2352_v21, %v12250_v56 }
 0x4da   : > { %v2719_v61 = vmax.f32 %v2479_v60, 0.0  ;;  %v15554_v60 = vld [vmem:[#allocation79_spill] sm:$0xff] }
 0x4db   : > { %v2913_v42 = vmax.f32 %v2733_v54, %v2736_v47  ;;  %5878 = vmatmul.bf16.gmra.mxu0 %v12483_v16  ;;  %v2722_v21 = vmax.f32 %v15554_v60, 0.0  ;;  %v10534_v16 = vld [vmem:[#allocation9 + $0x5cc] sm:$0xf0] }
 0x4dc   : > { %v12727_v3 = vmax.f32 %v2716_v7, %v2719_v61 }
 0x4dd   : > { %v2985_v32 = vmax.f32 %v12571_v40, %v2913_v42 }
 0x4de   : > { %v2230_v62 = vpop.f32.mrf.mxu3 }
 0x4df   : > { %3057 = vst [vmem:[#allocation3 + $0x130] sm:$0xff] %v2985_v32  ;;  %v2231_v6 = vadd.f32 %v2230_v62, %v2102_v27  ;;  %v2104_v47 = vpop.f32.mrf.mxu1  ;;  %v2481_v28 = vpop.f32.mrf.mxu2  ;;  %v3122_v5 = vpack.c.bf16 %v2985_v32, %v10741_v48 }
 0x4e0   : > { %v2482_v54 = vadd.f32 %v2481_v28, %v2353_v12  ;;  %v2354_v40 = vpop.f32.mrf.mxu0  ;;  %v2105_v23 = vadd.f32 %v2104_v47, %v12218_v50  ;;  %v10742_v12 = vld [vmem:[#allocation3 + $0x90] sm:$0xff] }
 0x4e1   : > { %v2742_v43 = vmax.f32 %v2231_v6, 0.0  ;;  %v2355_v55 = vadd.f32 %v2354_v40, %v12250_v56  ;;  %v15555_v47 = vld [vmem:[#allocation113_spill] sm:$0xff]  ;;  %v3397_v28 = vunpack.c.h.b16 %v3122_v5 }
 0x4e2   : > { %5750 = vmatmul.bf16.gmra.mxu1 %v12492_v11  ;;  %v2725_v15 = vmax.f32 %v2482_v54, 0.0  ;;  %v10502_v11 = vld [vmem:[#allocation9 + $0x4cc] sm:$0xf0] }
 0x4e3   : > { %v2916_v42 = vmax.f32 %v2739_v24, %v2742_v43  ;;  %5819 = vmatmul.bf16.gmra.mxu3 %v12494_v46  ;;  %v2745_v24 = vmax.f32 %v15555_v47, 0.0  ;;  %v3396_v43 = vunpack.c.l.b16 %v3122_v5  ;;  %v9699_v47 = vld [vmem:[#allocation9 + $0x4c0] sm:$0xf] }
 0x4e4   : > { %v12736_v61 = vmax.f32 %v2722_v21, %v2725_v15  ;;  %v9827_v15 = vld [vmem:[#allocation9 + $0x5c0] sm:$0xf] }
 0x4e5   : > { %v2988_v7 = vmax.f32 %v12599_v57, %v2916_v42 }
 0x4e6   : > { %v2233_v27 = vpop.f32.mrf.mxu3 }
 0x4e7   : > { %3060 = vst [vmem:[#allocation3 + $0xa0] sm:$0xff] %v2988_v7  ;;  %v3124_v62 = vpack.c.bf16 %v2988_v7, %v10742_v12  ;;  %v2234_v6 = vadd.f32 %v2233_v27, %v2105_v23  ;;  %v2106_v59 = vpop.f32.mrf.mxu1  ;;  %v2483_v54 = vpop.f32.mrf.mxu2  ;;  %v15558_v7 = vld [vmem:[#allocation70_spill] sm:$0xff]  ;;  %v9828_v12 = vor.u32 %v10534_v16, %v9827_v15 }
 0x4e8   : > { %v2484_v48 = vadd.f32 %v2483_v54, %v2355_v55  ;;  %v2357_v57 = vpop.f32.mrf.mxu0  ;;  %v2728_v23 = vmax.f32 %v15558_v7, 0.0  ;;  %v9700_v55 = vor.u32 %v10502_v11, %v9699_v47  ;;  %v10566_v11 = vld [vmem:[#allocation9 + $0x6cc] sm:$0xf0] }
 0x4e9   : > { %v3399_v60 = vunpack.c.l.b16 %v3124_v62  ;;  %v3400_v46 = vunpack.c.h.b16 %v3124_v62  ;;  %v2748_v32 = vmax.f32 %v2234_v6, 0.0  ;;  %v2107_v62 = vadd.f32 %v2106_v59, %v12218_v50  ;;  %v10598_v6 = vld [vmem:[#allocation9 + $0x7cc] sm:$0xf0]  ;;  %6073 = vmatpush.bf16.msra.mxu3 %v9828_v12  ;;  %v15560_v12 = vld [vmem:[#allocation69_spill] sm:$0xff] }
 0x4ea   : > { %v2731_v27 = vmax.f32 %v2484_v48, 0.0  ;;  %6004 = vmatpush.bf16.msra.mxu1 %v9700_v55  ;;  %v2734_v47 = vmax.f32 %v15560_v12, 0.0 }
 0x4eb   : > { %v12740_v42 = vpack.c.b16 %v3399_v60, %v3396_v43  ;;  %v12742_v21 = vpack.c.b16 %v3400_v46, %v3397_v28  ;;  %v2919_v40 = vmax.f32 %v2745_v24, %v2748_v32  ;;  %5883 = vmatmul.bf16.gmra.mxu0 %v12524_v52  ;;  %v10083_v46 = vld [vmem:[#allocation9 + $0x7c0] sm:$0xf]  ;;  %v2358_v43 = vadd.f32 %v2357_v57, %v12250_v56 }
 0x4ec   : > { %v12749_v24 = vmax.f32 %v2728_v23, %v2731_v27  ;;  %v10084_v16 = vor.u32 %v10598_v6, %v10083_v46 }
 0x4ed   : > { %15556 = vst [vmem:[#allocation132_spill] sm:$0xff] %v12740_v42  ;;  %v2991_v5 = vmax.f32 %v12614_v29, %v2919_v40  ;;  %5942 = vmatmul.bf16.vlgmr.msrb.gmra.mxu2 %v12740_v42  ;;  %v15559_v29 = vld [vmem:[#allocation115_spill] sm:$0xff]  ;;  %v9955_v40 = vld [vmem:[#allocation9 + $0x6c0] sm:$0xf] }
 0x4ee   : > { %15557 = vst [vmem:[#allocation35_spill] sm:$0xff] %v12742_v21  ;;  %v2235_v28 = vpop.f32.mrf.mxu3  ;;  %6211 = vmatpush.bf16.msra.mxu2 %v10084_v16  ;;  %v2751_v59 = vmax.f32 %v15559_v29, 0.0  ;;  %v9956_v23 = vor.u32 %v10566_v11, %v9955_v40 }
 0x4ef   : > { %3063 = vst [vmem:[#allocation3 + $0xe0] sm:$0xff] %v2991_v5  ;;  %v2236_v60 = vadd.f32 %v2235_v28, %v2107_v62  ;;  %v2109_v32 = vpop.f32.mrf.mxu1  ;;  %v2486_v48 = vpop.f32.mrf.mxu2  ;;  %v10743_v62 = vld [vmem:[#allocation3 + $0xe8] sm:$0xff] }
 0x4f0   : > { %v2487_v15 = vadd.f32 %v2486_v48, %v2358_v43  ;;  %v2359_v7 = vpop.f32.mrf.mxu0  ;;  %v2110_v27 = vadd.f32 %v2109_v32, %v12218_v50  ;;  %v3126_v55 = vpack.c.bf16 %v2991_v5, %v10743_v62  ;;  %6142 = vmatpush.bf16.msra.mxu0 %v9956_v23  ;;  %v15561_v32 = vld [vmem:[#allocation117_spill] sm:$0xff] }
 0x4f1   : > { %v2754_v54 = vmax.f32 %v2236_v60, 0.0  ;;  %v2360_v43 = vadd.f32 %v2359_v7, %v12250_v56  ;;  %v10744_v60 = vld [vmem:[#allocation3 + $0x8] sm:$0xff]  ;;  %v2757_v48 = vmax.f32 %v15561_v32, 0.0 }
 0x4f2   : > { %5755 = vmatmul.bf16.gmra.mxu1 %v12533_v13  ;;  %v2737_v46 = vmax.f32 %v2487_v15, 0.0  ;;  %v3402_v40 = vunpack.c.l.b16 %v3126_v55  ;;  %v3403_v12 = vunpack.c.h.b16 %v3126_v55 }
 0x4f3   : > { %v2922_v57 = vmax.f32 %v2751_v59, %v2754_v54  ;;  %5824 = vmatmul.bf16.gmra.mxu3 %v12535_v9 }
 0x4f4   : > { %v2914_v28 = vmax.f32 %v2734_v47, %v2737_v46 }
 0x4f5   : > { %v2994_v6 = vmax.f32 %v12628_v19, %v2922_v57 }
 0x4f6   : > { %v2238_v16 = vpop.f32.mrf.mxu3  ;;  %v2986_v11 = vmax.f32 %v12634_v25, %v2914_v28 }
 0x4f7   : > { %3066 = vst [vmem:[#allocation3 + $0x58] sm:$0xff] %v2994_v6  ;;  %v3128_v29 = vpack.c.bf16 %v2994_v6, %v10744_v60  ;;  %v2239_v59 = vadd.f32 %v2238_v16, %v2110_v27  ;;  %v2111_v54 = vpop.f32.mrf.mxu1  ;;  %v2488_v62 = vpop.f32.mrf.mxu2  ;;  %v15564_v27 = vld [vmem:[#allocation72_spill] sm:$0xff] }
 0x4f8   : > { %3058 = vst [vmem:[#allocation3 + $0x68] sm:$0xff] %v2986_v11  ;;  %v2489_v19 = vadd.f32 %v2488_v62, %v2360_v43  ;;  %v2362_v57 = vpop.f32.mrf.mxu0  ;;  %v2740_v6 = vmax.f32 %v15564_v27, 0.0  ;;  %v2112_v25 = vadd.f32 %v2111_v54, %v12218_v50  ;;  %v3123_v32 = vpack.c.bf16 %v2986_v11, %v2986_v11  ;;  %v10530_v54 = vld [vmem:[#allocation9 + $0x5ac] sm:$0xf0] }
 0x4f9   : > { %v3405_v5 = vunpack.c.l.b16 %v3128_v29  ;;  %v3406_v15 = vunpack.c.h.b16 %v3128_v29  ;;  %v2760_v23 = vmax.f32 %v2239_v59, 0.0  ;;  %v2363_v28 = vadd.f32 %v2362_v57, %v12250_v56 }
 0x4fa   : > { %v2743_v16 = vmax.f32 %v2489_v19, 0.0 }
 0x4fb   : > { %v12761_v7 = vpack.c.b16 %v3405_v5, %v3402_v40  ;;  %v12763_v47 = vpack.c.b16 %v3406_v15, %v3403_v12  ;;  %v2925_v46 = vmax.f32 %v2757_v48, %v2760_v23  ;;  %5888 = vmatmul.bf16.gmra.mxu0 %v12565_v30  ;;  %v15565_v40 = vld [vmem:[#allocation119_spill] sm:$0xff]  ;;  %v9811_v15 = vld [vmem:[#allocation9 + $0x5a0] sm:$0xf] }
 0x4fc   : > { %v2917_v55 = vmax.f32 %v2740_v6, %v2743_v16  ;;  %v2763_v12 = vmax.f32 %v15565_v40, 0.0  ;;  %v9812_v57 = vor.u32 %v10530_v54, %v9811_v15  ;;  %v10745_v16 = vld [vmem:[#allocation3 + $0x78] sm:$0xff]  ;;  %v9683_v15 = vld [vmem:[#allocation9 + $0x4a0] sm:$0xf] }
 0x4fd   : > { %15562 = vst [vmem:[#allocation133_spill] sm:$0xff] %v12761_v7  ;;  %v2997_v60 = vmax.f32 %v12640_v4, %v2925_v46  ;;  %5947 = vmatmul.bf16.gmra.mxu2 %v12761_v7  ;;  %v15566_v46 = vld [vmem:[#allocation75_spill] sm:$0xff] }
 0x4fe   : > { %15563 = vst [vmem:[#allocation38_spill] sm:$0xff] %v12763_v47  ;;  %v2240_v43 = vpop.f32.mrf.mxu3  ;;  %v2989_v48 = vmax.f32 %v12645_v39, %v2917_v55  ;;  %v2746_v27 = vmax.f32 %v15566_v46, 0.0  ;;  %v3398_v39 = vunpack.c.l.b16 %v3123_v32  ;;  %6074 = vmatpush.bf16.msra.mxu3 %v9812_v57 }
 0x4ff   : > { %3069 = vst [vmem:[#allocation3 + $0xf0] sm:$0xff] %v2997_v60  ;;  %v2241_v29 = vadd.f32 %v2240_v43, %v2112_v25  ;;  %v2114_v59 = vpop.f32.mrf.mxu1  ;;  %v2491_v4 = vpop.f32.mrf.mxu2  ;;  %v3130_v25 = vpack.c.bf16 %v2997_v60, %v10745_v16 }
 0x500   : > { %3061 = vst [vmem:[#allocation3 + $0xd8] sm:$0xff] %v2989_v48  ;;  %v3125_v23 = vpack.c.bf16 %v2989_v48, %v2989_v48  ;;  %v2492_v62 = vadd.f32 %v2491_v4, %v2363_v28  ;;  %v2364_v19 = vpop.f32.mrf.mxu0  ;;  %v2115_v11 = vadd.f32 %v2114_v59, %v12218_v50  ;;  %v10746_v59 = vld [vmem:[#allocation3 + $0x38] sm:$0xff] }
 0x501   : > { %v2766_v5 = vmax.f32 %v2241_v29, 0.0  ;;  %v2365_v40 = vadd.f32 %v2364_v19, %v12250_v56  ;;  %v3408_v16 = vunpack.c.l.b16 %v3130_v25 }
 0x502   : > { %5760 = vmatmul.bf16.gmra.mxu1 %v12573_v45  ;;  %v3401_v55 = vunpack.c.l.b16 %v3125_v23  ;;  %v2749_v43 = vmax.f32 %v2492_v62, 0.0  ;;  %v10594_v23 = vld [vmem:[#allocation9 + $0x7ac] sm:$0xf0]  ;;  %v15568_v62 = vld [vmem:[#allocation121_spill] sm:$0xff]  ;;  %v3238_v45 = vld [vmem:[#allocation3 + $0x108] sm:$0xff] }
 0x503   : > { %v2928_v6 = vmax.f32 %v2763_v12, %v2766_v5  ;;  %5829 = vmatmul.bf16.gmra.mxu3 %v12575_v53  ;;  %v10498_v12 = vld [vmem:[#allocation9 + $0x4ac] sm:$0xf0]  ;;  %v10067_v5 = vld [vmem:[#allocation9 + $0x7a0] sm:$0xf]  ;;  %v2769_v57 = vmax.f32 %v15568_v62, 0.0 }
 0x504   : > { %v12778_v28 = vpack.c.b16 %v3401_v55, %v3398_v39  ;;  %v2920_v48 = vmax.f32 %v2746_v27, %v2749_v43  ;;  %v9684_v60 = vor.u32 %v10498_v12, %v9683_v15  ;;  %v3409_v27 = vunpack.c.h.b16 %v3130_v25  ;;  %v9939_v15 = vld [vmem:[#allocation9 + $0x6a0] sm:$0xf]  ;;  %v10562_v12 = vld [vmem:[#allocation9 + $0x6ac] sm:$0xf0] }
 0x505   : > { %v3000_v29 = vmax.f32 %v12652_v2, %v2928_v6  ;;  %v10068_v6 = vor.u32 %v10594_v23, %v10067_v5  ;;  %v9940_v25 = vor.u32 %v10562_v12, %v9939_v15 }
 0x506   : > { %15567 = vst [vmem:[#allocation37_spill] sm:$0xff] %v12778_v28  ;;  %v2243_v4 = vpop.f32.mrf.mxu3  ;;  %v2992_v2 = vmax.f32 %v12658_v22, %v2920_v48  ;;  %6005 = vmatpush.bf16.msra.mxu1 %v9684_v60 }
 0x507   : > { %3072 = vst [vmem:[#allocation3 + $0x28] sm:$0xff] %v3000_v29  ;;  %v3132_v54 = vpack.c.bf16 %v3000_v29, %v10746_v59  ;;  %v2244_v32 = vadd.f32 %v2243_v4, %v2115_v11  ;;  %v2116_v46 = vpop.f32.mrf.mxu1  ;;  %v2493_v43 = vpop.f32.mrf.mxu2  ;;  %6212 = vmatpush.bf16.msra.mxu2 %v10068_v6  ;;  %v15571_v59 = vld [vmem:[#allocation78_spill] sm:$0xff]  ;;  %6143 = vmatpush.bf16.msra.mxu0 %v9940_v25 }
 0x508   : > { %3064 = vst [vmem:[#allocation3 + $0xb8] sm:$0xff] %v2992_v2  ;;  %v2494_v53 = vadd.f32 %v2493_v43, %v2365_v40  ;;  %v2367_v30 = vpop.f32.mrf.mxu0  ;;  %v2752_v22 = vmax.f32 %v15571_v59, 0.0 }
 0x509   : > { %v3411_v39 = vunpack.c.l.b16 %v3132_v54  ;;  %v3412_v19 = vunpack.c.h.b16 %v3132_v54  ;;  %v2772_v55 = vmax.f32 %v2244_v32, 0.0  ;;  %v2117_v54 = vadd.f32 %v2116_v46, %v12218_v50 }
 0x50a   : > { %v2755_v48 = vmax.f32 %v2494_v53, 0.0  ;;  %v2368_v32 = vadd.f32 %v2367_v30, %v12250_v56  ;;  %v2758_v30 = vmax.f32 %v12150_v33, 0.0  ;;  %v10748_v33 = vld [vmem:[#allocation3 + $0x110] sm:$0xff] }
 0x50b   : > { %v12783_v11 = vpack.c.b16 %v3411_v39, %v3408_v16  ;;  %v12785_v29 = vpack.c.b16 %v3412_v19, %v3409_v27  ;;  %v2931_v4 = vmax.f32 %v2769_v57, %v2772_v55  ;;  %5893 = vmatmul.bf16.gmra.mxu0 %v12607_v36  ;;  %v3127_v57 = vpack.c.bf16 %v2992_v2, %v2992_v2  ;;  %v15572_v16 = vld [vmem:[#allocation123_spill] sm:$0xff] }
 0x50c   : > { %v2923_v40 = vmax.f32 %v2752_v22, %v2755_v48  ;;  %v2775_v6 = vmax.f32 %v15572_v16, 0.0  ;;  %v9397_v36 = vld [vmem:[#allocation9 + $0x270] sm:$0xf0] }
 0x50d   : > { %15569 = vst [vmem:[#allocation29_spill] sm:$0xff] %v12783_v11  ;;  %v3003_v5 = vmax.f32 %v12662_v34, %v2931_v4  ;;  %5952 = vmatmul.bf16.gmra.mxu2 %v12783_v11  ;;  %v3404_v2 = vunpack.c.l.b16 %v3127_v57  ;;  %v10747_v4 = vld [vmem:[#allocation3 + $0x128] sm:$0xff] }
 0x50e   : > { %15570 = vst [vmem:[#allocation134_spill] sm:$0xff] %v12785_v29  ;;  %v2245_v60 = vpop.f32.mrf.mxu3  ;;  %v2995_v53 = vmax.f32 %v12667_v17, %v2923_v40 }
 0x50f   : > { %3075 = vst [vmem:[#allocation3 + $0xd0] sm:$0xff] %v3003_v5  ;;  %v2246_v23 = vadd.f32 %v2245_v60, %v2117_v54  ;;  %v2119_v62 = vpop.f32.mrf.mxu1  ;;  %v2496_v27 = vpop.f32.mrf.mxu2  ;;  %v3134_v17 = vpack.c.bf16 %v3003_v5, %v10747_v4 }
 0x510   : > { %3067 = vst [vmem:[#allocation3 + $0xc0] sm:$0xff] %v2995_v53  ;;  %v3129_v46 = vpack.c.bf16 %v2995_v53, %v2995_v53  ;;  %v2497_v39 = vadd.f32 %v2496_v27, %v2368_v32  ;;  %v2369_v19 = vpop.f32.mrf.mxu0  ;;  %v2120_v43 = vadd.f32 %v2119_v62, %v12218_v50 }
 0x511   : > { %v2778_v34 = vmax.f32 %v2246_v23, 0.0  ;;  %v2370_v25 = vadd.f32 %v2369_v19, %v12250_v56  ;;  %v15574_v23 = vld [vmem:[#allocation125_spill] sm:$0xff]  ;;  %v3414_v57 = vunpack.c.l.b16 %v3134_v17  ;;  %v3415_v53 = vunpack.c.h.b16 %v3134_v17  ;;  %v10494_v17 = vld [vmem:[#allocation9 + $0x48c] sm:$0xf0] }
 0x512   : > { %5765 = vmatmul.bf16.gmra.mxu1 %v12740_v42  ;;  %v3407_v15 = vunpack.c.l.b16 %v3129_v46  ;;  %v2761_v12 = vmax.f32 %v2497_v39, 0.0  ;;  %v2781_v62 = vmax.f32 %v15574_v23, 0.0 }
 0x513   : > { %v2934_v55 = vmax.f32 %v2775_v6, %v2778_v34  ;;  %5834 = vmatmul.bf16.gmra.mxu3 %v12742_v21 }
 0x514   : > { %v12800_v22 = vpack.c.b16 %v3407_v15, %v3404_v2  ;;  %v2926_v48 = vmax.f32 %v2758_v30, %v2761_v12  ;;  %v15577_v2 = vld [vmem:[#allocation81_spill] sm:$0xff] }
 0x515   : > { %v3006_v59 = vmax.f32 %v12674_v44, %v2934_v55  ;;  %v9795_v55 = vld [vmem:[#allocation9 + $0x580] sm:$0xf]  ;;  %v2764_v4 = vmax.f32 %v15577_v2, 0.0 }
 0x516   : > { %15573 = vst [vmem:[#allocation41_spill] sm:$0xff] %v12800_v22  ;;  %v2248_v54 = vpop.f32.mrf.mxu3  ;;  %v2998_v5 = vmax.f32 %v12679_v41, %v2926_v48  ;;  %v9667_v41 = vld [vmem:[#allocation9 + $0x480] sm:$0xf] }
 0x517   : > { %3078 = vst [vmem:[#allocation3 + $0xf8] sm:$0xff] %v3006_v59  ;;  %v3136_v40 = vpack.c.bf16 %v3006_v59, %v10748_v33  ;;  %v2249_v32 = vadd.f32 %v2248_v54, %v2120_v43  ;;  %v2121_v60 = vpop.f32.mrf.mxu1  ;;  %v2498_v34 = vpop.f32.mrf.mxu2  ;;  %v10526_v43 = vld [vmem:[#allocation9 + $0x58c] sm:$0xf0]  ;;  %v10051_v54 = vld [vmem:[#allocation9 + $0x780] sm:$0xf] }
 0x518   : > { %3070 = vst [vmem:[#allocation3] sm:$0xff] %v2998_v5  ;;  %v2499_v27 = vadd.f32 %v2498_v34, %v2370_v25  ;;  %v2372_v46 = vpop.f32.mrf.mxu0  ;;  %v9796_v12 = vor.u32 %v10526_v43, %v9795_v55  ;;  %v2122_v48 = vadd.f32 %v2121_v60, %v12218_v50  ;;  %v9668_v25 = vor.u32 %v10494_v17, %v9667_v41  ;;  %v10590_v33 = vld [vmem:[#allocation9 + $0x78c] sm:$0xf0] }
 0x519   : > { %v3417_v16 = vunpack.c.l.b16 %v3136_v40  ;;  %v3418_v6 = vunpack.c.h.b16 %v3136_v40  ;;  %v2784_v44 = vmax.f32 %v2249_v32, 0.0  ;;  %v9923_v40 = vld [vmem:[#allocation9 + $0x680] sm:$0xf]  ;;  %v2373_v23 = vadd.f32 %v2372_v46, %v12250_v56  ;;  %v15578_v34 = vld [vmem:[#allocation126_spill] sm:$0xff] }
 0x51a   : > { %v2767_v15 = vmax.f32 %v2499_v27, 0.0  ;;  %6075 = vmatpush.bf16.msra.mxu3 %v9796_v12  ;;  %6006 = vmatpush.bf16.msra.mxu1 %v9668_v25  ;;  %v2787_v27 = vmax.f32 %v15578_v34, 0.0 }
 0x51b   : > { %v12805_v39 = vpack.c.b16 %v3417_v16, %v3414_v57  ;;  %v12807_v19 = vpack.c.b16 %v3418_v6, %v3415_v53  ;;  %v2937_v30 = vmax.f32 %v2781_v62, %v2784_v44  ;;  %5898 = vmatmul.bf16.gmra.mxu0 %v12637_v35  ;;  %v10052_v57 = vor.u32 %v10590_v33, %v10051_v54  ;;  %v10558_v53 = vld [vmem:[#allocation9 + $0x68c] sm:$0xf0] }
 0x51c   : > { %v2929_v32 = vmax.f32 %v2764_v4, %v2767_v15  ;;  %v9924_v60 = vor.u32 %v10558_v53, %v9923_v40  ;;  %v3131_v6 = vpack.c.bf16 %v2998_v5, %v2998_v5  ;;  %v15579_v4 = vld [vmem:[#allocation84_spill] sm:$0xff]  ;;  %v10749_v5 = vld [vmem:[#allocation3 + $0x20] sm:$0xff] }
 0x51d   : > { %15575 = vst [vmem:[#allocation135_spill] sm:$0xff] %v12805_v39  ;;  %v3009_v59 = vmax.f32 %v12683_v14, %v2937_v30  ;;  %5957 = vmatmul.bf16.gmra.mxu2 %v12805_v39  ;;  %v2770_v15 = vmax.f32 %v15579_v4, 0.0 }
 0x51e   : > { %15576 = vst [vmem:[#allocation44_spill] sm:$0xff] %v12807_v19  ;;  %v2250_v62 = vpop.f32.mrf.mxu3  ;;  %v3001_v44 = vmax.f32 %v12688_v49, %v2929_v32  ;;  %6213 = vmatpush.bf16.msra.mxu2 %v10052_v57  ;;  %6144 = vmatpush.bf16.msra.mxu0 %v9924_v60  ;;  %v3410_v49 = vunpack.c.l.b16 %v3131_v6 }
 0x51f   : > { %3081 = vst [vmem:[#allocation3 + $0x70] sm:$0xff] %v3009_v59  ;;  %v2251_v16 = vadd.f32 %v2250_v62, %v2122_v48  ;;  %v2124_v14 = vpop.f32.mrf.mxu1  ;;  %v2501_v55 = vpop.f32.mrf.mxu2  ;;  %v3138_v17 = vpack.c.bf16 %v3009_v59, %v10749_v5  ;;  %v10750_v62 = vld [vmem:[#allocation3 + $0x108] sm:$0xff]  ;;  %v10522_v5 = vld [vmem:[#allocation9 + $0x56c] sm:$0xf0] }
 0x520   : > { %3073 = vst [vmem:[#allocation3 + $0xb0] sm:$0xff] %v3001_v44  ;;  %v3133_v46 = vpack.c.bf16 %v3001_v44, %v3001_v44  ;;  %v2502_v43 = vadd.f32 %v2501_v55, %v2373_v23  ;;  %v2374_v2 = vpop.f32.mrf.mxu0  ;;  %v2125_v41 = vadd.f32 %v2124_v14, %v12218_v50  ;;  %v15581_v14 = vld [vmem:[#allocation128_spill] sm:$0xff] }
 0x521   : > { %v2790_v30 = vmax.f32 %v2251_v16, 0.0  ;;  %v2375_v32 = vadd.f32 %v2374_v2, %v12250_v56  ;;  %v2793_v60 = vmax.f32 %v15581_v14, 0.0  ;;  %v3420_v6 = vunpack.c.l.b16 %v3138_v17 }
 0x522   : > { %5770 = vmatmul.bf16.gmra.mxu1 %v12761_v7  ;;  %v3413_v48 = vunpack.c.l.b16 %v3133_v46  ;;  %v2773_v25 = vmax.f32 %v2502_v43, 0.0  ;;  %v3421_v44 = vunpack.c.h.b16 %v3138_v17 }
 0x523   : > { %v2940_v12 = vmax.f32 %v2787_v27, %v2790_v30  ;;  %5839 = vmatmul.bf16.gmra.mxu3 %v12763_v47 }
 0x524   : > { %v12822_v33 = vpack.c.b16 %v3413_v48, %v3410_v49  ;;  %v2932_v40 = vmax.f32 %v2770_v15, %v2773_v25  ;;  %v15584_v15 = vld [vmem:[#allocation87_spill] sm:$0xff]  ;;  %v9779_v49 = vld [vmem:[#allocation9 + $0x560] sm:$0xf] }
 0x525   : > { %v3012_v54 = vmax.f32 %v12695_v8, %v2940_v12  ;;  %v2776_v12 = vmax.f32 %v15584_v15, 0.0  ;;  %v9780_v48 = vor.u32 %v10522_v5, %v9779_v49 }
 0x526   : > { %15580 = vst [vmem:[#allocation43_spill] sm:$0xff] %v12822_v33  ;;  %v2253_v23 = vpop.f32.mrf.mxu3  ;;  %v3004_v59 = vmax.f32 %v12700_v10, %v2932_v40  ;;  %v3236_v52 = vld [vmem:[#allocation3 + $0x70] sm:$0xff] }
 0x527   : > { %3084 = vst [vmem:[#allocation3 + $0xc8] sm:$0xff] %v3012_v54  ;;  %v3140_v57 = vpack.c.bf16 %v3012_v54, %v10750_v62  ;;  %v2254_v53 = vadd.f32 %v2253_v23, %v2125_v41  ;;  %v2126_v16 = vpop.f32.mrf.mxu1  ;;  %v2503_v30 = vpop.f32.mrf.mxu2  ;;  %6076 = vmatpush.bf16.msra.mxu3 %v9780_v48  ;;  %v9651_v48 = vld [vmem:[#allocation9 + $0x460] sm:$0xf] }
 0x528   : > { %3076 = vst [vmem:[#allocation3 + $0x120] sm:$0xff] %v3004_v59  ;;  %v2504_v55 = vadd.f32 %v2503_v30, %v2375_v32  ;;  %v2377_v46 = vpop.f32.mrf.mxu0  ;;  %v2127_v17 = vadd.f32 %v2126_v16, %v12218_v50  ;;  %v4277_v32 = vld [vmem:[#allocation10] sm:$0xf] }
 0x529   : > { %v3423_v34 = vunpack.c.l.b16 %v3140_v57  ;;  %v3424_v27 = vunpack.c.h.b16 %v3140_v57  ;;  %v2796_v8 = vmax.f32 %v2254_v53, 0.0  ;;  %v2378_v54 = vadd.f32 %v2377_v46, %v12250_v56 }
 0x52a   : > { %v2779_v41 = vmax.f32 %v2504_v55, 0.0  ;;  %v3135_v57 = vpack.c.bf16 %v3004_v59, %v3004_v59  ;;  %v12839_v16 = vperm.slane %v4277_v32, 0  ;;  %v10751_v55 = vld [vmem:[#allocation3 + $0x88] sm:$0xff] }
 0x52b   : > { %v12827_v43 = vpack.c.b16 %v3423_v34, %v3420_v6  ;;  %v12829_v2 = vpack.c.b16 %v3424_v27, %v3421_v44  ;;  %v2943_v4 = vmax.f32 %v2793_v60, %v2796_v8  ;;  %5903 = vmatmul.bf16.gmra.mxu0 %v12778_v28  ;;  %v15586_v27 = vld [vmem:[#allocation90_spill] sm:$0xff] }
 0x52c   : > { %v2935_v25 = vmax.f32 %v2776_v12, %v2779_v41  ;;  %v2782_v8 = vmax.f32 %v15586_v27, 0.0  ;;  %v3416_v59 = vunpack.c.l.b16 %v3135_v57 }
 0x52d   : > { %15582 = vst [vmem:[#allocation34_spill] sm:$0xff] %v12827_v43  ;;  %v3015_v10 = vmax.f32 %v12704_v1, %v2943_v4  ;;  %5962 = vmatmul.bf16.gmra.mxu2 %v12827_v43  ;;  %v15585_v1 = vld [vmem:[#allocation130_spill] sm:$0xff] }
 0x52e   : > { %15583 = vst [vmem:[#allocation136_spill] sm:$0xff] %v12829_v2  ;;  %v2255_v40 = vpop.f32.mrf.mxu3  ;;  %v3007_v53 = vmax.f32 %v12709_v0, %v2935_v25  ;;  %v2799_v14 = vmax.f32 %v15585_v1, 0.0  ;;  %v10490_v25 = vld [vmem:[#allocation9 + $0x46c] sm:$0xf0] }
 0x52f   : > { %3087 = vst [vmem:[#allocation3 + $0x98] sm:$0xff] %v3015_v10  ;;  %v2256_v23 = vadd.f32 %v2255_v40, %v2127_v17  ;;  %v5736_v62 = vpop.f32.mrf.mxu1  ;;  %v2506_v60 = vpop.f32.mrf.mxu2  ;;  %v3142_v0 = vpack.c.bf16 %v3015_v10, %v10751_v55  ;;  %v10752_v40 = vld [vmem:[#allocation3 + $0x10] sm:$0xff]  ;;  %v9652_v57 = vor.u32 %v10490_v25, %v9651_v48  ;;  %v15594_v25 = vld [vmem:[#allocation18_spill] sm:$0xff] }
 0x530   : > { %3079 = vst [vmem:[#allocation3 + $0x18] sm:$0xff] %v3007_v53  ;;  %v3137_v6 = vpack.c.bf16 %v3007_v53, %v3007_v53  ;;  %v2507_v44 = vadd.f32 %v2506_v60, %v2378_v54  ;;  %v2379_v34 = vpop.f32.mrf.mxu0  ;;  %v5737_v12 = vadd.f32 %v5736_v62, %v12839_v16  ;;  %v10035_v54 = vld [vmem:[#allocation9 + $0x760] sm:$0xf]  ;;  %v10586_v53 = vld [vmem:[#allocation9 + $0x76c] sm:$0xf0] }
 0x531   : > { %v2802_v50 = vmax.f32 %v2256_v23, 0.0  ;;  %v2380_v5 = vadd.f32 %v2379_v34, %v12250_v56  ;;  %v3426_v1 = vunpack.c.l.b16 %v3142_v0  ;;  %v3427_v60 = vunpack.c.h.b16 %v3142_v0  ;;  %6007 = vmatpush.bf16.msra.mxu1 %v9652_v57 }
 0x532   : > { %5775 = vmatmul.bf16.gmra.mxu1 %v12783_v11  ;;  %v3419_v46 = vunpack.c.l.b16 %v3137_v6  ;;  %v2785_v4 = vmax.f32 %v2507_v44, 0.0  ;;  %v9141_v11 = vld [vmem:[#allocation9 + $0x70] sm:$0xf0] }
 0x533   : > { %v2946_v30 = vmax.f32 %v2799_v14, %v2802_v50  ;;  %5844 = vmatmul.bf16.gmra.mxu3 %v12785_v29  ;;  %v10036_v14 = vor.u32 %v10586_v53, %v10035_v54  ;;  %v10554_v50 = vld [vmem:[#allocation9 + $0x66c] sm:$0xf0]  ;;  %v3500_v54 = vunpack.c.l.b16 %v15594_v25 }
 0x534   : > { %v12846_v41 = vpack.c.b16 %v3419_v46, %v3416_v59  ;;  %v2938_v49 = vmax.f32 %v2782_v8, %v2785_v4  ;;  %v15588_v59 = vld [vmem:[#allocation105_spill] sm:$0xff]  ;;  %v15589_v46 = vld [vmem:[#allocation112_spill] sm:$0xff]  ;;  %v10582_v25 = vld [vmem:[#allocation9 + $0x74c] sm:$0xf0] }
 0x535   : > { %v3018_v15 = vmax.f32 %v12714_v51, %v2946_v30  ;;  %v9907_v51 = vld [vmem:[#allocation9 + $0x660] sm:$0xf]  ;;  %v3497_v55 = vunpack.c.l.b16 %v15588_v59  ;;  %v3503_v4 = vunpack.c.l.b16 %v15589_v46  ;;  %6214 = vmatpush.bf16.msra.mxu2 %v10036_v14 }
 0x536   : > { %15587 = vst [vmem:[#allocation47_spill] sm:$0xff] %v12846_v41  ;;  %v5805_v17 = vpop.f32.mrf.mxu3  ;;  %v3010_v62 = vmax.f32 %v12719_v37, %v2938_v49  ;;  %v9908_v27 = vor.u32 %v10554_v50, %v9907_v51  ;;  %v15592_v37 = vld [vmem:[#allocation93_spill] sm:$0xff] }
 0x537   : > { %3090 = vst [vmem:[#allocation3 + $0x118] sm:$0xff] %v3018_v15  ;;  %v3144_v32 = vpack.c.bf16 %v3018_v15, %v10752_v40  ;;  %v12849_v23 = vadd.f32 %v5805_v17, %v5737_v12  ;;  %v5738_v10 = vpop.f32.mrf.mxu1  ;;  %v2508_v34 = vpop.f32.mrf.mxu2  ;;  %v2788_v0 = vmax.f32 %v15592_v37, 0.0  ;;  %v15593_v17 = vld [vmem:[#allocation103_spill] sm:$0xff]  ;;  %v12865_v51 = vpack.c.b16 %v3503_v4, %v3500_v54  ;;  %v10486_v37 = vld [vmem:[#allocation9 + $0x44c] sm:$0xf0] }
 0x538   : > { %3082 = vst [vmem:[#allocation3 + $0x100] sm:$0xff] %v3010_v62  ;;  %v2509_v8 = vadd.f32 %v2508_v34, %v2380_v5  ;;  %v2382_v30 = vpop.f32.mrf.mxu0  ;;  %6145 = vmatpush.bf16.msra.mxu0 %v9908_v27  ;;  %v3494_v48 = vunpack.c.l.b16 %v15593_v17  ;;  %v5739_v5 = vadd.f32 %v5738_v10, %v12839_v16  ;;  %v3139_v50 = vpack.c.bf16 %v3010_v62, %v3010_v62  ;;  %v15595_v10 = vld [vmem:[#allocation95_spill] sm:$0xff]  ;;  %v9635_v62 = vld [vmem:[#allocation9 + $0x440] sm:$0xf] }
 0x539   : > { %v3429_v6 = vunpack.c.l.b16 %v3144_v32  ;;  %v3430_v44 = vunpack.c.h.b16 %v3144_v32  ;;  %v2383_v32 = vadd.f32 %v2382_v30, %v12250_v56  ;;  %v2794_v34 = vmax.f32 %v15595_v10, 0.0 }
 0x53a   : > { %v2791_v49 = vmax.f32 %v2509_v8, 0.0  ;;  %v3533_v53 = vpack.c.b16 %v3497_v55, %v3494_v48  ;;  %v3563_v4 = vshll.u32 %v12865_v51, 16  ;;  %v9636_v48 = vor.u32 %v10486_v37, %v9635_v62 }
 0x53b   : > { %v12854_v15 = vpack.c.b16 %v3429_v6, %v3426_v1  ;;  %v12856_v12 = vpack.c.b16 %v3430_v44, %v3427_v60  ;;  %5908 = vmatmul.bf16.gmra.mxu0 %v12800_v22  ;;  %v9763_v6 = vld [vmem:[#allocation9 + $0x540] sm:$0xf]  ;;  %v10518_v44 = vld [vmem:[#allocation9 + $0x54c] sm:$0xf0] }
 0x53c   : > { %v2941_v40 = vmax.f32 %v2788_v0, %v2791_v49  ;;  %v9764_v8 = vor.u32 %v10518_v44, %v9763_v6  ;;  %v3558_v55 = vshll.u32 %v3533_v53, 16  ;;  %v3422_v0 = vunpack.c.l.b16 %v3139_v50  ;;  %6008 = vmatpush.bf16.msra.mxu1 %v9636_v48 }
 0x53d   : > { %15590 = vst [vmem:[#allocation137_spill] sm:$0xff] %v12854_v15  ;;  %5967 = vmatmul.bf16.gmra.mxu2 %v12854_v15 }
 0x53e   : > { %15591 = vst [vmem:[#allocation50_spill] sm:$0xff] %v12856_v12  ;;  %v5807_v57 = vpop.f32.mrf.mxu3  ;;  %v3013_v60 = vmax.f32 %v12727_v3, %v2941_v40  ;;  %v10019_v3 = vld [vmem:[#allocation9 + $0x740] sm:$0xf]  ;;  %6077 = vmatpush.bf16.msra.mxu3 %v9764_v8  ;;  %v3560_v6 = vrot.slane %v3558_v55, 1  ;;  %v3565_v8 = vrot.slane %v3563_v4, 1  ;;  %v15597_v55 = vld [vmem:[#allocation98_spill] sm:$0xff] }
 0x53f   : > { %v12867_v1 = vadd.f32 %v5807_v57, %v5739_v5  ;;  %v5741_v14 = vpop.f32.mrf.mxu1  ;;  %v2511_v27 = vpop.f32.mrf.mxu2  ;;  %v10020_v5 = vor.u32 %v10582_v25, %v10019_v3  ;;  %v3509_v25 = vunpack.c.l.b16 %v12468_v58  ;;  %v10510_v58 = vld [vmem:[#allocation9 + $0x50c] sm:$0xf0] }
 0x540   : > { %3085 = vst [vmem:[#allocation3 + $0x60] sm:$0xff] %v3013_v60  ;;  %v3141_v59 = vpack.c.bf16 %v3013_v60, %v3013_v60  ;;  %v2512_v46 = vadd.f32 %v2511_v27, %v2383_v32  ;;  %v2384_v30 = vpop.f32.mrf.mxu0  ;;  %v5742_v54 = vadd.f32 %v5741_v14, %v12839_v16  ;;  %v3556_v27 = vshrl.u32 %v3533_v53, 16  ;;  %v10514_v53 = vld [vmem:[#allocation9 + $0x52c] sm:$0xf0] }
 0x541   : > { %v2385_v57 = vadd.f32 %v2384_v30, %v12250_v56  ;;  %6215 = vmatpush.bf16.msra.mxu2 %v10020_v5  ;;  %v9619_v56 = vld [vmem:[#allocation9 + $0x420] sm:$0xf]  ;;  %v10482_v30 = vld [vmem:[#allocation9 + $0x42c] sm:$0xf0] }
 0x542   : > { %5780 = vmatmul.bf16.gmra.mxu1 %v12805_v39  ;;  %v3425_v49 = vunpack.c.l.b16 %v3141_v59  ;;  %v2797_v17 = vmax.f32 %v2512_v46, 0.0  ;;  %v9891_v59 = vld [vmem:[#allocation9 + $0x640] sm:$0xf]  ;;  %v10550_v46 = vld [vmem:[#allocation9 + $0x64c] sm:$0xf0]  ;;  %v3561_v3 = vor.u32 %v3560_v6, %v3556_v27 }
 0x543   : > { %5849 = vmatmul.bf16.gmra.mxu3 %v12807_v19  ;;  %v9892_v62 = vor.u32 %v10550_v46, %v9891_v59  ;;  %v10478_v6 = vld [vmem:[#allocation9 + $0x40c] sm:$0xf0]  ;;  %v9731_v27 = vld [vmem:[#allocation9 + $0x500] sm:$0xf] }
 0x544   : > { %v12875_v40 = vpack.c.b16 %v3425_v49, %v3422_v0  ;;  %v2944_v32 = vmax.f32 %v2794_v34, %v2797_v17  ;;  %v2800_v0 = vmax.f32 %v15597_v55, 0.0  ;;  %v9620_v17 = vor.u32 %v10482_v30, %v9619_v56 }
 0x545   : > { %6146 = vmatpush.bf16.msra.mxu0 %v9892_v62  ;;  %v12886_v48 = vsel %vm3554_vm1, %v3561_v3, %v3565_v8 }
 0x546   : > { %15596 = vst [vmem:[#allocation138_spill] sm:$0xff] %v12875_v40  ;;  %v5810_v60 = vpop.f32.mrf.mxu3  ;;  %v3016_v50 = vmax.f32 %v12736_v61, %v2944_v32  ;;  %v9747_v61 = vld [vmem:[#allocation9 + $0x520] sm:$0xf]  ;;  %6009 = vmatpush.bf16.msra.mxu1 %v9620_v17 }
 0x547   : > { %v12878_v44 = vadd.f32 %v5810_v60, %v5742_v54  ;;  %v5743_v10 = vpop.f32.mrf.mxu1  ;;  %v2513_v14 = vpop.f32.mrf.mxu2  ;;  %15598 = vst [vmem:[#allocation53_spill] sm:$0xff] %v12886_v48  ;;  %v9748_v54 = vor.u32 %v10514_v53, %v9747_v61  ;;  %v9603_v60 = vld [vmem:[#allocation9 + $0x400] sm:$0xf] }
 0x548   : > { %3088 = vst [vmem:[#allocation3 + $0x50] sm:$0xff] %v3016_v50  ;;  %v2514_v37 = vadd.f32 %v2513_v14, %v2385_v57  ;;  %v5874_v34 = vpop.f32.mrf.mxu0  ;;  %v5744_v5 = vadd.f32 %v5743_v10, %v12839_v16  ;;  %v3506_v57 = vunpack.c.l.b16 %v12466_v26  ;;  %v9604_v14 = vor.u32 %v10478_v6, %v9603_v60  ;;  %v10003_v60 = vld [vmem:[#allocation9 + $0x720] sm:$0xf]  ;;  %v10578_v6 = vld [vmem:[#allocation9 + $0x72c] sm:$0xf0] }
 0x549   : > { %v12883_v49 = vadd.f32 %v5874_v34, %v12849_v23  ;;  %6078 = vmatpush.bf16.msra.mxu3 %v9748_v54  ;;  %v3143_v62 = vpack.c.bf16 %v3016_v50, %v3016_v50  ;;  %v9732_v34 = vor.u32 %v10510_v58, %v9731_v27  ;;  %v3512_v27 = vunpack.c.l.b16 %v12507_v63  ;;  %v9875_v58 = vld [vmem:[#allocation9 + $0x620] sm:$0xf] }
 0x54a   : > { %v2803_v4 = vmax.f32 %v2514_v37, 0.0  ;;  %v3539_v37 = vpack.c.b16 %v3509_v25, %v3506_v57  ;;  %6010 = vmatpush.bf16.msra.mxu1 %v9604_v14 }
 0x54b   : > { %5913 = vmatmul.bf16.gmra.mxu0 %v12822_v33  ;;  %v3428_v30 = vunpack.c.l.b16 %v3143_v62  ;;  %v10546_v62 = vld [vmem:[#allocation9 + $0x62c] sm:$0xf0] }
 0x54c   : > { %v2947_v32 = vmax.f32 %v2800_v0, %v2803_v4  ;;  %v3595_v0 = vshll.u32 %v3539_v37, 16  ;;  %v3591_v4 = vshrl.u32 %v12865_v51, 16 }
 0x54d   : > { %5972 = vmatmul.bf16.gmra.mxu2 %v12886_v48  ;;  %6079 = vmatpush.bf16.msra.mxu3 %v9732_v34 }
 0x54e   : > { %v5812_v23 = vpop.f32.mrf.mxu3  ;;  %v3019_v10 = vmax.f32 %v12749_v24, %v2947_v32  ;;  %v3597_v25 = vrot.slane %v3595_v0, 1  ;;  %v3615_v0 = vshrl.u32 %v3539_v37, 16 }
 0x54f   : > { %v5813_v59 = vadd.f32 %v5812_v23, %v5744_v5  ;;  %v5746_v46 = vpop.f32.mrf.mxu1  ;;  %v3593_v5 = vor.u32 %v3591_v4, %v3565_v8  ;;  %v3515_v23 = vunpack.c.l.b16 %v12509_v31  ;;  %v10004_v8 = vor.u32 %v10578_v6, %v10003_v60  ;;  %v9859_v4 = vld [vmem:[#allocation9 + $0x600] sm:$0xf] }
 0x550   : > { %3091 = vst [vmem:[#allocation3 + $0x40] sm:$0xff] %v3019_v10  ;;  %v3145_v3 = vpack.c.bf16 %v3019_v10, %v3019_v10  ;;  %v5876_v56 = vpop.f32.mrf.mxu0  ;;  %v5747_v50 = vadd.f32 %v5746_v46, %v12839_v16  ;;  %v9876_v10 = vor.u32 %v10546_v62, %v9875_v58  ;;  %v3518_v6 = vunpack.c.l.b16 %v12548_v20  ;;  %v9987_v58 = vld [vmem:[#allocation9 + $0x700] sm:$0xf]  ;;  %v10574_v62 = vld [vmem:[#allocation9 + $0x70c] sm:$0xf0] }
 0x551   : > { %v12897_v26 = vadd.f32 %v5876_v56, %v12867_v1  ;;  %v12907_v1 = vsel %vm3554_vm1, %v3593_v5, %v3597_v25  ;;  %v3542_v14 = vpack.c.b16 %v3515_v23, %v3512_v27  ;;  %6216 = vmatpush.bf16.msra.mxu2 %v10004_v8 }
 0x552   : > { %5785 = vmatmul.bf16.gmra.mxu1 %v12827_v43  ;;  %v3431_v55 = vunpack.c.l.b16 %v3145_v3  ;;  %15600 = vst [vmem:[#allocation56_spill] sm:$0xff] %v12907_v1  ;;  %6147 = vmatpush.bf16.msra.mxu0 %v9876_v10  ;;  %v9988_v10 = vor.u32 %v10574_v62, %v9987_v58 }
 0x553   : > { %5854 = vmatmul.bf16.gmra.mxu3 %v12829_v2  ;;  %v3619_v3 = vshll.u32 %v3542_v14, 16 }
 0x554   : > { %v12900_v24 = vpack.c.b16 %v3431_v55, %v3428_v30 }
 0x555   : > { %6217 = vmatpush.bf16.msra.mxu2 %v9988_v10 }
 0x556   : > { %15599 = vst [vmem:[#allocation139_spill] sm:$0xff] %v12900_v24  ;;  %v5815_v17 = vpop.f32.mrf.mxu3 }
 0x557   : > { %v5816_v61 = vadd.f32 %v5815_v17, %v5747_v50  ;;  %v5748_v53 = vpop.f32.mrf.mxu1  ;;  %v3621_v50 = vrot.slane %v3619_v3, 1 }
 0x558   : > { %v5879_v54 = vpop.f32.mrf.mxu0  ;;  %v5749_v57 = vadd.f32 %v5748_v53, %v12839_v16  ;;  %v3617_v53 = vor.u32 %v3615_v0, %v3597_v25 }
 0x559   : > { %v12904_v32 = vadd.f32 %v5879_v54, %v12878_v44  ;;  %v10542_v54 = vld [vmem:[#allocation9 + $0x60c] sm:$0xf0] }
 0x55a   : > { %v9860_v23 = vor.u32 %v10542_v54, %v9859_v4 }
 0x55b   : > { %5918 = vmatmul.bf16.gmra.mxu0 %v12846_v41 }
 0x55c   : > { %6148 = vmatpush.bf16.msra.mxu0 %v9860_v23  ;;  %v3527_v23 = vunpack.c.l.b16 %v12591_v18 }
 0x55d   : > { %5977 = vmatmul.bf16.gmra.mxu2 %v12907_v1 }
 0x55e   : > { %v5817_v51 = vpop.f32.mrf.mxu3 }
 0x55f   : > { %v5818_v46 = vadd.f32 %v5817_v51, %v5749_v57  ;;  %v5751_v44 = vpop.f32.mrf.mxu1  ;;  %v12922_v57 = vsel %vm3554_vm1, %v3617_v53, %v3621_v50 }
 0x560   : > { %v5881_v31 = vpop.f32.mrf.mxu0  ;;  %v5752_v56 = vadd.f32 %v5751_v44, %v12839_v16  ;;  %15601 = vst [vmem:[#allocation33_spill] sm:$0xff] %v12922_v57 }
 0x561   : > { %v12916_v34 = vadd.f32 %v5881_v31, %v5813_v59  ;;  %v3521_v59 = vunpack.c.l.b16 %v12550_v38 }
 0x562   : > { %5790 = vmatmul.bf16.gmra.mxu1 %v12854_v15 }
 0x563   : > { %5859 = vmatmul.bf16.gmra.mxu3 %v12856_v12  ;;  %v3545_v27 = vpack.c.b16 %v3521_v59, %v3518_v6 }
 0x565   : > { %v3643_v31 = vshll.u32 %v3545_v27, 16 }
 0x566   : > { %v5820_v63 = vpop.f32.mrf.mxu3 }
 0x567   : > { %v5821_v30 = vadd.f32 %v5820_v63, %v5752_v56  ;;  %v5753_v55 = vpop.f32.mrf.mxu1  ;;  %v3645_v0 = vrot.slane %v3643_v31, 1 }
 0x568   : > { %v5884_v17 = vpop.f32.mrf.mxu0  ;;  %v5754_v60 = vadd.f32 %v5753_v55, %v12839_v16 }
 0x569   : > { %v12919_v5 = vadd.f32 %v5884_v17, %v5816_v61 }
 0x56b   : > { %5923 = vmatmul.bf16.gmra.mxu0 %v12875_v40 }
 0x56d   : > { %5982 = vmatmul.bf16.gmra.mxu2 %v12922_v57 }
 0x56e   : > { %v5822_v37 = vpop.f32.mrf.mxu3 }
 0x56f   : > { %v5823_v25 = vadd.f32 %v5822_v37, %v5754_v60  ;;  %v5756_v51 = vpop.f32.mrf.mxu1  ;;  %v15603_v60 = vld [vmem:[#allocation22_spill] sm:$0xff] }
 0x570   : > { %v5943_v61 = vpop.f32.mrf.mxu2  ;;  %v5886_v38 = vpop.f32.mrf.mxu0  ;;  %v5757_v20 = vadd.f32 %v5756_v51, %v12839_v16  ;;  %v3524_v37 = vunpack.c.l.b16 %v15603_v60 }
 0x571   : > { %v12930_v8 = vadd.f32 %v5943_v61, %v12883_v49  ;;  %v12934_v44 = vadd.f32 %v5886_v38, %v5818_v46  ;;  %v3639_v49 = vshrl.u32 %v3542_v14, 16 }
 0x572   : > { %6011 = vmatmul.bf16.vlgmr.msra.gmra.mxu1 %v12742_v21 }
 0x573   : > { %6080 = vmatmul.bf16.vlgmr.msra.gmra.mxu3 %v12778_v28  ;;  %v3641_v4 = vor.u32 %v3639_v49, %v3621_v50  ;;  %v3548_v50 = vpack.c.b16 %v3527_v23, %v3524_v37  ;;  %v9205_v49 = vld [vmem:[#allocation9 + $0xf0] sm:$0xf0] }
 0x575   : > { %v12943_v54 = vsel %vm3554_vm1, %v3641_v4, %v3645_v0  ;;  %v3667_v38 = vshll.u32 %v3548_v50, 16 }
 0x576   : > { %v5825_v3 = vpop.f32.mrf.mxu3  ;;  %15602 = vst [vmem:[#allocation59_spill] sm:$0xff] %v12943_v54 }
 0x577   : > { %v5826_v56 = vadd.f32 %v5825_v3, %v5757_v20  ;;  %v5758_v63 = vpop.f32.mrf.mxu1  ;;  %v3663_v3 = vshrl.u32 %v3545_v27, 16  ;;  %v10634_v27 = vld [vmem:[#allocation9 + $0x8ec] sm:$0xf0] }
 0x578   : > { %v5945_v55 = vpop.f32.mrf.mxu2  ;;  %v5889_v53 = vpop.f32.mrf.mxu0  ;;  %v5759_v59 = vadd.f32 %v5758_v63, %v12839_v16  ;;  %v3669_v63 = vrot.slane %v3667_v38, 1 }
 0x579   : > { %v12938_v17 = vadd.f32 %v5945_v55, %v12897_v26  ;;  %v12940_v46 = vadd.f32 %v5889_v53, %v5821_v30  ;;  %v3665_v4 = vor.u32 %v3663_v3, %v3645_v0 }
 0x57b   : > { %5928 = vmatmul.bf16.gmra.mxu0 %v12900_v24 }
 0x57d   : > { %5987 = vmatmul.bf16.gmra.mxu2 %v12943_v54 }
 0x57e   : > { %v5827_v14 = vpop.f32.mrf.mxu3 }
 0x57f   : > { %v5828_v26 = vadd.f32 %v5827_v14, %v5759_v59  ;;  %v5761_v6 = vpop.f32.mrf.mxu1  ;;  %v15605_v14 = vld [vmem:[#allocation129_spill] sm:$0xff] }
 0x580   : > { %v5948_v51 = vpop.f32.mrf.mxu2  ;;  %v5891_v61 = vpop.f32.mrf.mxu0  ;;  %v5762_v58 = vadd.f32 %v5761_v6, %v12839_v16  ;;  %v3530_v60 = vunpack.c.l.b16 %v15605_v14  ;;  %v10440_v6 = vld [vmem:[#allocation9 + $0x2e4] sm:$0xf] }
 0x581   : > { %v12951_v30 = vadd.f32 %v5948_v51, %v12904_v32  ;;  %v12955_v18 = vadd.f32 %v5891_v61, %v5823_v25  ;;  %v10376_v32 = vld [vmem:[#allocation9 + $0xe4] sm:$0xf]  ;;  %v12964_v25 = vsel %vm3554_vm1, %v3665_v4, %v3669_v63  ;;  %v9461_v61 = vld [vmem:[#allocation9 + $0x2f0] sm:$0xf0] }
 0x582   : > { %6016 = vmatmul.bf16.gmra.mxu1 %v12763_v47  ;;  %v9208_v23 = vor.u32 %v10376_v32, %v9205_v49  ;;  %15604 = vst [vmem:[#allocation36_spill] sm:$0xff] %v12964_v25  ;;  %v9333_v32 = vld [vmem:[#allocation9 + $0x1f0] sm:$0xf0] }
 0x583   : > { %6085 = vmatmul.bf16.gmra.mxu3 %v12800_v22 }
 0x584   : > { %6348 = vmatpush.bf16.msrb.mxu3 %v9208_v23 }
 0x586   : > { %v5830_v62 = vpop.f32.mrf.mxu3 }
 0x587   : > { %v5831_v31 = vadd.f32 %v5830_v62, %v5762_v58  ;;  %v5763_v10 = vpop.f32.mrf.mxu1  ;;  %v9464_v58 = vor.u32 %v10440_v6, %v9461_v61 }
 0x588   : > { %v5950_v20 = vpop.f32.mrf.mxu2  ;;  %v5894_v53 = vpop.f32.mrf.mxu0  ;;  %v5764_v37 = vadd.f32 %v5763_v10, %v12839_v16  ;;  %v10408_v10 = vld [vmem:[#allocation9 + $0x1e4] sm:$0xf] }
 0x589   : > { %v12959_v55 = vadd.f32 %v5950_v20, %v12916_v34  ;;  %v12961_v59 = vadd.f32 %v5894_v53, %v5826_v56  ;;  %v10227_v34 = vld [vmem:[#allocation9 + $0x8e0] sm:$0xf]  ;;  %v3551_v20 = vpack.c.b16 %v3530_v60, %v3530_v60  ;;  %6486 = vmatpush.bf16.msrb.mxu2 %v9464_v58  ;;  %v9336_v53 = vor.u32 %v10408_v10, %v9333_v32  ;;  %v9189_v32 = vld [vmem:[#allocation9 + $0xd0] sm:$0xf0] }
 0x58a   : > { %v10228_v0 = vor.u32 %v10634_v27, %v10227_v34 }
 0x58b   : > { %6149 = vmatmul.bf16.vlgmr.msra.gmra.mxu0 %v12886_v48  ;;  %v3691_v23 = vshll.u32 %v3551_v20, 16 }
 0x58c   : > { %6279 = vmatpush.bf16.msrb.mxu1 %v10228_v0  ;;  %6417 = vmatpush.bf16.msrb.mxu0 %v9336_v53 }
 0x58d   : > { %5992 = vmatmul.bf16.gmra.mxu2 %v12964_v25 }
 0x58e   : > { %v5832_v51 = vpop.f32.mrf.mxu3 }
 0x58f   : > { %v5833_v56 = vadd.f32 %v5832_v51, %v5764_v37  ;;  %v5766_v38 = vpop.f32.mrf.mxu1  ;;  %v3687_v37 = vshrl.u32 %v3548_v50, 16  ;;  %v3693_v51 = vrot.slane %v3691_v23, 1  ;;  %v10211_v23 = vld [vmem:[#allocation9 + $0x8c0] sm:$0xf] }
 0x590   : > { %v5953_v62 = vpop.f32.mrf.mxu2  ;;  %v5896_v49 = vpop.f32.mrf.mxu0  ;;  %v5767_v14 = vadd.f32 %v5766_v38, %v12839_v16 }
 0x591   : > { %v12971_v3 = vadd.f32 %v5953_v62, %v12919_v5  ;;  %v12975_v4 = vadd.f32 %v5896_v49, %v5828_v26  ;;  %v3689_v6 = vor.u32 %v3687_v37, %v3669_v63 }
 0x592   : > { %6021 = vmatmul.bf16.gmra.mxu1 %v12785_v29 }
 0x593   : > { %6090 = vmatmul.bf16.gmra.mxu3 %v12822_v33  ;;  %v12984_v26 = vsel %vm3554_vm1, %v3689_v6, %v3693_v51  ;;  %v9301_v33 = vld [vmem:[#allocation9 + $0x1b0] sm:$0xf0] }
 0x594   : > { %15606 = vst [vmem:[#allocation62_spill] sm:$0xff] %v12984_v26 }
 0x596   : > { %v5835_v60 = vpop.f32.mrf.mxu3 }
 0x597   : > { %v5836_v34 = vadd.f32 %v5835_v60, %v5767_v14  ;;  %v5768_v5 = vpop.f32.mrf.mxu1  ;;  %v10630_v14 = vld [vmem:[#allocation9 + $0x8cc] sm:$0xf0]  ;;  %v10436_v60 = vld [vmem:[#allocation9 + $0x2c4] sm:$0xf] }
 0x598   : > { %v5955_v27 = vpop.f32.mrf.mxu2  ;;  %v5899_v61 = vpop.f32.mrf.mxu0  ;;  %v5769_v62 = vadd.f32 %v5768_v5, %v12839_v16  ;;  %v10212_v37 = vor.u32 %v10630_v14, %v10211_v23  ;;  %v9445_v5 = vld [vmem:[#allocation9 + $0x2d0] sm:$0xf0] }
 0x599   : > { %v12979_v0 = vadd.f32 %v5955_v27, %v12934_v44  ;;  %v12981_v58 = vadd.f32 %v5899_v61, %v5831_v31  ;;  %v10372_v44 = vld [vmem:[#allocation9 + $0xc4] sm:$0xf] }
 0x59a   : > { %v9192_v49 = vor.u32 %v10372_v44, %v9189_v32  ;;  %6280 = vmatpush.bf16.msrb.mxu1 %v10212_v37 }
 0x59b   : > { %6154 = vmatmul.bf16.gmra.mxu0 %v12907_v1 }
 0x59c   : > { %6349 = vmatpush.bf16.msrb.mxu3 %v9192_v49 }
 0x59d   : > { %5997 = vmatmul.bf16.gmra.mxu2 %v12984_v26 }
 0x59e   : > { %v5837_v50 = vpop.f32.mrf.mxu3 }
 0x59f   : > { %v5838_v38 = vadd.f32 %v5837_v50, %v5769_v62  ;;  %v5771_v20 = vpop.f32.mrf.mxu1 }
 0x5a0   : > { %v5958_v63 = vpop.f32.mrf.mxu2  ;;  %v5901_v31 = vpop.f32.mrf.mxu0  ;;  %v5772_v27 = vadd.f32 %v5771_v20, %v12839_v16  ;;  %v15607_v20 = vld [vmem:[#allocation118_spill] sm:$0xff] }
 0x5a1   : > { %v12990_v10 = vadd.f32 %v5958_v63, %v12940_v46  ;;  %v12994_v53 = vadd.f32 %v5901_v31, %v5833_v56  ;;  %v9448_v46 = vor.u32 %v10436_v60, %v9445_v5  ;;  %v10404_v56 = vld [vmem:[#allocation9 + $0x1c4] sm:$0xf]  ;;  %v9317_v63 = vld [vmem:[#allocation9 + $0x1d0] sm:$0xf0] }
 0x5a2   : > { %6026 = vmatmul.bf16.gmra.mxu1 %v12807_v19  ;;  %v9320_v32 = vor.u32 %v10404_v56, %v9317_v63  ;;  %v3151_v63 = vld [vmem:[#allocation2 + $0x38] sm:$0xff] }
 0x5a3   : > { %6095 = vmatmul.bf16.gmra.mxu3 %v12846_v41  ;;  %6487 = vmatpush.bf16.msrb.mxu2 %v9448_v46 }
 0x5a4   : > { %6418 = vmatpush.bf16.msrb.mxu0 %v9320_v32 }
 0x5a6   : > { %v5840_v6 = vpop.f32.mrf.mxu3 }
 0x5a7   : > { %v5841_v51 = vadd.f32 %v5840_v6, %v5772_v27  ;;  %v5773_v61 = vpop.f32.mrf.mxu1 }
 0x5a8   : > { %v5960_v62 = vpop.f32.mrf.mxu2  ;;  %v5904_v44 = vpop.f32.mrf.mxu0  ;;  %v5774_v49 = vadd.f32 %v5773_v61, %v12839_v16 }
 0x5a9   : > { %v12998_v50 = vadd.f32 %v5960_v62, %v12955_v18  ;;  %v13000_v31 = vadd.f32 %v5904_v44, %v5836_v34  ;;  %v10368_v44 = vld [vmem:[#allocation9 + $0xa4] sm:$0xf] }
 0x5ab   : > { %6159 = vmatmul.bf16.gmra.mxu0 %v12922_v57  ;;  %v3157_v57 = vld [vmem:[#allocation2 + $0x28] sm:$0xff] }
 0x5ad   : > { %6218 = vmatmul.bf16.vlgmr.msra.gmra.mxu2 %v15607_v20 }
 0x5ae   : > { %v5842_v23 = vpop.f32.mrf.mxu3 }
 0x5af   : > { %v5843_v14 = vadd.f32 %v5842_v23, %v5774_v49  ;;  %v5776_v60 = vpop.f32.mrf.mxu1 }
 0x5b0   : > { %v5963_v37 = vpop.f32.mrf.mxu2  ;;  %v5906_v5 = vpop.f32.mrf.mxu0  ;;  %v5777_v27 = vadd.f32 %v5776_v60, %v12839_v16 }
 0x5b1   : > { %v13006_v18 = vadd.f32 %v5963_v37, %v12961_v59  ;;  %v13010_v34 = vadd.f32 %v5906_v5, %v5838_v38  ;;  %v9173_v59 = vld [vmem:[#allocation9 + $0xb0] sm:$0xf0]  ;;  %v3148_v37 = vld [vmem:[#allocation2 + $0x10] sm:$0xfe]  ;;  %v3154_v38 = vld [vmem:[#allocation2 + $0x80] sm:$0xff]  ;;  %v3188_v5 = vpack.c.bf16 %v3151_v63, %v3151_v63 }
 0x5b2   : > { %6031 = vmatmul.bf16.gmra.mxu1 %v12829_v2  ;;  %v9176_v49 = vor.u32 %v10368_v44, %v9173_v59  ;;  %v3186_v48 = vpack.c.bf16 %v3148_v37, %v3148_v37  ;;  %v3190_v63 = vpack.c.bf16 %v3154_v38, %v3154_v38 }
 0x5b3   : > { %6100 = vmatmul.bf16.gmra.mxu3 %v12875_v40  ;;  %v3192_v40 = vpack.c.bf16 %v3157_v57, %v3157_v57 }
 0x5b4   : > { %6350 = vmatpush.bf16.msrb.mxu3 %v9176_v49  ;;  %v3499_v49 = vunpack.c.l.b16 %v3188_v5  ;;  %v3496_v37 = vunpack.c.l.b16 %v3186_v48 }
 0x5b5   : > { %v3505_v57 = vunpack.c.l.b16 %v3192_v40 }
 0x5b6   : > { %v5845_v46 = vpop.f32.mrf.mxu3  ;;  %v3535_v38 = vpack.c.b16 %v3499_v49, %v3496_v37 }
 0x5b7   : > { %v5846_v6 = vadd.f32 %v5845_v46, %v5777_v27  ;;  %v5778_v61 = vpop.f32.mrf.mxu1  ;;  %v15608_v27 = vld [vmem:[#allocation20_spill] sm:$0xff]  ;;  %v10626_v46 = vld [vmem:[#allocation9 + $0x8ac] sm:$0xf0] }
 0x5b8   : > { %v5965_v62 = vpop.f32.mrf.mxu2  ;;  %v5909_v32 = vpop.f32.mrf.mxu0  ;;  %v5779_v60 = vadd.f32 %v5778_v61, %v12839_v16  ;;  %v3580_v37 = vshrl.u32 %v3535_v38, 16 }
 0x5b9   : > { %v13014_v56 = vadd.f32 %v5965_v62, %v12975_v4  ;;  %v13016_v23 = vadd.f32 %v5909_v32, %v5841_v51  ;;  %v10195_v4 = vld [vmem:[#allocation9 + $0x8a0] sm:$0xf]  ;;  %v10432_v62 = vld [vmem:[#allocation9 + $0x2a4] sm:$0xf]  ;;  %v9429_v51 = vld [vmem:[#allocation9 + $0x2b0] sm:$0xf0] }
 0x5ba   : > { %v10196_v44 = vor.u32 %v10626_v46, %v10195_v4  ;;  %v9432_v41 = vor.u32 %v10432_v62, %v9429_v51 }
 0x5bb   : > { %6164 = vmatmul.bf16.gmra.mxu0 %v12943_v54  ;;  %v10400_v54 = vld [vmem:[#allocation9 + $0x1a4] sm:$0xf] }
 0x5bc   : > { %6281 = vmatpush.bf16.msrb.mxu1 %v10196_v44  ;;  %6488 = vmatpush.bf16.msrb.mxu2 %v9432_v41  ;;  %v9304_v4 = vor.u32 %v10400_v54, %v9301_v33  ;;  %v3582_v44 = vshll.u32 %v3535_v38, 16  ;;  %v3163_v54 = vld [vmem:[#allocation2 + $0xc8] sm:$0xff] }
 0x5bd   : > { %6223 = vmatmul.bf16.gmra.mxu2 %v15608_v27 }
 0x5be   : > { %v5847_v1 = vpop.f32.mrf.mxu3  ;;  %6419 = vmatpush.bf16.msrb.mxu0 %v9304_v4 }
 0x5bf   : > { %v5848_v59 = vadd.f32 %v5847_v1, %v5779_v60  ;;  %v5781_v32 = vpop.f32.mrf.mxu1  ;;  %v3502_v60 = vunpack.c.l.b16 %v3190_v63  ;;  %v3160_v63 = vld [vmem:[#allocation2 + $0x118] sm:$0xff] }
 0x5c0   : > { %v5968_v2 = vpop.f32.mrf.mxu2  ;;  %v5911_v15 = vpop.f32.mrf.mxu0  ;;  %v5782_v5 = vadd.f32 %v5781_v32, %v12839_v16  ;;  %v15609_v32 = vld [vmem:[#allocation26_spill] sm:$0xff] }
 0x5c1   : > { %v13022_v61 = vadd.f32 %v5968_v2, %v12981_v58  ;;  %v13026_v1 = vadd.f32 %v5911_v15, %v5843_v14  ;;  %v13029_v58 = vpack.c.b16 %v3505_v57, %v3502_v60  ;;  %v3584_v14 = vrot.slane %v3582_v44, 1  ;;  %v9157_v44 = vld [vmem:[#allocation9 + $0x90] sm:$0xf0] }
 0x5c2   : > { %6036 = vmatmul.bf16.gmra.mxu1 %v12856_v12  ;;  %v3221_v12 = vld [vmem:[#allocation3 + $0x58] sm:$0xff] }
 0x5c3   : > { %6105 = vmatmul.bf16.gmra.mxu3 %v12900_v24  ;;  %v3587_v15 = vshll.u32 %v13029_v58, 16  ;;  %v3212_v24 = vld [vmem:[#allocation3 + $0x130] sm:$0xfe] }
 0x5c5   : > { %v13042_v57 = vrot.slane %v3587_v15, 1 }
 0x5c6   : > { %v5850_v2 = vpop.f32.mrf.mxu3 }
 0x5c7   : > { %v13031_v41 = vadd.f32 %v5850_v2, %v5782_v5  ;;  %v5783_v46 = vpop.f32.mrf.mxu1  ;;  %v3194_v2 = vpack.c.bf16 %v3160_v63, %v3160_v63  ;;  %v10622_v63 = vld [vmem:[#allocation9 + $0x88c] sm:$0xf0] }
 0x5c8   : > { %v5970_v62 = vpop.f32.mrf.mxu2  ;;  %v5914_v33 = vpop.f32.mrf.mxu0  ;;  %v5784_v51 = vadd.f32 %v5783_v46, %v12839_v16  ;;  %v10364_v46 = vld [vmem:[#allocation9 + $0x84] sm:$0xf] }
 0x5c9   : > { %v13034_v40 = vadd.f32 %v5970_v62, %v12994_v53  ;;  %v13037_v48 = vadd.f32 %v5914_v33, %v5846_v6  ;;  %v3196_v53 = vpack.c.bf16 %v3163_v54, %v3163_v54  ;;  %v3585_v6 = vor.u32 %v3584_v14, %v3580_v37  ;;  %v3215_v54 = vld [vmem:[#allocation3 + $0xa0] sm:$0xff]  ;;  %v10179_v14 = vld [vmem:[#allocation9 + $0x880] sm:$0xf] }
 0x5ca   : > { %v3508_v37 = vunpack.c.l.b16 %v3194_v2  ;;  %v3218_v2 = vld [vmem:[#allocation3 + $0xe0] sm:$0xff] }
 0x5cb   : > { %6169 = vmatmul.bf16.gmra.mxu0 %v12964_v25  ;;  %v13052_v33 = vsel %vm3554_vm1, %v3585_v6, %v13042_v57  ;;  %v3511_v15 = vunpack.c.l.b16 %v3196_v53  ;;  %v9413_v25 = vld [vmem:[#allocation9 + $0x290] sm:$0xf0]  ;;  %v3214_v6 = vld [vmem:[#allocation3 + $0x90] sm:$0xff] }
 0x5cc   : > { %15610 = vst [vmem:[#allocation65_spill] sm:$0xff] %v13052_v33 }
 0x5cd   : > { %6228 = vmatmul.bf16.gmra.mxu2 %v15609_v32  ;;  %v13058_v22 = vpack.c.b16 %v3511_v15, %v3508_v37  ;;  %v3217_v15 = vld [vmem:[#allocation3 + $0xe8] sm:$0xff] }
 0x5ce   : > { %v5852_v49 = vpop.f32.mrf.mxu3 }
 0x5cf   : > { %v13044_v4 = vadd.f32 %v5852_v49, %v5784_v51  ;;  %v5786_v60 = vpop.f32.mrf.mxu1  ;;  %v9160_v51 = vor.u32 %v10364_v46, %v9157_v44  ;;  %v13060_v46 = vpack.c.bf16 %v3215_v54, %v3214_v6  ;;  %v9285_v54 = vld [vmem:[#allocation9 + $0x190] sm:$0xf0] }
 0x5d0   : > { %v5973_v5 = vpop.f32.mrf.mxu2  ;;  %v5916_v38 = vpop.f32.mrf.mxu0 }
 0x5d1   : > { %v13047_v62 = vadd.f32 %v5973_v5, %v13000_v31  ;;  %v13055_v49 = vadd.f32 %v5916_v38, %v5848_v59  ;;  %v10428_v31 = vld [vmem:[#allocation9 + $0x284] sm:$0xf]  ;;  %6351 = vmatpush.bf16.msrb.mxu3 %v9160_v51  ;;  %v10180_v5 = vor.u32 %v10622_v63, %v10179_v14  ;;  %v3211_v38 = vld [vmem:[#allocation3 + $0xa8] sm:$0xfe]  ;;  %v3758_v6 = vunpack.c.l.b16 %v13060_v46 }
 0x5d2   : > { %6041 = vmatmul.bf16.gmra.mxu1 %v15607_v20  ;;  %v5787_v20 = vadd.f32 %v5786_v60, %v12839_v16  ;;  %v9416_v19 = vor.u32 %v10428_v31, %v9413_v25  ;;  %v3220_v51 = vld [vmem:[#allocation3 + $0x8] sm:$0xff]  ;;  %v13064_v63 = vpack.c.bf16 %v3212_v24, %v3211_v38  ;;  %v10396_v31 = vld [vmem:[#allocation9 + $0x184] sm:$0xf]  ;;  %v3169_v24 = vld [vmem:[#allocation2 + $0xb8] sm:$0xff] }
 0x5d3   : > { %6110 = vmatmul.bf16.gmra.mxu3 %v13052_v33  ;;  %6282 = vmatpush.bf16.msrb.mxu1 %v10180_v5  ;;  %v13066_v60 = vpack.c.bf16 %v3221_v12, %v3220_v51  ;;  %v13072_v5 = vpack.c.bf16 %v3218_v2, %v3217_v15  ;;  %v15611_v51 = vld [vmem:[#allocation30_spill] sm:$0xff]  ;;  %v3607_v2 = vshrl.u32 %v13029_v58, 16 }
 0x5d4   : > { %6489 = vmatpush.bf16.msrb.mxu2 %v9416_v19  ;;  %v3755_v12 = vunpack.c.l.b16 %v13064_v63 }
 0x5d6   : > { %v5855_v53 = vpop.f32.mrf.mxu3 }
 0x5d7   : > { %v13062_v59 = vadd.f32 %v5855_v53, %v5787_v20  ;;  %v5788_v44 = vpop.f32.mrf.mxu1  ;;  %v3611_v20 = vshll.u32 %v13058_v22, 16  ;;  %v9288_v53 = vor.u32 %v10396_v31, %v9285_v54  ;;  %v3794_v54 = vpack.c.b16 %v3758_v6, %v3755_v12 }
 0x5d8   : > { %v5975_v14 = vpop.f32.mrf.mxu2  ;;  %v5919_v37 = vpop.f32.mrf.mxu0  ;;  %v5789_v38 = vadd.f32 %v5788_v44, %v12839_v16  ;;  %v3609_v44 = vor.u32 %v3607_v2, %v13042_v57 }
 0x5d9   : > { %v13069_v25 = vadd.f32 %v5975_v14, %v13010_v34  ;;  %v13076_v19 = vadd.f32 %v5919_v37, %v13031_v41  ;;  %v3764_v34 = vunpack.c.l.b16 %v13066_v60  ;;  %6420 = vmatpush.bf16.msrb.mxu0 %v9288_v53  ;;  %v3166_v14 = vld [vmem:[#allocation2 + $0x88] sm:$0xff]  ;;  %v13084_v31 = vrot.slane %v3611_v20, 1 }
 0x5da   : > { %v3761_v41 = vunpack.c.l.b16 %v13072_v5  ;;  %v3200_v37 = vpack.c.bf16 %v3169_v24, %v3169_v24  ;;  %v3198_v39 = vpack.c.bf16 %v3166_v14, %v3166_v14  ;;  %v3818_v6 = vshll.u32 %v3794_v54, 16 }
 0x5db   : > { %6174 = vmatmul.bf16.gmra.mxu0 %v12984_v26  ;;  %v13098_v58 = vsel %vm3554_vm1, %v3609_v44, %v13084_v31  ;;  %v3224_v44 = vld [vmem:[#allocation3 + $0xf0] sm:$0xff]  ;;  %v3816_v47 = vshrl.u32 %v3794_v54, 16 }
 0x5dc   : > { %v13090_v28 = vpack.c.b16 %v3764_v34, %v3761_v41  ;;  %15612 = vst [vmem:[#allocation49_spill] sm:$0xff] %v13098_v58  ;;  %v3517_v24 = vunpack.c.l.b16 %v3200_v37  ;;  %v3514_v34 = vunpack.c.l.b16 %v3198_v39  ;;  %v3820_v14 = vrot.slane %v3818_v6, 1  ;;  %v3226_v37 = vld [vmem:[#allocation3 + $0x38] sm:$0xff] }
 0x5dd   : > { %6233 = vmatmul.bf16.gmra.mxu2 %v15611_v51 }
 0x5de   : > { %v5857_v15 = vpop.f32.mrf.mxu3  ;;  %v3823_v57 = vshll.u32 %v13090_v28, 16 }
 0x5df   : > { %v13087_v43 = vadd.f32 %v5857_v15, %v5789_v38  ;;  %v5791_v29 = vpop.f32.mrf.mxu1  ;;  %v3227_v38 = vld [vmem:[#allocation3 + $0x28] sm:$0xff]  ;;  %v13106_v15 = vpack.c.b16 %v3517_v24, %v3514_v34  ;;  %v3821_v24 = vor.u32 %v3820_v14, %v3816_v47 }
 0x5e0   : > { %v5978_v53 = vpop.f32.mrf.mxu2  ;;  %v5921_v20 = vpop.f32.mrf.mxu0  ;;  %v13110_v35 = vrot.slane %v3823_v57, 1  ;;  %v15614_v47 = vld [vmem:[#allocation32_spill] sm:$0xff] }
 0x5e1   : > { %v13093_v26 = vadd.f32 %v5978_v53, %v13016_v23  ;;  %v13102_v12 = vadd.f32 %v5921_v20, %v13044_v4  ;;  %v5792_v23 = vadd.f32 %v5791_v29, %v12839_v16  ;;  %v13112_v4 = vpack.c.bf16 %v3227_v38, %v3226_v37  ;;  %v3223_v29 = vld [vmem:[#allocation3 + $0x78] sm:$0xff]  ;;  %v10360_v20 = vld [vmem:[#allocation9 + $0x64] sm:$0xf] }
 0x5e2   : > { %6046 = vmatmul.bf16.gmra.mxu1 %v15608_v27  ;;  %v3635_v34 = vshll.u32 %v13106_v15, 16  ;;  %v9144_v21 = vor.u32 %v10360_v20, %v9141_v11  ;;  %v13125_v57 = vsel %vm3554_vm1, %v3821_v24, %v13110_v35  ;;  %v10618_v11 = vld [vmem:[#allocation9 + $0x86c] sm:$0xf0]  ;;  %v10424_v37 = vld [vmem:[#allocation9 + $0x264] sm:$0xf] }
 0x5e3   : > { %6115 = vmatmul.bf16.gmra.mxu3 %v13098_v58  ;;  %15613 = vst [vmem:[#allocation40_spill] sm:$0xff] %v13125_v57  ;;  %v9400_v7 = vor.u32 %v10424_v37, %v9397_v36 }
 0x5e4   : > { %6352 = vmatpush.bf16.msrb.mxu3 %v9144_v21  ;;  %v13132_v20 = vrot.slane %v3635_v34, 1 }
 0x5e5   : > { %6490 = vmatpush.bf16.msrb.mxu2 %v9400_v7 }
 0x5e6   : > { %v5860_v2 = vpop.f32.mrf.mxu3 }
 0x5e7   : > { %v13108_v41 = vadd.f32 %v5860_v2, %v5792_v23  ;;  %v5793_v53 = vpop.f32.mrf.mxu1  ;;  %v13118_v23 = vpack.c.bf16 %v3224_v44, %v3223_v29  ;;  %v3175_v2 = vld [vmem:[#allocation2 + $0x130] sm:$0xff]  ;;  %v10163_v44 = vld [vmem:[#allocation9 + $0x860] sm:$0xf]  ;;  %v3631_v29 = vshrl.u32 %v13058_v22, 16 }
 0x5e8   : > { %v5980_v27 = vpop.f32.mrf.mxu2  ;;  %v5924_v6 = vpop.f32.mrf.mxu0  ;;  %v5794_v38 = vadd.f32 %v5793_v53, %v12839_v16  ;;  %v3204_v14 = vpack.c.bf16 %v3175_v2, %v3175_v2  ;;  %v10164_v24 = vor.u32 %v10618_v11, %v10163_v44  ;;  %v10392_v44 = vld [vmem:[#allocation9 + $0x164] sm:$0xf]  ;;  %v9269_v11 = vld [vmem:[#allocation9 + $0x170] sm:$0xf0] }
 0x5e9   : > { %v13115_v39 = vadd.f32 %v5980_v27, %v13026_v1  ;;  %v13121_v54 = vadd.f32 %v5924_v6, %v13062_v59  ;;  %v3770_v27 = vunpack.c.l.b16 %v13112_v4  ;;  %v3172_v1 = vld [vmem:[#allocation2 + $0x98] sm:$0xff]  ;;  %v3767_v6 = vunpack.c.l.b16 %v13118_v23 }
 0x5ea   : > { %v3202_v53 = vpack.c.bf16 %v3172_v1, %v3172_v1  ;;  %6283 = vmatpush.bf16.msrb.mxu1 %v10164_v24  ;;  %v3523_v34 = vunpack.c.l.b16 %v3204_v14  ;;  %v3851_v24 = vshrl.u32 %v13090_v28, 16  ;;  %v3181_v28 = vld [vmem:[#allocation2 + $0x30] sm:$0xff] }
 0x5eb   : > { %6179 = vmatmul.bf16.gmra.mxu0 %v13125_v57  ;;  %v3633_v57 = vor.u32 %v3631_v29, %v13084_v31  ;;  %v13139_v9 = vpack.c.b16 %v3770_v27, %v3767_v6 }
 0x5ec   : > { %v3520_v27 = vunpack.c.l.b16 %v3202_v53 }
 0x5ed   : > { %6238 = vmatmul.bf16.gmra.mxu2 %v15614_v47  ;;  %v13147_v36 = vsel %vm3554_vm1, %v3633_v57, %v13132_v20  ;;  %v3230_v57 = vld [vmem:[#allocation3 + $0xd0] sm:$0xff] }
 0x5ee   : > { %v5862_v59 = vpop.f32.mrf.mxu3  ;;  %15615 = vst [vmem:[#allocation68_spill] sm:$0xff] %v13147_v36  ;;  %v13154_v7 = vpack.c.b16 %v3523_v34, %v3520_v27 }
 0x5ef   : > { %v13135_v21 = vadd.f32 %v5862_v59, %v5794_v38  ;;  %v6012_v16 = vpop.f32.mrf.mxu1  ;;  %v3232_v59 = vld [vmem:[#allocation3 + $0x110] sm:$0xff] }
 0x5f0   : > { %v5983_v42 = vpop.f32.mrf.mxu2  ;;  %v6013_v2 = vadd.f32 %v6012_v16, %v12930_v8  ;;  %v5926_v1 = vpop.f32.mrf.mxu0  ;;  %v9272_v8 = vor.u32 %v10392_v44, %v9269_v11  ;;  %v3659_v34 = vshll.u32 %v13154_v7, 16  ;;  %v3229_v44 = vld [vmem:[#allocation3 + $0x128] sm:$0xff]  ;;  %v3853_v11 = vor.u32 %v3851_v24, %v13110_v35 }
 0x5f1   : > { %v13142_v22 = vadd.f32 %v5983_v42, %v13037_v48  ;;  %v13151_v31 = vadd.f32 %v5926_v1, %v13087_v43  ;;  %v3855_v42 = vshll.u32 %v13139_v9, 16  ;;  %v3233_v48 = vld [vmem:[#allocation3 + $0xf8] sm:$0xff]  ;;  %v3759_v1 = vunpack.c.h.b16 %v13060_v46  ;;  %v15617_v46 = vld [vmem:[#allocation31_spill] sm:$0xff] }
 0x5f2   : > { %6051 = vmatmul.bf16.gmra.mxu1 %v15609_v32  ;;  %6421 = vmatpush.bf16.msrb.mxu0 %v9272_v8  ;;  %v13162_v16 = vpack.c.bf16 %v3233_v48, %v3232_v59  ;;  %v3765_v8 = vunpack.c.h.b16 %v13066_v60  ;;  %v3762_v48 = vunpack.c.h.b16 %v13072_v5  ;;  %v3655_v60 = vshrl.u32 %v13106_v15, 16 }
 0x5f3   : > { %6120 = vmatmul.bf16.gmra.mxu3 %v13147_v36  ;;  %v13160_v43 = vrot.slane %v3855_v42, 1  ;;  %v3756_v42 = vunpack.c.h.b16 %v13064_v63 }
 0x5f4   : > { %v3776_v35 = vunpack.c.l.b16 %v13162_v16 }
 0x5f5   : > { %v3795_v59 = vpack.c.b16 %v3759_v1, %v3756_v42  ;;  %v10356_v1 = vld [vmem:[#allocation9 + $0x44] sm:$0xf] }
 0x5f6   : > { %v6081_v38 = vpop.f32.mrf.mxu3 }
 0x5f7   : > { %v13156_v14 = vadd.f32 %v6081_v38, %v6013_v2  ;;  %v6014_v37 = vpop.f32.mrf.mxu1  ;;  %v3178_v38 = vld [vmem:[#allocation2 + $0x70] sm:$0xff]  ;;  %v3830_v42 = vshll.u32 %v3795_v59, 16 }
 0x5f8   : > { %v5985_v29 = vpop.f32.mrf.mxu2  ;;  %v6015_v6 = vadd.f32 %v6014_v37, %v12938_v17  ;;  %v5929_v2 = vpop.f32.mrf.mxu0  ;;  %v13171_v17 = vpack.c.bf16 %v3230_v57, %v3229_v44  ;;  %v3208_v37 = vpack.c.bf16 %v3181_v28, %v3181_v28  ;;  %v13186_v57 = vrot.slane %v3659_v34, 1 }
 0x5f9   : > { %v13165_v53 = vadd.f32 %v5985_v29, %v13055_v49  ;;  %v13174_v27 = vadd.f32 %v5929_v2, %v13108_v41  ;;  %v13178_v49 = vsel %vm3554_vm1, %v3853_v11, %v13160_v43  ;;  %v13188_v29 = vpack.c.b16 %v3765_v8, %v3762_v48  ;;  %v9125_v8 = vld [vmem:[#allocation9 + $0x50] sm:$0xf0] }
 0x5fa   : > { %15616 = vst [vmem:[#allocation39_spill] sm:$0xff] %v13178_v49  ;;  %v3773_v63 = vunpack.c.l.b16 %v13171_v17  ;;  %v3206_v44 = vpack.c.bf16 %v3178_v38, %v3178_v38  ;;  %v3529_v34 = vunpack.c.l.b16 %v3208_v37  ;;  %v9128_v48 = vor.u32 %v10356_v1, %v9125_v8  ;;  %v10614_v38 = vld [vmem:[#allocation9 + $0x84c] sm:$0xf0] }
 0x5fb   : > { %6184 = vmatmul.bf16.gmra.mxu0 %v13178_v49  ;;  %v3657_v49 = vor.u32 %v3655_v60, %v13132_v20  ;;  %v10420_v60 = vld [vmem:[#allocation9 + $0x244] sm:$0xf]  ;;  %v3832_v1 = vrot.slane %v3830_v42, 1 }
 0x5fc   : > { %v13195_v32 = vpack.c.b16 %v3776_v35, %v3773_v63  ;;  %v10147_v35 = vld [vmem:[#allocation9 + $0x840] sm:$0xf]  ;;  %6353 = vmatpush.bf16.msrb.mxu3 %v9128_v48 }
 0x5fd   : > { %6243 = vmatmul.bf16.gmra.mxu2 %v15617_v46 }
 0x5fe   : > { %v6083_v41 = vpop.f32.mrf.mxu3  ;;  %v3879_v37 = vshll.u32 %v13195_v32, 16 }
 0x5ff   : > { %v13191_v24 = vadd.f32 %v6083_v41, %v6015_v6  ;;  %v6017_v5 = vpop.f32.mrf.mxu1  ;;  %v13203_v6 = vsel %vm3554_vm1, %v3657_v49, %v13186_v57  ;;  %v10148_v41 = vor.u32 %v10614_v38, %v10147_v35  ;;  %v9381_v49 = vld [vmem:[#allocation9 + $0x250] sm:$0xf0] }
 0x600   : > { %v5988_v2 = vpop.f32.mrf.mxu2  ;;  %v6018_v11 = vadd.f32 %v6017_v5, %v12951_v30  ;;  %15619 = vst [vmem:[#allocation42_spill] sm:$0xff] %v13203_v6  ;;  %v5931_v28 = vpop.f32.mrf.mxu0  ;;  %v3835_v30 = vshll.u32 %v13188_v29, 16  ;;  %v3239_v5 = vld [vmem:[#allocation3 + $0xc8] sm:$0xff] }
 0x601   : > { %v13198_v15 = vadd.f32 %v5988_v2, %v13076_v19  ;;  %v13208_v20 = vadd.f32 %v5931_v28, %v13135_v21  ;;  %v3526_v19 = vunpack.c.l.b16 %v3206_v44  ;;  %v9384_v2 = vor.u32 %v10420_v60, %v9381_v49  ;;  %6284 = vmatpush.bf16.msrb.mxu1 %v10148_v41 }
 0x602   : > { %6056 = vmatmul.bf16.gmra.mxu1 %v15611_v51  ;;  %v3828_v28 = vshrl.u32 %v3795_v59, 16  ;;  %v13215_v44 = vrot.slane %v3835_v30, 1  ;;  %v13221_v35 = vpack.c.bf16 %v3239_v5, %v3238_v45  ;;  %v3235_v59 = vld [vmem:[#allocation3 + $0x20] sm:$0xff]  ;;  %v3771_v45 = vunpack.c.h.b16 %v13112_v4  ;;  %v10352_v5 = vld [vmem:[#allocation9 + $0x24] sm:$0xf] }
 0x603   : > { %15618 = vst [vmem:[#allocation71_spill] sm:$0xff] %v13198_v15  ;;  %6125 = vmatmul.bf16.gmra.mxu3 %v13203_v6  ;;  %v13211_v63 = vpack.c.b16 %v3529_v34, %v3526_v19  ;;  %6491 = vmatpush.bf16.msrb.mxu2 %v9384_v2  ;;  %v3875_v34 = vshrl.u32 %v13139_v9, 16  ;;  %v13219_v19 = vrot.slane %v3879_v37, 1  ;;  %v9253_v30 = vld [vmem:[#allocation9 + $0x150] sm:$0xf0]  ;;  %v13228_v49 = vpack.c.bf16 %v3236_v52, %v3235_v59 }
 0x604   : > { %v3833_v60 = vor.u32 %v3832_v1, %v3828_v28  ;;  %v3782_v52 = vunpack.c.l.b16 %v13221_v35  ;;  %v3768_v4 = vunpack.c.h.b16 %v13118_v23 }
 0x605   : > { %v3877_v41 = vor.u32 %v3875_v34, %v13160_v43  ;;  %v3679_v34 = vshrl.u32 %v13154_v7, 16 }
 0x606   : > { %v6086_v51 = vpop.f32.mrf.mxu3  ;;  %v13236_v2 = vsel %vm3554_vm1, %v3833_v60, %v13215_v44 }
 0x607   : > { %v13213_v8 = vadd.f32 %v6086_v51, %v6018_v11  ;;  %v6019_v21 = vpop.f32.mrf.mxu1  ;;  %v3683_v51 = vshll.u32 %v13211_v63, 16  ;;  %v10388_v11 = vld [vmem:[#allocation9 + $0x144] sm:$0xf]  ;;  %15620 = vst [vmem:[#allocation74_spill] sm:$0xff] %v13236_v2  ;;  %v13240_v1 = vsel %vm3554_vm1, %v3877_v41, %v13219_v19  ;;  %v13250_v41 = vpack.c.b16 %v3771_v45, %v3768_v4  ;;  %v9093_v4 = vld [vmem:[#allocation9 + $0x10] sm:$0xf0] }
 0x608   : > { %v5990_v15 = vpop.f32.mrf.mxu2  ;;  %v6020_v48 = vadd.f32 %v6019_v21, %v12959_v55  ;;  %v6150_v38 = vpop.f32.mrf.mxu0  ;;  %v3184_v55 = vld [vmem:[#allocation2 + $0x58] sm:$0x1]  ;;  %v9256_v9 = vor.u32 %v10388_v11, %v9253_v30  ;;  %15621 = vst [vmem:[#allocation55_spill] sm:$0xff] %v13240_v1  ;;  %v9109_v21 = vld [vmem:[#allocation9 + $0x30] sm:$0xf0]  ;;  %v3779_v11 = vunpack.c.l.b16 %v13228_v49  ;;  %v3681_v23 = vor.u32 %v3679_v34, %v13186_v57 }
 0x609   : > { %v13224_v42 = vadd.f32 %v5990_v15, %v13102_v12  ;;  %v13231_v37 = vadd.f32 %v6150_v38, %v13156_v14  ;;  %v10131_v12 = vld [vmem:[#allocation9 + $0x820] sm:$0xf]  ;;  %v10610_v15 = vld [vmem:[#allocation9 + $0x82c] sm:$0xf0]  ;;  %v9112_v14 = vor.u32 %v10352_v5, %v9109_v21  ;;  %v3685_v59 = vrot.slane %v3683_v51, 1 }
 0x60a   : > { %6422 = vmatpush.bf16.msrb.mxu0 %v9256_v9  ;;  %v10132_v43 = vor.u32 %v10610_v15, %v10131_v12  ;;  %v3210_v30 = vpack.c.bf16 %v3184_v55, %v3184_v55  ;;  %v13254_v15 = vpack.c.b16 %v3782_v52, %v3779_v11  ;;  %v10115_v51 = vld [vmem:[#allocation9 + $0x800] sm:$0xf]  ;;  %v10606_v5 = vld [vmem:[#allocation9 + $0x80c] sm:$0xf0]  ;;  %v10348_v55 = vld [vmem:[#allocation9 + $0x4] sm:$0xf] }
 0x60b   : > { %6189 = vmatmul.bf16.gmra.mxu0 %v13240_v1  ;;  %6354 = vmatpush.bf16.msrb.mxu3 %v9112_v14  ;;  %v10116_v21 = vor.u32 %v10606_v5, %v10115_v51  ;;  %v9096_v57 = vor.u32 %v10348_v55, %v9093_v4  ;;  %v3245_v14 = vld [vmem:[#allocation3 + $0x118] sm:$0xff]  ;;  %v3899_v55 = vshrl.u32 %v13195_v32, 16 }
 0x60c   : > { %6285 = vmatpush.bf16.msrb.mxu1 %v10132_v43  ;;  %v3532_v43 = vunpack.c.l.b16 %v3210_v30  ;;  %v3903_v52 = vshll.u32 %v13254_v15, 16 }
 0x60d   : > { %6248 = vmatmul.bf16.gmra.mxu2 %v13236_v2 }
 0x60e   : > { %v6088_v28 = vpop.f32.mrf.mxu3  ;;  %v3553_v34 = vpack.c.b16 %v3532_v43, %v3532_v43 }
 0x60f   : > { %v13248_v38 = vadd.f32 %v6088_v28, %v6020_v48  ;;  %v6022_v60 = vpop.f32.mrf.mxu1  ;;  %v13261_v48 = vsel %vm3554_vm1, %v3681_v23, %v3685_v59  ;;  %6355 = vmatpush.bf16.msrb.mxu3 %v9096_v57  ;;  %v3242_v23 = vld [vmem:[#allocation3 + $0x98] sm:$0xff] }
 0x610   : > { %v5993_v9 = vpop.f32.mrf.mxu2  ;;  %v6023_v12 = vadd.f32 %v6022_v60, %v12971_v3  ;;  %15622 = vst [vmem:[#allocation77_spill] sm:$0xff] %v13261_v48  ;;  %v6152_v45 = vpop.f32.mrf.mxu0  ;;  %6286 = vmatpush.bf16.msrb.mxu1 %v10116_v21  ;;  %v3859_v60 = vshrl.u32 %v13188_v29, 16  ;;  %v3901_v29 = vor.u32 %v3899_v55, %v13219_v19  ;;  %v10416_v19 = vld [vmem:[#allocation9 + $0x224] sm:$0xf] }
 0x611   : > { %v13257_v7 = vadd.f32 %v5993_v9, %v13121_v54  ;;  %v13265_v3 = vadd.f32 %v6152_v45, %v13191_v24  ;;  %v3863_v54 = vshll.u32 %v13250_v41, 16  ;;  %v3244_v24 = vld [vmem:[#allocation3 + $0x10] sm:$0xff]  ;;  %v3905_v45 = vrot.slane %v3903_v52, 1 }
 0x612   : > { %6061 = vmatmul.bf16.gmra.mxu1 %v15614_v47  ;;  %v13276_v21 = vpack.c.bf16 %v3245_v14, %v3244_v24  ;;  %v3861_v57 = vor.u32 %v3859_v60, %v13215_v44  ;;  %v3703_v52 = vshrl.u32 %v13211_v63, 16  ;;  %v9365_v14 = vld [vmem:[#allocation9 + $0x230] sm:$0xf0] }
 0x613   : > { %6130 = vmatmul.bf16.gmra.mxu3 %v13261_v48  ;;  %v13272_v9 = vrot.slane %v3863_v54, 1  ;;  %v3707_v54 = vshll.u32 %v3553_v34, 16 }
 0x614   : > { %v3788_v44 = vunpack.c.l.b16 %v13276_v21  ;;  %v3705_v34 = vor.u32 %v3703_v52, %v3685_v59 }
 0x615   : > { %v13291_v32 = vsel %vm3554_vm1, %v3861_v57, %v13272_v9  ;;  %v10384_v57 = vld [vmem:[#allocation9 + $0x124] sm:$0xf] }
 0x616   : > { %v6091_v28 = vpop.f32.mrf.mxu3  ;;  %15623 = vst [vmem:[#allocation46_spill] sm:$0xff] %v13291_v32 }
 0x617   : > { %v13269_v11 = vadd.f32 %v6091_v28, %v6023_v12  ;;  %v6024_v30 = vpop.f32.mrf.mxu1  ;;  %v3241_v12 = vld [vmem:[#allocation3 + $0x88] sm:$0xff] }
 0x618   : > { %v5995_v51 = vpop.f32.mrf.mxu2  ;;  %v6025_v5 = vadd.f32 %v6024_v30, %v12979_v0  ;;  %v6155_v43 = vpop.f32.mrf.mxu0  ;;  %v13283_v28 = vpack.c.bf16 %v3242_v23, %v3241_v12  ;;  %v3777_v0 = vunpack.c.h.b16 %v13162_v16  ;;  %v3709_v30 = vrot.slane %v3707_v54, 1 }
 0x619   : > { %v13279_v4 = vadd.f32 %v5995_v51, %v13151_v31  ;;  %v13286_v2 = vadd.f32 %v6155_v43, %v13213_v8  ;;  %v13294_v31 = vsel %vm3554_vm1, %v3901_v29, %v3905_v45  ;;  %v3774_v8 = vunpack.c.h.b16 %v13171_v17  ;;  %v9237_v29 = vld [vmem:[#allocation9 + $0x130] sm:$0xf0] }
 0x61a   : > { %15624 = vst [vmem:[#allocation80_spill] sm:$0xff] %v13294_v31  ;;  %v3785_v60 = vunpack.c.l.b16 %v13283_v28  ;;  %v9368_v23 = vor.u32 %v10416_v19, %v9365_v14  ;;  %v13312_v59 = vsel %vm3554_vm1, %v3705_v34, %v3709_v30  ;;  %v9240_v54 = vor.u32 %v10384_v57, %v9237_v29 }
 0x61b   : > { %6194 = vmatmul.bf16.gmra.mxu0 %v13294_v31  ;;  %v13302_v55 = vpack.c.b16 %v3777_v0, %v3774_v8  ;;  %15625 = vst [vmem:[#allocation45_spill] sm:$0xff] %v13312_v59 }
 0x61c   : > { %v13305_v43 = vpack.c.b16 %v3788_v44, %v3785_v60  ;;  %6492 = vmatpush.bf16.msrb.mxu2 %v9368_v23  ;;  %6423 = vmatpush.bf16.msrb.mxu0 %v9240_v54  ;;  %v3248_v44 = vld [vmem:[#allocation3 + $0x48] sm:$0x1]  ;;  %v3923_v23 = vshrl.u32 %v13254_v15, 16  ;;  %v10380_v54 = vld [vmem:[#allocation9 + $0x104] sm:$0xf] }
 0x61d   : > { %6253 = vmatmul.bf16.gmra.mxu2 %v13291_v32 }
 0x61e   : > { %v6093_v16 = vpop.f32.mrf.mxu3  ;;  %v3927_v52 = vshll.u32 %v13305_v43, 16 }
 0x61f   : > { %v6094_v24 = vadd.f32 %v6093_v16, %v6025_v5  ;;  %v6027_v51 = vpop.f32.mrf.mxu1  ;;  %v3883_v16 = vshrl.u32 %v13250_v41, 16 }
 0x620   : > { %v5998_v63 = vpop.f32.mrf.mxu2  ;;  %v6028_v12 = vadd.f32 %v6027_v51, %v12990_v10  ;;  %v6157_v5 = vpop.f32.mrf.mxu0  ;;  %v3887_v10 = vshll.u32 %v13302_v55, 16 }
 0x621   : > { %v13308_v17 = vadd.f32 %v5998_v63, %v13174_v27  ;;  %v13316_v0 = vadd.f32 %v6157_v5, %v13248_v38  ;;  %v3247_v27 = vld [vmem:[#allocation3 + $0x30] sm:$0x1]  ;;  %v3929_v38 = vrot.slane %v3927_v52, 1  ;;  %v3885_v57 = vor.u32 %v3883_v16, %v13272_v9 }
 0x622   : > { %6066 = vmatmul.bf16.gmra.mxu1 %v15617_v46  ;;  %v3889_v34 = vrot.slane %v3887_v10, 1  ;;  %v13323_v51 = vpack.c.bf16 %v3248_v44, %v3247_v27  ;;  %v3925_v5 = vor.u32 %v3923_v23, %v3905_v45  ;;  %v3783_v10 = vunpack.c.h.b16 %v13221_v35  ;;  %v15628_v23 = vld [vmem:[#allocation17_spill] sm:$0xff] }
 0x623   : > { %6135 = vmatmul.bf16.gmra.mxu3 %v13312_v59 }
 0x624   : > { %v13333_v41 = vsel %vm3554_vm1, %v3885_v57, %v3889_v34  ;;  %v13336_v15 = vsel %vm3554_vm1, %v3925_v5, %v3929_v38 }
 0x625   : > { %15626 = vst [vmem:[#allocation83_spill] sm:$0xff] %v13333_v41 }
 0x626   : > { %v6096_v8 = vpop.f32.mrf.mxu3  ;;  %15627 = vst [vmem:[#allocation48_spill] sm:$0xff] %v13336_v15 }
 0x627   : > { %v6097_v19 = vadd.f32 %v6096_v8, %v6028_v12  ;;  %v6029_v14 = vpop.f32.mrf.mxu1 }
 0x628   : > { %v6000_v30 = vpop.f32.mrf.mxu2  ;;  %v6030_v60 = vadd.f32 %v6029_v14, %v12998_v50  ;;  %v6160_v29 = vpop.f32.mrf.mxu0  ;;  %v9221_v50 = vld [vmem:[#allocation9 + $0x110] sm:$0xf0] }
 0x629   : > { %v13326_v63 = vadd.f32 %v6000_v30, %v13208_v20  ;;  %v13330_v12 = vadd.f32 %v6160_v29, %v13269_v11  ;;  %v3791_v20 = vunpack.c.l.b16 %v13323_v51  ;;  %v9224_v52 = vor.u32 %v10380_v54, %v9221_v50  ;;  %v10412_v29 = vld [vmem:[#allocation9 + $0x204] sm:$0xf] }
 0x62a   : > { %v3780_v11 = vunpack.c.h.b16 %v13228_v49  ;;  %v9349_v49 = vld [vmem:[#allocation9 + $0x210] sm:$0xf0] }
 0x62b   : > { %6199 = vmatmul.bf16.gmra.mxu0 %v13336_v15  ;;  %v3812_v16 = vpack.c.b16 %v3791_v20, %v3791_v20  ;;  %v9352_v54 = vor.u32 %v10412_v29, %v9349_v49 }
 0x62c   : > { %6424 = vmatpush.bf16.msrb.mxu0 %v9224_v52  ;;  %v3807_v14 = vpack.c.b16 %v3783_v10, %v3780_v11 }
 0x62d   : > { %6258 = vmatmul.bf16.gmra.mxu2 %v13333_v41  ;;  %v9941_v41 = vld [vmem:[#allocation9 + $0x6b0] sm:$0xf0] }
 0x62e   : > { %v6098_v9 = vpop.f32.mrf.mxu3  ;;  %v3911_v5 = vshll.u32 %v3807_v14, 16  ;;  %6493 = vmatpush.bf16.msrb.mxu2 %v9352_v54 }
 0x62f   : > { %v6099_v45 = vadd.f32 %v6098_v9, %v6030_v60  ;;  %v6032_v27 = vpop.f32.mrf.mxu1  ;;  %v3951_v60 = vshll.u32 %v3812_v16, 16 }
 0x630   : > { %v6033_v44 = vadd.f32 %v6032_v27, %v13006_v18  ;;  %v6219_v8 = vpop.f32.mrf.mxu2  ;;  %v6162_v30 = vpop.f32.mrf.mxu0  ;;  %v3947_v18 = vshrl.u32 %v13305_v43, 16  ;;  %v3913_v11 = vrot.slane %v3911_v5, 1 }
 0x631   : > { %v13345_v35 = vadd.f32 %v6219_v8, %v13231_v37  ;;  %v13349_v57 = vadd.f32 %v6162_v30, %v6094_v24  ;;  %v3907_v37 = vshrl.u32 %v13302_v55, 16  ;;  %v3953_v24 = vrot.slane %v3951_v60, 1 }
 0x632   : > { %6287 = vmatmul.bf16.vlgmr.msrb.gmra.mxu1 %v13052_v33  ;;  %v3949_v27 = vor.u32 %v3947_v18, %v3929_v38  ;;  %v3789_v55 = vunpack.c.h.b16 %v13276_v21  ;;  %v15631_v21 = vld [vmem:[#allocation107_spill] sm:$0xff] }
 0x633   : > { %6356 = vmatmul.bf16.vlgmr.msrb.gmra.mxu3 %v15628_v23  ;;  %v3909_v16 = vor.u32 %v3907_v37, %v3889_v34 }
 0x635   : > { %v13360_v43 = vsel %vm3554_vm1, %v3909_v16, %v3913_v11 }
 0x636   : > { %v6101_v50 = vpop.f32.mrf.mxu3  ;;  %15629 = vst [vmem:[#allocation86_spill] sm:$0xff] %v13360_v43 }
 0x637   : > { %v6102_v10 = vadd.f32 %v6101_v50, %v6033_v44  ;;  %v6034_v20 = vpop.f32.mrf.mxu1  ;;  %v13363_v44 = vsel %vm3554_vm1, %v3949_v27, %v3953_v24 }
 0x638   : > { %v6035_v52 = vadd.f32 %v6034_v20, %v13014_v56  ;;  %v6221_v9 = vpop.f32.mrf.mxu2  ;;  %v6165_v30 = vpop.f32.mrf.mxu0  ;;  %15630 = vst [vmem:[#allocation85_spill] sm:$0xff] %v13363_v44 }
 0x639   : > { %v13355_v8 = vadd.f32 %v6221_v9, %v13265_v3  ;;  %v13357_v29 = vadd.f32 %v6165_v30, %v6097_v19  ;;  %v3786_v3 = vunpack.c.h.b16 %v13283_v28  ;;  %v9717_v30 = vld [vmem:[#allocation9 + $0x4f0] sm:$0xf0] }
 0x63b   : > { %6204 = vmatmul.bf16.gmra.mxu0 %v13363_v44  ;;  %v3810_v5 = vpack.c.b16 %v3789_v55, %v3786_v3 }
 0x63d   : > { %6263 = vmatmul.bf16.gmra.mxu2 %v13360_v43  ;;  %v3935_v18 = vshll.u32 %v3810_v5, 16 }
 0x63e   : > { %v6103_v56 = vpop.f32.mrf.mxu3 }
 0x63f   : > { %v6104_v38 = vadd.f32 %v6103_v56, %v6035_v52  ;;  %v6037_v49 = vpop.f32.mrf.mxu1  ;;  %v3937_v27 = vrot.slane %v3935_v18, 1  ;;  %v9973_v18 = vld [vmem:[#allocation9 + $0x6f0] sm:$0xf0] }
 0x640   : > { %v6038_v19 = vadd.f32 %v6037_v49, %v13022_v61  ;;  %v6224_v34 = vpop.f32.mrf.mxu2  ;;  %v6167_v54 = vpop.f32.mrf.mxu0  ;;  %v3931_v61 = vshrl.u32 %v3807_v14, 16  ;;  %v3792_v49 = vunpack.c.h.b16 %v13323_v51  ;;  %v10472_v14 = vld [vmem:[#allocation9 + $0x3e4] sm:$0xf] }
 0x641   : > { %v13371_v60 = vadd.f32 %v6224_v34, %v13286_v2  ;;  %v13375_v50 = vadd.f32 %v6167_v54, %v6099_v45  ;;  %v10504_v2 = vld [vmem:[#allocation9 + $0x4e4] sm:$0xf] }
 0x642   : > { %6292 = vmatmul.bf16.gmra.mxu1 %v13098_v58  ;;  %v3933_v55 = vor.u32 %v3931_v61, %v3913_v11  ;;  %v9720_v56 = vor.u32 %v10504_v2, %v9717_v30  ;;  %v3813_v61 = vpack.c.b16 %v3792_v49, %v3792_v49  ;;  %v10536_v2 = vld [vmem:[#allocation9 + $0x5e4] sm:$0xf]  ;;  %v9845_v30 = vld [vmem:[#allocation9 + $0x5f0] sm:$0xf0] }
 0x643   : > { %6361 = vmatmul.bf16.gmra.mxu3 %v15631_v21 }
 0x644   : > { %v13384_v45 = vsel %vm3554_vm1, %v3933_v55, %v3937_v27  ;;  %6624 = vmatpush.bf16.msra.mxu3 %v9720_v56  ;;  %v9848_v55 = vor.u32 %v10536_v2, %v9845_v30  ;;  %v15634_v56 = vld [vmem:[#allocation19_spill] sm:$0xff] }
 0x645   : > { %15632 = vst [vmem:[#allocation76_spill] sm:$0xff] %v13384_v45 }
 0x646   : > { %v6106_v20 = vpop.f32.mrf.mxu3  ;;  %6693 = vmatpush.bf16.msra.mxu0 %v9848_v55 }
 0x647   : > { %v6107_v37 = vadd.f32 %v6106_v20, %v6038_v19  ;;  %v6039_v28 = vpop.f32.mrf.mxu1  ;;  %v10568_v19 = vld [vmem:[#allocation9 + $0x6e4] sm:$0xf] }
 0x648   : > { %v6040_v52 = vadd.f32 %v6039_v28, %v13034_v40  ;;  %v6226_v9 = vpop.f32.mrf.mxu2  ;;  %v6170_v16 = vpop.f32.mrf.mxu0  ;;  %v15633_v40 = vld [vmem:[#allocation101_spill] sm:$0xff] }
 0x649   : > { %v13379_v24 = vadd.f32 %v6226_v9, %v13316_v0  ;;  %v13381_v3 = vadd.f32 %v6170_v16, %v6102_v10  ;;  %v9589_v0 = vld [vmem:[#allocation9 + $0x3f0] sm:$0xf0]  ;;  %v9976_v10 = vor.u32 %v10568_v19, %v9973_v18 }
 0x64a   : > { %v9592_v54 = vor.u32 %v10472_v14, %v9589_v0  ;;  %v3959_v14 = vshll.u32 %v3813_v61, 16  ;;  %v3955_v0 = vshrl.u32 %v3810_v5, 16  ;;  %v15636_v61 = vld [vmem:[#allocation109_spill] sm:$0xff] }
 0x64b   : > { %6425 = vmatmul.bf16.vlgmr.msrb.gmra.mxu0 %v15633_v40  ;;  %6762 = vmatpush.bf16.msra.mxu2 %v9976_v10 }
 0x64c   : > { %6555 = vmatpush.bf16.msra.mxu1 %v9592_v54  ;;  %v3957_v54 = vor.u32 %v3955_v0, %v3937_v27  ;;  %v3961_v18 = vrot.slane %v3959_v14, 1  ;;  %v15637_v14 = vld [vmem:[#allocation122_spill] sm:$0xff]  ;;  %v10468_v0 = vld [vmem:[#allocation9 + $0x3c4] sm:$0xf] }
 0x64d   : > { %6268 = vmatmul.bf16.gmra.mxu2 %v13384_v45 }
 0x64e   : > { %v6108_v34 = vpop.f32.mrf.mxu3 }
 0x64f   : > { %v6109_v11 = vadd.f32 %v6108_v34, %v6040_v52  ;;  %v6042_v20 = vpop.f32.mrf.mxu1 }
 0x650   : > { %v6043_v28 = vadd.f32 %v6042_v20, %v13047_v62  ;;  %v6229_v9 = vpop.f32.mrf.mxu2  ;;  %v6172_v16 = vpop.f32.mrf.mxu0 }
 0x651   : > { %v13391_v51 = vadd.f32 %v6229_v9, %v13330_v12  ;;  %v13395_v52 = vadd.f32 %v6172_v16, %v6104_v38  ;;  %v13404_v38 = vsel %vm3554_vm1, %v3957_v54, %v3961_v18  ;;  %v9701_v16 = vld [vmem:[#allocation9 + $0x4d0] sm:$0xf0] }
 0x652   : > { %6297 = vmatmul.bf16.gmra.mxu1 %v13147_v36  ;;  %15635 = vst [vmem:[#allocation61_spill] sm:$0xff] %v13404_v38 }
 0x653   : > { %6366 = vmatmul.bf16.gmra.mxu3 %v15634_v56 }
 0x656   : > { %v6111_v62 = vpop.f32.mrf.mxu3 }
 0x657   : > { %v6112_v49 = vadd.f32 %v6111_v62, %v6043_v28  ;;  %v6044_v19 = vpop.f32.mrf.mxu1 }
 0x658   : > { %v6045_v12 = vadd.f32 %v6044_v19, %v13069_v25  ;;  %v6231_v34 = vpop.f32.mrf.mxu2  ;;  %v6175_v10 = vpop.f32.mrf.mxu0  ;;  %v9573_v19 = vld [vmem:[#allocation9 + $0x3d0] sm:$0xf0] }
 0x659   : > { %v13399_v20 = vadd.f32 %v6231_v34, %v13349_v57  ;;  %v13401_v9 = vadd.f32 %v6175_v10, %v6107_v37  ;;  %v10500_v57 = vld [vmem:[#allocation9 + $0x4c4] sm:$0xf]  ;;  %v9576_v34 = vor.u32 %v10468_v0, %v9573_v19  ;;  %v15639_v0 = vld [vmem:[#allocation116_spill] sm:$0xff] }
 0x65a   : > { %v9704_v55 = vor.u32 %v10500_v57, %v9701_v16  ;;  %v9829_v57 = vld [vmem:[#allocation9 + $0x5d0] sm:$0xf0] }
 0x65b   : > { %6430 = vmatmul.bf16.gmra.mxu0 %v15636_v61  ;;  %6556 = vmatpush.bf16.msra.mxu1 %v9576_v34  ;;  %v9909_v61 = vld [vmem:[#allocation9 + $0x670] sm:$0xf0] }
 0x65c   : > { %6625 = vmatpush.bf16.msra.mxu3 %v9704_v55  ;;  %v15638_v55 = vld [vmem:[#allocation114_spill] sm:$0xff] }
 0x65d   : > { %6273 = vmatmul.bf16.gmra.mxu2 %v13404_v38 }
 0x65e   : > { %v6113_v5 = vpop.f32.mrf.mxu3 }
 0x65f   : > { %v6114_v28 = vadd.f32 %v6113_v5, %v6045_v12  ;;  %v6047_v2 = vpop.f32.mrf.mxu1  ;;  %v10564_v12 = vld [vmem:[#allocation9 + $0x6c4] sm:$0xf] }
 0x660   : > { %v6048_v25 = vadd.f32 %v6047_v2, %v13093_v26  ;;  %v6234_v27 = vpop.f32.mrf.mxu2  ;;  %v6177_v37 = vpop.f32.mrf.mxu0  ;;  %v9957_v26 = vld [vmem:[#allocation9 + $0x6d0] sm:$0xf0] }
 0x661   : > { %v13410_v30 = vadd.f32 %v6234_v27, %v13357_v29  ;;  %v13414_v62 = vadd.f32 %v6177_v37, %v6109_v11  ;;  %v9960_v54 = vor.u32 %v10564_v12, %v9957_v26  ;;  %v10532_v11 = vld [vmem:[#allocation9 + $0x5c4] sm:$0xf] }
 0x662   : > { %6302 = vmatmul.bf16.gmra.mxu1 %v13203_v6  ;;  %v9832_v37 = vor.u32 %v10532_v11, %v9829_v57  ;;  %v3216_v11 = vld [vmem:[#allocation3 + $0xd8] sm:$0xff]  ;;  %v10496_v57 = vld [vmem:[#allocation9 + $0x4a4] sm:$0xf] }
 0x663   : > { %6371 = vmatmul.bf16.gmra.mxu3 %v15637_v14  ;;  %6763 = vmatpush.bf16.msra.mxu2 %v9960_v54 }
 0x664   : > { %6694 = vmatpush.bf16.msra.mxu0 %v9832_v37  ;;  %v3213_v37 = vld [vmem:[#allocation3 + $0x68] sm:$0xfe] }
 0x666   : > { %v6116_v18 = vpop.f32.mrf.mxu3 }
 0x667   : > { %v6117_v29 = vadd.f32 %v6116_v18, %v6048_v25  ;;  %v6049_v10 = vpop.f32.mrf.mxu1 }
 0x668   : > { %v6050_v5 = vadd.f32 %v6049_v10, %v13115_v39  ;;  %v6236_v2 = vpop.f32.mrf.mxu2  ;;  %v6180_v16 = vpop.f32.mrf.mxu0 }
 0x669   : > { %v13418_v27 = vadd.f32 %v6236_v2, %v13375_v50  ;;  %v13420_v38 = vadd.f32 %v6180_v16, %v6112_v49 }
 0x66b   : > { %6435 = vmatmul.bf16.gmra.mxu0 %v15639_v0  ;;  %v9813_v0 = vld [vmem:[#allocation9 + $0x5b0] sm:$0xf0] }
 0x66d   : > { %6494 = vmatmul.bf16.vlgmr.msrb.gmra.mxu2 %v15638_v55  ;;  %v10464_v55 = vld [vmem:[#allocation9 + $0x3a4] sm:$0xf] }
 0x66e   : > { %v6118_v25 = vpop.f32.mrf.mxu3 }
 0x66f   : > { %v6119_v19 = vadd.f32 %v6118_v25, %v6050_v5  ;;  %v6052_v12 = vpop.f32.mrf.mxu1  ;;  %v3222_v25 = vld [vmem:[#allocation3 + $0xc0] sm:$0xff] }
 0x670   : > { %v6053_v39 = vadd.f32 %v6052_v12, %v13142_v22  ;;  %v6239_v34 = vpop.f32.mrf.mxu2  ;;  %v6182_v26 = vpop.f32.mrf.mxu0 }
 0x671   : > { %v13426_v50 = vadd.f32 %v6239_v34, %v13381_v3  ;;  %v13430_v49 = vadd.f32 %v6182_v26, %v6114_v28  ;;  %v9685_v3 = vld [vmem:[#allocation9 + $0x4b0] sm:$0xf0]  ;;  %v3253_v28 = vpack.c.bf16 %v3216_v11, %v3216_v11  ;;  %v3219_v26 = vld [vmem:[#allocation3 + $0xb8] sm:$0xff] }
 0x672   : > { %6307 = vmatmul.bf16.gmra.mxu1 %v13261_v48  ;;  %v9688_v12 = vor.u32 %v10496_v57, %v9685_v3  ;;  %v3255_v57 = vpack.c.bf16 %v3219_v26, %v3219_v26  ;;  %v15642_v11 = vld [vmem:[#allocation71_spill] sm:$0xff] }
 0x673   : > { %6376 = vmatmul.bf16.gmra.mxu3 %v12533_v13 }
 0x674   : > { %6626 = vmatpush.bf16.msra.mxu3 %v9688_v12 }
 0x676   : > { %v6121_v54 = vpop.f32.mrf.mxu3 }
 0x677   : > { %v6122_v18 = vadd.f32 %v6121_v54, %v6053_v39  ;;  %v6054_v10 = vpop.f32.mrf.mxu1  ;;  %v15640_v39 = vld [vmem:[#allocation120_spill] sm:$0xff] }
 0x678   : > { %v6055_v2 = vadd.f32 %v6054_v10, %v13165_v53  ;;  %v6241_v5 = vpop.f32.mrf.mxu2  ;;  %v6185_v16 = vpop.f32.mrf.mxu0  ;;  %v15641_v54 = vld [vmem:[#allocation124_spill] sm:$0xff]  ;;  %v3251_v53 = vpack.c.bf16 %v3213_v37, %v3213_v37  ;;  %v3257_v10 = vpack.c.bf16 %v3222_v25, %v3222_v25 }
 0x679   : > { %v13434_v22 = vadd.f32 %v6241_v5, %v13395_v52  ;;  %v13436_v34 = vadd.f32 %v6185_v16, %v6117_v29  ;;  %v9557_v52 = vld [vmem:[#allocation9 + $0x3b0] sm:$0xf0]  ;;  %v10560_v5 = vld [vmem:[#allocation9 + $0x6a4] sm:$0xf]  ;;  %v3760_v29 = vunpack.c.l.b16 %v3253_v28 }
 0x67a   : > { %v9560_v43 = vor.u32 %v10464_v55, %v9557_v52  ;;  %v9944_v3 = vor.u32 %v10560_v5, %v9941_v41  ;;  %v3757_v37 = vunpack.c.l.b16 %v3251_v53  ;;  %v3766_v25 = vunpack.c.l.b16 %v3257_v10 }
 0x67b   : > { %6440 = vmatmul.bf16.gmra.mxu0 %v15641_v54  ;;  %v10528_v54 = vld [vmem:[#allocation9 + $0x5a4] sm:$0xf]  ;;  %v3763_v41 = vunpack.c.l.b16 %v3255_v57 }
 0x67c   : > { %6557 = vmatpush.bf16.msra.mxu1 %v9560_v43  ;;  %6764 = vmatpush.bf16.msra.mxu2 %v9944_v3 }
 0x67d   : > { %6499 = vmatmul.bf16.gmra.mxu2 %v15640_v39  ;;  %v13448_v43 = vpack.c.b16 %v3766_v25, %v3763_v41 }
 0x67e   : > { %v6123_v45 = vpop.f32.mrf.mxu3 }
 0x67f   : > { %v6124_v32 = vadd.f32 %v6123_v45, %v6055_v2  ;;  %v6057_v13 = vpop.f32.mrf.mxu1  ;;  %v9816_v45 = vor.u32 %v10528_v54, %v9813_v0  ;;  %v15643_v2 = vld [vmem:[#allocation28_spill] sm:$0xff]  ;;  %v3847_v0 = vshll.u32 %v13448_v43, 16 }
 0x680   : > { %v6058_v16 = vadd.f32 %v6057_v13, %v15642_v11  ;;  %v6244_v12 = vpop.f32.mrf.mxu2  ;;  %v6187_v55 = vpop.f32.mrf.mxu0  ;;  %v3796_v13 = vpack.c.b16 %v3760_v29, %v3757_v37  ;;  %v3225_v29 = vld [vmem:[#allocation3] sm:$0xff]  ;;  %v15645_v37 = vld [vmem:[#allocation24_spill] sm:$0xff] }
 0x681   : > { %v13442_v39 = vadd.f32 %v6244_v12, %v13401_v9  ;;  %v13446_v28 = vadd.f32 %v6187_v55, %v6119_v19  ;;  %6695 = vmatpush.bf16.msra.mxu0 %v9816_v45  ;;  %v3228_v19 = vld [vmem:[#allocation3 + $0xb0] sm:$0xff]  ;;  %v3849_v25 = vrot.slane %v3847_v0, 1 }
 0x682   : > { %6312 = vmatmul.bf16.gmra.mxu1 %v13312_v59  ;;  %v3842_v10 = vshll.u32 %v3796_v13, 16  ;;  %v15644_v12 = vld [vmem:[#allocation21_spill] sm:$0xff]  ;;  %v3261_v55 = vpack.c.bf16 %v3228_v19, %v3228_v19  ;;  %v9669_v19 = vld [vmem:[#allocation9 + $0x490] sm:$0xf0] }
 0x683   : > { %6381 = vmatmul.bf16.gmra.mxu3 %v15643_v2  ;;  %v10492_v0 = vld [vmem:[#allocation9 + $0x484] sm:$0xf] }
 0x684   : > { %v3844_v57 = vrot.slane %v3842_v10, 1 }
 0x686   : > { %v6126_v9 = vpop.f32.mrf.mxu3 }
 0x687   : > { %v6127_v26 = vadd.f32 %v6126_v9, %v6058_v16  ;;  %v6059_v53 = vpop.f32.mrf.mxu1  ;;  %v3840_v16 = vshrl.u32 %v3796_v13, 16  ;;  %v3259_v9 = vpack.c.bf16 %v3225_v29, %v3225_v29  ;;  %v9672_v29 = vor.u32 %v10492_v0, %v9669_v19  ;;  %v3234_v0 = vld [vmem:[#allocation3 + $0x18] sm:$0xff] }
 0x688   : > { %v6060_v52 = vadd.f32 %v6059_v53, %v13224_v42  ;;  %v6246_v5 = vpop.f32.mrf.mxu2  ;;  %v6190_v54 = vpop.f32.mrf.mxu0 }
 0x689   : > { %v13452_v3 = vadd.f32 %v6246_v5, %v13414_v62  ;;  %v13455_v11 = vadd.f32 %v6190_v54, %v6122_v18  ;;  %v3845_v62 = vor.u32 %v3844_v57, %v3840_v16  ;;  %v3772_v54 = vunpack.c.l.b16 %v3261_v55  ;;  %v9541_v16 = vld [vmem:[#allocation9 + $0x390] sm:$0xf0]  ;;  %6627 = vmatpush.bf16.msra.mxu3 %v9672_v29 }
 0x68a   : > { %v3769_v57 = vunpack.c.l.b16 %v3259_v9  ;;  %v3231_v29 = vld [vmem:[#allocation3 + $0x120] sm:$0xff] }
 0x68b   : > { %6445 = vmatmul.bf16.gmra.mxu0 %v15645_v37  ;;  %v13464_v10 = vsel %vm3554_vm1, %v3845_v62, %v3849_v25 }
 0x68c   : > { %15646 = vst [vmem:[#allocation89_spill] sm:$0xff] %v13464_v10 }
 0x68d   : > { %6504 = vmatmul.bf16.gmra.mxu2 %v15644_v12  ;;  %v15647_v12 = vld [vmem:[#allocation132_spill] sm:$0xff] }
 0x68e   : > { %v6128_v42 = vpop.f32.mrf.mxu3 }
 0x68f   : > { %v6129_v45 = vadd.f32 %v6128_v42, %v6060_v52  ;;  %v6062_v41 = vpop.f32.mrf.mxu1  ;;  %v10556_v42 = vld [vmem:[#allocation9 + $0x684] sm:$0xf] }
 0x690   : > { %v6063_v53 = vadd.f32 %v6062_v41, %v13257_v7  ;;  %v6249_v5 = vpop.f32.mrf.mxu2  ;;  %v6192_v13 = vpop.f32.mrf.mxu0  ;;  %v10460_v7 = vld [vmem:[#allocation9 + $0x384] sm:$0xf]  ;;  %v9925_v41 = vld [vmem:[#allocation9 + $0x690] sm:$0xf0] }
 0x691   : > { %v13461_v18 = vadd.f32 %v6249_v5, %v13420_v38  ;;  %v13468_v52 = vadd.f32 %v6192_v13, %v6124_v32  ;;  %v9544_v38 = vor.u32 %v10460_v7, %v9541_v16  ;;  %v13470_v5 = vpack.c.b16 %v3772_v54, %v3769_v57  ;;  %v10524_v7 = vld [vmem:[#allocation9 + $0x584] sm:$0xf]  ;;  %v9797_v54 = vld [vmem:[#allocation9 + $0x590] sm:$0xf0] }
 0x692   : > { %6317 = vmatmul.bf16.gmra.mxu1 %v13464_v10  ;;  %v9928_v55 = vor.u32 %v10556_v42, %v9925_v41  ;;  %v9800_v16 = vor.u32 %v10524_v7, %v9797_v54  ;;  %v3265_v42 = vpack.c.bf16 %v3234_v0, %v3234_v0  ;;  %v3263_v41 = vpack.c.bf16 %v3231_v29, %v3231_v29  ;;  %v15651_v54 = vld [vmem:[#allocation133_spill] sm:$0xff] }
 0x693   : > { %6386 = vmatmul.bf16.gmra.mxu3 %v15647_v12  ;;  %6558 = vmatpush.bf16.msra.mxu1 %v9544_v38  ;;  %v3871_v13 = vshll.u32 %v13470_v5, 16  ;;  %v15649_v38 = vld [vmem:[#allocation27_spill] sm:$0xff] }
 0x694   : > { %6765 = vmatpush.bf16.msra.mxu2 %v9928_v55  ;;  %6696 = vmatpush.bf16.msra.mxu0 %v9800_v16 }
 0x696   : > { %v6131_v62 = vpop.f32.mrf.mxu3 }
 0x697   : > { %v6132_v37 = vadd.f32 %v6131_v62, %v6063_v53  ;;  %v6064_v2 = vpop.f32.mrf.mxu1  ;;  %v15648_v53 = vld [vmem:[#allocation127_spill] sm:$0xff] }
 0x698   : > { %v6065_v10 = vadd.f32 %v6064_v2, %v13279_v4  ;;  %v6251_v32 = vpop.f32.mrf.mxu2  ;;  %v6195_v19 = vpop.f32.mrf.mxu0  ;;  %v3867_v4 = vshrl.u32 %v13448_v43, 16  ;;  %v3873_v2 = vrot.slane %v3871_v13, 1  ;;  %v3775_v13 = vunpack.c.l.b16 %v3263_v41  ;;  %v10488_v41 = vld [vmem:[#allocation9 + $0x464] sm:$0xf] }
 0x699   : > { %v13474_v9 = vadd.f32 %v6251_v32, %v13430_v49  ;;  %v13477_v57 = vadd.f32 %v6195_v19, %v6127_v26  ;;  %v3778_v19 = vunpack.c.l.b16 %v3265_v42 }
 0x69a   : > { %v3869_v32 = vor.u32 %v3867_v4, %v3849_v25 }
 0x69b   : > { %6450 = vmatmul.bf16.gmra.mxu0 %v15649_v38  ;;  %v9525_v38 = vld [vmem:[#allocation9 + $0x370] sm:$0xf0] }
 0x69c   : > { %v13487_v0 = vsel %vm3554_vm1, %v3869_v32, %v3873_v2  ;;  %v3240_v32 = vld [vmem:[#allocation3 + $0x60] sm:$0xff] }
 0x69d   : > { %6509 = vmatmul.bf16.gmra.mxu2 %v15648_v53  ;;  %15650 = vst [vmem:[#allocation52_spill] sm:$0xff] %v13487_v0 }
 0x69e   : > { %v6133_v49 = vpop.f32.mrf.mxu3 }
 0x69f   : > { %v6134_v55 = vadd.f32 %v6133_v49, %v6065_v10  ;;  %v6067_v62 = vpop.f32.mrf.mxu1  ;;  %v13493_v10 = vpack.c.b16 %v3778_v19, %v3775_v13  ;;  %v3891_v19 = vshrl.u32 %v13470_v5, 16  ;;  %v15652_v13 = vld [vmem:[#allocation131_spill] sm:$0xff] }
 0x6a0   : > { %v6068_v14 = vadd.f32 %v6067_v62, %v13308_v17  ;;  %v6254_v26 = vpop.f32.mrf.mxu2  ;;  %v6197_v43 = vpop.f32.mrf.mxu0 }
 0x6a1   : > { %v13484_v7 = vadd.f32 %v6254_v26, %v13436_v34  ;;  %v13491_v29 = vadd.f32 %v6197_v43, %v6129_v45  ;;  %v3895_v4 = vshll.u32 %v13493_v10, 16  ;;  %v9653_v26 = vld [vmem:[#allocation9 + $0x470] sm:$0xf0] }
 0x6a2   : > { %6322 = vmatmul.bf16.gmra.mxu1 %v13487_v0  ;;  %v9656_v45 = vor.u32 %v10488_v41, %v9653_v26 }
 0x6a3   : > { %6391 = vmatmul.bf16.gmra.mxu3 %v15651_v54  ;;  %v3897_v43 = vrot.slane %v3895_v4, 1 }
 0x6a4   : > { %6628 = vmatpush.bf16.msra.mxu3 %v9656_v45  ;;  %v15656_v45 = vld [vmem:[#allocation29_spill] sm:$0xff] }
 0x6a6   : > { %v6136_v25 = vpop.f32.mrf.mxu3 }
 0x6a7   : > { %v6137_v17 = vadd.f32 %v6136_v25, %v6068_v14  ;;  %v6069_v16 = vpop.f32.mrf.mxu1  ;;  %v3237_v14 = vld [vmem:[#allocation3 + $0x100] sm:$0xff]  ;;  %v3269_v25 = vpack.c.bf16 %v3240_v32, %v3240_v32 }
 0x6a8   : > { %v6070_v42 = vadd.f32 %v6069_v16, %v13326_v63  ;;  %v6256_v34 = vpop.f32.mrf.mxu2  ;;  %v6200_v62 = vpop.f32.mrf.mxu0  ;;  %v15653_v63 = vld [vmem:[#allocation35_spill] sm:$0xff]  ;;  %v10456_v16 = vld [vmem:[#allocation9 + $0x364] sm:$0xf]  ;;  %v3267_v41 = vpack.c.bf16 %v3237_v14, %v3237_v14 }
 0x6a9   : > { %v13498_v49 = vadd.f32 %v6256_v34, %v13446_v28  ;;  %v13500_v53 = vadd.f32 %v6200_v62, %v6132_v37  ;;  %v10552_v28 = vld [vmem:[#allocation9 + $0x664] sm:$0xf]  ;;  %v9528_v0 = vor.u32 %v10456_v16, %v9525_v38  ;;  %v3893_v62 = vor.u32 %v3891_v19, %v3873_v2  ;;  %v9781_v2 = vld [vmem:[#allocation9 + $0x570] sm:$0xf0] }
 0x6aa   : > { %v9912_v26 = vor.u32 %v10552_v28, %v9909_v61  ;;  %v3784_v40 = vunpack.c.l.b16 %v3269_v25 }
 0x6ab   : > { %6455 = vmatmul.bf16.gmra.mxu0 %v15653_v63  ;;  %6559 = vmatpush.bf16.msra.mxu1 %v9528_v0  ;;  %v13512_v32 = vsel %vm3554_vm1, %v3893_v62, %v3897_v43  ;;  %v3246_v62 = vld [vmem:[#allocation3 + $0x40] sm:$0xff] }
 0x6ac   : > { %15655 = vst [vmem:[#allocation91_spill] sm:$0xff] %v13512_v32  ;;  %6766 = vmatpush.bf16.msra.mxu2 %v9912_v26  ;;  %v15658_v26 = vld [vmem:[#allocation25_spill] sm:$0xff] }
 0x6ad   : > { %6514 = vmatmul.bf16.gmra.mxu2 %v15652_v13 }
 0x6ae   : > { %v6138_v34 = vpop.f32.mrf.mxu3 }
 0x6af   : > { %v6139_v56 = vadd.f32 %v6138_v34, %v6070_v42  ;;  %v6288_v37 = vpop.f32.mrf.mxu1  ;;  %v10520_v42 = vld [vmem:[#allocation9 + $0x564] sm:$0xf] }
 0x6b0   : > { %v6259_v5 = vpop.f32.mrf.mxu2  ;;  %v13506_v4 = vadd.f32 %v6288_v37, %v13345_v35  ;;  %v6202_v38 = vpop.f32.mrf.mxu0  ;;  %v3781_v35 = vunpack.c.l.b16 %v3267_v41  ;;  %v9784_v19 = vor.u32 %v10520_v42, %v9781_v2  ;;  %v3243_v41 = vld [vmem:[#allocation3 + $0x50] sm:$0xff]  ;;  %v3273_v42 = vpack.c.bf16 %v3246_v62, %v3246_v62  ;;  %v9637_v62 = vld [vmem:[#allocation9 + $0x450] sm:$0xf0] }
 0x6b1   : > { %v13509_v13 = vadd.f32 %v6259_v5, %v13455_v11  ;;  %v13516_v61 = vadd.f32 %v6202_v38, %v6134_v55  ;;  %v3915_v5 = vshrl.u32 %v13493_v10, 16 }
 0x6b2   : > { %15654 = vst [vmem:[#allocation92_spill] sm:$0xff] %v13506_v4  ;;  %6327 = vmatmul.bf16.gmra.mxu1 %v13512_v32  ;;  %v13518_v0 = vpack.c.b16 %v3784_v40, %v3781_v35  ;;  %6697 = vmatpush.bf16.msra.mxu0 %v9784_v19  ;;  %v15659_v40 = vld [vmem:[#allocation38_spill] sm:$0xff]  ;;  %v10753_v4 = vld [vmem:[#allocation10] sm:$0xf] }
 0x6b3   : > { %6396 = vmatmul.bf16.gmra.mxu3 %v15656_v45  ;;  %v3917_v35 = vor.u32 %v3915_v5, %v3897_v43 }
 0x6b4   : > { %v3919_v34 = vshll.u32 %v13518_v0, 16 }
 0x6b6   : > { %v6357_v11 = vpop.f32.mrf.mxu3  ;;  %v3921_v38 = vrot.slane %v3919_v34, 1  ;;  %v10484_v34 = vld [vmem:[#allocation9 + $0x444] sm:$0xf] }
 0x6b7   : > { %v6290_v14 = vpop.f32.mrf.mxu1  ;;  %v9640_v5 = vor.u32 %v10484_v34, %v9637_v62 }
 0x6b8   : > { %v6261_v16 = vpop.f32.mrf.mxu2  ;;  %v13521_v25 = vadd.f32 %v6290_v14, %v13355_v8  ;;  %v6205_v37 = vpop.f32.mrf.mxu0 }
 0x6b9   : > { %v13524_v28 = vadd.f32 %v6261_v16, %v13468_v52  ;;  %v13527_v55 = vadd.f32 %v6205_v37, %v6137_v17  ;;  %v3271_v52 = vpack.c.bf16 %v3243_v41, %v3243_v41  ;;  %v13539_v16 = vsel %vm3554_vm1, %v3917_v35, %v3921_v38  ;;  %6629 = vmatpush.bf16.msra.mxu3 %v9640_v5  ;;  %v9765_v5 = vld [vmem:[#allocation9 + $0x550] sm:$0xf0] }
 0x6ba   : > { %15657 = vst [vmem:[#allocation82_spill] sm:$0xff] %v13521_v25  ;;  %v3790_v37 = vunpack.c.l.b16 %v3273_v42  ;;  %v15662_v25 = vld [vmem:[#allocation135_spill] sm:$0xff]  ;;  %v13545_v35 = vperm.slane %v10753_v4, 1 }
 0x6bb   : > { %6460 = vmatmul.bf16.gmra.mxu0 %v15659_v40  ;;  %15661 = vst [vmem:[#allocation94_spill] sm:$0xff] %v13539_v16  ;;  %v3787_v41 = vunpack.c.l.b16 %v3271_v52 }
 0x6bd   : > { %6519 = vmatmul.bf16.gmra.mxu2 %v15658_v26  ;;  %v13547_v42 = vpack.c.b16 %v3790_v37, %v3787_v41  ;;  %v3249_v37 = vld [vmem:[#allocation3 + $0x80] sm:$0x1]  ;;  %v10516_v41 = vld [vmem:[#allocation9 + $0x544] sm:$0xf] }
 0x6be   : > { %v6359_v8 = vpop.f32.mrf.mxu3 }
 0x6bf   : > { %v6293_v2 = vpop.f32.mrf.mxu1  ;;  %v3943_v4 = vshll.u32 %v13547_v42, 16 }
 0x6c0   : > { %v6264_v19 = vpop.f32.mrf.mxu2  ;;  %v13533_v14 = vadd.f32 %v6293_v2, %v13371_v60  ;;  %v6207_v10 = vpop.f32.mrf.mxu0  ;;  %v10452_v60 = vld [vmem:[#allocation9 + $0x344] sm:$0xf]  ;;  %v9509_v2 = vld [vmem:[#allocation9 + $0x350] sm:$0xf0] }
 0x6c1   : > { %v13536_v17 = vadd.f32 %v6264_v19, %v13477_v57  ;;  %v13543_v43 = vadd.f32 %v6207_v10, %v6139_v56  ;;  %v9512_v57 = vor.u32 %v10452_v60, %v9509_v2  ;;  %v9893_v19 = vld [vmem:[#allocation9 + $0x650] sm:$0xf0]  ;;  %v6358_v10 = vadd.f32 %v6357_v11, %v13545_v35  ;;  %v10448_v2 = vld [vmem:[#allocation9 + $0x324] sm:$0xf]  ;;  %v15665_v11 = vld [vmem:[#allocation134_spill] sm:$0xff] }
 0x6c2   : > { %15660 = vst [vmem:[#allocation51_spill] sm:$0xff] %v13533_v14  ;;  %6332 = vmatmul.bf16.gmra.mxu1 %v13539_v16  ;;  %v10548_v14 = vld [vmem:[#allocation9 + $0x644] sm:$0xf]  ;;  %v9768_v60 = vor.u32 %v10516_v41, %v9765_v5 }
 0x6c3   : > { %6401 = vmatmul.bf16.gmra.mxu3 %v15662_v25  ;;  %v9896_v26 = vor.u32 %v10548_v14, %v9893_v19  ;;  %6560 = vmatpush.bf16.msra.mxu1 %v9512_v57  ;;  %v10480_v57 = vld [vmem:[#allocation9 + $0x424] sm:$0xf] }
 0x6c4   : > { %6698 = vmatpush.bf16.msra.mxu0 %v9768_v60  ;;  %v10444_v60 = vld [vmem:[#allocation9 + $0x304] sm:$0xf] }
 0x6c5   : > { %6767 = vmatpush.bf16.msra.mxu2 %v9896_v26  ;;  %v9493_v26 = vld [vmem:[#allocation9 + $0x330] sm:$0xf0] }
 0x6c6   : > { %v6362_v16 = vpop.f32.mrf.mxu3  ;;  %v9496_v19 = vor.u32 %v10448_v2, %v9493_v26  ;;  %v6360_v2 = vadd.f32 %v6359_v8, %v13545_v35 }
 0x6c7   : > { %v6295_v32 = vpop.f32.mrf.mxu1 }
 0x6c8   : > { %v6266_v56 = vpop.f32.mrf.mxu2  ;;  %v13550_v52 = vadd.f32 %v6295_v32, %v13379_v24  ;;  %v6426_v62 = vpop.f32.mrf.mxu0  ;;  %v9621_v24 = vld [vmem:[#allocation9 + $0x430] sm:$0xf0]  ;;  %v15664_v32 = vld [vmem:[#allocation37_spill] sm:$0xff]  ;;  %6561 = vmatpush.bf16.msra.mxu1 %v9496_v19 }
 0x6c9   : > { %v13554_v34 = vadd.f32 %v6266_v56, %v13491_v29  ;;  %v13557_v14 = vadd.f32 %v6426_v62, %v6358_v10  ;;  %v3939_v29 = vshrl.u32 %v13518_v0, 16  ;;  %v3945_v56 = vrot.slane %v3943_v4, 1  ;;  %v10476_v19 = vld [vmem:[#allocation9 + $0x404] sm:$0xf] }
 0x6ca   : > { %15663 = vst [vmem:[#allocation54_spill] sm:$0xff] %v13550_v52  ;;  %v3275_v52 = vpack.c.bf16 %v3249_v37, %v3249_v37  ;;  %v9624_v21 = vor.u32 %v10480_v57, %v9621_v24  ;;  %v9477_v57 = vld [vmem:[#allocation9 + $0x310] sm:$0xf0] }
 0x6cb   : > { %6465 = vmatmul.bf16.gmra.mxu0 %v15665_v11  ;;  %v3941_v62 = vor.u32 %v3939_v29, %v3921_v38  ;;  %v15668_v38 = vld [vmem:[#allocation34_spill] sm:$0xff]  ;;  %v9605_v24 = vld [vmem:[#allocation9 + $0x410] sm:$0xf0] }
 0x6cc   : > { %6630 = vmatpush.bf16.msra.mxu3 %v9624_v21  ;;  %v3793_v4 = vunpack.c.l.b16 %v3275_v52  ;;  %v9608_v8 = vor.u32 %v10476_v19, %v9605_v24 }
 0x6cd   : > { %6524 = vmatmul.bf16.gmra.mxu2 %v15664_v32  ;;  %v13570_v0 = vsel %vm3554_vm1, %v3941_v62, %v3945_v56 }
 0x6ce   : > { %v6364_v44 = vpop.f32.mrf.mxu3  ;;  %15667 = vst [vmem:[#allocation96_spill] sm:$0xff] %v13570_v0  ;;  %v3814_v29 = vpack.c.b16 %v3793_v4, %v3793_v4  ;;  %v15670_v4 = vld [vmem:[#allocation41_spill] sm:$0xff] }
 0x6cf   : > { %v6298_v10 = vpop.f32.mrf.mxu1 }
 0x6d0   : > { %v6269_v41 = vpop.f32.mrf.mxu2  ;;  %v13563_v5 = vadd.f32 %v6298_v10, %v13391_v51  ;;  %v6428_v37 = vpop.f32.mrf.mxu0  ;;  %v9480_v51 = vor.u32 %v10444_v60, %v9477_v57  ;;  %6631 = vmatpush.bf16.msra.mxu3 %v9608_v8  ;;  %v3963_v57 = vshrl.u32 %v13547_v42, 16  ;;  %v10544_v8 = vld [vmem:[#allocation9 + $0x624] sm:$0xf] }
 0x6d1   : > { %v13567_v26 = vadd.f32 %v6269_v41, %v13500_v53  ;;  %v13574_v21 = vadd.f32 %v6428_v37, %v6360_v2  ;;  %v6363_v41 = vadd.f32 %v6362_v16, %v13545_v35  ;;  %v3967_v2 = vshll.u32 %v3814_v29, 16 }
 0x6d2   : > { %15666 = vst [vmem:[#allocation97_spill] sm:$0xff] %v13563_v5  ;;  %6337 = vmatmul.bf16.gmra.mxu1 %v13570_v0  ;;  %v3965_v19 = vor.u32 %v3963_v57, %v3945_v56  ;;  %v6365_v29 = vadd.f32 %v6364_v44, %v13545_v35 }
 0x6d3   : > { %6406 = vmatmul.bf16.gmra.mxu3 %v15668_v38  ;;  %6562 = vmatpush.bf16.msra.mxu1 %v9480_v51  ;;  %v15671_v51 = vld [vmem:[#allocation44_spill] sm:$0xff]  ;;  %v3969_v24 = vrot.slane %v3967_v2, 1  ;;  %v9749_v2 = vld [vmem:[#allocation9 + $0x530] sm:$0xf0] }
 0x6d6   : > { %v6367_v53 = vpop.f32.mrf.mxu3 }
 0x6d7   : > { %v6300_v10 = vpop.f32.mrf.mxu1 }
 0x6d8   : > { %v6271_v62 = vpop.f32.mrf.mxu2  ;;  %v13577_v52 = vadd.f32 %v6300_v10, %v13399_v20  ;;  %v6431_v37 = vpop.f32.mrf.mxu0  ;;  %v9877_v20 = vld [vmem:[#allocation9 + $0x630] sm:$0xf0] }
 0x6d9   : > { %v13581_v5 = vadd.f32 %v6271_v62, %v13516_v61  ;;  %v13583_v60 = vadd.f32 %v6431_v37, %v6363_v41  ;;  %v13596_v62 = vsel %vm3554_vm1, %v3965_v19, %v3969_v24  ;;  %v10512_v41 = vld [vmem:[#allocation9 + $0x524] sm:$0xf] }
 0x6da   : > { %15669 = vst [vmem:[#allocation88_spill] sm:$0xff] %v13577_v52  ;;  %v9880_v52 = vor.u32 %v10544_v8, %v9877_v20  ;;  %v15674_v37 = vld [vmem:[#allocation137_spill] sm:$0xff]  ;;  %v9752_v8 = vor.u32 %v10512_v41, %v9749_v2 }
 0x6db   : > { %6470 = vmatmul.bf16.gmra.mxu0 %v15671_v51  ;;  %15673 = vst [vmem:[#allocation99_spill] sm:$0xff] %v13596_v62 }
 0x6dc   : > { %6768 = vmatpush.bf16.msra.mxu2 %v9880_v52  ;;  %6699 = vmatpush.bf16.msra.mxu0 %v9752_v8 }
 0x6dd   : > { %6529 = vmatmul.bf16.gmra.mxu2 %v15670_v4 }
 0x6de   : > { %v6369_v10 = vpop.f32.mrf.mxu3 }
 0x6df   : > { %v6303_v16 = vpop.f32.mrf.mxu1 }
 0x6e0   : > { %v6274_v0 = vpop.f32.mrf.mxu2  ;;  %v13589_v61 = vadd.f32 %v6303_v16, %v13410_v30  ;;  %v6433_v56 = vpop.f32.mrf.mxu0  ;;  %v10508_v16 = vld [vmem:[#allocation9 + $0x504] sm:$0xf] }
 0x6e1   : > { %v13593_v42 = vadd.f32 %v6274_v0, %v13527_v55  ;;  %v6434_v57 = vadd.f32 %v6433_v56, %v6365_v29  ;;  %v6368_v55 = vadd.f32 %v6367_v53, %v13545_v35  ;;  %v15676_v29 = vld [vmem:[#allocation43_spill] sm:$0xff]  ;;  %v15677_v56 = vld [vmem:[#allocation136_spill] sm:$0xff] }
 0x6e2   : > { %15672 = vst [vmem:[#allocation67_spill] sm:$0xff] %v13589_v61  ;;  %6342 = vmatmul.bf16.gmra.mxu1 %v13596_v62  ;;  %v9733_v61 = vld [vmem:[#allocation9 + $0x510] sm:$0xf0] }
 0x6e3   : > { %6411 = vmatmul.bf16.gmra.mxu3 %v15674_v37  ;;  %v9736_v62 = vor.u32 %v10508_v16, %v9733_v61 }
 0x6e5   : > { %6700 = vmatpush.bf16.msra.mxu0 %v9736_v62 }
 0x6e6   : > { %v6372_v30 = vpop.f32.mrf.mxu3 }
 0x6e7   : > { %v6305_v52 = vpop.f32.mrf.mxu1 }
 0x6e8   : > { %v6276_v20 = vpop.f32.mrf.mxu2  ;;  %v13601_v44 = vadd.f32 %v6305_v52, %v13418_v27  ;;  %v6436_v19 = vpop.f32.mrf.mxu0 }
 0x6e9   : > { %v13605_v0 = vadd.f32 %v6276_v20, %v13543_v43  ;;  %v13607_v24 = vadd.f32 %v6436_v19, %v6368_v55  ;;  %v6370_v43 = vadd.f32 %v6369_v10, %v13545_v35  ;;  %v10540_v20 = vld [vmem:[#allocation9 + $0x604] sm:$0xf]  ;;  %v9861_v55 = vld [vmem:[#allocation9 + $0x610] sm:$0xf0] }
 0x6ea   : > { %15675 = vst [vmem:[#allocation58_spill] sm:$0xff] %v13601_v44  ;;  %v9864_v62 = vor.u32 %v10540_v20, %v9861_v55 }
 0x6eb   : > { %6475 = vmatmul.bf16.gmra.mxu0 %v15677_v56 }
 0x6ec   : > { %6769 = vmatpush.bf16.msra.mxu2 %v9864_v62 }
 0x6ed   : > { %6534 = vmatmul.bf16.gmra.mxu2 %v15676_v29 }
 0x6ee   : > { %v6374_v41 = vpop.f32.mrf.mxu3 }
 0x6ef   : > { %v6308_v2 = vpop.f32.mrf.mxu1 }
 0x6f0   : > { %v13612_v27 = vadd.f32 %v6308_v2, %v13426_v50  ;;  %v6495_v53 = vpop.f32.mrf.mxu2  ;;  %v6438_v52 = vpop.f32.mrf.mxu0 }
 0x6f1   : > { %v13616_v8 = vadd.f32 %v6495_v53, %v13557_v14  ;;  %v13620_v61 = vadd.f32 %v6438_v52, %v6370_v43  ;;  %v6373_v14 = vadd.f32 %v6372_v30, %v13545_v35  ;;  %v15680_v43 = vld [vmem:[#allocation47_spill] sm:$0xff]  ;;  %v15681_v52 = vld [vmem:[#allocation50_spill] sm:$0xff] }
 0x6f2   : > { %15678 = vst [vmem:[#allocation100_spill] sm:$0xff] %v13612_v27  ;;  %6563 = vmatmul.bf16.vlgmr.msra.gmra.mxu1 %v15647_v12 }
 0x6f3   : > { %6632 = vmatmul.bf16.vlgmr.msra.gmra.mxu3 %v15653_v63 }
 0x6f6   : > { %v6377_v19 = vpop.f32.mrf.mxu3 }
 0x6f7   : > { %v6310_v50 = vpop.f32.mrf.mxu1 }
 0x6f8   : > { %v13623_v16 = vadd.f32 %v6310_v50, %v13434_v22  ;;  %v6497_v10 = vpop.f32.mrf.mxu2  ;;  %v6441_v53 = vpop.f32.mrf.mxu0  ;;  %v6375_v50 = vadd.f32 %v6374_v41, %v13545_v35 }
 0x6f9   : > { %v13627_v2 = vadd.f32 %v6497_v10, %v13574_v21  ;;  %v13629_v27 = vadd.f32 %v6441_v53, %v6373_v14 }
 0x6fa   : > { %15679 = vst [vmem:[#allocation57_spill] sm:$0xff] %v13623_v16 }
 0x6fb   : > { %6480 = vmatmul.bf16.gmra.mxu0 %v15681_v52 }
 0x6fd   : > { %6539 = vmatmul.bf16.gmra.mxu2 %v15680_v43 }
 0x6fe   : > { %v6379_v20 = vpop.f32.mrf.mxu3 }
 0x6ff   : > { %v6313_v55 = vpop.f32.mrf.mxu1 }
 0x700   : > { %v13634_v62 = vadd.f32 %v6313_v55, %v13442_v39  ;;  %v6500_v22 = vpop.f32.mrf.mxu2  ;;  %v6443_v21 = vpop.f32.mrf.mxu0  ;;  %v6378_v55 = vadd.f32 %v6377_v19, %v13545_v35 }
 0x701   : > { %v13638_v30 = vadd.f32 %v6500_v22, %v13583_v60  ;;  %v13642_v10 = vadd.f32 %v6443_v21, %v6375_v50  ;;  %v10632_v60 = vld [vmem:[#allocation9 + $0x8e4] sm:$0xf]  ;;  %v10229_v22 = vld [vmem:[#allocation9 + $0x8f0] sm:$0xf0] }
 0x702   : > { %15682 = vst [vmem:[#allocation102_spill] sm:$0xff] %v13634_v62  ;;  %6568 = vmatmul.bf16.gmra.mxu1 %v15651_v54  ;;  %v10232_v63 = vor.u32 %v10632_v60, %v10229_v22  ;;  %v15684_v54 = vld [vmem:[#allocation138_spill] sm:$0xff]  ;;  %v10600_v50 = vld [vmem:[#allocation9 + $0x7e4] sm:$0xf]  ;;  %v10101_v21 = vld [vmem:[#allocation9 + $0x7f0] sm:$0xf0] }
 0x703   : > { %6637 = vmatmul.bf16.gmra.mxu3 %v15659_v40  ;;  %v9339_v40 = vld [vmem:[#allocation9 + $0x1e8] sm:$0xf] }
 0x704   : > { %6900 = vmatpush.bf16.msrb.mxu3 %v10232_v63  ;;  %v9211_v22 = vld [vmem:[#allocation9 + $0xe8] sm:$0xf]  ;;  %v10379_v63 = vld [vmem:[#allocation9 + $0xf4] sm:$0xf0] }
 0x706   : > { %v6382_v14 = vpop.f32.mrf.mxu3 }
 0x707   : > { %v6315_v53 = vpop.f32.mrf.mxu1 }
 0x708   : > { %v13645_v16 = vadd.f32 %v6315_v53, %v13452_v3  ;;  %v6502_v39 = vpop.f32.mrf.mxu2  ;;  %v6446_v41 = vpop.f32.mrf.mxu0  ;;  %v10104_v53 = vor.u32 %v10600_v50, %v10101_v21 }
 0x709   : > { %v13648_v62 = vadd.f32 %v6502_v39, %v6434_v57  ;;  %v13650_v44 = vadd.f32 %v6446_v41, %v6378_v55  ;;  %v6380_v55 = vadd.f32 %v6379_v20, %v13545_v35 }
 0x70a   : > { %15683 = vst [vmem:[#allocation60_spill] sm:$0xff] %v13645_v16  ;;  %v10411_v16 = vld [vmem:[#allocation9 + $0x1f4] sm:$0xf0]  ;;  %6831 = vmatpush.bf16.msrb.mxu1 %v10104_v53 }
 0x70b   : > { %6701 = vmatmul.bf16.vlgmr.msra.gmra.mxu0 %v15664_v32  ;;  %v9340_v57 = vor.u32 %v10411_v16, %v9339_v40  ;;  %v9212_v40 = vor.u32 %v10379_v63, %v9211_v22 }
 0x70d   : > { %6544 = vmatmul.bf16.gmra.mxu2 %v15684_v54  ;;  %6969 = vmatpush.bf16.msrb.mxu0 %v9212_v40  ;;  %v10628_v40 = vld [vmem:[#allocation9 + $0x8c4] sm:$0xf] }
 0x70e   : > { %v6384_v3 = vpop.f32.mrf.mxu3  ;;  %7038 = vmatpush.bf16.msrb.mxu2 %v9340_v57  ;;  %v15687_v57 = vld [vmem:[#allocation139_spill] sm:$0xff] }
 0x70f   : > { %v6318_v19 = vpop.f32.mrf.mxu1  ;;  %v6385_v63 = vadd.f32 %v6384_v3, %v13545_v35 }
 0x710   : > { %v13655_v39 = vadd.f32 %v6318_v19, %v13461_v18  ;;  %v6505_v12 = vpop.f32.mrf.mxu2  ;;  %v6448_v60 = vpop.f32.mrf.mxu0 }
 0x711   : > { %v13659_v41 = vadd.f32 %v6505_v12, %v13607_v24  ;;  %v13663_v50 = vadd.f32 %v6448_v60, %v6380_v55  ;;  %v6383_v12 = vadd.f32 %v6382_v14, %v13545_v35 }
 0x712   : > { %15685 = vst [vmem:[#allocation104_spill] sm:$0xff] %v13655_v39  ;;  %6573 = vmatmul.bf16.gmra.mxu1 %v15656_v45 }
 0x713   : > { %6642 = vmatmul.bf16.gmra.mxu3 %v15665_v11 }
 0x716   : > { %v6387_v18 = vpop.f32.mrf.mxu3 }
 0x717   : > { %v6320_v16 = vpop.f32.mrf.mxu1  ;;  %v6388_v32 = vadd.f32 %v6387_v18, %v13545_v35 }
 0x718   : > { %v13666_v21 = vadd.f32 %v6320_v16, %v13474_v9  ;;  %v6507_v20 = vpop.f32.mrf.mxu2  ;;  %v6451_v53 = vpop.f32.mrf.mxu0  ;;  %v10213_v16 = vld [vmem:[#allocation9 + $0x8d0] sm:$0xf0] }
 0x719   : > { %v13670_v24 = vadd.f32 %v6507_v20, %v13620_v61  ;;  %v13672_v19 = vadd.f32 %v6451_v53, %v6383_v12  ;;  %v10216_v12 = vor.u32 %v10628_v40, %v10213_v16  ;;  %v10596_v53 = vld [vmem:[#allocation9 + $0x7c4] sm:$0xf]  ;;  %v9195_v40 = vld [vmem:[#allocation9 + $0xc8] sm:$0xf]  ;;  %v10375_v16 = vld [vmem:[#allocation9 + $0xd4] sm:$0xf0] }
 0x71a   : > { %15686 = vst [vmem:[#allocation73_spill] sm:$0xff] %v13666_v21  ;;  %v10085_v21 = vld [vmem:[#allocation9 + $0x7d0] sm:$0xf0] }
 0x71b   : > { %6706 = vmatmul.bf16.gmra.mxu0 %v15670_v4  ;;  %6901 = vmatpush.bf16.msrb.mxu3 %v10216_v12  ;;  %v9196_v12 = vor.u32 %v10375_v16, %v9195_v40  ;;  %v10624_v16 = vld [vmem:[#allocation9 + $0x8a4] sm:$0xf] }
 0x71d   : > { %6549 = vmatmul.bf16.gmra.mxu2 %v15687_v57  ;;  %6970 = vmatpush.bf16.msrb.mxu0 %v9196_v12  ;;  %v10197_v12 = vld [vmem:[#allocation9 + $0x8b0] sm:$0xf0] }
 0x71e   : > { %v6389_v55 = vpop.f32.mrf.mxu3 }
 0x71f   : > { %v6323_v60 = vpop.f32.mrf.mxu1 }
 0x720   : > { %v13677_v22 = vadd.f32 %v6323_v60, %v13484_v7  ;;  %v6510_v9 = vpop.f32.mrf.mxu2  ;;  %v6453_v61 = vpop.f32.mrf.mxu0  ;;  %v9323_v7 = vld [vmem:[#allocation9 + $0x1c8] sm:$0xf]  ;;  %v10088_v60 = vor.u32 %v10596_v53, %v10085_v21 }
 0x721   : > { %v13681_v14 = vadd.f32 %v6510_v9, %v13629_v27  ;;  %v13685_v20 = vadd.f32 %v6453_v61, %v6385_v63 }
 0x722   : > { %15688 = vst [vmem:[#allocation106_spill] sm:$0xff] %v13677_v22  ;;  %6578 = vmatmul.bf16.gmra.mxu1 %v15662_v25  ;;  %v10407_v22 = vld [vmem:[#allocation9 + $0x1d4] sm:$0xf0] }
 0x723   : > { %6647 = vmatmul.bf16.gmra.mxu3 %v15671_v51  ;;  %v9324_v3 = vor.u32 %v10407_v22, %v9323_v7  ;;  %6832 = vmatpush.bf16.msrb.mxu1 %v10088_v60  ;;  %v15690_v22 = vld [vmem:[#allocation53_spill] sm:$0xff] }
 0x725   : > { %7039 = vmatpush.bf16.msrb.mxu2 %v9324_v3 }
 0x726   : > { %v6392_v39 = vpop.f32.mrf.mxu3 }
 0x727   : > { %v6325_v27 = vpop.f32.mrf.mxu1  ;;  %v6393_v40 = vadd.f32 %v6392_v39, %v13545_v35  ;;  %v10403_v39 = vld [vmem:[#allocation9 + $0x1b4] sm:$0xf0] }
 0x728   : > { %v13688_v9 = vadd.f32 %v6325_v27, %v13498_v49  ;;  %v6512_v4 = vpop.f32.mrf.mxu2  ;;  %v6456_v61 = vpop.f32.mrf.mxu0 }
 0x729   : > { %v13692_v63 = vadd.f32 %v6512_v4, %v13642_v10  ;;  %v13694_v21 = vadd.f32 %v6456_v61, %v6388_v32  ;;  %v6390_v4 = vadd.f32 %v6389_v55, %v13545_v35 }
 0x72a   : > { %15689 = vst [vmem:[#allocation64_spill] sm:$0xff] %v13688_v9 }
 0x72b   : > { %6711 = vmatmul.bf16.gmra.mxu0 %v15676_v29 }
 0x72d   : > { %6770 = vmatmul.bf16.vlgmr.msra.gmra.mxu2 %v15690_v22 }
 0x72e   : > { %v6394_v53 = vpop.f32.mrf.mxu3 }
 0x72f   : > { %v6328_v49 = vpop.f32.mrf.mxu1 }
 0x730   : > { %v13699_v7 = vadd.f32 %v6328_v49, %v13509_v13  ;;  %v6515_v18 = vpop.f32.mrf.mxu2  ;;  %v6458_v32 = vpop.f32.mrf.mxu0 }
 0x731   : > { %v13703_v10 = vadd.f32 %v6515_v18, %v13650_v44  ;;  %v13707_v60 = vadd.f32 %v6458_v32, %v6390_v4  ;;  %v10200_v18 = vor.u32 %v10624_v16, %v10197_v12  ;;  %v10592_v4 = vld [vmem:[#allocation9 + $0x7a4] sm:$0xf]  ;;  %v10069_v32 = vld [vmem:[#allocation9 + $0x7b0] sm:$0xf0]  ;;  %v9179_v12 = vld [vmem:[#allocation9 + $0xa8] sm:$0xf] }
 0x732   : > { %15691 = vst [vmem:[#allocation108_spill] sm:$0xff] %v13699_v7  ;;  %6583 = vmatmul.bf16.gmra.mxu1 %v15668_v38  ;;  %v15693_v7 = vld [vmem:[#allocation56_spill] sm:$0xff] }
 0x733   : > { %6652 = vmatmul.bf16.gmra.mxu3 %v15677_v56 }
 0x734   : > { %6902 = vmatpush.bf16.msrb.mxu3 %v10200_v18  ;;  %v10371_v18 = vld [vmem:[#allocation9 + $0xb4] sm:$0xf0] }
 0x736   : > { %v6397_v3 = vpop.f32.mrf.mxu3 }
 0x737   : > { %v6330_v27 = vpop.f32.mrf.mxu1 }
 0x738   : > { %v13710_v61 = vadd.f32 %v6330_v27, %v13524_v28  ;;  %v6517_v13 = vpop.f32.mrf.mxu2  ;;  %v6461_v44 = vpop.f32.mrf.mxu0  ;;  %v9307_v28 = vld [vmem:[#allocation9 + $0x1a8] sm:$0xf] }
 0x739   : > { %v13714_v55 = vadd.f32 %v6517_v13, %v13663_v50  ;;  %v13716_v49 = vadd.f32 %v6461_v44, %v6393_v40  ;;  %v9308_v50 = vor.u32 %v10403_v39, %v9307_v28  ;;  %v6395_v40 = vadd.f32 %v6394_v53, %v13545_v35 }
 0x73a   : > { %15692 = vst [vmem:[#allocation63_spill] sm:$0xff] %v13710_v61  ;;  %v10072_v61 = vor.u32 %v10592_v4, %v10069_v32  ;;  %v9180_v32 = vor.u32 %v10371_v18, %v9179_v12 }
 0x73b   : > { %6716 = vmatmul.bf16.gmra.mxu0 %v15680_v43  ;;  %7040 = vmatpush.bf16.msrb.mxu2 %v9308_v50  ;;  %v15696_v50 = vld [vmem:[#allocation33_spill] sm:$0xff] }
 0x73c   : > { %6833 = vmatpush.bf16.msrb.mxu1 %v10072_v61  ;;  %6971 = vmatpush.bf16.msrb.mxu0 %v9180_v32  ;;  %v10181_v32 = vld [vmem:[#allocation9 + $0x890] sm:$0xf0] }
 0x73d   : > { %6775 = vmatmul.bf16.gmra.mxu2 %v15693_v7 }
 0x73e   : > { %v6399_v27 = vpop.f32.mrf.mxu3 }
 0x73f   : > { %v6333_v9 = vpop.f32.mrf.mxu1  ;;  %v6400_v18 = vadd.f32 %v6399_v27, %v13545_v35 }
 0x740   : > { %v13721_v13 = vadd.f32 %v6333_v9, %v13536_v17  ;;  %v6520_v29 = vpop.f32.mrf.mxu2  ;;  %v6463_v16 = vpop.f32.mrf.mxu0 }
 0x741   : > { %v13725_v44 = vadd.f32 %v6520_v29, %v13672_v19  ;;  %v13729_v4 = vadd.f32 %v6463_v16, %v6395_v40  ;;  %v6398_v29 = vadd.f32 %v6397_v3, %v13545_v35 }
 0x742   : > { %15694 = vst [vmem:[#allocation110_spill] sm:$0xff] %v13721_v13  ;;  %6588 = vmatmul.bf16.gmra.mxu1 %v15674_v37  ;;  %v10053_v13 = vld [vmem:[#allocation9 + $0x790] sm:$0xf0] }
 0x743   : > { %6657 = vmatmul.bf16.gmra.mxu3 %v15681_v52 }
 0x746   : > { %v6402_v17 = vpop.f32.mrf.mxu3 }
 0x747   : > { %v6335_v9 = vpop.f32.mrf.mxu1 }
 0x748   : > { %v13732_v61 = vadd.f32 %v6335_v9, %v13554_v34  ;;  %v6522_v53 = vpop.f32.mrf.mxu2  ;;  %v6466_v28 = vpop.f32.mrf.mxu0 }
 0x749   : > { %v13736_v19 = vadd.f32 %v6522_v53, %v13685_v20  ;;  %v13738_v39 = vadd.f32 %v6466_v28, %v6398_v29  ;;  %v10620_v20 = vld [vmem:[#allocation9 + $0x884] sm:$0xf]  ;;  %v15698_v29 = vld [vmem:[#allocation118_spill] sm:$0xff] }
 0x74a   : > { %15695 = vst [vmem:[#allocation66_spill] sm:$0xff] %v13732_v61  ;;  %v10184_v53 = vor.u32 %v10620_v20, %v10181_v32  ;;  %v10588_v61 = vld [vmem:[#allocation9 + $0x784] sm:$0xf]  ;;  %v6403_v20 = vadd.f32 %v6402_v17, %v13545_v35  ;;  %v9163_v32 = vld [vmem:[#allocation9 + $0x88] sm:$0xf] }
 0x74b   : > { %6721 = vmatmul.bf16.gmra.mxu0 %v15684_v54 }
 0x74c   : > { %6903 = vmatpush.bf16.msrb.mxu3 %v10184_v53 }
 0x74d   : > { %6780 = vmatmul.bf16.gmra.mxu2 %v15696_v50 }
 0x74e   : > { %v6404_v40 = vpop.f32.mrf.mxu3 }
 0x74f   : > { %v6338_v16 = vpop.f32.mrf.mxu1 }
 0x750   : > { %v13743_v12 = vadd.f32 %v6338_v16, %v13567_v26  ;;  %v6525_v34 = vpop.f32.mrf.mxu2  ;;  %v6468_v9 = vpop.f32.mrf.mxu0  ;;  %v9291_v26 = vld [vmem:[#allocation9 + $0x188] sm:$0xf]  ;;  %v10056_v16 = vor.u32 %v10588_v61, %v10053_v13  ;;  %v15700_v61 = vld [vmem:[#allocation59_spill] sm:$0xff] }
 0x751   : > { %v13747_v3 = vadd.f32 %v6525_v34, %v13694_v21  ;;  %v13751_v28 = vadd.f32 %v6468_v9, %v6400_v18  ;;  %v10367_v9 = vld [vmem:[#allocation9 + $0x94] sm:$0xf0] }
 0x752   : > { %15697 = vst [vmem:[#allocation111_spill] sm:$0xff] %v13743_v12  ;;  %6593 = vmatmul.bf16.gmra.mxu1 %v15690_v22  ;;  %v10399_v12 = vld [vmem:[#allocation9 + $0x194] sm:$0xf0]  ;;  %v9164_v53 = vor.u32 %v10367_v9, %v9163_v32 }
 0x753   : > { %6662 = vmatmul.bf16.gmra.mxu3 %v15698_v29  ;;  %v9292_v27 = vor.u32 %v10399_v12, %v9291_v26  ;;  %6834 = vmatpush.bf16.msrb.mxu1 %v10056_v16  ;;  %v15702_v16 = vld [vmem:[#allocation20_spill] sm:$0xff] }
 0x754   : > { %6972 = vmatpush.bf16.msrb.mxu0 %v9164_v53  ;;  %v10165_v53 = vld [vmem:[#allocation9 + $0x870] sm:$0xf0] }
 0x755   : > { %7041 = vmatpush.bf16.msrb.mxu2 %v9292_v27 }
 0x756   : > { %v6407_v54 = vpop.f32.mrf.mxu3 }
 0x757   : > { %v6340_v21 = vpop.f32.mrf.mxu1  ;;  %v6408_v9 = vadd.f32 %v6407_v54, %v13545_v35  ;;  %v10395_v54 = vld [vmem:[#allocation9 + $0x174] sm:$0xf0] }
 0x758   : > { %v13754_v34 = vadd.f32 %v6340_v21, %v13581_v5  ;;  %v6527_v43 = vpop.f32.mrf.mxu2  ;;  %v6471_v22 = vpop.f32.mrf.mxu0 }
 0x759   : > { %v13758_v18 = vadd.f32 %v6527_v43, %v13707_v60  ;;  %v13760_v13 = vadd.f32 %v6471_v22, %v6403_v20  ;;  %v6405_v43 = vadd.f32 %v6404_v40, %v13545_v35 }
 0x75a   : > { %15699 = vst [vmem:[#allocation79_spill] sm:$0xff] %v13754_v34 }
 0x75b   : > { %6726 = vmatmul.bf16.gmra.mxu0 %v15687_v57 }
 0x75d   : > { %6785 = vmatmul.bf16.gmra.mxu2 %v15700_v61 }
 0x75e   : > { %v6409_v12 = vpop.f32.mrf.mxu3 }
 0x75f   : > { %v6343_v5 = vpop.f32.mrf.mxu1 }
 0x760   : > { %v13765_v26 = vadd.f32 %v6343_v5, %v13593_v42  ;;  %v6530_v17 = vpop.f32.mrf.mxu2  ;;  %v6473_v22 = vpop.f32.mrf.mxu0 }
 0x761   : > { %v13769_v60 = vadd.f32 %v6530_v17, %v13716_v49  ;;  %v13773_v27 = vadd.f32 %v6473_v22, %v6405_v43  ;;  %v10616_v49 = vld [vmem:[#allocation9 + $0x864] sm:$0xf]  ;;  %v15704_v43 = vld [vmem:[#allocation36_spill] sm:$0xff] }
 0x762   : > { %15701 = vst [vmem:[#allocation113_spill] sm:$0xff] %v13765_v26  ;;  %6598 = vmatmul.bf16.gmra.mxu1 %v15693_v7  ;;  %v10168_v17 = vor.u32 %v10616_v49, %v10165_v53  ;;  %v10584_v22 = vld [vmem:[#allocation9 + $0x764] sm:$0xf]  ;;  %v9147_v53 = vld [vmem:[#allocation9 + $0x68] sm:$0xf] }
 0x763   : > { %6667 = vmatmul.bf16.gmra.mxu3 %v15702_v16 }
 0x764   : > { %6904 = vmatpush.bf16.msrb.mxu3 %v10168_v17 }
 0x766   : > { %v6412_v21 = vpop.f32.mrf.mxu3 }
 0x767   : > { %v6345_v20 = vpop.f32.mrf.mxu1 }
 0x768   : > { %v13776_v32 = vadd.f32 %v6345_v20, %v13605_v0  ;;  %v6532_v42 = vpop.f32.mrf.mxu2  ;;  %v6476_v5 = vpop.f32.mrf.mxu0  ;;  %v10037_v0 = vld [vmem:[#allocation9 + $0x770] sm:$0xf0]  ;;  %v9275_v20 = vld [vmem:[#allocation9 + $0x168] sm:$0xf] }
 0x769   : > { %v13780_v40 = vadd.f32 %v6532_v42, %v13729_v4  ;;  %v13782_v26 = vadd.f32 %v6476_v5, %v6408_v9  ;;  %v10040_v34 = vor.u32 %v10584_v22, %v10037_v0  ;;  %v9276_v4 = vor.u32 %v10395_v54, %v9275_v20  ;;  %v10363_v5 = vld [vmem:[#allocation9 + $0x74] sm:$0xf0]  ;;  %v15705_v22 = vld [vmem:[#allocation26_spill] sm:$0xff] }
 0x76a   : > { %15703 = vst [vmem:[#allocation70_spill] sm:$0xff] %v13776_v32  ;;  %v6410_v9 = vadd.f32 %v6409_v12, %v13545_v35  ;;  %v9148_v52 = vor.u32 %v10363_v5, %v9147_v53  ;;  %v15706_v53 = vld [vmem:[#allocation62_spill] sm:$0xff] }
 0x76b   : > { %6731 = vmatmul.bf16.gmra.mxu0 %v13052_v33  ;;  %6835 = vmatpush.bf16.msrb.mxu1 %v10040_v34 }
 0x76c   : > { %7042 = vmatpush.bf16.msrb.mxu2 %v9276_v4  ;;  %6973 = vmatpush.bf16.msrb.mxu0 %v9148_v52 }
 0x76d   : > { %6790 = vmatmul.bf16.gmra.mxu2 %v15704_v43 }
 0x76e   : > { %v6414_v32 = vpop.f32.mrf.mxu3 }
 0x76f   : > { %v6564_v57 = vpop.f32.mrf.mxu1 }
 0x770   : > { %v6535_v42 = vpop.f32.mrf.mxu2  ;;  %v6565_v7 = vadd.f32 %v6564_v57, %v13616_v8  ;;  %v6478_v17 = vpop.f32.mrf.mxu0 }
 0x771   : > { %v13789_v49 = vadd.f32 %v6535_v42, %v13738_v39  ;;  %v13793_v0 = vadd.f32 %v6478_v17, %v6410_v9  ;;  %v6413_v39 = vadd.f32 %v6412_v21, %v13545_v35 }
 0x772   : > { %6603 = vmatmul.bf16.gmra.mxu1 %v15696_v50  ;;  %v9259_v50 = vld [vmem:[#allocation9 + $0x148] sm:$0xf] }
 0x773   : > { %6672 = vmatmul.bf16.gmra.mxu3 %v15705_v22 }
 0x776   : > { %v6633_v20 = vpop.f32.mrf.mxu3 }
 0x777   : > { %v6634_v8 = vadd.f32 %v6633_v20, %v6565_v7  ;;  %v6566_v57 = vpop.f32.mrf.mxu1  ;;  %v10149_v20 = vld [vmem:[#allocation9 + $0x850] sm:$0xf0] }
 0x778   : > { %v6537_v34 = vpop.f32.mrf.mxu2  ;;  %v6567_v12 = vadd.f32 %v6566_v57, %v13627_v2  ;;  %v6481_v4 = vpop.f32.mrf.mxu0  ;;  %v6415_v2 = vadd.f32 %v6414_v32, %v13545_v35 }
 0x779   : > { %v13798_v54 = vadd.f32 %v6537_v34, %v13751_v28  ;;  %v13800_v42 = vadd.f32 %v6481_v4, %v6413_v39  ;;  %v10612_v28 = vld [vmem:[#allocation9 + $0x844] sm:$0xf]  ;;  %v15707_v39 = vld [vmem:[#allocation30_spill] sm:$0xff] }
 0x77a   : > { %v10152_v34 = vor.u32 %v10612_v28, %v10149_v20  ;;  %v10359_v20 = vld [vmem:[#allocation9 + $0x54] sm:$0xf0] }
 0x77b   : > { %6736 = vmatmul.bf16.gmra.mxu0 %v13098_v58 }
 0x77c   : > { %6905 = vmatpush.bf16.msrb.mxu3 %v10152_v34  ;;  %v10576_v34 = vld [vmem:[#allocation9 + $0x724] sm:$0xf] }
 0x77d   : > { %6795 = vmatmul.bf16.gmra.mxu2 %v15706_v53 }
 0x77e   : > { %v6635_v9 = vpop.f32.mrf.mxu3 }
 0x77f   : > { %v6636_v52 = vadd.f32 %v6635_v9, %v6567_v12  ;;  %v6569_v5 = vpop.f32.mrf.mxu1  ;;  %v10580_v12 = vld [vmem:[#allocation9 + $0x744] sm:$0xf]  ;;  %v10021_v9 = vld [vmem:[#allocation9 + $0x750] sm:$0xf0] }
 0x780   : > { %v6540_v7 = vpop.f32.mrf.mxu2  ;;  %v6570_v17 = vadd.f32 %v6569_v5, %v13638_v30  ;;  %v6483_v57 = vpop.f32.mrf.mxu0  ;;  %v10024_v30 = vor.u32 %v10580_v12, %v10021_v9  ;;  %v10391_v5 = vld [vmem:[#allocation9 + $0x154] sm:$0xf0]  ;;  %v10005_v12 = vld [vmem:[#allocation9 + $0x730] sm:$0xf0] }
 0x781   : > { %v13807_v21 = vadd.f32 %v6540_v7, %v13760_v13  ;;  %v13811_v4 = vadd.f32 %v6483_v57, %v6415_v2  ;;  %v9260_v35 = vor.u32 %v10391_v5, %v9259_v50  ;;  %v9131_v2 = vld [vmem:[#allocation9 + $0x48] sm:$0xf]  ;;  %v10608_v50 = vld [vmem:[#allocation9 + $0x824] sm:$0xf]  ;;  %v10008_v9 = vor.u32 %v10576_v34, %v10005_v12  ;;  %v10117_v34 = vld [vmem:[#allocation9 + $0x810] sm:$0xf0] }
 0x782   : > { %6608 = vmatmul.bf16.gmra.mxu1 %v15700_v61  ;;  %v9132_v37 = vor.u32 %v10359_v20, %v9131_v2  ;;  %v10604_v2 = vld [vmem:[#allocation9 + $0x804] sm:$0xf] }
 0x783   : > { %6677 = vmatmul.bf16.gmra.mxu3 %v15707_v39  ;;  %6836 = vmatpush.bf16.msrb.mxu1 %v10024_v30  ;;  %v15708_v30 = vld [vmem:[#allocation40_spill] sm:$0xff] }
 0x784   : > { %7043 = vmatpush.bf16.msrb.mxu2 %v9260_v35  ;;  %6974 = vmatpush.bf16.msrb.mxu0 %v9132_v37  ;;  %v9989_v37 = vld [vmem:[#allocation9 + $0x710] sm:$0xf0] }
 0x786   : > { %v6638_v32 = vpop.f32.mrf.mxu3 }
 0x787   : > { %v6639_v13 = vadd.f32 %v6638_v32, %v6570_v17  ;;  %v6571_v7 = vpop.f32.mrf.mxu1  ;;  %v10133_v17 = vld [vmem:[#allocation9 + $0x830] sm:$0xf0]  ;;  %6837 = vmatpush.bf16.msrb.mxu1 %v10008_v9 }
 0x788   : > { %v6542_v56 = vpop.f32.mrf.mxu2  ;;  %v6572_v61 = vadd.f32 %v6571_v7, %v13648_v62  ;;  %v6702_v57 = vpop.f32.mrf.mxu0  ;;  %v10136_v62 = vor.u32 %v10608_v50, %v10133_v17  ;;  %v10572_v7 = vld [vmem:[#allocation9 + $0x704] sm:$0xf] }
 0x789   : > { %v13815_v28 = vadd.f32 %v6542_v56, %v13773_v27  ;;  %v13817_v51 = vadd.f32 %v6702_v57, %v6634_v8  ;;  %v9992_v57 = vor.u32 %v10572_v7, %v9989_v37  ;;  %v10387_v7 = vld [vmem:[#allocation9 + $0x134] sm:$0xf0] }
 0x78a   : > { %6906 = vmatpush.bf16.msrb.mxu3 %v10136_v62 }
 0x78b   : > { %6741 = vmatmul.bf16.gmra.mxu0 %v13147_v36  ;;  %6838 = vmatpush.bf16.msrb.mxu1 %v9992_v57 }
 0x78d   : > { %6800 = vmatmul.bf16.gmra.mxu2 %v15708_v30  ;;  %v15727_v30 = vld [vmem:[#allocation91_spill] sm:$0xff] }
 0x78e   : > { %v6640_v5 = vpop.f32.mrf.mxu3 }
 0x78f   : > { %v6641_v56 = vadd.f32 %v6640_v5, %v6572_v61  ;;  %v6574_v27 = vpop.f32.mrf.mxu1  ;;  %v10120_v61 = vor.u32 %v10604_v2, %v10117_v34 }
 0x790   : > { %v6545_v35 = vpop.f32.mrf.mxu2  ;;  %v6575_v8 = vadd.f32 %v6574_v27, %v13659_v41  ;;  %v6704_v20 = vpop.f32.mrf.mxu0 }
 0x791   : > { %v13823_v32 = vadd.f32 %v6545_v35, %v13782_v26  ;;  %v13827_v12 = vadd.f32 %v6704_v20, %v6636_v52  ;;  %6907 = vmatpush.bf16.msrb.mxu3 %v10120_v61  ;;  %v15709_v35 = vld [vmem:[#allocation39_spill] sm:$0xff]  ;;  %v9243_v52 = vld [vmem:[#allocation9 + $0x128] sm:$0xf] }
 0x792   : > { %6613 = vmatmul.bf16.gmra.mxu1 %v15704_v43  ;;  %v9244_v2 = vor.u32 %v10387_v7, %v9243_v52 }
 0x793   : > { %6682 = vmatmul.bf16.gmra.mxu3 %v15614_v47 }
 0x794   : > { %7044 = vmatpush.bf16.msrb.mxu2 %v9244_v2  ;;  %v9099_v2 = vld [vmem:[#allocation9 + $0x8] sm:$0xf] }
 0x796   : > { %v6643_v50 = vpop.f32.mrf.mxu3 }
 0x797   : > { %v6644_v41 = vadd.f32 %v6643_v50, %v6575_v8  ;;  %v6576_v9 = vpop.f32.mrf.mxu1 }
 0x798   : > { %v6547_v26 = vpop.f32.mrf.mxu2  ;;  %v6577_v17 = vadd.f32 %v6576_v9, %v13670_v24  ;;  %v6707_v5 = vpop.f32.mrf.mxu0 }
 0x799   : > { %v13831_v62 = vadd.f32 %v6547_v26, %v13793_v0  ;;  %v13833_v27 = vadd.f32 %v6707_v5, %v6639_v13  ;;  %v9115_v0 = vld [vmem:[#allocation9 + $0x28] sm:$0xf]  ;;  %v10355_v13 = vld [vmem:[#allocation9 + $0x34] sm:$0xf0] }
 0x79a   : > { %v9116_v50 = vor.u32 %v10355_v13, %v9115_v0 }
 0x79b   : > { %6746 = vmatmul.bf16.gmra.mxu0 %v13203_v6 }
 0x79c   : > { %6975 = vmatpush.bf16.msrb.mxu0 %v9116_v50  ;;  %v9227_v50 = vld [vmem:[#allocation9 + $0x108] sm:$0xf] }
 0x79d   : > { %6805 = vmatmul.bf16.gmra.mxu2 %v15709_v35 }
 0x79e   : > { %v6645_v37 = vpop.f32.mrf.mxu3 }
 0x79f   : > { %v6646_v20 = vadd.f32 %v6645_v37, %v6577_v17  ;;  %v6579_v8 = vpop.f32.mrf.mxu1 }
 0x7a0   : > { %v6550_v57 = vpop.f32.mrf.mxu2  ;;  %v6580_v34 = vadd.f32 %v6579_v8, %v13681_v14  ;;  %v6709_v61 = vpop.f32.mrf.mxu0  ;;  %v10351_v8 = vld [vmem:[#allocation9 + $0x14] sm:$0xf0] }
 0x7a1   : > { %v13839_v24 = vadd.f32 %v6550_v57, %v13800_v42  ;;  %v6710_v9 = vadd.f32 %v6709_v61, %v6641_v56  ;;  %v9100_v57 = vor.u32 %v10351_v8, %v9099_v2 }
 0x7a2   : > { %6618 = vmatmul.bf16.gmra.mxu1 %v15706_v53 }
 0x7a3   : > { %6687 = vmatmul.bf16.gmra.mxu3 %v15617_v46  ;;  %6976 = vmatpush.bf16.msrb.mxu0 %v9100_v57 }
 0x7a6   : > { %v6648_v26 = vpop.f32.mrf.mxu3 }
 0x7a7   : > { %v6649_v17 = vadd.f32 %v6648_v26, %v6580_v34  ;;  %v6581_v5 = vpop.f32.mrf.mxu1  ;;  %v10383_v26 = vld [vmem:[#allocation9 + $0x114] sm:$0xf0] }
 0x7a8   : > { %v6552_v52 = vpop.f32.mrf.mxu2  ;;  %v6582_v14 = vadd.f32 %v6581_v5, %v13692_v63  ;;  %v6712_v42 = vpop.f32.mrf.mxu0  ;;  %v9228_v5 = vor.u32 %v10383_v26, %v9227_v50 }
 0x7a9   : > { %v13845_v7 = vadd.f32 %v6552_v52, %v13811_v4  ;;  %v13847_v37 = vadd.f32 %v6712_v42, %v6644_v41 }
 0x7aa   : > { %7045 = vmatpush.bf16.msrb.mxu2 %v9228_v5 }
 0x7ab   : > { %6751 = vmatmul.bf16.gmra.mxu0 %v13261_v48 }
 0x7ad   : > { %6810 = vmatmul.bf16.gmra.mxu2 %v13240_v1 }
 0x7ae   : > { %v6650_v56 = vpop.f32.mrf.mxu3 }
 0x7af   : > { %v6651_v34 = vadd.f32 %v6650_v56, %v6582_v14  ;;  %v6584_v0 = vpop.f32.mrf.mxu1 }
 0x7b0   : > { %v6585_v13 = vadd.f32 %v6584_v0, %v13703_v10  ;;  %v6771_v63 = vpop.f32.mrf.mxu2  ;;  %v6714_v41 = vpop.f32.mrf.mxu0 }
 0x7b1   : > { %v13853_v4 = vadd.f32 %v6771_v63, %v13817_v51  ;;  %v13857_v61 = vadd.f32 %v6714_v41, %v6646_v20 }
 0x7b2   : > { %6839 = vmatmul.bf16.vlgmr.msrb.gmra.mxu1 %v15698_v29 }
 0x7b3   : > { %6908 = vmatmul.bf16.vlgmr.msrb.gmra.mxu3 %v13052_v33 }
 0x7b6   : > { %v6653_v52 = vpop.f32.mrf.mxu3 }
 0x7b7   : > { %v6654_v14 = vadd.f32 %v6653_v52, %v6585_v13  ;;  %v6586_v42 = vpop.f32.mrf.mxu1 }
 0x7b8   : > { %v6587_v10 = vadd.f32 %v6586_v42, %v13714_v55  ;;  %v6773_v2 = vpop.f32.mrf.mxu2  ;;  %v6717_v8 = vpop.f32.mrf.mxu0 }
 0x7b9   : > { %v13861_v51 = vadd.f32 %v6773_v2, %v13827_v12  ;;  %v13863_v57 = vadd.f32 %v6717_v8, %v6649_v17 }
 0x7bb   : > { %6756 = vmatmul.bf16.gmra.mxu0 %v13312_v59 }
 0x7bd   : > { %6815 = vmatmul.bf16.gmra.mxu2 %v13294_v31 }
 0x7be   : > { %v6655_v20 = vpop.f32.mrf.mxu3 }
 0x7bf   : > { %v6656_v56 = vadd.f32 %v6655_v20, %v6587_v10  ;;  %v6589_v0 = vpop.f32.mrf.mxu1  ;;  %v10475_v10 = vld [vmem:[#allocation9 + $0x3f4] sm:$0xf0] }
 0x7c0   : > { %v6590_v63 = vadd.f32 %v6589_v0, %v13725_v44  ;;  %v6776_v13 = vpop.f32.mrf.mxu2  ;;  %v6719_v55 = vpop.f32.mrf.mxu0  ;;  %v9595_v44 = vld [vmem:[#allocation9 + $0x3e8] sm:$0xf]  ;;  %v10443_v20 = vld [vmem:[#allocation9 + $0x2f4] sm:$0xf0] }
 0x7c1   : > { %v13869_v41 = vadd.f32 %v6776_v13, %v13833_v27  ;;  %v13873_v12 = vadd.f32 %v6719_v55, %v6651_v34  ;;  %v9596_v27 = vor.u32 %v10475_v10, %v9595_v44  ;;  %v9467_v34 = vld [vmem:[#allocation9 + $0x2e8] sm:$0xf]  ;;  %v10507_v10 = vld [vmem:[#allocation9 + $0x4f4] sm:$0xf0] }
 0x7c2   : > { %6844 = vmatmul.bf16.gmra.mxu1 %v15702_v16  ;;  %v9851_v0 = vld [vmem:[#allocation9 + $0x5e8] sm:$0xf]  ;;  %v9468_v13 = vor.u32 %v10443_v20, %v9467_v34 }
 0x7c3   : > { %6913 = vmatmul.bf16.gmra.mxu3 %v13098_v58  ;;  %v9723_v44 = vld [vmem:[#allocation9 + $0x4e8] sm:$0xf] }
 0x7c4   : > { %7176 = vmatpush.bf16.msra.mxu3 %v9596_v27  ;;  %7107 = vmatpush.bf16.msra.mxu1 %v9468_v13  ;;  %v9724_v27 = vor.u32 %v10507_v10, %v9723_v44 }
 0x7c6   : > { %v6658_v17 = vpop.f32.mrf.mxu3  ;;  %7245 = vmatpush.bf16.msra.mxu0 %v9724_v27  ;;  %v10471_v27 = vld [vmem:[#allocation9 + $0x3d4] sm:$0xf0] }
 0x7c7   : > { %v6659_v50 = vadd.f32 %v6658_v17, %v6590_v63  ;;  %v6591_v26 = vpop.f32.mrf.mxu1 }
 0x7c8   : > { %v6592_v5 = vadd.f32 %v6591_v26, %v13736_v19  ;;  %v6778_v52 = vpop.f32.mrf.mxu2  ;;  %v6722_v2 = vpop.f32.mrf.mxu0  ;;  %v10539_v19 = vld [vmem:[#allocation9 + $0x5f4] sm:$0xf0] }
 0x7c9   : > { %v13876_v42 = vadd.f32 %v6778_v52, %v6710_v9  ;;  %v13878_v8 = vadd.f32 %v6722_v2, %v6654_v14  ;;  %v9852_v17 = vor.u32 %v10539_v19, %v9851_v0 }
 0x7cb   : > { %6977 = vmatmul.bf16.vlgmr.msrb.gmra.mxu0 %v15628_v23  ;;  %7314 = vmatpush.bf16.msra.mxu2 %v9852_v17  ;;  %v15711_v17 = vld [vmem:[#allocation107_spill] sm:$0xff] }
 0x7cd   : > { %6820 = vmatmul.bf16.gmra.mxu2 %v13336_v15 }
 0x7ce   : > { %v6660_v63 = vpop.f32.mrf.mxu3 }
 0x7cf   : > { %v6661_v55 = vadd.f32 %v6660_v63, %v6592_v5  ;;  %v6594_v9 = vpop.f32.mrf.mxu1 }
 0x7d0   : > { %v6595_v26 = vadd.f32 %v6594_v9, %v13747_v3  ;;  %v6781_v52 = vpop.f32.mrf.mxu2  ;;  %v6724_v2 = vpop.f32.mrf.mxu0  ;;  %v15710_v9 = vld [vmem:[#allocation85_spill] sm:$0xff] }
 0x7d1   : > { %v13884_v14 = vadd.f32 %v6781_v52, %v13847_v37  ;;  %v13888_v34 = vadd.f32 %v6724_v2, %v6656_v56 }
 0x7d2   : > { %6849 = vmatmul.bf16.gmra.mxu1 %v15705_v22 }
 0x7d3   : > { %6918 = vmatmul.bf16.gmra.mxu3 %v13147_v36 }
 0x7d6   : > { %v6663_v5 = vpop.f32.mrf.mxu3 }
 0x7d7   : > { %v6664_v20 = vadd.f32 %v6663_v5, %v6595_v26  ;;  %v6596_v3 = vpop.f32.mrf.mxu1 }
 0x7d8   : > { %v6597_v0 = vadd.f32 %v6596_v3, %v13758_v18  ;;  %v6783_v63 = vpop.f32.mrf.mxu2  ;;  %v6727_v13 = vpop.f32.mrf.mxu0  ;;  %v9579_v18 = vld [vmem:[#allocation9 + $0x3c8] sm:$0xf] }
 0x7d9   : > { %v13892_v37 = vadd.f32 %v6783_v63, %v13857_v61  ;;  %v13894_v19 = vadd.f32 %v6727_v13, %v6659_v50  ;;  %v9580_v50 = vor.u32 %v10471_v27, %v9579_v18  ;;  %v9451_v3 = vld [vmem:[#allocation9 + $0x2c8] sm:$0xf]  ;;  %v10439_v63 = vld [vmem:[#allocation9 + $0x2d4] sm:$0xf0] }
 0x7da   : > { %v9452_v13 = vor.u32 %v10439_v63, %v9451_v3  ;;  %v10503_v27 = vld [vmem:[#allocation9 + $0x4d4] sm:$0xf0] }
 0x7db   : > { %6982 = vmatmul.bf16.gmra.mxu0 %v15711_v17  ;;  %7177 = vmatpush.bf16.msra.mxu3 %v9580_v50  ;;  %v15712_v50 = vld [vmem:[#allocation101_spill] sm:$0xff]  ;;  %v15713_v3 = vld [vmem:[#allocation19_spill] sm:$0xff] }
 0x7dc   : > { %7108 = vmatpush.bf16.msra.mxu1 %v9452_v13 }
 0x7dd   : > { %6825 = vmatmul.bf16.gmra.mxu2 %v15710_v9 }
 0x7de   : > { %v6665_v52 = vpop.f32.mrf.mxu3 }
 0x7df   : > { %v6666_v56 = vadd.f32 %v6665_v52, %v6597_v0  ;;  %v6599_v44 = vpop.f32.mrf.mxu1  ;;  %v9835_v0 = vld [vmem:[#allocation9 + $0x5c8] sm:$0xf] }
 0x7e0   : > { %v6600_v10 = vadd.f32 %v6599_v44, %v13769_v60  ;;  %v6786_v26 = vpop.f32.mrf.mxu2  ;;  %v6729_v61 = vpop.f32.mrf.mxu0  ;;  %v10535_v60 = vld [vmem:[#allocation9 + $0x5d4] sm:$0xf0] }
 0x7e1   : > { %v13900_v2 = vadd.f32 %v6786_v26, %v13863_v57  ;;  %v13904_v5 = vadd.f32 %v6729_v61, %v6661_v55  ;;  %v9836_v52 = vor.u32 %v10535_v60, %v9835_v0  ;;  %v9707_v55 = vld [vmem:[#allocation9 + $0x4c8] sm:$0xf] }
 0x7e2   : > { %6854 = vmatmul.bf16.gmra.mxu1 %v15707_v39  ;;  %v9708_v31 = vor.u32 %v10503_v27, %v9707_v55  ;;  %v10467_v55 = vld [vmem:[#allocation9 + $0x3b4] sm:$0xf0] }
 0x7e3   : > { %6923 = vmatmul.bf16.gmra.mxu3 %v13203_v6  ;;  %7315 = vmatpush.bf16.msra.mxu2 %v9836_v52 }
 0x7e4   : > { %7246 = vmatpush.bf16.msra.mxu0 %v9708_v31 }
 0x7e6   : > { %v6668_v44 = vpop.f32.mrf.mxu3 }
 0x7e7   : > { %v6669_v57 = vadd.f32 %v6668_v44, %v6600_v10  ;;  %v6601_v26 = vpop.f32.mrf.mxu1 }
 0x7e8   : > { %v6602_v9 = vadd.f32 %v6601_v26, %v13780_v40  ;;  %v6788_v15 = vpop.f32.mrf.mxu2  ;;  %v6732_v61 = vpop.f32.mrf.mxu0 }
 0x7e9   : > { %v13908_v18 = vadd.f32 %v6788_v15, %v13873_v12  ;;  %v13910_v1 = vadd.f32 %v6732_v61, %v6664_v20 }
 0x7eb   : > { %6987 = vmatmul.bf16.gmra.mxu0 %v15713_v3 }
 0x7ed   : > { %7046 = vmatmul.bf16.vlgmr.msrb.gmra.mxu2 %v15712_v50 }
 0x7ee   : > { %v6670_v10 = vpop.f32.mrf.mxu3 }
 0x7ef   : > { %v6671_v63 = vadd.f32 %v6670_v10, %v6602_v9  ;;  %v6604_v0 = vpop.f32.mrf.mxu1  ;;  %v15714_v10 = vld [vmem:[#allocation109_spill] sm:$0xff] }
 0x7f0   : > { %v6605_v40 = vadd.f32 %v6604_v0, %v13789_v49  ;;  %v6791_v13 = vpop.f32.mrf.mxu2  ;;  %v6734_v12 = vpop.f32.mrf.mxu0  ;;  %v9563_v49 = vld [vmem:[#allocation9 + $0x3a8] sm:$0xf] }
 0x7f1   : > { %v13916_v15 = vadd.f32 %v6791_v13, %v13878_v8  ;;  %v13920_v20 = vadd.f32 %v6734_v12, %v6666_v56  ;;  %v9564_v27 = vor.u32 %v10467_v55, %v9563_v49  ;;  %v15715_v56 = vld [vmem:[#allocation122_spill] sm:$0xff]  ;;  %v9435_v0 = vld [vmem:[#allocation9 + $0x2a8] sm:$0xf]  ;;  %v10499_v55 = vld [vmem:[#allocation9 + $0x4b4] sm:$0xf0] }
 0x7f2   : > { %6859 = vmatmul.bf16.gmra.mxu1 %v15614_v47  ;;  %v9819_v13 = vld [vmem:[#allocation9 + $0x5a8] sm:$0xf] }
 0x7f3   : > { %6928 = vmatmul.bf16.gmra.mxu3 %v13261_v48  ;;  %v9691_v49 = vld [vmem:[#allocation9 + $0x4a8] sm:$0xf] }
 0x7f4   : > { %7178 = vmatpush.bf16.msra.mxu3 %v9564_v27  ;;  %v9692_v27 = vor.u32 %v10499_v55, %v9691_v49 }
 0x7f6   : > { %v6673_v31 = vpop.f32.mrf.mxu3  ;;  %7247 = vmatpush.bf16.msra.mxu0 %v9692_v27  ;;  %v10463_v27 = vld [vmem:[#allocation9 + $0x394] sm:$0xf0] }
 0x7f7   : > { %v6674_v60 = vadd.f32 %v6673_v31, %v6605_v40  ;;  %v6606_v52 = vpop.f32.mrf.mxu1  ;;  %v10435_v40 = vld [vmem:[#allocation9 + $0x2b4] sm:$0xf0] }
 0x7f8   : > { %v6607_v44 = vadd.f32 %v6606_v52, %v13798_v54  ;;  %v6793_v9 = vpop.f32.mrf.mxu2  ;;  %v6737_v8 = vpop.f32.mrf.mxu0  ;;  %v9436_v54 = vor.u32 %v10435_v40, %v9435_v0  ;;  %v10531_v31 = vld [vmem:[#allocation9 + $0x5b4] sm:$0xf0] }
 0x7f9   : > { %v13924_v26 = vadd.f32 %v6793_v9, %v13888_v34  ;;  %v13926_v61 = vadd.f32 %v6737_v8, %v6669_v57  ;;  %v9820_v9 = vor.u32 %v10531_v31, %v9819_v13  ;;  %v15716_v31 = vld [vmem:[#allocation116_spill] sm:$0xff] }
 0x7fa   : > { %7109 = vmatpush.bf16.msra.mxu1 %v9436_v54 }
 0x7fb   : > { %6992 = vmatmul.bf16.gmra.mxu0 %v15715_v56  ;;  %7316 = vmatpush.bf16.msra.mxu2 %v9820_v9 }
 0x7fd   : > { %7051 = vmatmul.bf16.gmra.mxu2 %v15714_v10 }
 0x7fe   : > { %v6675_v12 = vpop.f32.mrf.mxu3 }
 0x7ff   : > { %v6676_v52 = vadd.f32 %v6675_v12, %v6607_v44  ;;  %v6609_v34 = vpop.f32.mrf.mxu1 }
 0x800   : > { %v6610_v50 = vadd.f32 %v6609_v34, %v13807_v21  ;;  %v6796_v35 = vpop.f32.mrf.mxu2  ;;  %v6739_v8 = vpop.f32.mrf.mxu0  ;;  %v15717_v34 = vld [vmem:[#allocation23_spill] sm:$0xff] }
 0x801   : > { %v13932_v57 = vadd.f32 %v6796_v35, %v13894_v19  ;;  %v13936_v0 = vadd.f32 %v6739_v8, %v6671_v63 }
 0x802   : > { %6864 = vmatmul.bf16.gmra.mxu1 %v15617_v46 }
 0x803   : > { %6933 = vmatmul.bf16.gmra.mxu3 %v13312_v59 }
 0x806   : > { %v6678_v44 = vpop.f32.mrf.mxu3 }
 0x807   : > { %v6679_v40 = vadd.f32 %v6678_v44, %v6610_v50  ;;  %v6611_v21 = vpop.f32.mrf.mxu1 }
 0x808   : > { %v6612_v13 = vadd.f32 %v6611_v21, %v13815_v28  ;;  %v6798_v12 = vpop.f32.mrf.mxu2  ;;  %v6742_v19 = vpop.f32.mrf.mxu0  ;;  %v9547_v28 = vld [vmem:[#allocation9 + $0x388] sm:$0xf] }
 0x809   : > { %v13940_v35 = vadd.f32 %v6798_v12, %v13904_v5  ;;  %v13942_v54 = vadd.f32 %v6742_v19, %v6674_v60  ;;  %v15718_v5 = vld [vmem:[#allocation74_spill] sm:$0xff]  ;;  %v9548_v60 = vor.u32 %v10463_v27, %v9547_v28  ;;  %v15719_v21 = vld [vmem:[#allocation89_spill] sm:$0xff]  ;;  %v10495_v27 = vld [vmem:[#allocation9 + $0x494] sm:$0xf0] }
 0x80a   : > { %v9419_v19 = vld [vmem:[#allocation9 + $0x288] sm:$0xf] }
 0x80b   : > { %6997 = vmatmul.bf16.gmra.mxu0 %v15717_v34  ;;  %7179 = vmatpush.bf16.msra.mxu3 %v9548_v60  ;;  %v15721_v60 = vld [vmem:[#allocation28_spill] sm:$0xff] }
 0x80d   : > { %7056 = vmatmul.bf16.gmra.mxu2 %v15716_v31  ;;  %v10431_v31 = vld [vmem:[#allocation9 + $0x294] sm:$0xf0] }
 0x80e   : > { %v6680_v9 = vpop.f32.mrf.mxu3 }
 0x80f   : > { %v6681_v63 = vadd.f32 %v6680_v9, %v6612_v13  ;;  %v6614_v49 = vpop.f32.mrf.mxu1  ;;  %v9803_v13 = vld [vmem:[#allocation9 + $0x588] sm:$0xf]  ;;  %v9420_v9 = vor.u32 %v10431_v31, %v9419_v19  ;;  %v15720_v31 = vld [vmem:[#allocation124_spill] sm:$0xff] }
 0x810   : > { %v6615_v55 = vadd.f32 %v6614_v49, %v13823_v32  ;;  %v6801_v50 = vpop.f32.mrf.mxu2  ;;  %v6744_v44 = vpop.f32.mrf.mxu0  ;;  %v10527_v32 = vld [vmem:[#allocation9 + $0x594] sm:$0xf0] }
 0x811   : > { %v13948_v8 = vadd.f32 %v6801_v50, %v13910_v1  ;;  %v13952_v12 = vadd.f32 %v6744_v44, %v6676_v52  ;;  %v9804_v49 = vor.u32 %v10527_v32, %v9803_v13  ;;  %7110 = vmatpush.bf16.msra.mxu1 %v9420_v9  ;;  %v9675_v52 = vld [vmem:[#allocation9 + $0x488] sm:$0xf]  ;;  %v15723_v32 = vld [vmem:[#allocation52_spill] sm:$0xff] }
 0x812   : > { %6869 = vmatmul.bf16.gmra.mxu1 %v15718_v5 }
 0x813   : > { %6938 = vmatmul.bf16.gmra.mxu3 %v15719_v21  ;;  %7317 = vmatpush.bf16.msra.mxu2 %v9804_v49  ;;  %v9676_v21 = vor.u32 %v10495_v27, %v9675_v52 }
 0x815   : > { %7248 = vmatpush.bf16.msra.mxu0 %v9676_v21 }
 0x816   : > { %v6683_v10 = vpop.f32.mrf.mxu3 }
 0x817   : > { %v6684_v1 = vadd.f32 %v6683_v10, %v6615_v55  ;;  %v6616_v50 = vpop.f32.mrf.mxu1 }
 0x818   : > { %v6617_v34 = vadd.f32 %v6616_v50, %v13831_v62  ;;  %v6803_v56 = vpop.f32.mrf.mxu2  ;;  %v6747_v44 = vpop.f32.mrf.mxu0 }
 0x819   : > { %v13956_v28 = vadd.f32 %v6803_v56, %v13920_v20  ;;  %v13958_v5 = vadd.f32 %v6747_v44, %v6679_v40  ;;  %v15722_v56 = vld [vmem:[#allocation46_spill] sm:$0xff]  ;;  %v10459_v44 = vld [vmem:[#allocation9 + $0x374] sm:$0xf0] }
 0x81b   : > { %7002 = vmatmul.bf16.gmra.mxu0 %v15721_v60 }
 0x81d   : > { %7061 = vmatmul.bf16.gmra.mxu2 %v15720_v31 }
 0x81e   : > { %v6685_v10 = vpop.f32.mrf.mxu3 }
 0x81f   : > { %v6686_v55 = vadd.f32 %v6685_v10, %v6617_v34  ;;  %v6619_v19 = vpop.f32.mrf.mxu1 }
 0x820   : > { %v6620_v62 = vadd.f32 %v6619_v19, %v13839_v24  ;;  %v6806_v13 = vpop.f32.mrf.mxu2  ;;  %v6749_v9 = vpop.f32.mrf.mxu0  ;;  %v9531_v24 = vld [vmem:[#allocation9 + $0x368] sm:$0xf] }
 0x821   : > { %v13964_v20 = vadd.f32 %v6806_v13, %v13926_v61  ;;  %v13968_v40 = vadd.f32 %v6749_v9, %v6681_v63  ;;  %v9532_v10 = vor.u32 %v10459_v44, %v9531_v24  ;;  %v15724_v13 = vld [vmem:[#allocation24_spill] sm:$0xff]  ;;  %v9403_v9 = vld [vmem:[#allocation9 + $0x268] sm:$0xf]  ;;  %v10491_v44 = vld [vmem:[#allocation9 + $0x474] sm:$0xf0] }
 0x822   : > { %6874 = vmatmul.bf16.gmra.mxu1 %v15722_v56  ;;  %v15725_v63 = vld [vmem:[#allocation132_spill] sm:$0xff]  ;;  %v9659_v24 = vld [vmem:[#allocation9 + $0x468] sm:$0xf] }
 0x823   : > { %6943 = vmatmul.bf16.gmra.mxu3 %v15723_v32 }
 0x824   : > { %7180 = vmatpush.bf16.msra.mxu3 %v9532_v10 }
 0x826   : > { %v6688_v21 = vpop.f32.mrf.mxu3 }
 0x827   : > { %v6689_v49 = vadd.f32 %v6688_v21, %v6620_v62  ;;  %v6621_v50 = vpop.f32.mrf.mxu1  ;;  %v10427_v62 = vld [vmem:[#allocation9 + $0x274] sm:$0xf0]  ;;  %v9787_v21 = vld [vmem:[#allocation9 + $0x568] sm:$0xf] }
 0x828   : > { %v6622_v52 = vadd.f32 %v6621_v50, %v13845_v7  ;;  %v6808_v34 = vpop.f32.mrf.mxu2  ;;  %v6752_v61 = vpop.f32.mrf.mxu0  ;;  %v9404_v7 = vor.u32 %v10427_v62, %v9403_v9  ;;  %v10523_v50 = vld [vmem:[#allocation9 + $0x574] sm:$0xf0] }
 0x829   : > { %v13972_v27 = vadd.f32 %v6808_v34, %v13936_v0  ;;  %v13974_v19 = vadd.f32 %v6752_v61, %v6684_v1  ;;  %v9788_v34 = vor.u32 %v10523_v50, %v9787_v21  ;;  %v15726_v61 = vld [vmem:[#allocation83_spill] sm:$0xff] }
 0x82a   : > { %7111 = vmatpush.bf16.msra.mxu1 %v9404_v7  ;;  %v15729_v50 = vld [vmem:[#allocation27_spill] sm:$0xff] }
 0x82b   : > { %7007 = vmatmul.bf16.gmra.mxu0 %v15725_v63  ;;  %7318 = vmatpush.bf16.msra.mxu2 %v9788_v34 }
 0x82d   : > { %7066 = vmatmul.bf16.gmra.mxu2 %v15724_v13  ;;  %v9660_v13 = vor.u32 %v10491_v44, %v9659_v24 }
 0x82e   : > { %v6690_v31 = vpop.f32.mrf.mxu3 }
 0x82f   : > { %v6691_v32 = vadd.f32 %v6690_v31, %v6622_v52  ;;  %v6840_v0 = vpop.f32.mrf.mxu1  ;;  %7249 = vmatpush.bf16.msra.mxu0 %v9660_v13 }
 0x830   : > { %v6811_v60 = vpop.f32.mrf.mxu2  ;;  %v6841_v56 = vadd.f32 %v6840_v0, %v13853_v4  ;;  %v6754_v10 = vpop.f32.mrf.mxu0  ;;  %v15730_v0 = vld [vmem:[#allocation133_spill] sm:$0xff] }
 0x831   : > { %v13980_v1 = vadd.f32 %v6811_v60, %v13942_v54  ;;  %v13984_v9 = vadd.f32 %v6754_v10, %v6686_v55  ;;  %v15732_v10 = vld [vmem:[#allocation86_spill] sm:$0xff] }
 0x832   : > { %6879 = vmatmul.bf16.gmra.mxu1 %v15726_v61  ;;  %v15755_v61 = vld [vmem:[#allocation21_spill] sm:$0xff] }
 0x833   : > { %6948 = vmatmul.bf16.gmra.mxu3 %v15727_v30  ;;  %v15743_v30 = vld [vmem:[#allocation99_spill] sm:$0xff] }
 0x836   : > { %v6909_v31 = vpop.f32.mrf.mxu3 }
 0x837   : > { %v13986_v52 = vadd.f32 %v6909_v31, %v6841_v56  ;;  %v6842_v4 = vpop.f32.mrf.mxu1 }
 0x838   : > { %v6813_v62 = vpop.f32.mrf.mxu2  ;;  %v6843_v54 = vadd.f32 %v6842_v4, %v13861_v51  ;;  %v6757_v21 = vpop.f32.mrf.mxu0  ;;  %v9515_v51 = vld [vmem:[#allocation9 + $0x348] sm:$0xf]  ;;  %v15733_v4 = vld [vmem:[#allocation94_spill] sm:$0xff] }
 0x839   : > { %15728 = vst [vmem:[#allocation115_spill] sm:$0xff] %v13986_v52  ;;  %v13990_v60 = vadd.f32 %v6813_v62, %v13952_v12  ;;  %v13992_v7 = vadd.f32 %v6757_v21, %v6689_v49  ;;  %v10455_v12 = vld [vmem:[#allocation9 + $0x354] sm:$0xf0]  ;;  %v9387_v21 = vld [vmem:[#allocation9 + $0x248] sm:$0xf] }
 0x83a   : > { %v9516_v31 = vor.u32 %v10455_v12, %v9515_v51  ;;  %v10519_v52 = vld [vmem:[#allocation9 + $0x554] sm:$0xf0] }
 0x83b   : > { %7012 = vmatmul.bf16.gmra.mxu0 %v15730_v0 }
 0x83c   : > { %7181 = vmatpush.bf16.msra.mxu3 %v9516_v31 }
 0x83d   : > { %7071 = vmatmul.bf16.gmra.mxu2 %v15729_v50 }
 0x83e   : > { %v6911_v55 = vpop.f32.mrf.mxu3 }
 0x83f   : > { %v13996_v34 = vadd.f32 %v6911_v55, %v6843_v54  ;;  %v6845_v13 = vpop.f32.mrf.mxu1  ;;  %v10423_v54 = vld [vmem:[#allocation9 + $0x254] sm:$0xf0]  ;;  %v9771_v55 = vld [vmem:[#allocation9 + $0x548] sm:$0xf] }
 0x840   : > { %v6816_v56 = vpop.f32.mrf.mxu2  ;;  %v6846_v24 = vadd.f32 %v6845_v13, %v13869_v41  ;;  %v6759_v49 = vpop.f32.mrf.mxu0  ;;  %v9772_v41 = vor.u32 %v10519_v52, %v9771_v55  ;;  %v9499_v52 = vld [vmem:[#allocation9 + $0x328] sm:$0xf]  ;;  %v15735_v55 = vld [vmem:[#allocation35_spill] sm:$0xff] }
 0x841   : > { %15731 = vst [vmem:[#allocation69_spill] sm:$0xff] %v13996_v34  ;;  %v14000_v44 = vadd.f32 %v6816_v56, %v13958_v5  ;;  %v14004_v62 = vadd.f32 %v6759_v49, %v6691_v32  ;;  %v9388_v34 = vor.u32 %v10423_v54, %v9387_v21  ;;  %v9643_v32 = vld [vmem:[#allocation9 + $0x448] sm:$0xf]  ;;  %v10487_v49 = vld [vmem:[#allocation9 + $0x454] sm:$0xf0] }
 0x842   : > { %6884 = vmatmul.bf16.gmra.mxu1 %v15732_v10  ;;  %7319 = vmatpush.bf16.msra.mxu2 %v9772_v41  ;;  %v9644_v31 = vor.u32 %v10487_v49, %v9643_v32  ;;  %v9371_v21 = vld [vmem:[#allocation9 + $0x228] sm:$0xf]  ;;  %v10419_v54 = vld [vmem:[#allocation9 + $0x234] sm:$0xf0] }
 0x843   : > { %6953 = vmatmul.bf16.gmra.mxu3 %v15733_v4  ;;  %7112 = vmatpush.bf16.msra.mxu1 %v9388_v34  ;;  %v9372_v34 = vor.u32 %v10419_v54, %v9371_v21  ;;  %v9355_v49 = vld [vmem:[#allocation9 + $0x208] sm:$0xf]  ;;  %v15737_v21 = vld [vmem:[#allocation76_spill] sm:$0xff]  ;;  %v10635_v10 = vld [vmem:[#allocation9 + $0x8f4] sm:$0xf0] }
 0x844   : > { %7250 = vmatpush.bf16.msra.mxu0 %v9644_v31  ;;  %v10415_v31 = vld [vmem:[#allocation9 + $0x214] sm:$0xf0] }
 0x846   : > { %v6914_v13 = vpop.f32.mrf.mxu3 }
 0x847   : > { %v14006_v5 = vadd.f32 %v6914_v13, %v6846_v24  ;;  %v6847_v56 = vpop.f32.mrf.mxu1  ;;  %v10451_v24 = vld [vmem:[#allocation9 + $0x334] sm:$0xf0]  ;;  %7113 = vmatpush.bf16.msra.mxu1 %v9372_v34  ;;  %v15738_v34 = vld [vmem:[#allocation96_spill] sm:$0xff] }
 0x848   : > { %v6818_v50 = vpop.f32.mrf.mxu2  ;;  %v6848_v51 = vadd.f32 %v6847_v56, %v13876_v42  ;;  %v14012_v4 = vpop.f32.mrf.mxu0  ;;  %v9500_v41 = vor.u32 %v10451_v24, %v9499_v52  ;;  %v9483_v52 = vld [vmem:[#allocation9 + $0x308] sm:$0xf]  ;;  %v10447_v24 = vld [vmem:[#allocation9 + $0x314] sm:$0xf0] }
 0x849   : > { %15734 = vst [vmem:[#allocation117_spill] sm:$0xff] %v14006_v5  ;;  %v14010_v12 = vadd.f32 %v6818_v50, %v13968_v40  ;;  %v9356_v5 = vor.u32 %v10415_v31, %v9355_v49  ;;  %v9755_v49 = vld [vmem:[#allocation9 + $0x528] sm:$0xf]  ;;  %v10515_v31 = vld [vmem:[#allocation9 + $0x534] sm:$0xf0] }
 0x84a   : > { %7182 = vmatpush.bf16.msra.mxu3 %v9500_v41 }
 0x84b   : > { %7017 = vmatmul.bf16.gmra.mxu0 %v15656_v45  ;;  %7114 = vmatpush.bf16.msra.mxu1 %v9356_v5  ;;  %v9756_v5 = vor.u32 %v10515_v31, %v9755_v49 }
 0x84d   : > { %7076 = vmatmul.bf16.gmra.mxu2 %v15735_v55 }
 0x84e   : > { %v6916_v42 = vpop.f32.mrf.mxu3  ;;  %7320 = vmatpush.bf16.msra.mxu2 %v9756_v5 }
 0x84f   : > { %v14016_v40 = vadd.f32 %v6916_v42, %v6848_v51  ;;  %v6850_v50 = vpop.f32.mrf.mxu1  ;;  %v9484_v51 = vor.u32 %v10447_v24, %v9483_v52 }
 0x850   : > { %v6821_v13 = vpop.f32.mrf.mxu2  ;;  %v6851_v56 = vadd.f32 %v6850_v50, %v13884_v14  ;;  %v14023_v54 = vpop.f32.mrf.mxu0 }
 0x851   : > { %15736 = vst [vmem:[#allocation72_spill] sm:$0xff] %v14016_v40  ;;  %v14020_v32 = vadd.f32 %v6821_v13, %v13974_v19  ;;  %7183 = vmatpush.bf16.msra.mxu3 %v9484_v51 }
 0x852   : > { %6889 = vmatmul.bf16.gmra.mxu1 %v15737_v21  ;;  %v15740_v21 = vld [vmem:[#allocation38_spill] sm:$0xff] }
 0x853   : > { %6958 = vmatmul.bf16.gmra.mxu3 %v15738_v34 }
 0x856   : > { %v6919_v41 = vpop.f32.mrf.mxu3 }
 0x857   : > { %v14026_v42 = vadd.f32 %v6919_v41, %v6851_v56  ;;  %v6852_v14 = vpop.f32.mrf.mxu1 }
 0x858   : > { %v6823_v19 = vpop.f32.mrf.mxu2  ;;  %v6853_v50 = vadd.f32 %v6852_v14, %v13892_v37  ;;  %v6983_v40 = vpop.f32.mrf.mxu0  ;;  %v10483_v14 = vld [vmem:[#allocation9 + $0x434] sm:$0xf0] }
 0x859   : > { %15739 = vst [vmem:[#allocation119_spill] sm:$0xff] %v14026_v42  ;;  %v14030_v13 = vadd.f32 %v6823_v19, %v13984_v9  ;;  %v9627_v9 = vld [vmem:[#allocation9 + $0x428] sm:$0xf] }
 0x85a   : > { %v15742_v19 = vld [vmem:[#allocation61_spill] sm:$0xff]  ;;  %v9628_v34 = vor.u32 %v10483_v14, %v9627_v9  ;;  %v10479_v9 = vld [vmem:[#allocation9 + $0x414] sm:$0xf0] }
 0x85b   : > { %7022 = vmatmul.bf16.gmra.mxu0 %v15662_v25 }
 0x85c   : > { %7251 = vmatpush.bf16.msra.mxu0 %v9628_v34 }
 0x85d   : > { %7081 = vmatmul.bf16.gmra.mxu2 %v15740_v21 }
 0x85e   : > { %v6921_v52 = vpop.f32.mrf.mxu3 }
 0x85f   : > { %v14034_v24 = vadd.f32 %v6921_v52, %v6853_v50  ;;  %v6855_v56 = vpop.f32.mrf.mxu1 }
 0x860   : > { %v6826_v51 = vpop.f32.mrf.mxu2  ;;  %v6856_v41 = vadd.f32 %v6855_v56, %v13900_v2  ;;  %v6985_v42 = vpop.f32.mrf.mxu0  ;;  %v10754_v56 = vld [vmem:[#allocation10] sm:$0xf] }
 0x861   : > { %15741 = vst [vmem:[#allocation75_spill] sm:$0xff] %v14034_v24  ;;  %v14038_v37 = vadd.f32 %v6826_v51, %v13992_v7  ;;  %v14050_v51 = vperm.slane %v10754_v56, 2  ;;  %v9611_v24 = vld [vmem:[#allocation9 + $0x408] sm:$0xf]  ;;  %v15746_v56 = vld [vmem:[#allocation114_spill] sm:$0xff] }
 0x862   : > { %6894 = vmatmul.bf16.gmra.mxu1 %v15742_v19  ;;  %v9612_v14 = vor.u32 %v10479_v9, %v9611_v24  ;;  %v9739_v9 = vld [vmem:[#allocation9 + $0x508] sm:$0xf] }
 0x863   : > { %6963 = vmatmul.bf16.gmra.mxu3 %v15743_v30 }
 0x864   : > { %7252 = vmatpush.bf16.msra.mxu0 %v9612_v14 }
 0x866   : > { %v6924_v49 = vpop.f32.mrf.mxu3 }
 0x867   : > { %v14042_v50 = vadd.f32 %v6924_v49, %v6856_v41  ;;  %v6857_v31 = vpop.f32.mrf.mxu1 }
 0x868   : > { %v6828_v52 = vpop.f32.mrf.mxu2  ;;  %v6858_v2 = vadd.f32 %v6857_v31, %v13908_v18  ;;  %v14048_v7 = vpop.f32.mrf.mxu0  ;;  %v6979_v18 = vadd.f32 %v14012_v4, %v14050_v51  ;;  %v6981_v4 = vadd.f32 %v14023_v54, %v14050_v51 }
 0x869   : > { %15744 = vst [vmem:[#allocation121_spill] sm:$0xff] %v14042_v50  ;;  %v14046_v5 = vadd.f32 %v6828_v52, %v14004_v62  ;;  %v10511_v50 = vld [vmem:[#allocation9 + $0x514] sm:$0xf0] }
 0x86a   : > { %v9740_v14 = vor.u32 %v10511_v50, %v9739_v9  ;;  %v6984_v50 = vadd.f32 %v6983_v40, %v14050_v51 }
 0x86b   : > { %7027 = vmatmul.bf16.gmra.mxu0 %v15668_v38 }
 0x86c   : > { %7321 = vmatpush.bf16.msra.mxu2 %v9740_v14 }
 0x86d   : > { %7086 = vmatmul.bf16.gmra.mxu2 %v15665_v11 }
 0x86e   : > { %v6926_v34 = vpop.f32.mrf.mxu3 }
 0x86f   : > { %v14056_v41 = vadd.f32 %v6926_v34, %v6858_v2  ;;  %v6860_v62 = vpop.f32.mrf.mxu1 }
 0x870   : > { %v6861_v49 = vadd.f32 %v6860_v62, %v13916_v15  ;;  %v7047_v31 = vpop.f32.mrf.mxu2  ;;  %v14062_v24 = vpop.f32.mrf.mxu0 }
 0x871   : > { %15745 = vst [vmem:[#allocation78_spill] sm:$0xff] %v14056_v41  ;;  %v14059_v52 = vadd.f32 %v7047_v31, %v6979_v18  ;;  %v15748_v41 = vld [vmem:[#allocation44_spill] sm:$0xff] }
 0x872   : > { %7115 = vmatmul.bf16.vlgmr.msra.gmra.mxu1 %v15746_v56  ;;  %v15749_v56 = vld [vmem:[#allocation137_spill] sm:$0xff] }
 0x873   : > { %7184 = vmatmul.bf16.vlgmr.msra.gmra.mxu3 %v15725_v63  ;;  %v9213_v63 = vld [vmem:[#allocation9 + $0xf8] sm:$0xf0] }
 0x876   : > { %v6929_v30 = vpop.f32.mrf.mxu3 }
 0x877   : > { %v14067_v2 = vadd.f32 %v6929_v30, %v6861_v49  ;;  %v6862_v15 = vpop.f32.mrf.mxu1 }
 0x878   : > { %v6863_v34 = vadd.f32 %v6862_v15, %v13924_v26  ;;  %v7049_v18 = vpop.f32.mrf.mxu2  ;;  %v6993_v31 = vpop.f32.mrf.mxu0  ;;  %v15751_v26 = vld [vmem:[#allocation120_spill] sm:$0xff] }
 0x879   : > { %15747 = vst [vmem:[#allocation123_spill] sm:$0xff] %v14067_v2  ;;  %v14070_v62 = vadd.f32 %v7049_v18, %v6981_v4  ;;  %v6986_v18 = vadd.f32 %v6985_v42, %v14050_v51  ;;  %v10571_v42 = vld [vmem:[#allocation9 + $0x6f4] sm:$0xf0] }
 0x87b   : > { %7032 = vmatmul.bf16.gmra.mxu0 %v15749_v56 }
 0x87d   : > { %7091 = vmatmul.bf16.gmra.mxu2 %v15748_v41 }
 0x87e   : > { %v6931_v19 = vpop.f32.mrf.mxu3 }
 0x87f   : > { %v14075_v9 = vadd.f32 %v6931_v19, %v6863_v34  ;;  %v6865_v14 = vpop.f32.mrf.mxu1 }
 0x880   : > { %v6866_v30 = vadd.f32 %v6865_v14, %v13932_v57  ;;  %v7052_v54 = vpop.f32.mrf.mxu2  ;;  %v14081_v4 = vpop.f32.mrf.mxu0  ;;  %v10107_v57 = vld [vmem:[#allocation9 + $0x7e8] sm:$0xf] }
 0x881   : > { %15750 = vst [vmem:[#allocation125_spill] sm:$0xff] %v14075_v9  ;;  %v14078_v49 = vadd.f32 %v7052_v54, %v6984_v50  ;;  %v10603_v50 = vld [vmem:[#allocation9 + $0x7f4] sm:$0xf0] }
 0x882   : > { %7120 = vmatmul.bf16.gmra.mxu1 %v15751_v26  ;;  %v10108_v54 = vor.u32 %v10603_v50, %v10107_v57  ;;  %v15753_v26 = vld [vmem:[#allocation136_spill] sm:$0xff] }
 0x883   : > { %7189 = vmatmul.bf16.gmra.mxu3 %v15730_v0  ;;  %v9979_v0 = vld [vmem:[#allocation9 + $0x6e8] sm:$0xf] }
 0x884   : > { %7452 = vmatpush.bf16.msrb.mxu3 %v10108_v54 }
 0x886   : > { %v6934_v15 = vpop.f32.mrf.mxu3 }
 0x887   : > { %v14085_v2 = vadd.f32 %v6934_v15, %v6866_v30  ;;  %v6867_v40 = vpop.f32.mrf.mxu1  ;;  %v10377_v30 = vld [vmem:[#allocation9 + $0xec] sm:$0xf] }
 0x888   : > { %v6868_v19 = vadd.f32 %v6867_v40, %v13940_v35  ;;  %v7054_v34 = vpop.f32.mrf.mxu2  ;;  %v14090_v14 = vpop.f32.mrf.mxu0  ;;  %v6989_v35 = vadd.f32 %v14048_v7, %v14050_v51 }
 0x889   : > { %15752 = vst [vmem:[#allocation81_spill] sm:$0xff] %v14085_v2  ;;  %v14088_v9 = vadd.f32 %v7054_v34, %v6986_v18  ;;  %v9980_v2 = vor.u32 %v10571_v42, %v9979_v0  ;;  %v9216_v34 = vor.u32 %v10377_v30, %v9213_v63  ;;  %v6991_v63 = vadd.f32 %v14062_v24, %v14050_v51 }
 0x88b   : > { %7253 = vmatmul.bf16.vlgmr.msra.gmra.mxu0 %v15735_v55  ;;  %7383 = vmatpush.bf16.msrb.mxu1 %v9980_v2  ;;  %v10235_v55 = vld [vmem:[#allocation9 + $0x8e8] sm:$0xf] }
 0x88c   : > { %7590 = vmatpush.bf16.msrb.mxu2 %v9216_v34  ;;  %v10236_v42 = vor.u32 %v10635_v10, %v10235_v55  ;;  %v6994_v55 = vadd.f32 %v6993_v31, %v14050_v51  ;;  %v10373_v31 = vld [vmem:[#allocation9 + $0xcc] sm:$0xf] }
 0x88d   : > { %7096 = vmatmul.bf16.gmra.mxu2 %v15753_v26 }
 0x88e   : > { %v6936_v15 = vpop.f32.mrf.mxu3  ;;  %7521 = vmatpush.bf16.msrb.mxu0 %v10236_v42 }
 0x88f   : > { %v14096_v18 = vadd.f32 %v6936_v15, %v6868_v19  ;;  %v6870_v40 = vpop.f32.mrf.mxu1 }
 0x890   : > { %v6871_v57 = vadd.f32 %v6870_v40, %v13948_v8  ;;  %v7057_v50 = vpop.f32.mrf.mxu2  ;;  %v7000_v0 = vpop.f32.mrf.mxu0  ;;  %v15757_v40 = vld [vmem:[#allocation50_spill] sm:$0xff] }
 0x891   : > { %15754 = vst [vmem:[#allocation126_spill] sm:$0xff] %v14096_v18  ;;  %v14099_v54 = vadd.f32 %v7057_v50, %v6989_v35  ;;  %v10567_v18 = vld [vmem:[#allocation9 + $0x6d4] sm:$0xf0] }
 0x892   : > { %7125 = vmatmul.bf16.gmra.mxu1 %v15755_v61  ;;  %v10631_v61 = vld [vmem:[#allocation9 + $0x8d4] sm:$0xf0] }
 0x893   : > { %7194 = vmatmul.bf16.gmra.mxu3 %v15656_v45  ;;  %v10615_v45 = vld [vmem:[#allocation9 + $0x854] sm:$0xf0] }
 0x896   : > { %v6939_v7 = vpop.f32.mrf.mxu3 }
 0x897   : > { %v14105_v19 = vadd.f32 %v6939_v7, %v6871_v57  ;;  %v6872_v8 = vpop.f32.mrf.mxu1  ;;  %v10599_v7 = vld [vmem:[#allocation9 + $0x7d4] sm:$0xf0] }
 0x898   : > { %v6873_v2 = vadd.f32 %v6872_v8, %v13956_v28  ;;  %v7059_v30 = vpop.f32.mrf.mxu2  ;;  %v14110_v35 = vpop.f32.mrf.mxu0  ;;  %v10091_v28 = vld [vmem:[#allocation9 + $0x7c8] sm:$0xf] }
 0x899   : > { %15756 = vst [vmem:[#allocation84_spill] sm:$0xff] %v14105_v19  ;;  %v14108_v15 = vadd.f32 %v7059_v30, %v6991_v63  ;;  %v15759_v63 = vld [vmem:[#allocation127_spill] sm:$0xff]  ;;  %v10092_v30 = vor.u32 %v10599_v7, %v10091_v28  ;;  %v9963_v19 = vld [vmem:[#allocation9 + $0x6c8] sm:$0xf] }
 0x89b   : > { %7258 = vmatmul.bf16.gmra.mxu0 %v15740_v21  ;;  %7453 = vmatpush.bf16.msrb.mxu3 %v10092_v30 }
 0x89d   : > { %7101 = vmatmul.bf16.gmra.mxu2 %v15757_v40 }
 0x89e   : > { %v6941_v10 = vpop.f32.mrf.mxu3 }
 0x89f   : > { %v14115_v34 = vadd.f32 %v6941_v10, %v6873_v2  ;;  %v6875_v24 = vpop.f32.mrf.mxu1  ;;  %v9964_v2 = vor.u32 %v10567_v18, %v9963_v19  ;;  %v9197_v10 = vld [vmem:[#allocation9 + $0xd8] sm:$0xf0]  ;;  %v15761_v19 = vld [vmem:[#allocation37_spill] sm:$0xff] }
 0x8a0   : > { %v6876_v57 = vadd.f32 %v6875_v24, %v13964_v20  ;;  %v7062_v50 = vpop.f32.mrf.mxu2  ;;  %v14121_v8 = vpop.f32.mrf.mxu0 }
 0x8a1   : > { %15758 = vst [vmem:[#allocation128_spill] sm:$0xff] %v14115_v34  ;;  %v14118_v42 = vadd.f32 %v7062_v50, %v6994_v55  ;;  %v9200_v34 = vor.u32 %v10373_v31, %v9197_v10  ;;  %7384 = vmatpush.bf16.msrb.mxu1 %v9964_v2  ;;  %v6996_v55 = vadd.f32 %v14081_v4, %v14050_v51 }
 0x8a2   : > { %7130 = vmatmul.bf16.gmra.mxu1 %v15759_v63  ;;  %v10219_v63 = vld [vmem:[#allocation9 + $0x8c8] sm:$0xf]  ;;  %v6999_v4 = vadd.f32 %v14090_v14, %v14050_v51 }
 0x8a3   : > { %7199 = vmatmul.bf16.gmra.mxu3 %v15662_v25  ;;  %7591 = vmatpush.bf16.msrb.mxu2 %v9200_v34  ;;  %v10220_v18 = vor.u32 %v10631_v61, %v10219_v63 }
 0x8a5   : > { %7522 = vmatpush.bf16.msrb.mxu0 %v10220_v18 }
 0x8a6   : > { %v6944_v20 = vpop.f32.mrf.mxu3 }
 0x8a7   : > { %v14126_v24 = vadd.f32 %v6944_v20, %v6876_v57  ;;  %v6877_v50 = vpop.f32.mrf.mxu1  ;;  %v15763_v20 = vld [vmem:[#allocation131_spill] sm:$0xff] }
 0x8a8   : > { %v6878_v28 = vadd.f32 %v6877_v50, %v13972_v27  ;;  %v7064_v7 = vpop.f32.mrf.mxu2  ;;  %v7008_v30 = vpop.f32.mrf.mxu0 }
 0x8a9   : > { %15760 = vst [vmem:[#allocation87_spill] sm:$0xff] %v14126_v24  ;;  %v14129_v21 = vadd.f32 %v7064_v7, %v6996_v55  ;;  %v7001_v55 = vadd.f32 %v7000_v0, %v14050_v51  ;;  %v10563_v0 = vld [vmem:[#allocation9 + $0x6b4] sm:$0xf0]  ;;  %v9181_v24 = vld [vmem:[#allocation9 + $0xb8] sm:$0xf0] }
 0x8ab   : > { %7263 = vmatmul.bf16.gmra.mxu0 %v15665_v11  ;;  %v10627_v11 = vld [vmem:[#allocation9 + $0x8b4] sm:$0xf0] }
 0x8ad   : > { %7322 = vmatmul.bf16.vlgmr.msra.gmra.mxu2 %v15761_v19 }
 0x8ae   : > { %v6946_v31 = vpop.f32.mrf.mxu3 }
 0x8af   : > { %v14135_v57 = vadd.f32 %v6946_v31, %v6878_v28  ;;  %v6880_v34 = vpop.f32.mrf.mxu1  ;;  %v10595_v31 = vld [vmem:[#allocation9 + $0x7b4] sm:$0xf0] }
 0x8b0   : > { %v6881_v27 = vadd.f32 %v6880_v34, %v13980_v1  ;;  %v7067_v2 = vpop.f32.mrf.mxu2  ;;  %v14141_v61 = vpop.f32.mrf.mxu0  ;;  %v10075_v1 = vld [vmem:[#allocation9 + $0x7a8] sm:$0xf] }
 0x8b1   : > { %15762 = vst [vmem:[#allocation130_spill] sm:$0xff] %v14135_v57  ;;  %v14138_v10 = vadd.f32 %v7067_v2, %v6999_v4  ;;  %v10076_v34 = vor.u32 %v10595_v31, %v10075_v1  ;;  %v15765_v2 = vld [vmem:[#allocation41_spill] sm:$0xff] }
 0x8b2   : > { %7135 = vmatmul.bf16.gmra.mxu1 %v15763_v20  ;;  %v9947_v57 = vld [vmem:[#allocation9 + $0x6a8] sm:$0xf] }
 0x8b3   : > { %7204 = vmatmul.bf16.gmra.mxu3 %v15668_v38  ;;  %v15767_v20 = vld [vmem:[#allocation25_spill] sm:$0xff]  ;;  %v10357_v38 = vld [vmem:[#allocation9 + $0x4c] sm:$0xf] }
 0x8b4   : > { %7454 = vmatpush.bf16.msrb.mxu3 %v10076_v34 }
 0x8b6   : > { %v6949_v63 = vpop.f32.mrf.mxu3 }
 0x8b7   : > { %v14145_v50 = vadd.f32 %v6949_v63, %v6881_v27  ;;  %v6882_v14 = vpop.f32.mrf.mxu1  ;;  %v10369_v27 = vld [vmem:[#allocation9 + $0xac] sm:$0xf] }
 0x8b8   : > { %v6883_v28 = vadd.f32 %v6882_v14, %v13990_v60  ;;  %v7069_v7 = vpop.f32.mrf.mxu2  ;;  %v14150_v4 = vpop.f32.mrf.mxu0  ;;  %v7004_v60 = vadd.f32 %v14110_v35, %v14050_v51 }
 0x8b9   : > { %15764 = vst [vmem:[#allocation90_spill] sm:$0xff] %v14145_v50  ;;  %v14148_v18 = vadd.f32 %v7069_v7, %v7001_v55  ;;  %v9948_v50 = vor.u32 %v10563_v0, %v9947_v57  ;;  %v9184_v7 = vor.u32 %v10369_v27, %v9181_v24  ;;  %v7006_v24 = vadd.f32 %v14121_v8, %v14050_v51 }
 0x8bb   : > { %7268 = vmatmul.bf16.gmra.mxu0 %v15748_v41  ;;  %7385 = vmatpush.bf16.msrb.mxu1 %v9948_v50  ;;  %v10203_v41 = vld [vmem:[#allocation9 + $0x8a8] sm:$0xf] }
 0x8bc   : > { %7592 = vmatpush.bf16.msrb.mxu2 %v9184_v7  ;;  %v10204_v0 = vor.u32 %v10627_v11, %v10203_v41  ;;  %v7009_v41 = vadd.f32 %v7008_v30, %v14050_v51  ;;  %v10365_v30 = vld [vmem:[#allocation9 + $0x8c] sm:$0xf] }
 0x8bd   : > { %7327 = vmatmul.bf16.gmra.mxu2 %v15765_v2 }
 0x8be   : > { %v6951_v63 = vpop.f32.mrf.mxu3  ;;  %7523 = vmatpush.bf16.msrb.mxu0 %v10204_v0 }
 0x8bf   : > { %v14156_v55 = vadd.f32 %v6951_v63, %v6883_v28  ;;  %v6885_v14 = vpop.f32.mrf.mxu1 }
 0x8c0   : > { %v6886_v1 = vadd.f32 %v6885_v14, %v14000_v44  ;;  %v7072_v31 = vpop.f32.mrf.mxu2  ;;  %v7015_v57 = vpop.f32.mrf.mxu0  ;;  %v15769_v14 = vld [vmem:[#allocation43_spill] sm:$0xff] }
 0x8c1   : > { %15766 = vst [vmem:[#allocation105_spill] sm:$0xff] %v14156_v55  ;;  %v14159_v34 = vadd.f32 %v7072_v31, %v7004_v60  ;;  %v10559_v55 = vld [vmem:[#allocation9 + $0x694] sm:$0xf0] }
 0x8c2   : > { %7140 = vmatmul.bf16.gmra.mxu1 %v15767_v20  ;;  %v10623_v20 = vld [vmem:[#allocation9 + $0x894] sm:$0xf0] }
 0x8c3   : > { %7209 = vmatmul.bf16.gmra.mxu3 %v15749_v56  ;;  %v15779_v56 = vld [vmem:[#allocation33_spill] sm:$0xff] }
 0x8c6   : > { %v6954_v35 = vpop.f32.mrf.mxu3 }
 0x8c7   : > { %v14165_v28 = vadd.f32 %v6954_v35, %v6886_v1  ;;  %v6887_v44 = vpop.f32.mrf.mxu1  ;;  %v10591_v35 = vld [vmem:[#allocation9 + $0x794] sm:$0xf0] }
 0x8c8   : > { %v6888_v50 = vadd.f32 %v6887_v44, %v14010_v12  ;;  %v7074_v27 = vpop.f32.mrf.mxu2  ;;  %v14170_v60 = vpop.f32.mrf.mxu0  ;;  %v10059_v12 = vld [vmem:[#allocation9 + $0x788] sm:$0xf] }
 0x8c9   : > { %15768 = vst [vmem:[#allocation112_spill] sm:$0xff] %v14165_v28  ;;  %v14168_v63 = vadd.f32 %v7074_v27, %v7006_v24  ;;  %v10060_v44 = vor.u32 %v10591_v35, %v10059_v12  ;;  %v15771_v27 = vld [vmem:[#allocation53_spill] sm:$0xff] }
 0x8ca   : > { %v9931_v28 = vld [vmem:[#allocation9 + $0x688] sm:$0xf] }
 0x8cb   : > { %7273 = vmatmul.bf16.gmra.mxu0 %v15753_v26  ;;  %7455 = vmatpush.bf16.msrb.mxu3 %v10060_v44 }
 0x8cd   : > { %7332 = vmatmul.bf16.gmra.mxu2 %v15769_v14 }
 0x8ce   : > { %v6956_v11 = vpop.f32.mrf.mxu3 }
 0x8cf   : > { %v14175_v7 = vadd.f32 %v6956_v11, %v6888_v50  ;;  %v6890_v8 = vpop.f32.mrf.mxu1  ;;  %v9932_v50 = vor.u32 %v10559_v55, %v9931_v28  ;;  %v9165_v11 = vld [vmem:[#allocation9 + $0x98] sm:$0xf0]  ;;  %v15773_v28 = vld [vmem:[#allocation47_spill] sm:$0xff] }
 0x8d0   : > { %v6891_v1 = vadd.f32 %v6890_v8, %v14020_v32  ;;  %v7077_v31 = vpop.f32.mrf.mxu2  ;;  %v14181_v24 = vpop.f32.mrf.mxu0 }
 0x8d1   : > { %15770 = vst [vmem:[#allocation93_spill] sm:$0xff] %v14175_v7  ;;  %v14178_v0 = vadd.f32 %v7077_v31, %v7009_v41  ;;  %v9168_v7 = vor.u32 %v10365_v30, %v9165_v11  ;;  %7386 = vmatpush.bf16.msrb.mxu1 %v9932_v50  ;;  %v7011_v41 = vadd.f32 %v14141_v61, %v14050_v51 }
 0x8d2   : > { %7145 = vmatmul.bf16.gmra.mxu1 %v15761_v19  ;;  %v10187_v19 = vld [vmem:[#allocation9 + $0x888] sm:$0xf]  ;;  %v7014_v61 = vadd.f32 %v14150_v4, %v14050_v51 }
 0x8d3   : > { %7214 = vmatmul.bf16.gmra.mxu3 %v15771_v27  ;;  %7593 = vmatpush.bf16.msrb.mxu2 %v9168_v7  ;;  %v10188_v55 = vor.u32 %v10623_v20, %v10187_v19  ;;  %v15775_v20 = vld [vmem:[#allocation56_spill] sm:$0xff] }
 0x8d5   : > { %7524 = vmatpush.bf16.msrb.mxu0 %v10188_v55 }
 0x8d6   : > { %v6959_v32 = vpop.f32.mrf.mxu3 }
 0x8d7   : > { %v14186_v8 = vadd.f32 %v6959_v32, %v6891_v1  ;;  %v6892_v31 = vpop.f32.mrf.mxu1 }
 0x8d8   : > { %v6893_v12 = vadd.f32 %v6892_v31, %v14030_v13  ;;  %v7079_v35 = vpop.f32.mrf.mxu2  ;;  %v7023_v44 = vpop.f32.mrf.mxu0 }
 0x8d9   : > { %15772 = vst [vmem:[#allocation103_spill] sm:$0xff] %v14186_v8  ;;  %v14189_v26 = vadd.f32 %v7079_v35, %v7011_v41  ;;  %v7016_v41 = vadd.f32 %v7015_v57, %v14050_v51  ;;  %v10555_v57 = vld [vmem:[#allocation9 + $0x674] sm:$0xf0]  ;;  %v9149_v8 = vld [vmem:[#allocation9 + $0x78] sm:$0xf0] }
 0x8db   : > { %7278 = vmatmul.bf16.gmra.mxu0 %v15757_v40 }
 0x8dd   : > { %7337 = vmatmul.bf16.gmra.mxu2 %v15773_v28 }
 0x8de   : > { %v6961_v30 = vpop.f32.mrf.mxu3 }
 0x8df   : > { %v14195_v1 = vadd.f32 %v6961_v30, %v6893_v12  ;;  %v6895_v7 = vpop.f32.mrf.mxu1  ;;  %v10587_v30 = vld [vmem:[#allocation9 + $0x774] sm:$0xf0] }
 0x8e0   : > { %v6896_v13 = vadd.f32 %v6895_v7, %v14038_v37  ;;  %v7082_v50 = vpop.f32.mrf.mxu2  ;;  %v14201_v19 = vpop.f32.mrf.mxu0  ;;  %v10043_v37 = vld [vmem:[#allocation9 + $0x768] sm:$0xf] }
 0x8e1   : > { %15774 = vst [vmem:[#allocation18_spill] sm:$0xff] %v14195_v1  ;;  %v14198_v11 = vadd.f32 %v7082_v50, %v7014_v61  ;;  %v10044_v7 = vor.u32 %v10587_v30, %v10043_v37  ;;  %v15777_v50 = vld [vmem:[#allocation138_spill] sm:$0xff]  ;;  %v9915_v1 = vld [vmem:[#allocation9 + $0x668] sm:$0xf] }
 0x8e2   : > { %7150 = vmatmul.bf16.gmra.mxu1 %v15765_v2  ;;  %v10619_v2 = vld [vmem:[#allocation9 + $0x874] sm:$0xf0] }
 0x8e3   : > { %7219 = vmatmul.bf16.gmra.mxu3 %v15775_v20 }
 0x8e4   : > { %7456 = vmatpush.bf16.msrb.mxu3 %v10044_v7  ;;  %v10171_v7 = vld [vmem:[#allocation9 + $0x868] sm:$0xf] }
 0x8e6   : > { %v6964_v32 = vpop.f32.mrf.mxu3 }
 0x8e7   : > { %v14205_v31 = vadd.f32 %v6964_v32, %v6896_v13  ;;  %v6897_v4 = vpop.f32.mrf.mxu1  ;;  %v10361_v13 = vld [vmem:[#allocation9 + $0x6c] sm:$0xf] }
 0x8e8   : > { %v6898_v12 = vadd.f32 %v6897_v4, %v14046_v5  ;;  %v7084_v35 = vpop.f32.mrf.mxu2  ;;  %v14210_v61 = vpop.f32.mrf.mxu0  ;;  %v7019_v5 = vadd.f32 %v14170_v60, %v14050_v51 }
 0x8e9   : > { %15776 = vst [vmem:[#allocation95_spill] sm:$0xff] %v14205_v31  ;;  %v14208_v55 = vadd.f32 %v7084_v35, %v7016_v41  ;;  %v9916_v31 = vor.u32 %v10555_v57, %v9915_v1  ;;  %v9152_v35 = vor.u32 %v10361_v13, %v9149_v8  ;;  %v10172_v57 = vor.u32 %v10619_v2, %v10171_v7 }
 0x8ea   : > { %v7021_v8 = vadd.f32 %v14181_v24, %v14050_v51 }
 0x8eb   : > { %7283 = vmatmul.bf16.gmra.mxu0 %v15698_v29  ;;  %7387 = vmatpush.bf16.msrb.mxu1 %v9916_v31 }
 0x8ec   : > { %7594 = vmatpush.bf16.msrb.mxu2 %v9152_v35  ;;  %7525 = vmatpush.bf16.msrb.mxu0 %v10172_v57 }
 0x8ed   : > { %7342 = vmatmul.bf16.gmra.mxu2 %v15777_v50 }
 0x8ee   : > { %v6966_v32 = vpop.f32.mrf.mxu3 }
 0x8ef   : > { %v14216_v41 = vadd.f32 %v6966_v32, %v6898_v12  ;;  %v7116_v4 = vpop.f32.mrf.mxu1 }
 0x8f0   : > { %v7087_v40 = vpop.f32.mrf.mxu2  ;;  %v7117_v37 = vadd.f32 %v7116_v4, %v14059_v52  ;;  %v14222_v1 = vpop.f32.mrf.mxu0  ;;  %v7024_v4 = vadd.f32 %v7023_v44, %v14050_v51 }
 0x8f1   : > { %15778 = vst [vmem:[#allocation98_spill] sm:$0xff] %v14216_v41  ;;  %v14219_v30 = vadd.f32 %v7087_v40, %v7019_v5  ;;  %v15780_v5 = vld [vmem:[#allocation139_spill] sm:$0xff]  ;;  %v9899_v41 = vld [vmem:[#allocation9 + $0x648] sm:$0xf] }
 0x8f2   : > { %7155 = vmatmul.bf16.gmra.mxu1 %v15769_v14  ;;  %v10551_v14 = vld [vmem:[#allocation9 + $0x654] sm:$0xf0] }
 0x8f3   : > { %7224 = vmatmul.bf16.gmra.mxu3 %v15779_v56  ;;  %v9900_v44 = vor.u32 %v10551_v14, %v9899_v41  ;;  %v10547_v41 = vld [vmem:[#allocation9 + $0x634] sm:$0xf0] }
 0x8f5   : > { %7388 = vmatpush.bf16.msrb.mxu1 %v9900_v44  ;;  %v10011_v44 = vld [vmem:[#allocation9 + $0x728] sm:$0xf] }
 0x8f6   : > { %v7185_v60 = vpop.f32.mrf.mxu3 }
 0x8f7   : > { %v7186_v12 = vadd.f32 %v7185_v60, %v7117_v37  ;;  %v7118_v52 = vpop.f32.mrf.mxu1  ;;  %v10027_v60 = vld [vmem:[#allocation9 + $0x748] sm:$0xf] }
 0x8f8   : > { %v7089_v31 = vpop.f32.mrf.mxu2  ;;  %v7119_v40 = vadd.f32 %v7118_v52, %v14070_v62  ;;  %v14230_v32 = vpop.f32.mrf.mxu0  ;;  %v10583_v62 = vld [vmem:[#allocation9 + $0x754] sm:$0xf0] }
 0x8f9   : > { %v14228_v13 = vadd.f32 %v7089_v31, %v7021_v8  ;;  %v10028_v52 = vor.u32 %v10583_v62, %v10027_v60  ;;  %v15781_v31 = vld [vmem:[#allocation59_spill] sm:$0xff] }
 0x8fb   : > { %7288 = vmatmul.bf16.gmra.mxu0 %v15702_v16  ;;  %7457 = vmatpush.bf16.msrb.mxu3 %v10028_v52 }
 0x8fd   : > { %7347 = vmatmul.bf16.gmra.mxu2 %v15780_v5 }
 0x8fe   : > { %v7187_v2 = vpop.f32.mrf.mxu3 }
 0x8ff   : > { %v7188_v35 = vadd.f32 %v7187_v2, %v7119_v40  ;;  %v7121_v7 = vpop.f32.mrf.mxu1  ;;  %v9133_v40 = vld [vmem:[#allocation9 + $0x58] sm:$0xf0] }
 0x900   : > { %v7092_v57 = vpop.f32.mrf.mxu2  ;;  %v7122_v24 = vadd.f32 %v7121_v7, %v14078_v49  ;;  %v14239_v8 = vpop.f32.mrf.mxu0  ;;  %v9136_v2 = vor.u32 %v10357_v38, %v9133_v40  ;;  %v7026_v49 = vadd.f32 %v14201_v19, %v14050_v51  ;;  %v9883_v38 = vld [vmem:[#allocation9 + $0x628] sm:$0xf]  ;;  %v10579_v19 = vld [vmem:[#allocation9 + $0x734] sm:$0xf0] }
 0x901   : > { %v14236_v37 = vadd.f32 %v7092_v57, %v7024_v4  ;;  %v9884_v40 = vor.u32 %v10547_v41, %v9883_v38  ;;  %v10575_v41 = vld [vmem:[#allocation9 + $0x714] sm:$0xf0] }
 0x902   : > { %7160 = vmatmul.bf16.gmra.mxu1 %v15773_v28  ;;  %7595 = vmatpush.bf16.msrb.mxu2 %v9136_v2  ;;  %v10155_v28 = vld [vmem:[#allocation9 + $0x848] sm:$0xf] }
 0x903   : > { %7229 = vmatmul.bf16.gmra.mxu3 %v15781_v31  ;;  %v10156_v52 = vor.u32 %v10615_v45, %v10155_v28  ;;  %7389 = vmatpush.bf16.msrb.mxu1 %v9884_v40 }
 0x905   : > { %7526 = vmatpush.bf16.msrb.mxu0 %v10156_v52 }
 0x906   : > { %v7190_v25 = vpop.f32.mrf.mxu3 }
 0x907   : > { %v7191_v4 = vadd.f32 %v7190_v25, %v7122_v24  ;;  %v7123_v7 = vpop.f32.mrf.mxu1  ;;  %v10012_v25 = vor.u32 %v10579_v19, %v10011_v44  ;;  %v7029_v24 = vadd.f32 %v14210_v61, %v14050_v51 }
 0x908   : > { %v7094_v57 = vpop.f32.mrf.mxu2  ;;  %v7124_v60 = vadd.f32 %v7123_v7, %v14088_v9  ;;  %v7254_v3 = vpop.f32.mrf.mxu0  ;;  %v10543_v7 = vld [vmem:[#allocation9 + $0x614] sm:$0xf0] }
 0x909   : > { %v14245_v62 = vadd.f32 %v7094_v57, %v7026_v49  ;;  %v14247_v14 = vadd.f32 %v7254_v3, %v7186_v12  ;;  %7458 = vmatpush.bf16.msrb.mxu3 %v10012_v25  ;;  %v9867_v49 = vld [vmem:[#allocation9 + $0x608] sm:$0xf] }
 0x90a   : > { %v9995_v57 = vld [vmem:[#allocation9 + $0x708] sm:$0xf]  ;;  %v9868_v38 = vor.u32 %v10543_v7, %v9867_v49  ;;  %v9117_v49 = vld [vmem:[#allocation9 + $0x38] sm:$0xf0] }
 0x90b   : > { %7293 = vmatmul.bf16.gmra.mxu0 %v15705_v22  ;;  %v9996_v61 = vor.u32 %v10575_v41, %v9995_v57 }
 0x90c   : > { %7390 = vmatpush.bf16.msrb.mxu1 %v9868_v38 }
 0x90d   : > { %7352 = vmatmul.bf16.gmra.mxu2 %v13052_v33  ;;  %7459 = vmatpush.bf16.msrb.mxu3 %v9996_v61  ;;  %v10611_v61 = vld [vmem:[#allocation9 + $0x834] sm:$0xf0] }
 0x90e   : > { %v7192_v9 = vpop.f32.mrf.mxu3 }
 0x90f   : > { %v7193_v2 = vadd.f32 %v7192_v9, %v7124_v60  ;;  %v7126_v45 = vpop.f32.mrf.mxu1 }
 0x910   : > { %v7097_v3 = vpop.f32.mrf.mxu2  ;;  %v7127_v28 = vadd.f32 %v7126_v45, %v14099_v54  ;;  %v7256_v52 = vpop.f32.mrf.mxu0  ;;  %v7031_v54 = vadd.f32 %v14222_v1, %v14050_v51  ;;  %v7034_v1 = vadd.f32 %v14230_v32, %v14050_v51  ;;  %v7036_v32 = vadd.f32 %v14239_v8, %v14050_v51 }
 0x911   : > { %v14254_v12 = vadd.f32 %v7097_v3, %v7029_v24  ;;  %v14258_v44 = vadd.f32 %v7256_v52, %v7188_v35  ;;  %v10353_v35 = vld [vmem:[#allocation9 + $0x2c] sm:$0xf] }
 0x912   : > { %7165 = vmatmul.bf16.gmra.mxu1 %v15777_v50  ;;  %v9120_v57 = vor.u32 %v10353_v35, %v9117_v49 }
 0x913   : > { %7234 = vmatmul.bf16.gmra.mxu3 %v15704_v43 }
 0x914   : > { %7596 = vmatpush.bf16.msrb.mxu2 %v9120_v57 }
 0x916   : > { %v7195_v60 = vpop.f32.mrf.mxu3 }
 0x917   : > { %v7196_v40 = vadd.f32 %v7195_v60, %v7127_v28  ;;  %v7128_v19 = vpop.f32.mrf.mxu1 }
 0x918   : > { %v7099_v25 = vpop.f32.mrf.mxu2  ;;  %v7129_v9 = vadd.f32 %v7128_v19, %v14108_v15  ;;  %v7259_v45 = vpop.f32.mrf.mxu0 }
 0x919   : > { %v14263_v24 = vadd.f32 %v7099_v25, %v7031_v54  ;;  %v14265_v3 = vadd.f32 %v7259_v45, %v7191_v4  ;;  %v10139_v4 = vld [vmem:[#allocation9 + $0x828] sm:$0xf] }
 0x91a   : > { %v10140_v54 = vor.u32 %v10611_v61, %v10139_v4 }
 0x91b   : > { %7298 = vmatmul.bf16.gmra.mxu0 %v15707_v39 }
 0x91c   : > { %7527 = vmatpush.bf16.msrb.mxu0 %v10140_v54  ;;  %v9101_v54 = vld [vmem:[#allocation9 + $0x18] sm:$0xf0] }
 0x91d   : > { %7357 = vmatmul.bf16.gmra.mxu2 %v13098_v58 }
 0x91e   : > { %v7197_v7 = vpop.f32.mrf.mxu3 }
 0x91f   : > { %v7198_v28 = vadd.f32 %v7197_v7, %v7129_v9  ;;  %v7131_v52 = vpop.f32.mrf.mxu1 }
 0x920   : > { %v7102_v38 = vpop.f32.mrf.mxu2  ;;  %v7132_v15 = vadd.f32 %v7131_v52, %v14118_v42  ;;  %v7261_v60 = vpop.f32.mrf.mxu0  ;;  %v10607_v52 = vld [vmem:[#allocation9 + $0x814] sm:$0xf0] }
 0x921   : > { %v14272_v41 = vadd.f32 %v7102_v38, %v7034_v1  ;;  %v7262_v19 = vadd.f32 %v7261_v60, %v7193_v2  ;;  %v10123_v1 = vld [vmem:[#allocation9 + $0x808] sm:$0xf]  ;;  %v10349_v60 = vld [vmem:[#allocation9 + $0xc] sm:$0xf] }
 0x922   : > { %7170 = vmatmul.bf16.gmra.mxu1 %v15780_v5  ;;  %v10124_v38 = vor.u32 %v10607_v52, %v10123_v1  ;;  %v15832_v5 = vld [vmem:[#allocation104_spill] sm:$0xff] }
 0x923   : > { %7239 = vmatmul.bf16.gmra.mxu3 %v15706_v53 }
 0x924   : > { %7528 = vmatpush.bf16.msrb.mxu0 %v10124_v38 }
 0x926   : > { %v7200_v25 = vpop.f32.mrf.mxu3 }
 0x927   : > { %v7201_v9 = vadd.f32 %v7200_v25, %v7132_v15  ;;  %v7133_v45 = vpop.f32.mrf.mxu1  ;;  %v9104_v25 = vor.u32 %v10349_v60, %v9101_v54 }
 0x928   : > { %v7104_v42 = vpop.f32.mrf.mxu2  ;;  %v7134_v35 = vadd.f32 %v7133_v45, %v14129_v21  ;;  %v7264_v7 = vpop.f32.mrf.mxu0 }
 0x929   : > { %v14279_v49 = vadd.f32 %v7104_v42, %v7036_v32  ;;  %v14281_v57 = vadd.f32 %v7264_v7, %v7196_v40  ;;  %7597 = vmatpush.bf16.msrb.mxu2 %v9104_v25 }
 0x92b   : > { %7303 = vmatmul.bf16.gmra.mxu0 %v15614_v47 }
 0x92d   : > { %7362 = vmatmul.bf16.gmra.mxu2 %v13147_v36 }
 0x92e   : > { %v7202_v2 = vpop.f32.mrf.mxu3 }
 0x92f   : > { %v7203_v51 = vadd.f32 %v7202_v2, %v7134_v35  ;;  %v7136_v8 = vpop.f32.mrf.mxu1 }
 0x930   : > { %v7137_v15 = vadd.f32 %v7136_v8, %v14138_v10  ;;  %v7323_v4 = vpop.f32.mrf.mxu2  ;;  %v7266_v40 = vpop.f32.mrf.mxu0 }
 0x931   : > { %v14287_v21 = vadd.f32 %v7323_v4, %v14247_v14  ;;  %v14291_v61 = vadd.f32 %v7266_v40, %v7198_v28 }
 0x932   : > { %7391 = vmatmul.bf16.vlgmr.msrb.gmra.mxu1 %v15771_v27 }
 0x933   : > { %7460 = vmatmul.bf16.vlgmr.msrb.gmra.mxu3 %v15698_v29 }
 0x936   : > { %v7205_v32 = vpop.f32.mrf.mxu3 }
 0x937   : > { %v7206_v45 = vadd.f32 %v7205_v32, %v7137_v15  ;;  %v7138_v42 = vpop.f32.mrf.mxu1  ;;  %v9469_v32 = vld [vmem:[#allocation9 + $0x2f8] sm:$0xf0] }
 0x938   : > { %v7139_v10 = vadd.f32 %v7138_v42, %v14148_v18  ;;  %v7325_v35 = vpop.f32.mrf.mxu2  ;;  %v7269_v7 = vpop.f32.mrf.mxu0 }
 0x939   : > { %v14295_v14 = vadd.f32 %v7325_v35, %v14258_v44  ;;  %v14297_v1 = vadd.f32 %v7269_v7, %v7201_v9  ;;  %v9341_v35 = vld [vmem:[#allocation9 + $0x1f8] sm:$0xf0]  ;;  %v10505_v7 = vld [vmem:[#allocation9 + $0x4ec] sm:$0xf] }
 0x93b   : > { %7308 = vmatmul.bf16.gmra.mxu0 %v15617_v46 }
 0x93d   : > { %7367 = vmatmul.bf16.gmra.mxu2 %v13203_v6 }
 0x93e   : > { %v7207_v28 = vpop.f32.mrf.mxu3 }
 0x93f   : > { %v7208_v52 = vadd.f32 %v7207_v28, %v7139_v10  ;;  %v7141_v38 = vpop.f32.mrf.mxu1 }
 0x940   : > { %v7142_v2 = vadd.f32 %v7141_v38, %v14159_v34  ;;  %v7328_v8 = vpop.f32.mrf.mxu2  ;;  %v7271_v18 = vpop.f32.mrf.mxu0  ;;  %v10441_v34 = vld [vmem:[#allocation9 + $0x2ec] sm:$0xf] }
 0x941   : > { %v14303_v15 = vadd.f32 %v7328_v8, %v14265_v3  ;;  %v14307_v44 = vadd.f32 %v7271_v18, %v7203_v51  ;;  %v9472_v3 = vor.u32 %v10441_v34, %v9469_v32  ;;  %v10409_v51 = vld [vmem:[#allocation9 + $0x1ec] sm:$0xf] }
 0x942   : > { %7396 = vmatmul.bf16.gmra.mxu1 %v15775_v20  ;;  %v9344_v38 = vor.u32 %v10409_v51, %v9341_v35 }
 0x943   : > { %7465 = vmatmul.bf16.gmra.mxu3 %v15702_v16 }
 0x944   : > { %7728 = vmatpush.bf16.msra.mxu3 %v9472_v3  ;;  %7659 = vmatpush.bf16.msra.mxu1 %v9344_v38 }
 0x946   : > { %v7210_v9 = vpop.f32.mrf.mxu3 }
 0x947   : > { %v7211_v4 = vadd.f32 %v7210_v9, %v7142_v2  ;;  %v7143_v40 = vpop.f32.mrf.mxu1 }
 0x948   : > { %v7144_v60 = vadd.f32 %v7143_v40, %v14168_v63  ;;  %v7330_v54 = vpop.f32.mrf.mxu2  ;;  %v7274_v42 = vpop.f32.mrf.mxu0  ;;  %v9725_v63 = vld [vmem:[#allocation9 + $0x4f8] sm:$0xf0]  ;;  %v10473_v40 = vld [vmem:[#allocation9 + $0x3ec] sm:$0xf] }
 0x949   : > { %v14310_v25 = vadd.f32 %v7330_v54, %v7262_v19  ;;  %v14312_v10 = vadd.f32 %v7274_v42, %v7206_v45  ;;  %v9728_v8 = vor.u32 %v10505_v7, %v9725_v63  ;;  %v9597_v54 = vld [vmem:[#allocation9 + $0x3f8] sm:$0xf0] }
 0x94a   : > { %v9600_v32 = vor.u32 %v10473_v40, %v9597_v54  ;;  %v10405_v54 = vld [vmem:[#allocation9 + $0x1cc] sm:$0xf] }
 0x94b   : > { %7529 = vmatmul.bf16.vlgmr.msrb.gmra.mxu0 %v13052_v33  ;;  %7866 = vmatpush.bf16.msra.mxu2 %v9728_v8  ;;  %v15824_v33 = vld [vmem:[#allocation57_spill] sm:$0xff] }
 0x94c   : > { %7797 = vmatpush.bf16.msra.mxu0 %v9600_v32  ;;  %v10501_v32 = vld [vmem:[#allocation9 + $0x4cc] sm:$0xf] }
 0x94d   : > { %7372 = vmatmul.bf16.gmra.mxu2 %v13261_v48 }
 0x94e   : > { %v7212_v28 = vpop.f32.mrf.mxu3 }
 0x94f   : > { %v7213_v2 = vadd.f32 %v7212_v28, %v7144_v60  ;;  %v7146_v19 = vpop.f32.mrf.mxu1 }
 0x950   : > { %v7147_v18 = vadd.f32 %v7146_v19, %v14178_v0  ;;  %v7333_v9 = vpop.f32.mrf.mxu2  ;;  %v7276_v34 = vpop.f32.mrf.mxu0 }
 0x951   : > { %v14318_v45 = vadd.f32 %v7333_v9, %v14281_v57  ;;  %v14322_v42 = vadd.f32 %v7276_v34, %v7208_v52  ;;  %v9453_v9 = vld [vmem:[#allocation9 + $0x2d8] sm:$0xf0] }
 0x952   : > { %7401 = vmatmul.bf16.gmra.mxu1 %v15779_v56  ;;  %v9325_v34 = vld [vmem:[#allocation9 + $0x1d8] sm:$0xf0] }
 0x953   : > { %7470 = vmatmul.bf16.gmra.mxu3 %v15705_v22  ;;  %v10597_v22 = vld [vmem:[#allocation9 + $0x7cc] sm:$0xf] }
 0x956   : > { %v7215_v60 = vpop.f32.mrf.mxu3 }
 0x957   : > { %v7216_v3 = vadd.f32 %v7215_v60, %v7147_v18  ;;  %v7148_v0 = vpop.f32.mrf.mxu1  ;;  %v9328_v60 = vor.u32 %v10405_v54, %v9325_v34 }
 0x958   : > { %v7149_v51 = vadd.f32 %v7148_v0, %v14189_v26  ;;  %v7335_v35 = vpop.f32.mrf.mxu2  ;;  %v7279_v7 = vpop.f32.mrf.mxu0  ;;  %v10437_v26 = vld [vmem:[#allocation9 + $0x2cc] sm:$0xf] }
 0x959   : > { %v14326_v57 = vadd.f32 %v7335_v35, %v14291_v61  ;;  %v14328_v28 = vadd.f32 %v7279_v7, %v7211_v4  ;;  %v9456_v4 = vor.u32 %v10437_v26, %v9453_v9  ;;  %7660 = vmatpush.bf16.msra.mxu1 %v9328_v60 }
 0x95b   : > { %7534 = vmatmul.bf16.gmra.mxu0 %v13098_v58  ;;  %7729 = vmatpush.bf16.msra.mxu3 %v9456_v4  ;;  %v10601_v58 = vld [vmem:[#allocation9 + $0x7ec] sm:$0xf] }
 0x95d   : > { %7377 = vmatmul.bf16.gmra.mxu2 %v13312_v59 }
 0x95e   : > { %v7217_v38 = vpop.f32.mrf.mxu3 }
 0x95f   : > { %v7218_v52 = vadd.f32 %v7217_v38, %v7149_v51  ;;  %v7151_v63 = vpop.f32.mrf.mxu1 }
 0x960   : > { %v7152_v19 = vadd.f32 %v7151_v63, %v14198_v11  ;;  %v7338_v8 = vpop.f32.mrf.mxu2  ;;  %v7281_v61 = vpop.f32.mrf.mxu0  ;;  %v9709_v11 = vld [vmem:[#allocation9 + $0x4d8] sm:$0xf0] }
 0x961   : > { %v14334_v18 = vadd.f32 %v7338_v8, %v14297_v1  ;;  %v14338_v40 = vadd.f32 %v7281_v61, %v7213_v2  ;;  %v9712_v0 = vor.u32 %v10501_v32, %v9709_v11  ;;  %v10469_v2 = vld [vmem:[#allocation9 + $0x3cc] sm:$0xf]  ;;  %v9581_v8 = vld [vmem:[#allocation9 + $0x3d8] sm:$0xf0] }
 0x962   : > { %7406 = vmatmul.bf16.gmra.mxu1 %v15781_v31  ;;  %v9584_v9 = vor.u32 %v10469_v2, %v9581_v8  ;;  %v9309_v8 = vld [vmem:[#allocation9 + $0x1b8] sm:$0xf0] }
 0x963   : > { %7475 = vmatmul.bf16.gmra.mxu3 %v15707_v39  ;;  %7867 = vmatpush.bf16.msra.mxu2 %v9712_v0  ;;  %v15826_v39 = vld [vmem:[#allocation137_spill] sm:$0xff] }
 0x964   : > { %7798 = vmatpush.bf16.msra.mxu0 %v9584_v9 }
 0x966   : > { %v7220_v51 = vpop.f32.mrf.mxu3 }
 0x967   : > { %v7221_v1 = vadd.f32 %v7220_v51, %v7152_v19  ;;  %v7153_v35 = vpop.f32.mrf.mxu1 }
 0x968   : > { %v7154_v7 = vadd.f32 %v7153_v35, %v14208_v55  ;;  %v7340_v38 = vpop.f32.mrf.mxu2  ;;  %v7284_v26 = vpop.f32.mrf.mxu0 }
 0x969   : > { %v14342_v63 = vadd.f32 %v7340_v38, %v14307_v44  ;;  %v14344_v61 = vadd.f32 %v7284_v26, %v7216_v3  ;;  %v10497_v26 = vld [vmem:[#allocation9 + $0x4ac] sm:$0xf] }
 0x96b   : > { %7539 = vmatmul.bf16.gmra.mxu0 %v13147_v36 }
 0x96d   : > { %7598 = vmatmul.bf16.vlgmr.msrb.gmra.mxu2 %v15628_v23 }
 0x96e   : > { %v7222_v19 = vpop.f32.mrf.mxu3 }
 0x96f   : > { %v7223_v4 = vadd.f32 %v7222_v19, %v7154_v7  ;;  %v7156_v54 = vpop.f32.mrf.mxu1  ;;  %v9437_v7 = vld [vmem:[#allocation9 + $0x2b8] sm:$0xf0] }
 0x970   : > { %v7157_v55 = vadd.f32 %v7156_v54, %v14219_v30  ;;  %v7343_v34 = vpop.f32.mrf.mxu2  ;;  %v7286_v32 = vpop.f32.mrf.mxu0  ;;  %v10433_v30 = vld [vmem:[#allocation9 + $0x2ac] sm:$0xf]  ;;  %v9693_v19 = vld [vmem:[#allocation9 + $0x4b8] sm:$0xf0] }
 0x971   : > { %v14350_v44 = vadd.f32 %v7343_v34, %v14312_v10  ;;  %v14354_v3 = vadd.f32 %v7286_v32, %v7218_v52  ;;  %v9440_v38 = vor.u32 %v10433_v30, %v9437_v7  ;;  %v10401_v52 = vld [vmem:[#allocation9 + $0x1ac] sm:$0xf] }
 0x972   : > { %7411 = vmatmul.bf16.gmra.mxu1 %v15704_v43 }
 0x973   : > { %7480 = vmatmul.bf16.gmra.mxu3 %v15614_v47 }
 0x974   : > { %7730 = vmatpush.bf16.msra.mxu3 %v9440_v38 }
 0x976   : > { %v7225_v60 = vpop.f32.mrf.mxu3 }
 0x977   : > { %v7226_v23 = vadd.f32 %v7225_v60, %v7157_v55  ;;  %v7158_v11 = vpop.f32.mrf.mxu1  ;;  %v9696_v55 = vor.u32 %v10497_v26, %v9693_v19  ;;  %v9565_v60 = vld [vmem:[#allocation9 + $0x3b8] sm:$0xf0]  ;;  %v15782_v26 = vld [vmem:[#allocation19_spill] sm:$0xff] }
 0x978   : > { %v7159_v0 = vadd.f32 %v7158_v11, %v14228_v13  ;;  %v7345_v51 = vpop.f32.mrf.mxu2  ;;  %v7289_v10 = vpop.f32.mrf.mxu0  ;;  %v9312_v13 = vor.u32 %v10401_v52, %v9309_v8 }
 0x979   : > { %v14358_v35 = vadd.f32 %v7345_v51, %v14322_v42  ;;  %v14360_v2 = vadd.f32 %v7289_v10, %v7221_v1  ;;  %7868 = vmatpush.bf16.msra.mxu2 %v9696_v55 }
 0x97a   : > { %7661 = vmatpush.bf16.msra.mxu1 %v9312_v13 }
 0x97b   : > { %7544 = vmatmul.bf16.gmra.mxu0 %v13203_v6 }
 0x97d   : > { %7603 = vmatmul.bf16.gmra.mxu2 %v15711_v17  ;;  %v10465_v17 = vld [vmem:[#allocation9 + $0x3ac] sm:$0xf] }
 0x97e   : > { %v7227_v9 = vpop.f32.mrf.mxu3  ;;  %v9568_v51 = vor.u32 %v10465_v17, %v9565_v60  ;;  %v15784_v17 = vld [vmem:[#allocation74_spill] sm:$0xff] }
 0x97f   : > { %v7228_v54 = vadd.f32 %v7227_v9, %v7159_v0  ;;  %v7161_v42 = vpop.f32.mrf.mxu1 }
 0x980   : > { %v7162_v34 = vadd.f32 %v7161_v42, %v14236_v37  ;;  %v7348_v32 = vpop.f32.mrf.mxu2  ;;  %v7291_v11 = vpop.f32.mrf.mxu0  ;;  %7799 = vmatpush.bf16.msra.mxu0 %v9568_v51  ;;  %v9293_v51 = vld [vmem:[#allocation9 + $0x198] sm:$0xf0] }
 0x981   : > { %v14366_v1 = vadd.f32 %v7348_v32, %v14328_v28  ;;  %v14370_v30 = vadd.f32 %v7291_v11, %v7223_v4  ;;  %v10397_v11 = vld [vmem:[#allocation9 + $0x18c] sm:$0xf] }
 0x982   : > { %7416 = vmatmul.bf16.gmra.mxu1 %v15706_v53 }
 0x983   : > { %7485 = vmatmul.bf16.gmra.mxu3 %v15617_v46 }
 0x986   : > { %v7230_v0 = vpop.f32.mrf.mxu3 }
 0x987   : > { %v7231_v7 = vadd.f32 %v7230_v0, %v7162_v34  ;;  %v7163_v37 = vpop.f32.mrf.mxu1  ;;  %v9421_v34 = vld [vmem:[#allocation9 + $0x298] sm:$0xf0]  ;;  %v10493_v0 = vld [vmem:[#allocation9 + $0x48c] sm:$0xf] }
 0x988   : > { %v7164_v10 = vadd.f32 %v7163_v37, %v14245_v62  ;;  %v7350_v38 = vpop.f32.mrf.mxu2  ;;  %v7294_v52 = vpop.f32.mrf.mxu0  ;;  %v10429_v62 = vld [vmem:[#allocation9 + $0x28c] sm:$0xf]  ;;  %v9296_v37 = vor.u32 %v10397_v11, %v9293_v51 }
 0x989   : > { %v14374_v28 = vadd.f32 %v7350_v38, %v14338_v40  ;;  %v14376_v8 = vadd.f32 %v7294_v52, %v7226_v23  ;;  %v15783_v40 = vld [vmem:[#allocation40_spill] sm:$0xff]  ;;  %v9424_v23 = vor.u32 %v10429_v62, %v9421_v34 }
 0x98a   : > { %7662 = vmatpush.bf16.msra.mxu1 %v9296_v37  ;;  %v15786_v37 = vld [vmem:[#allocation39_spill] sm:$0xff] }
 0x98b   : > { %7549 = vmatmul.bf16.gmra.mxu0 %v13261_v48  ;;  %7731 = vmatpush.bf16.msra.mxu3 %v9424_v23  ;;  %v15785_v23 = vld [vmem:[#allocation122_spill] sm:$0xff] }
 0x98d   : > { %7608 = vmatmul.bf16.gmra.mxu2 %v15782_v26 }
 0x98e   : > { %v7232_v9 = vpop.f32.mrf.mxu3 }
 0x98f   : > { %v7233_v4 = vadd.f32 %v7232_v9, %v7164_v10  ;;  %v7166_v13 = vpop.f32.mrf.mxu1 }
 0x990   : > { %v7167_v19 = vadd.f32 %v7166_v13, %v14254_v12  ;;  %v7353_v42 = vpop.f32.mrf.mxu2  ;;  %v7296_v32 = vpop.f32.mrf.mxu0  ;;  %v9677_v12 = vld [vmem:[#allocation9 + $0x498] sm:$0xf0] }
 0x991   : > { %v14382_v55 = vadd.f32 %v7353_v42, %v14344_v61  ;;  %v14386_v60 = vadd.f32 %v7296_v32, %v7228_v54  ;;  %v9680_v10 = vor.u32 %v10493_v0, %v9677_v12  ;;  %v10461_v54 = vld [vmem:[#allocation9 + $0x38c] sm:$0xf]  ;;  %v9549_v42 = vld [vmem:[#allocation9 + $0x398] sm:$0xf0] }
 0x992   : > { %7421 = vmatmul.bf16.gmra.mxu1 %v15783_v40  ;;  %v9552_v34 = vor.u32 %v10461_v54, %v9549_v42 }
 0x993   : > { %7490 = vmatmul.bf16.gmra.mxu3 %v15784_v17  ;;  %7869 = vmatpush.bf16.msra.mxu2 %v9680_v10  ;;  %v15787_v10 = vld [vmem:[#allocation46_spill] sm:$0xff]  ;;  %v15797_v17 = vld [vmem:[#allocation132_spill] sm:$0xff] }
 0x994   : > { %7800 = vmatpush.bf16.msra.mxu0 %v9552_v34 }
 0x996   : > { %v7235_v38 = vpop.f32.mrf.mxu3 }
 0x997   : > { %v7236_v61 = vadd.f32 %v7235_v38, %v7167_v19  ;;  %v7168_v52 = vpop.f32.mrf.mxu1 }
 0x998   : > { %v7169_v26 = vadd.f32 %v7168_v52, %v14263_v24  ;;  %v7355_v9 = vpop.f32.mrf.mxu2  ;;  %v7299_v62 = vpop.f32.mrf.mxu0 }
 0x999   : > { %v14390_v13 = vadd.f32 %v7355_v9, %v14354_v3  ;;  %v14392_v32 = vadd.f32 %v7299_v62, %v7231_v7  ;;  %v9405_v62 = vld [vmem:[#allocation9 + $0x278] sm:$0xf0] }
 0x99b   : > { %7554 = vmatmul.bf16.gmra.mxu0 %v13312_v59  ;;  %v9645_v59 = vld [vmem:[#allocation9 + $0x458] sm:$0xf0] }
 0x99d   : > { %7613 = vmatmul.bf16.gmra.mxu2 %v15785_v23 }
 0x99e   : > { %v7237_v19 = vpop.f32.mrf.mxu3 }
 0x99f   : > { %v7238_v11 = vadd.f32 %v7237_v19, %v7169_v26  ;;  %v7171_v51 = vpop.f32.mrf.mxu1  ;;  %v15788_v19 = vld [vmem:[#allocation23_spill] sm:$0xff] }
 0x9a0   : > { %v7172_v24 = vadd.f32 %v7171_v51, %v14272_v41  ;;  %v7358_v0 = vpop.f32.mrf.mxu2  ;;  %v7301_v12 = vpop.f32.mrf.mxu0  ;;  %v10425_v41 = vld [vmem:[#allocation9 + $0x26c] sm:$0xf] }
 0x9a1   : > { %v14398_v3 = vadd.f32 %v7358_v0, %v14360_v2  ;;  %v14402_v7 = vadd.f32 %v7301_v12, %v7233_v4  ;;  %v9408_v34 = vor.u32 %v10425_v41, %v9405_v62  ;;  %v15789_v4 = vld [vmem:[#allocation89_spill] sm:$0xff]  ;;  %v10393_v12 = vld [vmem:[#allocation9 + $0x16c] sm:$0xf] }
 0x9a2   : > { %7426 = vmatmul.bf16.gmra.mxu1 %v15786_v37  ;;  %v10457_v62 = vld [vmem:[#allocation9 + $0x36c] sm:$0xf] }
 0x9a3   : > { %7495 = vmatmul.bf16.gmra.mxu3 %v15787_v10  ;;  %v9661_v10 = vld [vmem:[#allocation9 + $0x478] sm:$0xf0] }
 0x9a4   : > { %7732 = vmatpush.bf16.msra.mxu3 %v9408_v34  ;;  %v15790_v34 = vld [vmem:[#allocation55_spill] sm:$0xff] }
 0x9a6   : > { %v7240_v38 = vpop.f32.mrf.mxu3 }
 0x9a7   : > { %v7241_v52 = vadd.f32 %v7240_v38, %v7172_v24  ;;  %v7173_v9 = vpop.f32.mrf.mxu1  ;;  %v10489_v38 = vld [vmem:[#allocation9 + $0x46c] sm:$0xf] }
 0x9a8   : > { %v7174_v54 = vadd.f32 %v7173_v9, %v14279_v49  ;;  %v7360_v26 = vpop.f32.mrf.mxu2  ;;  %v7304_v2 = vpop.f32.mrf.mxu0  ;;  %v9277_v49 = vld [vmem:[#allocation9 + $0x178] sm:$0xf0] }
 0x9a9   : > { %v14406_v42 = vadd.f32 %v7360_v26, %v14370_v30  ;;  %v14408_v23 = vadd.f32 %v7304_v2, %v7236_v61  ;;  %v9280_v26 = vor.u32 %v10393_v12, %v9277_v49  ;;  %v9664_v61 = vor.u32 %v10489_v38, %v9661_v10  ;;  %v9533_v2 = vld [vmem:[#allocation9 + $0x378] sm:$0xf0] }
 0x9ab   : > { %7559 = vmatmul.bf16.gmra.mxu0 %v15789_v4  ;;  %v9536_v4 = vor.u32 %v10457_v62, %v9533_v2  ;;  %7663 = vmatpush.bf16.msra.mxu1 %v9280_v26  ;;  %v15792_v62 = vld [vmem:[#allocation28_spill] sm:$0xff] }
 0x9ac   : > { %7870 = vmatpush.bf16.msra.mxu2 %v9664_v61  ;;  %v15793_v2 = vld [vmem:[#allocation52_spill] sm:$0xff] }
 0x9ad   : > { %7618 = vmatmul.bf16.gmra.mxu2 %v15788_v19  ;;  %7801 = vmatpush.bf16.msra.mxu0 %v9536_v4 }
 0x9ae   : > { %v7242_v51 = vpop.f32.mrf.mxu3 }
 0x9af   : > { %v7243_v24 = vadd.f32 %v7242_v51, %v7174_v54  ;;  %v7392_v0 = vpop.f32.mrf.mxu1  ;;  %v15791_v54 = vld [vmem:[#allocation83_spill] sm:$0xff] }
 0x9b0   : > { %v7363_v9 = vpop.f32.mrf.mxu2  ;;  %v7393_v30 = vadd.f32 %v7392_v0, %v14287_v21  ;;  %v7306_v19 = vpop.f32.mrf.mxu0 }
 0x9b1   : > { %v14414_v41 = vadd.f32 %v7363_v9, %v14376_v8  ;;  %v14418_v51 = vadd.f32 %v7306_v19, %v7238_v11 }
 0x9b2   : > { %7431 = vmatmul.bf16.gmra.mxu1 %v15790_v34 }
 0x9b3   : > { %7500 = vmatmul.bf16.gmra.mxu3 %v15791_v54  ;;  %v9261_v54 = vld [vmem:[#allocation9 + $0x158] sm:$0xf0] }
 0x9b6   : > { %v7461_v21 = vpop.f32.mrf.mxu3 }
 0x9b7   : > { %v7462_v0 = vadd.f32 %v7461_v21, %v7393_v30  ;;  %v7394_v12 = vpop.f32.mrf.mxu1  ;;  %v9389_v21 = vld [vmem:[#allocation9 + $0x258] sm:$0xf0] }
 0x9b8   : > { %v7365_v49 = vpop.f32.mrf.mxu2  ;;  %v7395_v8 = vadd.f32 %v7394_v12, %v14295_v14  ;;  %v7309_v38 = vpop.f32.mrf.mxu0  ;;  %v10421_v14 = vld [vmem:[#allocation9 + $0x24c] sm:$0xf] }
 0x9b9   : > { %v14422_v10 = vadd.f32 %v7365_v49, %v14386_v60  ;;  %v14424_v9 = vadd.f32 %v7309_v38, %v7241_v52  ;;  %v15794_v60 = vld [vmem:[#allocation80_spill] sm:$0xff]  ;;  %v9392_v52 = vor.u32 %v10421_v14, %v9389_v21  ;;  %v15795_v49 = vld [vmem:[#allocation86_spill] sm:$0xff] }
 0x9ba   : > { %v10453_v21 = vld [vmem:[#allocation9 + $0x34c] sm:$0xf] }
 0x9bb   : > { %7564 = vmatmul.bf16.gmra.mxu0 %v15793_v2  ;;  %7733 = vmatpush.bf16.msra.mxu3 %v9392_v52  ;;  %v10389_v2 = vld [vmem:[#allocation9 + $0x14c] sm:$0xf] }
 0x9bd   : > { %7623 = vmatmul.bf16.gmra.mxu2 %v15792_v62 }
 0x9be   : > { %v7463_v11 = vpop.f32.mrf.mxu3 }
 0x9bf   : > { %v7464_v26 = vadd.f32 %v7463_v11, %v7395_v8  ;;  %v7397_v61 = vpop.f32.mrf.mxu1 }
 0x9c0   : > { %v7368_v4 = vpop.f32.mrf.mxu2  ;;  %v7398_v30 = vadd.f32 %v7397_v61, %v14303_v15  ;;  %v7311_v12 = vpop.f32.mrf.mxu0  ;;  %v10485_v15 = vld [vmem:[#allocation9 + $0x44c] sm:$0xf] }
 0x9c1   : > { %v14430_v19 = vadd.f32 %v7368_v4, %v14392_v32  ;;  %v14434_v38 = vadd.f32 %v7311_v12, %v7243_v24  ;;  %v9264_v4 = vor.u32 %v10389_v2, %v9261_v54  ;;  %v9648_v14 = vor.u32 %v10485_v15, %v9645_v59  ;;  %v9245_v15 = vld [vmem:[#allocation9 + $0x138] sm:$0xf0] }
 0x9c2   : > { %7436 = vmatmul.bf16.gmra.mxu1 %v15794_v60 }
 0x9c3   : > { %7505 = vmatmul.bf16.gmra.mxu3 %v15795_v49  ;;  %v9517_v49 = vld [vmem:[#allocation9 + $0x358] sm:$0xf0]  ;;  %7664 = vmatpush.bf16.msra.mxu1 %v9264_v4 }
 0x9c4   : > { %v9520_v12 = vor.u32 %v10453_v21, %v9517_v49  ;;  %7871 = vmatpush.bf16.msra.mxu2 %v9648_v14  ;;  %v9373_v14 = vld [vmem:[#allocation9 + $0x238] sm:$0xf0] }
 0x9c6   : > { %v7466_v62 = vpop.f32.mrf.mxu3  ;;  %7802 = vmatpush.bf16.msra.mxu0 %v9520_v12  ;;  %v10381_v12 = vld [vmem:[#allocation9 + $0x10c] sm:$0xf] }
 0x9c7   : > { %v7467_v8 = vadd.f32 %v7466_v62, %v7398_v30  ;;  %v7399_v11 = vpop.f32.mrf.mxu1  ;;  %v15796_v30 = vld [vmem:[#allocation92_spill] sm:$0xff] }
 0x9c8   : > { %v7370_v61 = vpop.f32.mrf.mxu2  ;;  %v7400_v32 = vadd.f32 %v7399_v11, %v14310_v25  ;;  %v7530_v24 = vpop.f32.mrf.mxu0  ;;  %v8211_v62 = vmax.f32 %v15796_v30, 0.0  ;;  %v15798_v25 = vld [vmem:[#allocation91_spill] sm:$0xff]  ;;  %v10385_v11 = vld [vmem:[#allocation9 + $0x12c] sm:$0xf] }
 0x9c9   : > { %v14438_v60 = vadd.f32 %v7370_v61, %v14402_v7  ;;  %v7531_v52 = vadd.f32 %v7530_v24, %v7462_v0  ;;  %v10417_v61 = vld [vmem:[#allocation9 + $0x22c] sm:$0xf]  ;;  %v9248_v49 = vor.u32 %v10385_v11, %v9245_v15 }
 0x9ca   : > { %v9376_v24 = vor.u32 %v10417_v61, %v9373_v14  ;;  %v10413_v30 = vld [vmem:[#allocation9 + $0x20c] sm:$0xf] }
 0x9cb   : > { %v8213_v34 = vmax.f32 %v7531_v52, 0.0  ;;  %7569 = vmatmul.bf16.gmra.mxu0 %v15798_v25  ;;  %v9229_v52 = vld [vmem:[#allocation9 + $0x118] sm:$0xf0]  ;;  %7665 = vmatpush.bf16.msra.mxu1 %v9248_v49 }
 0x9cc   : > { %v15799_v25 = vld [vmem:[#allocation48_spill] sm:$0xff]  ;;  %v9232_v48 = vor.u32 %v10381_v12, %v9229_v52  ;;  %7734 = vmatpush.bf16.msra.mxu3 %v9376_v24  ;;  %v15802_v24 = vld [vmem:[#allocation51_spill] sm:$0xff] }
 0x9cd   : > { %7628 = vmatmul.bf16.gmra.mxu2 %v15797_v17  ;;  %v14443_v2 = vmax.f32 %v8211_v62, %v8213_v34  ;;  %v15800_v62 = vld [vmem:[#allocation76_spill] sm:$0xff]  ;;  %v8219_v12 = vmax.f32 %v15802_v24, 0.0  ;;  %v15807_v24 = vld [vmem:[#allocation54_spill] sm:$0xff] }
 0x9ce   : > { %v7468_v54 = vpop.f32.mrf.mxu3 }
 0x9cf   : > { %v7469_v7 = vadd.f32 %v7468_v54, %v7400_v32  ;;  %v7402_v59 = vpop.f32.mrf.mxu1  ;;  %v9357_v32 = vld [vmem:[#allocation9 + $0x218] sm:$0xf0]  ;;  %7666 = vmatpush.bf16.msra.mxu1 %v9232_v48 }
 0x9d0   : > { %v7373_v4 = vpop.f32.mrf.mxu2  ;;  %v7403_v0 = vadd.f32 %v7402_v59, %v14318_v45  ;;  %v7532_v34 = vpop.f32.mrf.mxu0  ;;  %v9360_v45 = vor.u32 %v10413_v30, %v9357_v32  ;;  %v15801_v59 = vld [vmem:[#allocation82_spill] sm:$0xff]  ;;  %v15803_v30 = vld [vmem:[#allocation133_spill] sm:$0xff] }
 0x9d1   : > { %v14447_v21 = vadd.f32 %v7373_v4, %v14408_v23  ;;  %v7533_v54 = vadd.f32 %v7532_v34, %v7464_v26  ;;  %v8215_v11 = vmax.f32 %v15801_v59, 0.0  ;;  %v15804_v34 = vld [vmem:[#allocation94_spill] sm:$0xff] }
 0x9d2   : > { %7441 = vmatmul.bf16.gmra.mxu1 %v15799_v25  ;;  %7735 = vmatpush.bf16.msra.mxu3 %v9360_v45  ;;  %v10481_v59 = vld [vmem:[#allocation9 + $0x42c] sm:$0xf] }
 0x9d3   : > { %7510 = vmatmul.bf16.gmra.mxu3 %v15800_v62  ;;  %v8217_v15 = vmax.f32 %v7533_v54, 0.0 }
 0x9d5   : > { %v14452_v4 = vmax.f32 %v8215_v11, %v8217_v15  ;;  %v10449_v11 = vld [vmem:[#allocation9 + $0x32c] sm:$0xf]  ;;  %v9501_v15 = vld [vmem:[#allocation9 + $0x338] sm:$0xf0] }
 0x9d6   : > { %v7471_v23 = vpop.f32.mrf.mxu3 }
 0x9d7   : > { %v7472_v61 = vadd.f32 %v7471_v23, %v7403_v0  ;;  %v7404_v14 = vpop.f32.mrf.mxu1  ;;  %v15805_v23 = vld [vmem:[#allocation85_spill] sm:$0xff] }
 0x9d8   : > { %v7375_v37 = vpop.f32.mrf.mxu2  ;;  %v7405_v25 = vadd.f32 %v7404_v14, %v14326_v57  ;;  %v7535_v26 = vpop.f32.mrf.mxu0  ;;  %v9629_v57 = vld [vmem:[#allocation9 + $0x438] sm:$0xf0] }
 0x9d9   : > { %v14456_v62 = vadd.f32 %v7375_v37, %v14418_v51  ;;  %v7536_v49 = vadd.f32 %v7535_v26, %v7467_v8  ;;  %v9632_v51 = vor.u32 %v10481_v59, %v9629_v57  ;;  %v9504_v26 = vor.u32 %v10449_v11, %v9501_v15  ;;  %v15808_v15 = vld [vmem:[#allocation97_spill] sm:$0xff] }
 0x9db   : > { %v8221_v52 = vmax.f32 %v7536_v49, 0.0  ;;  %7574 = vmatmul.bf16.gmra.mxu0 %v15804_v34  ;;  %7872 = vmatpush.bf16.msra.mxu2 %v9632_v51  ;;  %v15806_v49 = vld [vmem:[#allocation61_spill] sm:$0xff] }
 0x9dc   : > { %7803 = vmatpush.bf16.msra.mxu0 %v9504_v26  ;;  %v15810_v26 = vld [vmem:[#allocation96_spill] sm:$0xff] }
 0x9dd   : > { %7633 = vmatmul.bf16.gmra.mxu2 %v15803_v30  ;;  %v14461_v0 = vmax.f32 %v8219_v12, %v8221_v52  ;;  %v8223_v12 = vmax.f32 %v15807_v24, 0.0 }
 0x9de   : > { %v7473_v32 = vpop.f32.mrf.mxu3 }
 0x9df   : > { %v7474_v48 = vadd.f32 %v7473_v32, %v7405_v25  ;;  %v7407_v54 = vpop.f32.mrf.mxu1 }
 0x9e0   : > { %v7378_v45 = vpop.f32.mrf.mxu2  ;;  %v7408_v37 = vadd.f32 %v7407_v54, %v14334_v18  ;;  %v7537_v14 = vpop.f32.mrf.mxu0 }
 0x9e1   : > { %v14465_v8 = vadd.f32 %v7378_v45, %v14424_v9  ;;  %v7538_v25 = vadd.f32 %v7537_v14, %v7469_v7  ;;  %v15809_v14 = vld [vmem:[#allocation29_spill] sm:$0xff] }
 0x9e2   : > { %7446 = vmatmul.bf16.gmra.mxu1 %v15805_v23  ;;  %v10477_v23 = vld [vmem:[#allocation9 + $0x40c] sm:$0xf] }
 0x9e3   : > { %7515 = vmatmul.bf16.gmra.mxu3 %v15806_v49  ;;  %v8225_v52 = vmax.f32 %v7538_v25, 0.0  ;;  %v8227_v49 = vmax.f32 %v15808_v15, 0.0  ;;  %v15813_v15 = vld [vmem:[#allocation88_spill] sm:$0xff] }
 0x9e5   : > { %v14470_v18 = vmax.f32 %v8223_v12, %v8225_v52  ;;  %v10445_v52 = vld [vmem:[#allocation9 + $0x30c] sm:$0xf] }
 0x9e6   : > { %v7476_v32 = vpop.f32.mrf.mxu3 }
 0x9e7   : > { %v7477_v54 = vadd.f32 %v7476_v32, %v7408_v37  ;;  %v7409_v9 = vpop.f32.mrf.mxu1  ;;  %v9485_v32 = vld [vmem:[#allocation9 + $0x318] sm:$0xf0] }
 0x9e8   : > { %v7380_v59 = vpop.f32.mrf.mxu2  ;;  %v7410_v57 = vadd.f32 %v7409_v9, %v14342_v63  ;;  %v7540_v51 = vpop.f32.mrf.mxu0  ;;  %v9488_v9 = vor.u32 %v10445_v52, %v9485_v32 }
 0x9e9   : > { %v14474_v45 = vadd.f32 %v7380_v59, %v14434_v38  ;;  %v7541_v11 = vadd.f32 %v7540_v51, %v7472_v61  ;;  %v15811_v61 = vld [vmem:[#allocation101_spill] sm:$0xff]  ;;  %v15812_v51 = vld [vmem:[#allocation114_spill] sm:$0xff] }
 0x9ea   : > { %7804 = vmatpush.bf16.msra.mxu0 %v9488_v9 }
 0x9eb   : > { %v8229_v7 = vmax.f32 %v7541_v11, 0.0  ;;  %7579 = vmatmul.bf16.gmra.mxu0 %v15810_v26  ;;  %v8231_v26 = vmax.f32 %v15813_v15, 0.0  ;;  %v15815_v15 = vld [vmem:[#allocation135_spill] sm:$0xff] }
 0x9ed   : > { %7638 = vmatmul.bf16.gmra.mxu2 %v15809_v14  ;;  %v14479_v24 = vmax.f32 %v8227_v49, %v8229_v7 }
 0x9ee   : > { %v7478_v25 = vpop.f32.mrf.mxu3 }
 0x9ef   : > { %v7479_v37 = vadd.f32 %v7478_v25, %v7410_v57  ;;  %v7412_v12 = vpop.f32.mrf.mxu1 }
 0x9f0   : > { %v7413_v63 = vadd.f32 %v7412_v12, %v14350_v44  ;;  %v14482_v38 = vpop.f32.mrf.mxu2  ;;  %v7542_v59 = vpop.f32.mrf.mxu0  ;;  %v9613_v44 = vld [vmem:[#allocation9 + $0x418] sm:$0xf0] }
 0x9f1   : > { %v7543_v11 = vadd.f32 %v7542_v59, %v7474_v48  ;;  %v9616_v32 = vor.u32 %v10477_v23, %v9613_v44  ;;  %v15817_v23 = vld [vmem:[#allocation109_spill] sm:$0xff] }
 0x9f2   : > { %7667 = vmatmul.bf16.vlgmr.msra.gmra.mxu1 %v15811_v61 }
 0x9f3   : > { %7736 = vmatmul.bf16.vlgmr.msra.gmra.mxu3 %v15812_v51  ;;  %v8233_v49 = vmax.f32 %v7543_v11, 0.0  ;;  %7873 = vmatpush.bf16.msra.mxu2 %v9616_v32  ;;  %v15814_v51 = vld [vmem:[#allocation67_spill] sm:$0xff] }
 0x9f4   : > { %v8235_v48 = vmax.f32 %v15814_v51, 0.0  ;;  %v15816_v11 = vld [vmem:[#allocation99_spill] sm:$0xff] }
 0x9f5   : > { %v14487_v57 = vmax.f32 %v8231_v26, %v8233_v49 }
 0x9f6   : > { %v7481_v7 = vpop.f32.mrf.mxu3 }
 0x9f7   : > { %v7482_v25 = vadd.f32 %v7481_v7, %v7413_v63  ;;  %v7414_v34 = vpop.f32.mrf.mxu1 }
 0x9f8   : > { %v7415_v12 = vadd.f32 %v7414_v34, %v14358_v35  ;;  %v14490_v52 = vpop.f32.mrf.mxu2  ;;  %v7545_v61 = vpop.f32.mrf.mxu0 }
 0x9f9   : > { %v7546_v9 = vadd.f32 %v7545_v61, %v7477_v54  ;;  %v15818_v54 = vld [vmem:[#allocation120_spill] sm:$0xff]  ;;  %v15819_v61 = vld [vmem:[#allocation58_spill] sm:$0xff] }
 0x9fb   : > { %v8237_v59 = vmax.f32 %v7546_v9, 0.0  ;;  %7584 = vmatmul.bf16.gmra.mxu0 %v15816_v11  ;;  %v8239_v9 = vmax.f32 %v15819_v61, 0.0  ;;  %v15821_v61 = vld [vmem:[#allocation34_spill] sm:$0xff] }
 0x9fd   : > { %7643 = vmatmul.bf16.gmra.mxu2 %v15815_v15  ;;  %v14495_v63 = vmax.f32 %v8235_v48, %v8237_v59 }
 0x9fe   : > { %v7483_v26 = vpop.f32.mrf.mxu3 }
 0x9ff   : > { %v7484_v49 = vadd.f32 %v7483_v26, %v7415_v12  ;;  %v7417_v7 = vpop.f32.mrf.mxu1 }
 0xa00   : > { %v7418_v35 = vadd.f32 %v7417_v7, %v14366_v1  ;;  %v14498_v34 = vpop.f32.mrf.mxu2  ;;  %v7547_v44 = vpop.f32.mrf.mxu0  ;;  %v10569_v1 = vld [vmem:[#allocation9 + $0x6ec] sm:$0xf]  ;;  %v9981_v7 = vld [vmem:[#allocation9 + $0x6f8] sm:$0xf0] }
 0xa01   : > { %v7548_v32 = vadd.f32 %v7547_v44, %v7479_v37 }
 0xa02   : > { %7672 = vmatmul.bf16.gmra.mxu1 %v15817_v23  ;;  %v9984_v23 = vor.u32 %v10569_v1, %v9981_v7  ;;  %v15823_v1 = vld [vmem:[#allocation21_spill] sm:$0xff]  ;;  %v9853_v7 = vld [vmem:[#allocation9 + $0x5f8] sm:$0xf0] }
 0xa03   : > { %7741 = vmatmul.bf16.gmra.mxu3 %v15818_v54  ;;  %v8241_v51 = vmax.f32 %v7548_v32, 0.0  ;;  %v15820_v54 = vld [vmem:[#allocation100_spill] sm:$0xff] }
 0xa04   : > { %8004 = vmatpush.bf16.msrb.mxu3 %v9984_v23  ;;  %v8243_v37 = vmax.f32 %v15820_v54, 0.0  ;;  %v10237_v54 = vld [vmem:[#allocation9 + $0x8f8] sm:$0xf0] }
 0xa05   : > { %v14503_v11 = vmax.f32 %v8239_v9, %v8241_v51  ;;  %v15822_v51 = vld [vmem:[#allocation116_spill] sm:$0xff] }
 0xa06   : > { %v7486_v6 = vpop.f32.mrf.mxu3 }
 0xa07   : > { %v7487_v48 = vadd.f32 %v7486_v6, %v7418_v35  ;;  %v7419_v59 = vpop.f32.mrf.mxu1 }
 0xa08   : > { %v7420_v12 = vadd.f32 %v7419_v59, %v14374_v28  ;;  %v14506_v26 = vpop.f32.mrf.mxu2  ;;  %v7550_v40 = vpop.f32.mrf.mxu0 }
 0xa09   : > { %v7551_v36 = vadd.f32 %v7550_v40, %v7482_v25  ;;  %v10537_v25 = vld [vmem:[#allocation9 + $0x5ec] sm:$0xf] }
 0xa0a   : > { %v9856_v23 = vor.u32 %v10537_v25, %v9853_v7  ;;  %v15825_v25 = vld [vmem:[#allocation102_spill] sm:$0xff] }
 0xa0b   : > { %v8245_v44 = vmax.f32 %v7551_v36, 0.0  ;;  %7805 = vmatmul.bf16.vlgmr.msra.gmra.mxu0 %v15797_v17  ;;  %v10633_v36 = vld [vmem:[#allocation9 + $0x8ec] sm:$0xf]  ;;  %v10109_v17 = vld [vmem:[#allocation9 + $0x7f8] sm:$0xf0]  ;;  %v8251_v7 = vmax.f32 %v15825_v25, 0.0 }
 0xa0c   : > { %7935 = vmatpush.bf16.msrb.mxu1 %v9856_v23  ;;  %v15828_v23 = vld [vmem:[#allocation124_spill] sm:$0xff] }
 0xa0d   : > { %7648 = vmatmul.bf16.gmra.mxu2 %v15821_v61  ;;  %v14511_v6 = vmax.f32 %v8243_v37, %v8245_v44  ;;  %v8247_v37 = vmax.f32 %v15824_v33, 0.0 }
 0xa0e   : > { %v7488_v32 = vpop.f32.mrf.mxu3 }
 0xa0f   : > { %v7489_v35 = vadd.f32 %v7488_v32, %v7420_v12  ;;  %v7422_v28 = vpop.f32.mrf.mxu1  ;;  %v10240_v12 = vor.u32 %v10633_v36, %v10237_v54  ;;  %v10112_v32 = vor.u32 %v10601_v58, %v10109_v17  ;;  %v15829_v17 = vld [vmem:[#allocation127_spill] sm:$0xff] }
 0xa10   : > { %v14513_v9 = vpop.f32.mrf.mxu2  ;;  %v7552_v59 = vpop.f32.mrf.mxu0 }
 0xa11   : > { %v7553_v40 = vadd.f32 %v7552_v59, %v7484_v49  ;;  %8142 = vmatpush.bf16.msrb.mxu2 %v10240_v12  ;;  %8073 = vmatpush.bf16.msrb.mxu0 %v10112_v32  ;;  %v15830_v32 = vld [vmem:[#allocation60_spill] sm:$0xff] }
 0xa12   : > { %7677 = vmatmul.bf16.gmra.mxu1 %v15822_v51 }
 0xa13   : > { %7746 = vmatmul.bf16.gmra.mxu3 %v15823_v1  ;;  %v8249_v44 = vmax.f32 %v7553_v40, 0.0 }
 0xa15   : > { %v14518_v47 = vmax.f32 %v8247_v37, %v8249_v44  ;;  %v10565_v37 = vld [vmem:[#allocation9 + $0x6cc] sm:$0xf]  ;;  %v9965_v44 = vld [vmem:[#allocation9 + $0x6d8] sm:$0xf0] }
 0xa16   : > { %v7491_v46 = vpop.f32.mrf.mxu3  ;;  %v9968_v12 = vor.u32 %v10565_v37, %v9965_v44  ;;  %v9837_v37 = vld [vmem:[#allocation9 + $0x5d8] sm:$0xf0]  ;;  %v10629_v44 = vld [vmem:[#allocation9 + $0x8cc] sm:$0xf] }
 0xa17   : > { %v7424_v51 = vpop.f32.mrf.mxu1 }
 0xa18   : > { %v14520_v49 = vpop.f32.mrf.mxu2  ;;  %v7555_v59 = vpop.f32.mrf.mxu0  ;;  %8005 = vmatpush.bf16.msrb.mxu3 %v9968_v12  ;;  %v10093_v12 = vld [vmem:[#allocation9 + $0x7d8] sm:$0xf0] }
 0xa19   : > { %v7556_v1 = vadd.f32 %v7555_v59, %v7487_v48  ;;  %v8255_v59 = vmax.f32 %v15830_v32, 0.0 }
 0xa1b   : > { %v8253_v53 = vmax.f32 %v7556_v1, 0.0  ;;  %7810 = vmatmul.bf16.gmra.mxu0 %v15803_v30 }
 0xa1d   : > { %7653 = vmatmul.bf16.gmra.mxu2 %v15826_v39  ;;  %v14525_v58 = vmax.f32 %v8251_v7, %v8253_v53  ;;  %v7423_v53 = vadd.f32 %v7422_v28, %v14382_v55  ;;  %v8259_v55 = vmax.f32 %v15832_v5, 0.0 }
 0xa1e   : > { %v7493_v33 = vpop.f32.mrf.mxu3 }
 0xa1f   : > { %v7427_v40 = vpop.f32.mrf.mxu1  ;;  %v7492_v43 = vadd.f32 %v7491_v46, %v7423_v53  ;;  %v10096_v46 = vor.u32 %v10597_v22, %v10093_v12  ;;  %v15835_v22 = vld [vmem:[#allocation131_spill] sm:$0xff] }
 0xa20   : > { %v14527_v36 = vpop.f32.mrf.mxu2  ;;  %v7557_v54 = vpop.f32.mrf.mxu0 }
 0xa21   : > { %15827 = vst [vmem:[#allocation22_spill] sm:$0xff] %v14527_v36  ;;  %v7558_v48 = vadd.f32 %v7557_v54, %v7489_v35  ;;  %8074 = vmatpush.bf16.msrb.mxu0 %v10096_v46 }
 0xa22   : > { %7682 = vmatmul.bf16.gmra.mxu1 %v15828_v23 }
 0xa23   : > { %7751 = vmatmul.bf16.gmra.mxu3 %v15829_v17  ;;  %v8257_v30 = vmax.f32 %v7558_v48, 0.0  ;;  %v10533_v17 = vld [vmem:[#allocation9 + $0x5cc] sm:$0xf]  ;;  %v10221_v48 = vld [vmem:[#allocation9 + $0x8d8] sm:$0xf0] }
 0xa24   : > { %v9840_v32 = vor.u32 %v10533_v17, %v9837_v37 }
 0xa25   : > { %v14533_v25 = vmax.f32 %v8255_v59, %v8257_v30  ;;  %v15833_v59 = vld [vmem:[#allocation35_spill] sm:$0xff]  ;;  %v10224_v30 = vor.u32 %v10629_v44, %v10221_v48  ;;  %v7428_v48 = vadd.f32 %v7427_v40, %v14398_v3 }
 0xa26   : > { %v7496_v1 = vpop.f32.mrf.mxu3  ;;  %7936 = vmatpush.bf16.msrb.mxu1 %v9840_v32 }
 0xa27   : > { %v7429_v7 = vpop.f32.mrf.mxu1  ;;  %8143 = vmatpush.bf16.msrb.mxu2 %v10224_v30 }
 0xa28   : > { %v14536_v23 = vpop.f32.mrf.mxu2  ;;  %v7560_v35 = vpop.f32.mrf.mxu0  ;;  %v7430_v40 = vadd.f32 %v7429_v7, %v14406_v42  ;;  %v10593_v42 = vld [vmem:[#allocation9 + $0x7ac] sm:$0xf]  ;;  %v15841_v7 = vld [vmem:[#allocation64_spill] sm:$0xff] }
 0xa29   : > { %15831 = vst [vmem:[#allocation129_spill] sm:$0xff] %v14536_v23  ;;  %v7561_v54 = vadd.f32 %v7560_v35, %v7492_v43  ;;  %v7425_v43 = vadd.f32 %v7424_v51, %v14390_v13 }
 0xa2b   : > { %v8261_v28 = vmax.f32 %v7561_v54, 0.0  ;;  %7815 = vmatmul.bf16.gmra.mxu0 %v15809_v14  ;;  %v7494_v37 = vadd.f32 %v7493_v33, %v7425_v43  ;;  %v15834_v54 = vld [vmem:[#allocation24_spill] sm:$0xff]  ;;  %v15836_v14 = vld [vmem:[#allocation73_spill] sm:$0xff]  ;;  %v10561_v43 = vld [vmem:[#allocation9 + $0x6ac] sm:$0xf] }
 0xa2c   : > { %v8263_v51 = vmax.f32 %v15836_v14, 0.0 }
 0xa2d   : > { %7874 = vmatmul.bf16.vlgmr.msra.gmra.mxu2 %v15833_v59  ;;  %v8331_v35 = vmax.f32 %v8259_v55, %v8261_v28  ;;  %v7497_v55 = vadd.f32 %v7496_v1, %v7428_v48 }
 0xa2e   : > { %v7498_v53 = vpop.f32.mrf.mxu3 }
 0xa2f   : > { %v7432_v23 = vpop.f32.mrf.mxu1  ;;  %v8355_v5 = vmax.f32 %v14443_v2, %v8331_v35  ;;  %v9949_v35 = vld [vmem:[#allocation9 + $0x6b8] sm:$0xf0]  ;;  %v7499_v14 = vadd.f32 %v7498_v53, %v7430_v40 }
 0xa30   : > { %v14544_v17 = vpop.f32.mrf.mxu2  ;;  %v7562_v36 = vpop.f32.mrf.mxu0 }
 0xa31   : > { %8379 = vst [vmem:[%s14548_s23] sm:$0xff] %v8355_v5  ;;  %v7563_v13 = vadd.f32 %v7562_v36, %v7494_v37  ;;  %v9952_v36 = vor.u32 %v10561_v43, %v9949_v35  ;;  %v15837_v37 = vld [vmem:[#allocation106_spill] sm:$0xff]  ;;  %v10205_v43 = vld [vmem:[#allocation9 + $0x8b8] sm:$0xf0]  ;;  %v8271_v35 = vmax.f32 %v15841_v7, 0.0 }
 0xa32   : > { %7687 = vmatmul.bf16.gmra.mxu1 %v15834_v54  ;;  %v8267_v5 = vmax.f32 %v15837_v37, 0.0  ;;  %v10077_v37 = vld [vmem:[#allocation9 + $0x7b8] sm:$0xf0] }
 0xa33   : > { %7756 = vmatmul.bf16.gmra.mxu3 %v15835_v22  ;;  %v8265_v44 = vmax.f32 %v7563_v13, 0.0  ;;  %v15838_v22 = vld [vmem:[#allocation38_spill] sm:$0xff] }
 0xa34   : > { %8006 = vmatpush.bf16.msrb.mxu3 %v9952_v36 }
 0xa35   : > { %v8333_v33 = vmax.f32 %v8263_v51, %v8265_v44  ;;  %v15839_v44 = vld [vmem:[#allocation27_spill] sm:$0xff] }
 0xa36   : > { %v7501_v32 = vpop.f32.mrf.mxu3 }
 0xa37   : > { %v7434_v12 = vpop.f32.mrf.mxu1  ;;  %v8357_v28 = vmax.f32 %v14452_v4, %v8333_v33  ;;  %v15840_v33 = vld [vmem:[#allocation25_spill] sm:$0xff] }
 0xa38   : > { %v14554_v2 = vpop.f32.mrf.mxu2  ;;  %v7565_v30 = vpop.f32.mrf.mxu0 }
 0xa39   : > { %8381 = vst [vmem:[%s14548_s23 + $0x10] sm:$0xff] %v8357_v28  ;;  %v7566_v46 = vadd.f32 %v7565_v30, %v7497_v55  ;;  %v10529_v28 = vld [vmem:[#allocation9 + $0x5ac] sm:$0xf] }
 0xa3b   : > { %v8269_v54 = vmax.f32 %v7566_v46, 0.0  ;;  %7820 = vmatmul.bf16.gmra.mxu0 %v15815_v15  ;;  %v9821_v15 = vld [vmem:[#allocation9 + $0x5b8] sm:$0xf0]  ;;  %v10625_v46 = vld [vmem:[#allocation9 + $0x8ac] sm:$0xf] }
 0xa3c   : > { %v9824_v30 = vor.u32 %v10529_v28, %v9821_v15  ;;  %v10208_v53 = vor.u32 %v10625_v46, %v10205_v43 }
 0xa3d   : > { %7879 = vmatmul.bf16.gmra.mxu2 %v15838_v22  ;;  %v8335_v1 = vmax.f32 %v8267_v5, %v8269_v54  ;;  %v10080_v5 = vor.u32 %v10593_v42, %v10077_v37  ;;  %v7433_v54 = vadd.f32 %v7432_v23, %v14414_v41  ;;  %v7435_v23 = vadd.f32 %v7434_v12, %v14422_v10 }
 0xa3e   : > { %v7503_v3 = vpop.f32.mrf.mxu3  ;;  %7937 = vmatpush.bf16.msrb.mxu1 %v9824_v30  ;;  %8144 = vmatpush.bf16.msrb.mxu2 %v10208_v53  ;;  %v15843_v30 = vld [vmem:[#allocation134_spill] sm:$0xff] }
 0xa3f   : > { %v7437_v4 = vpop.f32.mrf.mxu1  ;;  %v8359_v51 = vmax.f32 %v14461_v0, %v8335_v1  ;;  %8075 = vmatpush.bf16.msrb.mxu0 %v10080_v5  ;;  %v10557_v53 = vld [vmem:[#allocation9 + $0x68c] sm:$0xf]  ;;  %v15845_v5 = vld [vmem:[#allocation63_spill] sm:$0xff] }
 0xa40   : > { %v14562_v13 = vpop.f32.mrf.mxu2  ;;  %v7567_v48 = vpop.f32.mrf.mxu0  ;;  %v8279_v10 = vmax.f32 %v15845_v5, 0.0 }
 0xa41   : > { %8383 = vst [vmem:[%s14548_s23 + $0x20] sm:$0xff] %v8359_v51  ;;  %v7568_v55 = vadd.f32 %v7567_v48, %v7499_v14  ;;  %v7502_v51 = vadd.f32 %v7501_v32, %v7433_v54  ;;  %v7504_v32 = vadd.f32 %v7503_v3, %v7435_v23  ;;  %v7438_v3 = vadd.f32 %v7437_v4, %v14430_v19  ;;  %v10621_v23 = vld [vmem:[#allocation9 + $0x88c] sm:$0xf]  ;;  %v15847_v4 = vld [vmem:[#allocation44_spill] sm:$0xff] }
 0xa42   : > { %7692 = vmatmul.bf16.gmra.mxu1 %v15839_v44 }
 0xa43   : > { %7761 = vmatmul.bf16.gmra.mxu3 %v15840_v33  ;;  %v8273_v36 = vmax.f32 %v7568_v55, 0.0  ;;  %v15842_v55 = vld [vmem:[#allocation108_spill] sm:$0xff] }
 0xa44   : > { %v8275_v28 = vmax.f32 %v15842_v55, 0.0  ;;  %v10525_v55 = vld [vmem:[#allocation9 + $0x58c] sm:$0xf] }
 0xa45   : > { %v8337_v40 = vmax.f32 %v8271_v35, %v8273_v36  ;;  %v15844_v35 = vld [vmem:[#allocation37_spill] sm:$0xff] }
 0xa46   : > { %v7506_v0 = vpop.f32.mrf.mxu3 }
 0xa47   : > { %v7439_v1 = vpop.f32.mrf.mxu1  ;;  %v8361_v44 = vmax.f32 %v14470_v18, %v8337_v40 }
 0xa48   : > { %v14570_v14 = vpop.f32.mrf.mxu2  ;;  %v7570_v48 = vpop.f32.mrf.mxu0 }
 0xa49   : > { %8385 = vst [vmem:[%s14548_s23 + $0x30] sm:$0xff] %v8361_v44  ;;  %v7571_v33 = vadd.f32 %v7570_v48, %v7502_v51  ;;  %v7507_v51 = vadd.f32 %v7506_v0, %v7438_v3 }
 0xa4b   : > { %v8277_v15 = vmax.f32 %v7571_v33, 0.0  ;;  %7825 = vmatmul.bf16.gmra.mxu0 %v15821_v61  ;;  %v9933_v61 = vld [vmem:[#allocation9 + $0x698] sm:$0xf0] }
 0xa4c   : > { %v9936_v37 = vor.u32 %v10557_v53, %v9933_v61  ;;  %v7440_v61 = vadd.f32 %v7439_v1, %v14438_v60 }
 0xa4d   : > { %7884 = vmatmul.bf16.gmra.mxu2 %v15843_v30  ;;  %v8339_v46 = vmax.f32 %v8275_v28, %v8277_v15  ;;  %v9805_v28 = vld [vmem:[#allocation9 + $0x598] sm:$0xf0] }
 0xa4e   : > { %v7508_v41 = vpop.f32.mrf.mxu3  ;;  %8007 = vmatpush.bf16.msrb.mxu3 %v9936_v37  ;;  %v9808_v15 = vor.u32 %v10525_v55, %v9805_v28 }
 0xa4f   : > { %v7442_v43 = vpop.f32.mrf.mxu1  ;;  %v8363_v18 = vmax.f32 %v14479_v24, %v8339_v46  ;;  %v10189_v46 = vld [vmem:[#allocation9 + $0x898] sm:$0xf0] }
 0xa50   : > { %v14578_v42 = vpop.f32.mrf.mxu2  ;;  %v7572_v7 = vpop.f32.mrf.mxu0  ;;  %v10192_v0 = vor.u32 %v10621_v23, %v10189_v46  ;;  %7938 = vmatpush.bf16.msrb.mxu1 %v9808_v15  ;;  %v10755_v15 = vld [vmem:[#allocation10] sm:$0xf] }
 0xa51   : > { %8387 = vst [vmem:[%s14548_s23 + $0x40] sm:$0xff] %v8363_v18  ;;  %v7573_v36 = vadd.f32 %v7572_v7, %v7504_v32  ;;  %v10589_v32 = vld [vmem:[#allocation9 + $0x78c] sm:$0xf]  ;;  %v14611_v23 = vperm.slane %v10755_v15, 3 }
 0xa52   : > { %7697 = vmatmul.bf16.gmra.mxu1 %v15833_v59  ;;  %v15846_v18 = vld [vmem:[#allocation110_spill] sm:$0xff]  ;;  %8145 = vmatpush.bf16.msrb.mxu2 %v10192_v0  ;;  %v15850_v0 = vld [vmem:[#allocation111_spill] sm:$0xff] }
 0xa53   : > { %7766 = vmatmul.bf16.gmra.mxu3 %v15844_v35  ;;  %v8281_v12 = vmax.f32 %v7573_v36, 0.0  ;;  %v8283_v7 = vmax.f32 %v15846_v18, 0.0  ;;  %v10061_v36 = vld [vmem:[#allocation9 + $0x798] sm:$0xf0]  ;;  %v10553_v18 = vld [vmem:[#allocation9 + $0x66c] sm:$0xf] }
 0xa54   : > { %v10064_v53 = vor.u32 %v10589_v32, %v10061_v36  ;;  %v8291_v36 = vmax.f32 %v15850_v0, 0.0 }
 0xa55   : > { %v8341_v40 = vmax.f32 %v8279_v10, %v8281_v12  ;;  %v7509_v12 = vadd.f32 %v7508_v41, %v7440_v61 }
 0xa56   : > { %v7511_v54 = vpop.f32.mrf.mxu3  ;;  %8076 = vmatpush.bf16.msrb.mxu0 %v10064_v53  ;;  %v10521_v53 = vld [vmem:[#allocation9 + $0x56c] sm:$0xf] }
 0xa57   : > { %v14586_v24 = vpop.f32.mrf.mxu1  ;;  %v8365_v44 = vmax.f32 %v14487_v57, %v8341_v40  ;;  %v15848_v40 = vld [vmem:[#allocation41_spill] sm:$0xff] }
 0xa58   : > { %v14588_v59 = vpop.f32.mrf.mxu2  ;;  %v7575_v48 = vpop.f32.mrf.mxu0 }
 0xa59   : > { %8389 = vst [vmem:[%s14548_s23 + $0x50] sm:$0xff] %v8365_v44  ;;  %v7576_v33 = vadd.f32 %v7575_v48, %v7507_v51  ;;  %v15849_v44 = vld [vmem:[#allocation66_spill] sm:$0xff] }
 0xa5a   : > { %v8287_v60 = vmax.f32 %v15849_v44, 0.0 }
 0xa5b   : > { %v8285_v19 = vmax.f32 %v7576_v33, 0.0  ;;  %7830 = vmatmul.bf16.gmra.mxu0 %v15826_v39  ;;  %v7443_v33 = vadd.f32 %v7442_v43, %v14447_v21  ;;  %v15851_v43 = vld [vmem:[#allocation136_spill] sm:$0xff] }
 0xa5d   : > { %7889 = vmatmul.bf16.gmra.mxu2 %v15847_v4  ;;  %v8343_v37 = vmax.f32 %v8283_v7, %v8285_v19  ;;  %v9917_v7 = vld [vmem:[#allocation9 + $0x678] sm:$0xf0] }
 0xa5e   : > { %v7513_v57 = vpop.f32.mrf.mxu3  ;;  %v9920_v19 = vor.u32 %v10553_v18, %v9917_v7 }
 0xa5f   : > { %v14596_v5 = vpop.f32.mrf.mxu1  ;;  %v8367_v3 = vmax.f32 %v14495_v63, %v8343_v37  ;;  %v7512_v63 = vadd.f32 %v7511_v54, %v7443_v33  ;;  %v9789_v54 = vld [vmem:[#allocation9 + $0x578] sm:$0xf0] }
 0xa60   : > { %v14598_v10 = vpop.f32.mrf.mxu2  ;;  %v7577_v39 = vpop.f32.mrf.mxu0  ;;  %8008 = vmatpush.bf16.msrb.mxu3 %v9920_v19  ;;  %v9792_v37 = vor.u32 %v10521_v53, %v9789_v54  ;;  %v7448_v19 = vadd.f32 %v14596_v5, %v14465_v8  ;;  %v7605_v8 = vadd.f32 %v14498_v34, %v14611_v23 }
 0xa61   : > { %8391 = vst [vmem:[%s14548_s23 + $0x60] sm:$0xff] %v8367_v3  ;;  %v7578_v51 = vadd.f32 %v7577_v39, %v7509_v12  ;;  %v10617_v12 = vld [vmem:[#allocation9 + $0x86c] sm:$0xf]  ;;  %v10173_v3 = vld [vmem:[#allocation9 + $0x878] sm:$0xf0]  ;;  %v7445_v39 = vadd.f32 %v14586_v24, %v14456_v62  ;;  %v15853_v24 = vld [vmem:[#allocation79_spill] sm:$0xff] }
 0xa62   : > { %7702 = vmatmul.bf16.gmra.mxu1 %v15838_v22  ;;  %v8295_v18 = vmax.f32 %v15853_v24, 0.0  ;;  %v9773_v24 = vld [vmem:[#allocation9 + $0x558] sm:$0xf0] }
 0xa63   : > { %7771 = vmatmul.bf16.gmra.mxu3 %v15848_v40  ;;  %v8289_v1 = vmax.f32 %v7578_v51, 0.0  ;;  %7939 = vmatpush.bf16.msrb.mxu1 %v9792_v37 }
 0xa65   : > { %v8345_v55 = vmax.f32 %v8287_v60, %v8289_v1  ;;  %v10176_v60 = vor.u32 %v10617_v12, %v10173_v3  ;;  %v15854_v3 = vld [vmem:[#allocation113_spill] sm:$0xff] }
 0xa66   : > { %v7516_v48 = vpop.f32.mrf.mxu3 }
 0xa67   : > { %v14606_v28 = vpop.f32.mrf.mxu1  ;;  %v8369_v22 = vmax.f32 %v14503_v11, %v8345_v55  ;;  %v7600_v11 = vadd.f32 %v14482_v38, %v14611_v23  ;;  %v7514_v55 = vadd.f32 %v7513_v57, %v7445_v39  ;;  %8146 = vmatpush.bf16.msrb.mxu2 %v10176_v60  ;;  %v10585_v38 = vld [vmem:[#allocation9 + $0x76c] sm:$0xf]  ;;  %v7602_v57 = vadd.f32 %v14490_v52, %v14611_v23 }
 0xa68   : > { %v14608_v41 = vpop.f32.mrf.mxu2  ;;  %v7580_v46 = vpop.f32.mrf.mxu0  ;;  %v7517_v54 = vadd.f32 %v7516_v48, %v7448_v19  ;;  %v8299_v39 = vmax.f32 %v15854_v3, 0.0  ;;  %v15855_v52 = vld [vmem:[#allocation50_spill] sm:$0xff]  ;;  %v7450_v48 = vadd.f32 %v14606_v28, %v14474_v45 }
 0xa69   : > { %8393 = vst [vmem:[%s14548_s23 + $0x70] sm:$0xff] %v8369_v22  ;;  %v7581_v32 = vadd.f32 %v7580_v46, %v7512_v63  ;;  %v10045_v22 = vld [vmem:[#allocation9 + $0x778] sm:$0xf0]  ;;  %v10517_v28 = vld [vmem:[#allocation9 + $0x54c] sm:$0xf] }
 0xa6a   : > { %v10048_v46 = vor.u32 %v10585_v38, %v10045_v22  ;;  %v10549_v22 = vld [vmem:[#allocation9 + $0x64c] sm:$0xf] }
 0xa6b   : > { %v8293_v21 = vmax.f32 %v7581_v32, 0.0  ;;  %7835 = vmatmul.bf16.gmra.mxu0 %v15771_v27  ;;  %v15852_v32 = vld [vmem:[#allocation43_spill] sm:$0xff]  ;;  %v10581_v3 = vld [vmem:[#allocation9 + $0x74c] sm:$0xf] }
 0xa6c   : > { %8077 = vmatpush.bf16.msrb.mxu0 %v10048_v46 }
 0xa6d   : > { %7894 = vmatmul.bf16.gmra.mxu2 %v15851_v43  ;;  %v8347_v51 = vmax.f32 %v8291_v36, %v8293_v21 }
 0xa6e   : > { %v7518_v61 = vpop.f32.mrf.mxu3 }
 0xa6f   : > { %v7668_v44 = vpop.f32.mrf.mxu1  ;;  %v8371_v63 = vmax.f32 %v14511_v6, %v8347_v51 }
 0xa70   : > { %v14621_v1 = vpop.f32.mrf.mxu2  ;;  %v7669_v33 = vadd.f32 %v7668_v44, %v7600_v11  ;;  %v7582_v15 = vpop.f32.mrf.mxu0 }
 0xa71   : > { %8395 = vst [vmem:[%s14548_s23 + $0x80] sm:$0xff] %v8371_v63  ;;  %v7583_v62 = vadd.f32 %v7582_v15, %v7514_v55  ;;  %v7519_v63 = vadd.f32 %v7518_v61, %v7450_v48  ;;  %v9901_v15 = vld [vmem:[#allocation9 + $0x658] sm:$0xf0]  ;;  %v10513_v48 = vld [vmem:[#allocation9 + $0x52c] sm:$0xf] }
 0xa72   : > { %7707 = vmatmul.bf16.gmra.mxu1 %v15843_v30  ;;  %v9904_v34 = vor.u32 %v10549_v22, %v9901_v15 }
 0xa73   : > { %7776 = vmatmul.bf16.gmra.mxu3 %v15852_v32  ;;  %v8297_v7 = vmax.f32 %v7583_v62, 0.0  ;;  %v15856_v62 = vld [vmem:[#allocation47_spill] sm:$0xff] }
 0xa74   : > { %8009 = vmatpush.bf16.msrb.mxu3 %v9904_v34  ;;  %v10509_v34 = vld [vmem:[#allocation9 + $0x50c] sm:$0xf] }
 0xa75   : > { %v8349_v0 = vmax.f32 %v8295_v18, %v8297_v7  ;;  %v9776_v18 = vor.u32 %v10517_v28, %v9773_v24  ;;  %v10613_v7 = vld [vmem:[#allocation9 + $0x84c] sm:$0xf] }
 0xa76   : > { %v7737_v6 = vpop.f32.mrf.mxu3  ;;  %v10541_v28 = vld [vmem:[#allocation9 + $0x60c] sm:$0xf] }
 0xa77   : > { %v7738_v30 = vadd.f32 %v7737_v6, %v7669_v33  ;;  %v7670_v36 = vpop.f32.mrf.mxu1  ;;  %v8373_v11 = vmax.f32 %v14518_v47, %v8349_v0  ;;  %v15857_v6 = vld [vmem:[#allocation70_spill] sm:$0xff]  ;;  %7940 = vmatpush.bf16.msrb.mxu1 %v9776_v18 }
 0xa78   : > { %v14632_v21 = vpop.f32.mrf.mxu2  ;;  %v7671_v53 = vadd.f32 %v7670_v36, %v7602_v57  ;;  %v7585_v37 = vpop.f32.mrf.mxu0  ;;  %v10157_v57 = vld [vmem:[#allocation9 + $0x858] sm:$0xf0]  ;;  %v8303_v61 = vmax.f32 %v15857_v6, 0.0  ;;  %v7612_v6 = vadd.f32 %v14520_v49, %v14611_v23 }
 0xa79   : > { %8397 = vst [vmem:[%s14548_s23 + $0x90] sm:$0xff] %v8373_v11  ;;  %v7586_v12 = vadd.f32 %v7585_v37, %v7517_v54 }
 0xa7b   : > { %v8301_v51 = vmax.f32 %v7586_v12, 0.0  ;;  %7840 = vmatmul.bf16.gmra.mxu0 %v15775_v20 }
 0xa7d   : > { %7899 = vmatmul.bf16.gmra.mxu2 %v15855_v52  ;;  %v8351_v44 = vmax.f32 %v8299_v39, %v8301_v51  ;;  %v10029_v39 = vld [vmem:[#allocation9 + $0x758] sm:$0xf0] }
 0xa7e   : > { %v7739_v5 = vpop.f32.mrf.mxu3 }
 0xa7f   : > { %v14643_v47 = vadd.f32 %v7739_v5, %v7671_v53  ;;  %v7673_v60 = vpop.f32.mrf.mxu1  ;;  %v8375_v38 = vmax.f32 %v14525_v58, %v8351_v44  ;;  %v10160_v58 = vor.u32 %v10613_v7, %v10157_v57  ;;  %v9869_v7 = vld [vmem:[#allocation9 + $0x618] sm:$0xf0] }
 0xa80   : > { %v14645_v33 = vpop.f32.mrf.mxu2  ;;  %v7674_v55 = vadd.f32 %v7673_v60, %v7605_v8  ;;  %v7587_v46 = vpop.f32.mrf.mxu0  ;;  %v10032_v8 = vor.u32 %v10581_v3, %v10029_v39  ;;  %v10545_v60 = vld [vmem:[#allocation9 + $0x62c] sm:$0xf]  ;;  %v9872_v57 = vor.u32 %v10541_v28, %v9869_v7 }
 0xa81   : > { %8399 = vst [vmem:[%s14548_s23 + $0xa0] sm:$0xff] %v8375_v38  ;;  %v7588_v45 = vadd.f32 %v7587_v46, %v7519_v63  ;;  %8147 = vmatpush.bf16.msrb.mxu2 %v10160_v58  ;;  %v10573_v7 = vld [vmem:[#allocation9 + $0x70c] sm:$0xf] }
 0xa82   : > { %7712 = vmatmul.bf16.gmra.mxu1 %v15847_v4  ;;  %v7607_v4 = vadd.f32 %v14506_v26, %v14611_v23  ;;  %v9757_v26 = vld [vmem:[#allocation9 + $0x538] sm:$0xf0]  ;;  %8078 = vmatpush.bf16.msrb.mxu0 %v10032_v8 }
 0xa83   : > { %7781 = vmatmul.bf16.gmra.mxu3 %v15856_v62  ;;  %v8305_v19 = vmax.f32 %v7588_v45, 0.0  ;;  %v9760_v44 = vor.u32 %v10513_v48, %v9757_v26  ;;  %v9741_v45 = vld [vmem:[#allocation9 + $0x518] sm:$0xf0]  ;;  %v10577_v26 = vld [vmem:[#allocation9 + $0x72c] sm:$0xf] }
 0xa84   : > { %v9744_v18 = vor.u32 %v10509_v34, %v9741_v45 }
 0xa85   : > { %v8353_v36 = vmax.f32 %v8303_v61, %v8305_v19  ;;  %7941 = vmatpush.bf16.msrb.mxu1 %v9760_v44 }
 0xa86   : > { %v7742_v0 = vpop.f32.mrf.mxu3 }
 0xa87   : > { %v7743_v53 = vadd.f32 %v7742_v0, %v7674_v55  ;;  %v7675_v54 = vpop.f32.mrf.mxu1  ;;  %v8377_v12 = vmax.f32 %v14533_v25, %v8353_v36  ;;  %v9885_v55 = vld [vmem:[#allocation9 + $0x638] sm:$0xf0]  ;;  %v7610_v25 = vadd.f32 %v14513_v9, %v14611_v23 }
 0xa88   : > { %v14654_v11 = vpop.f32.mrf.mxu2  ;;  %v7676_v37 = vadd.f32 %v7675_v54, %v7607_v4  ;;  %v7806_v51 = vpop.f32.mrf.mxu0  ;;  %v9888_v63 = vor.u32 %v10545_v60, %v9885_v55  ;;  %v10141_v54 = vld [vmem:[#allocation9 + $0x838] sm:$0xf0]  ;;  %v15859_v55 = vld [vmem:[#allocation139_spill] sm:$0xff] }
 0xa89   : > { %8401 = vst [vmem:[%s14548_s23 + $0xb0] sm:$0xff] %v8377_v12  ;;  %v14658_v5 = vadd.f32 %v7806_v51, %v7738_v30  ;;  %7942 = vmatpush.bf16.msrb.mxu1 %v9744_v18 }
 0xa8a   : > { %8010 = vmatpush.bf16.msrb.mxu3 %v9888_v63 }
 0xa8b   : > { %7845 = vmatmul.bf16.gmra.mxu0 %v15779_v56 }
 0xa8d   : > { %7904 = vmatmul.bf16.gmra.mxu2 %v15698_v29 }
 0xa8e   : > { %v7744_v38 = vpop.f32.mrf.mxu3  ;;  %8011 = vmatpush.bf16.msrb.mxu3 %v9872_v57  ;;  %v9997_v57 = vld [vmem:[#allocation9 + $0x718] sm:$0xf0] }
 0xa8f   : > { %v7745_v22 = vadd.f32 %v7744_v38, %v7676_v37  ;;  %v7678_v15 = vpop.f32.mrf.mxu1  ;;  %v15858_v37 = vld [vmem:[#allocation22_spill] sm:$0xff] }
 0xa90   : > { %v14664_v30 = vpop.f32.mrf.mxu2  ;;  %v7679_v46 = vadd.f32 %v7678_v15, %v7610_v25  ;;  %v7808_v24 = vpop.f32.mrf.mxu0  ;;  %v7615_v12 = vadd.f32 %v15858_v37, %v14611_v23  ;;  %v15860_v25 = vld [vmem:[#allocation129_spill] sm:$0xff] }
 0xa91   : > { %v14669_v9 = vadd.f32 %v7808_v24, %v14643_v47  ;;  %v10609_v47 = vld [vmem:[#allocation9 + $0x82c] sm:$0xf]  ;;  %v7617_v38 = vadd.f32 %v15860_v25, %v14611_v23 }
 0xa92   : > { %7717 = vmatmul.bf16.gmra.mxu1 %v15851_v43  ;;  %v10144_v49 = vor.u32 %v10609_v47, %v10141_v54 }
 0xa93   : > { %7786 = vmatmul.bf16.gmra.mxu3 %v15777_v50 }
 0xa94   : > { %8148 = vmatpush.bf16.msrb.mxu2 %v10144_v49  ;;  %v10125_v49 = vld [vmem:[#allocation9 + $0x818] sm:$0xf0] }
 0xa96   : > { %v7747_v61 = vpop.f32.mrf.mxu3 }
 0xa97   : > { %v7748_v19 = vadd.f32 %v7747_v61, %v7679_v46  ;;  %v7680_v58 = vpop.f32.mrf.mxu1  ;;  %v15862_v61 = vld [vmem:[#allocation36_spill] sm:$0xff] }
 0xa98   : > { %v14673_v4 = vpop.f32.mrf.mxu2  ;;  %v7681_v43 = vadd.f32 %v7680_v58, %v7612_v6  ;;  %v7811_v0 = vpop.f32.mrf.mxu0  ;;  %v15861_v6 = vld [vmem:[#allocation26_spill] sm:$0xff] }
 0xa99   : > { %v14675_v36 = vadd.f32 %v7811_v0, %v7743_v53  ;;  %v10013_v53 = vld [vmem:[#allocation9 + $0x738] sm:$0xf0] }
 0xa9a   : > { %v10016_v60 = vor.u32 %v10577_v26, %v10013_v53 }
 0xa9b   : > { %7850 = vmatmul.bf16.gmra.mxu0 %v15781_v31 }
 0xa9c   : > { %8079 = vmatpush.bf16.msrb.mxu0 %v10016_v60 }
 0xa9d   : > { %7909 = vmatmul.bf16.gmra.mxu2 %v15702_v16 }
 0xa9e   : > { %v7749_v3 = vpop.f32.mrf.mxu3 }
 0xa9f   : > { %v7750_v39 = vadd.f32 %v7749_v3, %v7681_v43  ;;  %v7683_v51 = vpop.f32.mrf.mxu1  ;;  %v10605_v3 = vld [vmem:[#allocation9 + $0x80c] sm:$0xf] }
 0xaa0   : > { %v14681_v8 = vpop.f32.mrf.mxu2  ;;  %v7684_v48 = vadd.f32 %v7683_v51, %v7615_v12  ;;  %v7813_v44 = vpop.f32.mrf.mxu0  ;;  %v10128_v51 = vor.u32 %v10605_v3, %v10125_v49 }
 0xaa1   : > { %v7814_v63 = vadd.f32 %v7813_v44, %v7745_v22  ;;  %v7620_v22 = vadd.f32 %v14544_v17, %v14611_v23  ;;  %v7622_v17 = vadd.f32 %v14554_v2, %v14611_v23 }
 0xaa2   : > { %7722 = vmatmul.bf16.gmra.mxu1 %v15855_v52  ;;  %v10000_v52 = vor.u32 %v10573_v7, %v9997_v57  ;;  %8149 = vmatpush.bf16.msrb.mxu2 %v10128_v51  ;;  %v7627_v57 = vadd.f32 %v14570_v14, %v14611_v23 }
 0xaa3   : > { %7791 = vmatmul.bf16.gmra.mxu3 %v15859_v55 }
 0xaa4   : > { %8080 = vmatpush.bf16.msrb.mxu0 %v10000_v52 }
 0xaa6   : > { %v7752_v15 = vpop.f32.mrf.mxu3 }
 0xaa7   : > { %v7753_v46 = vadd.f32 %v7752_v15, %v7684_v48  ;;  %v7685_v34 = vpop.f32.mrf.mxu1 }
 0xaa8   : > { %v14687_v45 = vpop.f32.mrf.mxu2  ;;  %v7686_v28 = vadd.f32 %v7685_v34, %v7617_v38  ;;  %v7816_v24 = vpop.f32.mrf.mxu0  ;;  %v15863_v38 = vld [vmem:[#allocation30_spill] sm:$0xff] }
 0xaa9   : > { %v7817_v18 = vadd.f32 %v7816_v24, %v7748_v19 }
 0xaab   : > { %7855 = vmatmul.bf16.gmra.mxu0 %v15862_v61 }
 0xaad   : > { %7914 = vmatmul.bf16.gmra.mxu2 %v15861_v6 }
 0xaae   : > { %v7754_v58 = vpop.f32.mrf.mxu3 }
 0xaaf   : > { %v7755_v43 = vadd.f32 %v7754_v58, %v7686_v28  ;;  %v7688_v0 = vpop.f32.mrf.mxu1 }
 0xab0   : > { %v7689_v47 = vadd.f32 %v7688_v0, %v7620_v22  ;;  %v7875_v54 = vpop.f32.mrf.mxu2  ;;  %v7818_v19 = vpop.f32.mrf.mxu0 }
 0xab1   : > { %v14694_v37 = vadd.f32 %v7875_v54, %v14658_v5  ;;  %v7819_v12 = vadd.f32 %v7818_v19, %v7750_v39  ;;  %v7625_v39 = vadd.f32 %v14562_v13, %v14611_v23 }
 0xab2   : > { %7943 = vmatmul.bf16.vlgmr.msrb.gmra.mxu1 %v15844_v35 }
 0xab3   : > { %8012 = vmatmul.bf16.vlgmr.msrb.gmra.mxu3 %v15771_v27  ;;  %v15864_v27 = vld [vmem:[#allocation62_spill] sm:$0xff] }
 0xab6   : > { %v7757_v48 = vpop.f32.mrf.mxu3 }
 0xab7   : > { %v7758_v26 = vadd.f32 %v7757_v48, %v7689_v47  ;;  %v7690_v53 = vpop.f32.mrf.mxu1  ;;  %v7632_v48 = vadd.f32 %v14588_v59, %v14611_v23 }
 0xab8   : > { %v7691_v44 = vadd.f32 %v7690_v53, %v7622_v17  ;;  %v7877_v60 = vpop.f32.mrf.mxu2  ;;  %v7821_v35 = vpop.f32.mrf.mxu0 }
 0xab9   : > { %v14701_v5 = vadd.f32 %v7877_v60, %v14669_v9  ;;  %v7822_v25 = vadd.f32 %v7821_v35, %v7753_v46 }
 0xabb   : > { %7860 = vmatmul.bf16.gmra.mxu0 %v15864_v27 }
 0xabd   : > { %7919 = vmatmul.bf16.gmra.mxu2 %v15863_v38 }
 0xabe   : > { %v7759_v15 = vpop.f32.mrf.mxu3 }
 0xabf   : > { %v7760_v2 = vadd.f32 %v7759_v15, %v7691_v44  ;;  %v7693_v34 = vpop.f32.mrf.mxu1 }
 0xac0   : > { %v7694_v28 = vadd.f32 %v7693_v34, %v7625_v39  ;;  %v7880_v24 = vpop.f32.mrf.mxu2  ;;  %v7823_v9 = vpop.f32.mrf.mxu0 }
 0xac1   : > { %v14708_v7 = vadd.f32 %v7880_v24, %v14675_v36  ;;  %v7824_v46 = vadd.f32 %v7823_v9, %v7755_v43  ;;  %v15865_v36 = vld [vmem:[#allocation32_spill] sm:$0xff]  ;;  %v7637_v9 = vadd.f32 %v14608_v41, %v14611_v23 }
 0xac2   : > { %7948 = vmatmul.bf16.gmra.mxu1 %v15848_v40 }
 0xac3   : > { %8017 = vmatmul.bf16.gmra.mxu3 %v15775_v20  ;;  %v7630_v20 = vadd.f32 %v14578_v42, %v14611_v23 }
 0xac6   : > { %v7762_v52 = vpop.f32.mrf.mxu3 }
 0xac7   : > { %v7763_v22 = vadd.f32 %v7762_v52, %v7694_v28  ;;  %v7695_v13 = vpop.f32.mrf.mxu1 }
 0xac8   : > { %v7696_v58 = vadd.f32 %v7695_v13, %v7627_v57  ;;  %v7882_v0 = vpop.f32.mrf.mxu2  ;;  %v7826_v54 = vpop.f32.mrf.mxu0 }
 0xac9   : > { %v14714_v47 = vadd.f32 %v7882_v0, %v7814_v63  ;;  %v7827_v19 = vadd.f32 %v7826_v54, %v7758_v26 }
 0xacb   : > { %8081 = vmatmul.bf16.vlgmr.msrb.gmra.mxu0 %v15698_v29 }
 0xacd   : > { %7924 = vmatmul.bf16.gmra.mxu2 %v15865_v36 }
 0xace   : > { %v7764_v40 = vpop.f32.mrf.mxu3 }
 0xacf   : > { %v7765_v43 = vadd.f32 %v7764_v40, %v7696_v58  ;;  %v7698_v3 = vpop.f32.mrf.mxu1 }
 0xad0   : > { %v7699_v14 = vadd.f32 %v7698_v3, %v7630_v20  ;;  %v7885_v49 = vpop.f32.mrf.mxu2  ;;  %v7828_v63 = vpop.f32.mrf.mxu0 }
 0xad1   : > { %v14720_v51 = vadd.f32 %v7885_v49, %v7817_v18  ;;  %v7829_v17 = vadd.f32 %v7828_v63, %v7760_v2  ;;  %v15866_v18 = vld [vmem:[#allocation31_spill] sm:$0xff] }
 0xad2   : > { %7953 = vmatmul.bf16.gmra.mxu1 %v15852_v32 }
 0xad3   : > { %8022 = vmatmul.bf16.gmra.mxu3 %v15779_v56  ;;  %v7635_v56 = vadd.f32 %v14598_v10, %v14611_v23 }
 0xad6   : > { %v7767_v29 = vpop.f32.mrf.mxu3 }
 0xad7   : > { %v7768_v26 = vadd.f32 %v7767_v29, %v7699_v14  ;;  %v7700_v53 = vpop.f32.mrf.mxu1  ;;  %v7642_v14 = vadd.f32 %v14632_v21, %v14611_v23 }
 0xad8   : > { %v7701_v42 = vadd.f32 %v7700_v53, %v7632_v48  ;;  %v7887_v44 = vpop.f32.mrf.mxu2  ;;  %v7831_v35 = vpop.f32.mrf.mxu0 }
 0xad9   : > { %v14726_v60 = vadd.f32 %v7887_v44, %v7819_v12  ;;  %v7832_v39 = vadd.f32 %v7831_v35, %v7763_v22 }
 0xadb   : > { %8086 = vmatmul.bf16.gmra.mxu0 %v15702_v16 }
 0xadd   : > { %7929 = vmatmul.bf16.gmra.mxu2 %v15866_v18 }
 0xade   : > { %v7769_v32 = vpop.f32.mrf.mxu3 }
 0xadf   : > { %v7770_v15 = vadd.f32 %v7769_v32, %v7701_v42  ;;  %v7703_v2 = vpop.f32.mrf.mxu1 }
 0xae0   : > { %v7704_v59 = vadd.f32 %v7703_v2, %v7635_v56  ;;  %v7890_v34 = vpop.f32.mrf.mxu2  ;;  %v7833_v12 = vpop.f32.mrf.mxu0 }
 0xae1   : > { %v14732_v28 = vadd.f32 %v7890_v34, %v7822_v25  ;;  %v7834_v24 = vadd.f32 %v7833_v12, %v7765_v43  ;;  %v15867_v25 = vld [vmem:[#allocation65_spill] sm:$0xff] }
 0xae2   : > { %7958 = vmatmul.bf16.gmra.mxu1 %v15856_v62 }
 0xae3   : > { %8027 = vmatmul.bf16.gmra.mxu3 %v15781_v31  ;;  %v7640_v31 = vadd.f32 %v14621_v1, %v14611_v23 }
 0xae6   : > { %v7772_v16 = vpop.f32.mrf.mxu3 }
 0xae7   : > { %v7773_v57 = vadd.f32 %v7772_v16, %v7704_v59  ;;  %v7705_v52 = vpop.f32.mrf.mxu1 }
 0xae8   : > { %v7706_v10 = vadd.f32 %v7705_v52, %v7637_v9  ;;  %v7892_v22 = vpop.f32.mrf.mxu2  ;;  %v7836_v58 = vpop.f32.mrf.mxu0 }
 0xae9   : > { %v14738_v13 = vadd.f32 %v7892_v22, %v7824_v46  ;;  %v7837_v0 = vadd.f32 %v7836_v58, %v7768_v26  ;;  %v15870_v58 = vld [vmem:[#allocation40_spill] sm:$0xff] }
 0xaeb   : > { %8091 = vmatmul.bf16.gmra.mxu0 %v15861_v6 }
 0xaed   : > { %8150 = vmatmul.bf16.vlgmr.msrb.gmra.mxu2 %v15867_v25 }
 0xaee   : > { %v7774_v62 = vpop.f32.mrf.mxu3 }
 0xaef   : > { %v7775_v54 = vadd.f32 %v7774_v62, %v7706_v10  ;;  %v7708_v20 = vpop.f32.mrf.mxu1  ;;  %v7652_v62 = vadd.f32 %v14673_v4, %v14611_v23 }
 0xaf0   : > { %v7709_v41 = vadd.f32 %v7708_v20, %v7640_v31  ;;  %v7895_v40 = vpop.f32.mrf.mxu2  ;;  %v7838_v46 = vpop.f32.mrf.mxu0 }
 0xaf1   : > { %v14744_v43 = vadd.f32 %v7895_v40, %v7827_v19  ;;  %v7839_v3 = vadd.f32 %v7838_v46, %v7770_v15  ;;  %v15868_v19 = vld [vmem:[#allocation49_spill] sm:$0xff]  ;;  %v7647_v15 = vadd.f32 %v14654_v11, %v14611_v23 }
 0xaf2   : > { %7963 = vmatmul.bf16.gmra.mxu1 %v15777_v50  ;;  %v7645_v50 = vadd.f32 %v14645_v33, %v14611_v23 }
 0xaf3   : > { %8032 = vmatmul.bf16.gmra.mxu3 %v15862_v61 }
 0xaf6   : > { %v7777_v6 = vpop.f32.mrf.mxu3 }
 0xaf7   : > { %v7778_v49 = vadd.f32 %v7777_v6, %v7709_v41  ;;  %v7710_v63 = vpop.f32.mrf.mxu1 }
 0xaf8   : > { %v7711_v1 = vadd.f32 %v7710_v63, %v7642_v14  ;;  %v7897_v48 = vpop.f32.mrf.mxu2  ;;  %v7841_v26 = vpop.f32.mrf.mxu0 }
 0xaf9   : > { %v14750_v29 = vadd.f32 %v7897_v48, %v7829_v17  ;;  %v7842_v53 = vadd.f32 %v7841_v26, %v7773_v57  ;;  %v15872_v26 = vld [vmem:[#allocation39_spill] sm:$0xff] }
 0xafb   : > { %8096 = vmatmul.bf16.gmra.mxu0 %v15863_v38 }
 0xafd   : > { %8155 = vmatmul.bf16.gmra.mxu2 %v15868_v19 }
 0xafe   : > { %v7779_v61 = vpop.f32.mrf.mxu3 }
 0xaff   : > { %v7780_v42 = vadd.f32 %v7779_v61, %v7711_v1  ;;  %v7713_v44 = vpop.f32.mrf.mxu1  ;;  %v7657_v61 = vadd.f32 %v14687_v45, %v14611_v23 }
 0xb00   : > { %v7714_v21 = vadd.f32 %v7713_v44, %v7645_v50  ;;  %v7900_v35 = vpop.f32.mrf.mxu2  ;;  %v7843_v17 = vpop.f32.mrf.mxu0 }
 0xb01   : > { %v14756_v56 = vadd.f32 %v7900_v35, %v7832_v39  ;;  %v7844_v32 = vadd.f32 %v7843_v17, %v7775_v54  ;;  %v15869_v39 = vld [vmem:[#allocation68_spill] sm:$0xff] }
 0xb02   : > { %7968 = vmatmul.bf16.gmra.mxu1 %v15859_v55  ;;  %v7650_v55 = vadd.f32 %v14664_v30, %v14611_v23 }
 0xb03   : > { %8037 = vmatmul.bf16.gmra.mxu3 %v15864_v27 }
 0xb06   : > { %v7782_v38 = vpop.f32.mrf.mxu3 }
 0xb07   : > { %v7783_v2 = vadd.f32 %v7782_v38, %v7714_v21  ;;  %v7715_v59 = vpop.f32.mrf.mxu1  ;;  %v15874_v38 = vld [vmem:[#allocation74_spill] sm:$0xff] }
 0xb08   : > { %v7716_v33 = vadd.f32 %v7715_v59, %v7647_v15  ;;  %v7902_v34 = vpop.f32.mrf.mxu2  ;;  %v7846_v9 = vpop.f32.mrf.mxu0 }
 0xb09   : > { %v14762_v12 = vadd.f32 %v7902_v34, %v7834_v24  ;;  %v7847_v16 = vadd.f32 %v7846_v9, %v7778_v49  ;;  %v15875_v9 = vld [vmem:[#allocation55_spill] sm:$0xff] }
 0xb0b   : > { %8101 = vmatmul.bf16.gmra.mxu0 %v15865_v36 }
 0xb0d   : > { %8160 = vmatmul.bf16.gmra.mxu2 %v15869_v39 }
 0xb0e   : > { %v7784_v27 = vpop.f32.mrf.mxu3 }
 0xb0f   : > { %v7785_v57 = vadd.f32 %v7784_v27, %v7716_v33  ;;  %v7718_v52 = vpop.f32.mrf.mxu1 }
 0xb10   : > { %v7719_v11 = vadd.f32 %v7718_v52, %v7650_v55  ;;  %v7905_v10 = vpop.f32.mrf.mxu2  ;;  %v7848_v24 = vpop.f32.mrf.mxu0 }
 0xb11   : > { %v14768_v22 = vadd.f32 %v7905_v10, %v7837_v0  ;;  %v7849_v31 = vadd.f32 %v7848_v24, %v7780_v42  ;;  %v15871_v0 = vld [vmem:[#allocation42_spill] sm:$0xff] }
 0xb12   : > { %7973 = vmatmul.bf16.gmra.mxu1 %v15867_v25  ;;  %v7655_v25 = vadd.f32 %v14681_v8, %v14611_v23 }
 0xb13   : > { %8042 = vmatmul.bf16.gmra.mxu3 %v15870_v58 }
 0xb16   : > { %v7787_v36 = vpop.f32.mrf.mxu3 }
 0xb17   : > { %v7788_v54 = vadd.f32 %v7787_v36, %v7719_v11  ;;  %v7720_v20 = vpop.f32.mrf.mxu1 }
 0xb18   : > { %v7721_v30 = vadd.f32 %v7720_v20, %v7652_v62  ;;  %v7907_v41 = vpop.f32.mrf.mxu2  ;;  %v7851_v46 = vpop.f32.mrf.mxu0  ;;  %v15876_v62 = vld [vmem:[#allocation45_spill] sm:$0xff] }
 0xb19   : > { %v14774_v40 = vadd.f32 %v7907_v41, %v7839_v3  ;;  %v7852_v14 = vadd.f32 %v7851_v46, %v7783_v2 }
 0xb1b   : > { %8106 = vmatmul.bf16.gmra.mxu0 %v15866_v18 }
 0xb1d   : > { %8165 = vmatmul.bf16.gmra.mxu2 %v15871_v0 }
 0xb1e   : > { %v7789_v6 = vpop.f32.mrf.mxu3 }
 0xb1f   : > { %v7790_v49 = vadd.f32 %v7789_v6, %v7721_v30  ;;  %v7723_v63 = vpop.f32.mrf.mxu1 }
 0xb20   : > { %v7724_v4 = vadd.f32 %v7723_v63, %v7655_v25  ;;  %v7910_v1 = vpop.f32.mrf.mxu2  ;;  %v7853_v3 = vpop.f32.mrf.mxu0 }
 0xb21   : > { %v14780_v48 = vadd.f32 %v7910_v1, %v7842_v53  ;;  %v7854_v50 = vadd.f32 %v7853_v3, %v7785_v57  ;;  %v15873_v53 = vld [vmem:[#allocation77_spill] sm:$0xff] }
 0xb22   : > { %7978 = vmatmul.bf16.gmra.mxu1 %v15868_v19 }
 0xb23   : > { %8047 = vmatmul.bf16.gmra.mxu3 %v15872_v26  ;;  %v15879_v26 = vld [vmem:[#allocation89_spill] sm:$0xff] }
 0xb26   : > { %v7792_v18 = vpop.f32.mrf.mxu3 }
 0xb27   : > { %v7793_v42 = vadd.f32 %v7792_v18, %v7724_v4  ;;  %v7725_v44 = vpop.f32.mrf.mxu1 }
 0xb28   : > { %v7726_v8 = vadd.f32 %v7725_v44, %v7657_v61  ;;  %v7912_v21 = vpop.f32.mrf.mxu2  ;;  %v7856_v17 = vpop.f32.mrf.mxu0 }
 0xb29   : > { %v14786_v35 = vadd.f32 %v7912_v21, %v7844_v32  ;;  %v7857_v15 = vadd.f32 %v7856_v17, %v7788_v54 }
 0xb2b   : > { %8111 = vmatmul.bf16.gmra.mxu0 %v15874_v38 }
 0xb2d   : > { %8170 = vmatmul.bf16.gmra.mxu2 %v15873_v53 }
 0xb2e   : > { %v7794_v19 = vpop.f32.mrf.mxu3 }
 0xb2f   : > { %v7795_v2 = vadd.f32 %v7794_v19, %v7726_v8  ;;  %v7944_v59 = vpop.f32.mrf.mxu1 }
 0xb30   : > { %v7915_v33 = vpop.f32.mrf.mxu2  ;;  %v7945_v34 = vadd.f32 %v7944_v59, %v14694_v37  ;;  %v7858_v45 = vpop.f32.mrf.mxu0  ;;  %v15877_v37 = vld [vmem:[#allocation46_spill] sm:$0xff] }
 0xb31   : > { %v14791_v23 = vadd.f32 %v7915_v33, %v7847_v16  ;;  %v7859_v32 = vadd.f32 %v7858_v45, %v7790_v49  ;;  %v15882_v45 = vld [vmem:[#allocation52_spill] sm:$0xff] }
 0xb32   : > { %7983 = vmatmul.bf16.gmra.mxu1 %v15869_v39 }
 0xb33   : > { %8052 = vmatmul.bf16.gmra.mxu3 %v15875_v9 }
 0xb36   : > { %v8013_v55 = vpop.f32.mrf.mxu3 }
 0xb37   : > { %v8014_v27 = vadd.f32 %v8013_v55, %v7945_v34  ;;  %v7946_v57 = vpop.f32.mrf.mxu1 }
 0xb38   : > { %v7917_v52 = vpop.f32.mrf.mxu2  ;;  %v7947_v11 = vadd.f32 %v7946_v57, %v14701_v5  ;;  %v7861_v24 = vpop.f32.mrf.mxu0  ;;  %v15878_v5 = vld [vmem:[#allocation80_spill] sm:$0xff] }
 0xb39   : > { %v14796_v10 = vadd.f32 %v7917_v52, %v7849_v31  ;;  %v7862_v58 = vadd.f32 %v7861_v24, %v7793_v42 }
 0xb3b   : > { %8116 = vmatmul.bf16.gmra.mxu0 %v15877_v37 }
 0xb3d   : > { %8175 = vmatmul.bf16.gmra.mxu2 %v15876_v62 }
 0xb3e   : > { %v8015_v16 = vpop.f32.mrf.mxu3 }
 0xb3f   : > { %v8016_v39 = vadd.f32 %v8015_v16, %v7947_v11  ;;  %v7949_v36 = vpop.f32.mrf.mxu1 }
 0xb40   : > { %v7920_v54 = vpop.f32.mrf.mxu2  ;;  %v7950_v20 = vadd.f32 %v7949_v36, %v14708_v7  ;;  %v7863_v41 = vpop.f32.mrf.mxu0  ;;  %v15880_v7 = vld [vmem:[#allocation83_spill] sm:$0xff] }
 0xb41   : > { %v14801_v30 = vadd.f32 %v7920_v54, %v7852_v14  ;;  %v7864_v31 = vadd.f32 %v7863_v41, %v7795_v2  ;;  %v15885_v41 = vld [vmem:[#allocation91_spill] sm:$0xff] }
 0xb42   : > { %7988 = vmatmul.bf16.gmra.mxu1 %v15871_v0 }
 0xb43   : > { %8057 = vmatmul.bf16.gmra.mxu3 %v15878_v5 }
 0xb46   : > { %v8018_v46 = vpop.f32.mrf.mxu3 }
 0xb47   : > { %v8019_v25 = vadd.f32 %v8018_v46, %v7950_v20  ;;  %v7951_v6 = vpop.f32.mrf.mxu1 }
 0xb48   : > { %v7922_v49 = vpop.f32.mrf.mxu2  ;;  %v7952_v63 = vadd.f32 %v7951_v6, %v14714_v47  ;;  %v8082_v1 = vpop.f32.mrf.mxu0  ;;  %v15881_v47 = vld [vmem:[#allocation48_spill] sm:$0xff] }
 0xb49   : > { %v14806_v4 = vadd.f32 %v7922_v49, %v7854_v50  ;;  %v8083_v3 = vadd.f32 %v8082_v1, %v8014_v27 }
 0xb4b   : > { %8121 = vmatmul.bf16.gmra.mxu0 %v15880_v7 }
 0xb4d   : > { %8180 = vmatmul.bf16.gmra.mxu2 %v15879_v26 }
 0xb4e   : > { %v8020_v14 = vpop.f32.mrf.mxu3 }
 0xb4f   : > { %v8021_v0 = vadd.f32 %v8020_v14, %v7952_v63  ;;  %v7954_v61 = vpop.f32.mrf.mxu1  ;;  %v15887_v63 = vld [vmem:[#allocation115_spill] sm:$0xff] }
 0xb50   : > { %v7925_v18 = vpop.f32.mrf.mxu2  ;;  %v7955_v42 = vadd.f32 %v7954_v61, %v14720_v51  ;;  %v8084_v8 = vpop.f32.mrf.mxu0  ;;  %v15883_v51 = vld [vmem:[#allocation86_spill] sm:$0xff]  ;;  %v8212_v1 = vmax.f32 %v15887_v63, 0.0  ;;  %v15894_v63 = vld [vmem:[#allocation119_spill] sm:$0xff] }
 0xb51   : > { %v14811_v44 = vadd.f32 %v7925_v18, %v7857_v15  ;;  %v8085_v50 = vadd.f32 %v8084_v8, %v8016_v39 }
 0xb52   : > { %7993 = vmatmul.bf16.gmra.mxu1 %v15873_v53 }
 0xb53   : > { %8062 = vmatmul.bf16.gmra.mxu3 %v15881_v47  ;;  %v15888_v47 = vld [vmem:[#allocation69_spill] sm:$0xff] }
 0xb56   : > { %v8023_v21 = vpop.f32.mrf.mxu3 }
 0xb57   : > { %v8024_v17 = vadd.f32 %v8023_v21, %v7955_v42  ;;  %v7956_v38 = vpop.f32.mrf.mxu1  ;;  %v8216_v21 = vmax.f32 %v15888_v47, 0.0 }
 0xb58   : > { %v7927_v19 = vpop.f32.mrf.mxu2  ;;  %v7957_v2 = vadd.f32 %v7956_v38, %v14726_v60  ;;  %v8087_v33 = vpop.f32.mrf.mxu0  ;;  %v15884_v60 = vld [vmem:[#allocation85_spill] sm:$0xff]  ;;  %v15889_v38 = vld [vmem:[#allocation94_spill] sm:$0xff] }
 0xb59   : > { %v14816_v59 = vadd.f32 %v7927_v19, %v7859_v32  ;;  %v8088_v34 = vadd.f32 %v8087_v33, %v8019_v25  ;;  %v15890_v19 = vld [vmem:[#allocation61_spill] sm:$0xff] }
 0xb5b   : > { %8126 = vmatmul.bf16.gmra.mxu0 %v15883_v51 }
 0xb5d   : > { %8185 = vmatmul.bf16.gmra.mxu2 %v15882_v45 }
 0xb5e   : > { %v8025_v15 = vpop.f32.mrf.mxu3 }
 0xb5f   : > { %v8026_v53 = vadd.f32 %v8025_v15, %v7957_v2  ;;  %v7959_v9 = vpop.f32.mrf.mxu1 }
 0xb60   : > { %v7930_v55 = vpop.f32.mrf.mxu2  ;;  %v7960_v27 = vadd.f32 %v7959_v9, %v14732_v28  ;;  %v8089_v52 = vpop.f32.mrf.mxu0  ;;  %v15886_v28 = vld [vmem:[#allocation76_spill] sm:$0xff] }
 0xb61   : > { %v14821_v57 = vadd.f32 %v7930_v55, %v7862_v58  ;;  %v8090_v32 = vadd.f32 %v8089_v52, %v8021_v0 }
 0xb62   : > { %7998 = vmatmul.bf16.gmra.mxu1 %v15876_v62 }
 0xb63   : > { %8067 = vmatmul.bf16.gmra.mxu3 %v15884_v60 }
 0xb66   : > { %v8028_v11 = vpop.f32.mrf.mxu3 }
 0xb67   : > { %v8029_v24 = vadd.f32 %v8028_v11, %v7960_v27  ;;  %v7961_v37 = vpop.f32.mrf.mxu1 }
 0xb68   : > { %v7932_v16 = vpop.f32.mrf.mxu2  ;;  %v7962_v39 = vadd.f32 %v7961_v37, %v14738_v13  ;;  %v8092_v54 = vpop.f32.mrf.mxu0 }
 0xb69   : > { %v14826_v36 = vadd.f32 %v7932_v16, %v7864_v31  ;;  %v8093_v20 = vadd.f32 %v8092_v54, %v8024_v17 }
 0xb6b   : > { %8131 = vmatmul.bf16.gmra.mxu0 %v15886_v28 }
 0xb6d   : > { %8190 = vmatmul.bf16.gmra.mxu2 %v15885_v41  ;;  %v15892_v41 = vld [vmem:[#allocation72_spill] sm:$0xff] }
 0xb6e   : > { %v8030_v58 = vpop.f32.mrf.mxu3  ;;  %v8224_v28 = vmax.f32 %v15892_v41, 0.0 }
 0xb6f   : > { %v8031_v62 = vadd.f32 %v8030_v58, %v7962_v39  ;;  %v7964_v5 = vpop.f32.mrf.mxu1 }
 0xb70   : > { %v7965_v46 = vadd.f32 %v7964_v5, %v14744_v43  ;;  %v8151_v25 = vpop.f32.mrf.mxu2  ;;  %v8094_v49 = vpop.f32.mrf.mxu0  ;;  %v15893_v5 = vld [vmem:[#allocation96_spill] sm:$0xff] }
 0xb71   : > { %v8152_v6 = vadd.f32 %v8151_v25, %v8083_v3  ;;  %v8095_v13 = vadd.f32 %v8094_v49, %v8026_v53 }
 0xb73   : > { %v8214_v26 = vmax.f32 %v8152_v6, 0.0 }
 0xb75   : > { %v14832_v31 = vmax.f32 %v8212_v1, %v8214_v26  ;;  %v8228_v1 = vmax.f32 %v15894_v63, 0.0  ;;  %v15901_v63 = vld [vmem:[#allocation81_spill] sm:$0xff] }
 0xb76   : > { %v8033_v7 = vpop.f32.mrf.mxu3 }
 0xb77   : > { %v8034_v14 = vadd.f32 %v8033_v7, %v7965_v46  ;;  %v7966_v0 = vpop.f32.mrf.mxu1 }
 0xb78   : > { %v7967_v61 = vadd.f32 %v7966_v0, %v14750_v29  ;;  %v8153_v18 = vpop.f32.mrf.mxu2  ;;  %v8097_v8 = vpop.f32.mrf.mxu0 }
 0xb79   : > { %v8154_v42 = vadd.f32 %v8153_v18, %v8085_v50  ;;  %v8098_v17 = vadd.f32 %v8097_v8, %v8029_v24  ;;  %v15891_v50 = vld [vmem:[#allocation117_spill] sm:$0xff]  ;;  %v15895_v18 = vld [vmem:[#allocation75_spill] sm:$0xff] }
 0xb7a   : > { %v8220_v9 = vmax.f32 %v15891_v50, 0.0 }
 0xb7b   : > { %v8218_v43 = vmax.f32 %v8154_v42, 0.0  ;;  %8136 = vmatmul.bf16.gmra.mxu0 %v15890_v19  ;;  %v15897_v19 = vld [vmem:[#allocation121_spill] sm:$0xff] }
 0xb7d   : > { %v14836_v3 = vmax.f32 %v8216_v21, %v8218_v43  ;;  %8195 = vmatmul.bf16.gmra.mxu2 %v15889_v38  ;;  %v15896_v21 = vld [vmem:[#allocation99_spill] sm:$0xff] }
 0xb7e   : > { %v8035_v2 = vpop.f32.mrf.mxu3 }
 0xb7f   : > { %v8036_v33 = vadd.f32 %v8035_v2, %v7967_v61  ;;  %v7969_v45 = vpop.f32.mrf.mxu1  ;;  %v8236_v2 = vmax.f32 %v15897_v19, 0.0 }
 0xb80   : > { %v7970_v51 = vadd.f32 %v7969_v45, %v14756_v56  ;;  %v8156_v15 = vpop.f32.mrf.mxu2  ;;  %v8099_v53 = vpop.f32.mrf.mxu0 }
 0xb81   : > { %v8157_v29 = vadd.f32 %v8156_v15, %v8088_v34  ;;  %v8100_v27 = vadd.f32 %v8099_v53, %v8031_v62 }
 0xb83   : > { %v8222_v55 = vmax.f32 %v8157_v29, 0.0  ;;  %v15898_v29 = vld [vmem:[#allocation78_spill] sm:$0xff] }
 0xb84   : > { %v8240_v53 = vmax.f32 %v15898_v29, 0.0  ;;  %v15903_v29 = vld [vmem:[#allocation84_spill] sm:$0xff] }
 0xb85   : > { %v14842_v52 = vmax.f32 %v8220_v9, %v8222_v55 }
 0xb86   : > { %v8038_v60 = vpop.f32.mrf.mxu3 }
 0xb87   : > { %v8039_v11 = vadd.f32 %v8038_v60, %v7970_v51  ;;  %v7971_v24 = vpop.f32.mrf.mxu1 }
 0xb88   : > { %v7972_v37 = vadd.f32 %v7971_v24, %v14762_v12  ;;  %v8158_v16 = vpop.f32.mrf.mxu2  ;;  %v8102_v54 = vpop.f32.mrf.mxu0  ;;  %v15899_v24 = vld [vmem:[#allocation123_spill] sm:$0xff] }
 0xb89   : > { %v8159_v39 = vadd.f32 %v8158_v16, %v8090_v32  ;;  %v8103_v58 = vadd.f32 %v8102_v54, %v8034_v14  ;;  %v8232_v14 = vmax.f32 %v15895_v18, 0.0 }
 0xb8b   : > { %v8226_v56 = vmax.f32 %v8159_v39, 0.0 }
 0xb8d   : > { %v14846_v34 = vmax.f32 %v8224_v28, %v8226_v56  ;;  %8200 = vmatmul.bf16.gmra.mxu2 %v15893_v5  ;;  %v15900_v56 = vld [vmem:[#allocation125_spill] sm:$0xff] }
 0xb8e   : > { %v8040_v46 = vpop.f32.mrf.mxu3  ;;  %v8248_v5 = vmax.f32 %v15900_v56, 0.0 }
 0xb8f   : > { %v8041_v62 = vadd.f32 %v8040_v46, %v7972_v37  ;;  %v8244_v37 = vmax.f32 %v15899_v24, 0.0 }
 0xb90   : > { %v8161_v25 = vpop.f32.mrf.mxu2  ;;  %v8104_v49 = vpop.f32.mrf.mxu0 }
 0xb91   : > { %v8162_v6 = vadd.f32 %v8161_v25, %v8093_v20  ;;  %v8105_v12 = vadd.f32 %v8104_v49, %v8036_v33 }
 0xb93   : > { %v8230_v26 = vmax.f32 %v8162_v6, 0.0 }
 0xb95   : > { %v14850_v7 = vmax.f32 %v8228_v1, %v8230_v26  ;;  %v8252_v1 = vmax.f32 %v15901_v63, 0.0 }
 0xb96   : > { %v8043_v16 = vpop.f32.mrf.mxu3 }
 0xb98   : > { %v8163_v32 = vpop.f32.mrf.mxu2  ;;  %v8107_v61 = vpop.f32.mrf.mxu0 }
 0xb99   : > { %v8164_v0 = vadd.f32 %v8163_v32, %v8095_v13  ;;  %v8108_v8 = vadd.f32 %v8107_v61, %v8039_v11  ;;  %v7974_v11 = vpop.f32.mrf.mxu1 }
 0xb9b   : > { %v8234_v42 = vmax.f32 %v8164_v0, 0.0 }
 0xb9d   : > { %v14853_v47 = vmax.f32 %v8232_v14, %v8234_v42  ;;  %8205 = vmatmul.bf16.gmra.mxu2 %v15896_v21  ;;  %v15902_v42 = vld [vmem:[#allocation126_spill] sm:$0xff] }
 0xb9e   : > { %v8045_v25 = vpop.f32.mrf.mxu3  ;;  %v8256_v21 = vmax.f32 %v15902_v42, 0.0 }
 0xba0   : > { %v8166_v43 = vpop.f32.mrf.mxu2  ;;  %v8109_v38 = vpop.f32.mrf.mxu0 }
 0xba1   : > { %v8167_v20 = vadd.f32 %v8166_v43, %v8098_v17  ;;  %v8110_v33 = vadd.f32 %v8109_v38, %v8041_v62  ;;  %v7976_v46 = vpop.f32.mrf.mxu1  ;;  %v7975_v43 = vadd.f32 %v7974_v11, %v14768_v22 }
 0xba3   : > { %v8238_v45 = vmax.f32 %v8167_v20, 0.0  ;;  %v8044_v38 = vadd.f32 %v8043_v16, %v7975_v43  ;;  %v15906_v43 = vld [vmem:[#allocation130_spill] sm:$0xff] }
 0xba5   : > { %v14857_v51 = vmax.f32 %v8236_v2, %v8238_v45 }
 0xba6   : > { %v8048_v61 = vpop.f32.mrf.mxu3 }
 0xba8   : > { %v8168_v15 = vpop.f32.mrf.mxu2  ;;  %v8112_v54 = vpop.f32.mrf.mxu0 }
 0xba9   : > { %v8169_v13 = vadd.f32 %v8168_v15, %v8100_v27  ;;  %v7979_v0 = vpop.f32.mrf.mxu1 }
 0xbab   : > { %v8242_v50 = vmax.f32 %v8169_v13, 0.0 }
 0xbad   : > { %v14860_v9 = vmax.f32 %v8240_v53, %v8242_v50  ;;  %v8260_v53 = vmax.f32 %v15903_v29, 0.0  ;;  %v7977_v50 = vadd.f32 %v7976_v46, %v14774_v40 }
 0xbae   : > { %v8050_v13 = vpop.f32.mrf.mxu3 }
 0xbb0   : > { %v8171_v55 = vpop.f32.mrf.mxu2  ;;  %v8114_v6 = vpop.f32.mrf.mxu0 }
 0xbb1   : > { %v8172_v60 = vadd.f32 %v8171_v55, %v8103_v58  ;;  %v7981_v2 = vpop.f32.mrf.mxu1 }
 0xbb3   : > { %v8246_v17 = vmax.f32 %v8172_v60, 0.0  ;;  %v8046_v60 = vadd.f32 %v8045_v25, %v7977_v50 }
 0xbb5   : > { %v14863_v39 = vmax.f32 %v8244_v37, %v8246_v17  ;;  %v8115_v37 = vadd.f32 %v8114_v6, %v8046_v60 }
 0xbb8   : > { %v8173_v41 = vpop.f32.mrf.mxu2 }
 0xbb9   : > { %v8174_v28 = vadd.f32 %v8173_v41, %v8105_v12  ;;  %v8117_v12 = vpop.f32.mrf.mxu0  ;;  %v7984_v16 = vpop.f32.mrf.mxu1 }
 0xbbb   : > { %v8250_v27 = vmax.f32 %v8174_v28, 0.0  ;;  %v7980_v28 = vadd.f32 %v7979_v0, %v14780_v48 }
 0xbbd   : > { %v14866_v62 = vmax.f32 %v8248_v5, %v8250_v27  ;;  %v8053_v5 = vpop.f32.mrf.mxu3  ;;  %v8049_v27 = vadd.f32 %v8048_v61, %v7980_v28 }
 0xbc0   : > { %v8176_v49 = vpop.f32.mrf.mxu2 }
 0xbc1   : > { %v8177_v58 = vadd.f32 %v8176_v49, %v8108_v8  ;;  %v8113_v8 = vadd.f32 %v8112_v54, %v8044_v38  ;;  %v8119_v55 = vpop.f32.mrf.mxu0  ;;  %v15904_v54 = vld [vmem:[#allocation128_spill] sm:$0xff]  ;;  %v8118_v49 = vadd.f32 %v8117_v12, %v8049_v27  ;;  %v7985_v38 = vadd.f32 %v7984_v16, %v14791_v23 }
 0xbc2   : > { %v8264_v41 = vmax.f32 %v15904_v54, 0.0 }
 0xbc3   : > { %v8254_v26 = vmax.f32 %v8177_v58, 0.0  ;;  %v15905_v58 = vld [vmem:[#allocation87_spill] sm:$0xff] }
 0xbc4   : > { %v8268_v63 = vmax.f32 %v15905_v58, 0.0 }
 0xbc5   : > { %v14869_v32 = vmax.f32 %v8252_v1, %v8254_v26  ;;  %v7982_v1 = vadd.f32 %v7981_v2, %v14786_v35  ;;  %v8055_v0 = vpop.f32.mrf.mxu3 }
 0xbc8   : > { %v8178_v18 = vpop.f32.mrf.mxu2 }
 0xbc9   : > { %v8179_v14 = vadd.f32 %v8178_v18, %v8110_v33  ;;  %v8122_v46 = vpop.f32.mrf.mxu0  ;;  %v7986_v18 = vpop.f32.mrf.mxu1 }
 0xbca   : > { %v7987_v60 = vadd.f32 %v7986_v18, %v14796_v10 }
 0xbcb   : > { %v8258_v20 = vmax.f32 %v8179_v14, 0.0  ;;  %v8051_v14 = vadd.f32 %v8050_v13, %v7982_v1 }
 0xbcd   : > { %v14873_v19 = vmax.f32 %v8256_v21, %v8258_v20  ;;  %v8120_v42 = vadd.f32 %v8119_v55, %v8051_v14  ;;  %v8272_v20 = vmax.f32 %v15906_v43, 0.0  ;;  %v8058_v29 = vpop.f32.mrf.mxu3 }
 0xbd0   : > { %v8181_v45 = vpop.f32.mrf.mxu2 }
 0xbd1   : > { %v8182_v15 = vadd.f32 %v8181_v45, %v8113_v8  ;;  %v8124_v12 = vpop.f32.mrf.mxu0  ;;  %v8054_v45 = vadd.f32 %v8053_v5, %v7985_v38  ;;  %v7989_v2 = vpop.f32.mrf.mxu1 }
 0xbd3   : > { %v8262_v33 = vmax.f32 %v8182_v15, 0.0  ;;  %v8123_v15 = vadd.f32 %v8122_v46, %v8054_v45 }
 0xbd5   : > { %v8332_v24 = vmax.f32 %v8260_v53, %v8262_v33  ;;  %v15907_v33 = vld [vmem:[#allocation90_spill] sm:$0xff]  ;;  %v8060_v54 = vpop.f32.mrf.mxu3 }
 0xbd6   : > { %v8276_v55 = vmax.f32 %v15907_v33, 0.0 }
 0xbd7   : > { %v8356_v22 = vmax.f32 %v14832_v31, %v8332_v24 }
 0xbd8   : > { %v8183_v11 = vpop.f32.mrf.mxu2 }
 0xbd9   : > { %8380 = vst [vmem:[%s14548_s23 + $0x8] sm:$0xff] %v8356_v22  ;;  %v8184_v17 = vadd.f32 %v8183_v11, %v8115_v37  ;;  %v8127_v50 = vpop.f32.mrf.mxu0  ;;  %v8056_v37 = vadd.f32 %v8055_v0, %v7987_v60 }
 0xbdb   : > { %v8266_v56 = vmax.f32 %v8184_v17, 0.0  ;;  %v8125_v22 = vadd.f32 %v8124_v12, %v8056_v37  ;;  %v7991_v17 = vpop.f32.mrf.mxu1 }
 0xbdd   : > { %v8334_v40 = vmax.f32 %v8264_v41, %v8266_v56  ;;  %v15908_v41 = vld [vmem:[#allocation105_spill] sm:$0xff]  ;;  %v7990_v56 = vadd.f32 %v7989_v2, %v14801_v30 }
 0xbde   : > { %v8280_v28 = vmax.f32 %v15908_v41, 0.0 }
 0xbdf   : > { %v8358_v25 = vmax.f32 %v14836_v3, %v8334_v40  ;;  %v8059_v40 = vadd.f32 %v8058_v29, %v7990_v56 }
 0xbe0   : > { %v8186_v6 = vpop.f32.mrf.mxu2 }
 0xbe1   : > { %8382 = vst [vmem:[%s14548_s23 + $0x18] sm:$0xff] %v8358_v25  ;;  %v8187_v31 = vadd.f32 %v8186_v6, %v8118_v49  ;;  %v8129_v27 = vpop.f32.mrf.mxu0  ;;  %v8128_v46 = vadd.f32 %v8127_v50, %v8059_v40 }
 0xbe3   : > { %v8270_v26 = vmax.f32 %v8187_v31, 0.0  ;;  %v7994_v6 = vpop.f32.mrf.mxu1  ;;  %v15909_v31 = vld [vmem:[#allocation112_spill] sm:$0xff] }
 0xbe4   : > { %v8284_v58 = vmax.f32 %v15909_v31, 0.0  ;;  %v15914_v31 = vld [vmem:[#allocation98_spill] sm:$0xff] }
 0xbe5   : > { %v8336_v48 = vmax.f32 %v8268_v63, %v8270_v26  ;;  %v7992_v63 = vadd.f32 %v7991_v17, %v14806_v4  ;;  %v8063_v26 = vpop.f32.mrf.mxu3 }
 0xbe7   : > { %v8360_v61 = vmax.f32 %v14842_v52, %v8336_v48  ;;  %v8061_v18 = vadd.f32 %v8060_v54, %v7992_v63 }
 0xbe8   : > { %v8188_v21 = vpop.f32.mrf.mxu2 }
 0xbe9   : > { %8384 = vst [vmem:[%s14548_s23 + $0x28] sm:$0xff] %v8360_v61  ;;  %v8189_v3 = vadd.f32 %v8188_v21, %v8120_v42  ;;  %v8132_v14 = vpop.f32.mrf.mxu0  ;;  %v8130_v48 = vadd.f32 %v8129_v27, %v8061_v18  ;;  %v15910_v61 = vld [vmem:[#allocation93_spill] sm:$0xff]  ;;  %v7995_v21 = vadd.f32 %v7994_v6, %v14811_v44 }
 0xbea   : > { %v8288_v12 = vmax.f32 %v15910_v61, 0.0 }
 0xbeb   : > { %v8274_v8 = vmax.f32 %v8189_v3, 0.0  ;;  %v7996_v43 = vpop.f32.mrf.mxu1 }
 0xbec   : > { %v7997_v29 = vadd.f32 %v7996_v43, %v14816_v59 }
 0xbed   : > { %v8338_v35 = vmax.f32 %v8272_v20, %v8274_v8  ;;  %v8064_v20 = vadd.f32 %v8063_v26, %v7995_v21  ;;  %v8065_v38 = vpop.f32.mrf.mxu3 }
 0xbef   : > { %v8362_v13 = vmax.f32 %v14846_v34, %v8338_v35  ;;  %v8133_v8 = vadd.f32 %v8132_v14, %v8064_v20 }
 0xbf0   : > { %v8191_v53 = vpop.f32.mrf.mxu2 }
 0xbf1   : > { %8386 = vst [vmem:[%s14548_s23 + $0x38] sm:$0xff] %v8362_v13  ;;  %v8192_v52 = vadd.f32 %v8191_v53, %v8123_v15  ;;  %v8134_v35 = vpop.f32.mrf.mxu0  ;;  %v15911_v15 = vld [vmem:[#allocation103_spill] sm:$0xff] }
 0xbf2   : > { %v8292_v13 = vmax.f32 %v15911_v15, 0.0 }
 0xbf3   : > { %v8278_v24 = vmax.f32 %v8192_v52, 0.0  ;;  %v8066_v52 = vadd.f32 %v8065_v38, %v7997_v29  ;;  %v7999_v50 = vpop.f32.mrf.mxu1 }
 0xbf5   : > { %v8340_v23 = vmax.f32 %v8276_v55, %v8278_v24  ;;  %v8135_v33 = vadd.f32 %v8134_v35, %v8066_v52  ;;  %v8068_v60 = vpop.f32.mrf.mxu3 }
 0xbf7   : > { %v8364_v11 = vmax.f32 %v14850_v7, %v8340_v23  ;;  %v15912_v23 = vld [vmem:[#allocation18_spill] sm:$0xff] }
 0xbf8   : > { %v8193_v16 = vpop.f32.mrf.mxu2 }
 0xbf9   : > { %8388 = vst [vmem:[%s14548_s23 + $0x48] sm:$0xff] %v8364_v11  ;;  %v8194_v34 = vadd.f32 %v8193_v16, %v8125_v22  ;;  %v8137_v37 = vpop.f32.mrf.mxu0  ;;  %v8296_v22 = vmax.f32 %v15912_v23, 0.0  ;;  %v8000_v11 = vadd.f32 %v7999_v50, %v14821_v57 }
 0xbfb   : > { %v8282_v5 = vmax.f32 %v8194_v34, 0.0  ;;  %v8069_v59 = vadd.f32 %v8068_v60, %v8000_v11  ;;  %v8001_v41 = vpop.f32.mrf.mxu1 }
 0xbfc   : > { %v8002_v40 = vadd.f32 %v8001_v41, %v14826_v36  ;;  %v8304_v36 = vmax.f32 %v15914_v31, 0.0 }
 0xbfd   : > { %v8342_v10 = vmax.f32 %v8280_v28, %v8282_v5  ;;  %v8138_v34 = vadd.f32 %v8137_v37, %v8069_v59  ;;  %v8070_v56 = vpop.f32.mrf.mxu3  ;;  %v15913_v5 = vld [vmem:[#allocation95_spill] sm:$0xff] }
 0xbfe   : > { %v8300_v27 = vmax.f32 %v15913_v5, 0.0 }
 0xbff   : > { %v8366_v49 = vmax.f32 %v14853_v47, %v8342_v10 }
 0xc00   : > { %v8196_v25 = vpop.f32.mrf.mxu2 }
 0xc01   : > { %8390 = vst [vmem:[%s14548_s23 + $0x58] sm:$0xff] %v8366_v49  ;;  %v8197_v7 = vadd.f32 %v8196_v25, %v8128_v46  ;;  %v8139_v57 = vpop.f32.mrf.mxu0  ;;  %v8071_v46 = vadd.f32 %v8070_v56, %v8002_v40 }
 0xc03   : > { %v8286_v1 = vmax.f32 %v8197_v7, 0.0  ;;  %v8140_v25 = vadd.f32 %v8139_v57, %v8071_v46 }
 0xc05   : > { %v8344_v30 = vmax.f32 %v8284_v58, %v8286_v1 }
 0xc07   : > { %v8368_v0 = vmax.f32 %v14857_v51, %v8344_v30 }
 0xc08   : > { %v8198_v42 = vpop.f32.mrf.mxu2 }
 0xc09   : > { %8392 = vst [vmem:[%s14548_s23 + $0x68] sm:$0xff] %v8368_v0  ;;  %v8199_v47 = vadd.f32 %v8198_v42, %v8130_v48 }
 0xc0b   : > { %v8290_v3 = vmax.f32 %v8199_v47, 0.0 }
 0xc0d   : > { %v8346_v4 = vmax.f32 %v8288_v12, %v8290_v3 }
 0xc0f   : > { %v8370_v45 = vmax.f32 %v14860_v9, %v8346_v4 }
 0xc10   : > { %v8201_v2 = vpop.f32.mrf.mxu2 }
 0xc11   : > { %8394 = vst [vmem:[%s14548_s23 + $0x78] sm:$0xff] %v8370_v45  ;;  %v8202_v51 = vadd.f32 %v8201_v2, %v8133_v8 }
 0xc13   : > { %v8294_v53 = vmax.f32 %v8202_v51, 0.0 }
 0xc15   : > { %v8348_v44 = vmax.f32 %v8292_v13, %v8294_v53 }
 0xc17   : > { %v8372_v55 = vmax.f32 %v14863_v39, %v8348_v44 }
 0xc18   : > { %v8203_v24 = vpop.f32.mrf.mxu2 }
 0xc19   : > { %8396 = vst [vmem:[%s14548_s23 + $0x88] sm:$0xff] %v8372_v55  ;;  %v8204_v9 = vadd.f32 %v8203_v24, %v8135_v33 }
 0xc1b   : > { %v8298_v17 = vmax.f32 %v8204_v9, 0.0 }
 0xc1d   : > { %v8350_v16 = vmax.f32 %v8296_v22, %v8298_v17 }
 0xc1f   : > { %v8374_v54 = vmax.f32 %v14866_v62, %v8350_v16 }
 0xc20   : > { %v8206_v28 = vpop.f32.mrf.mxu2 }
 0xc21   : > { %8398 = vst [vmem:[%s14548_s23 + $0x98] sm:$0xff] %v8374_v54  ;;  %v8207_v39 = vadd.f32 %v8206_v28, %v8138_v34 }
 0xc23   : > { %v8302_v10 = vmax.f32 %v8207_v39, 0.0 }
 0xc25   : > { %v8352_v49 = vmax.f32 %v8300_v27, %v8302_v10 }
 0xc27   : > { %v8376_v62 = vmax.f32 %v14869_v32, %v8352_v49 }
 0xc28   : > { %v8208_v7 = vpop.f32.mrf.mxu2 }
 0xc29   : > { %8400 = vst [vmem:[%s14548_s23 + $0xa8] sm:$0xff] %v8376_v62  ;;  %v8209_v6 = vadd.f32 %v8208_v7, %v8140_v25 }
 0xc2b   : > { %v8306_v58 = vmax.f32 %v8209_v6, 0.0 }
 0xc2d   : > { %v8354_v63 = vmax.f32 %v8304_v36, %v8306_v58 }
 0xc2f   : > { %v8378_v1 = vmax.f32 %v14873_v19, %v8354_v63 }
 0xc31   : > { %8402 = vst [vmem:[%s14548_s23 + $0xb8] sm:$0xff] %v8378_v1 }
 0xc32   : > { %10903 = shalt.err (!%p10900_p8)
}
 0xc33   : > { %s10961_s13 = smov 256   ;;  %s10962_s14 = smov 16  }
 0xc34   : > { %10656 = dma.vmem_to_hbm [thread:$0]  (%p11031_p5), %s8418_s9, 3072, %s8420_s11, %s8404_s22, %s10961_s13, %s10961_s13, %s10962_s14  }
 0xc35 PF: > { %p10683_p9 = scmp.ge.s32.totalorder %s10950_s21, 2  ;;  %s8434_s16 = sand.u32 1, %s10938_s18  }
 0xc36   : > { %s8435_s17 = scalar_lea.sflag [#allocation6], %s8434_s16 }
 0xc37   : > { %p10672_p10 = pnand %p10683_p9, %p11035_p6 }
 0xc39   : > { %p10673_p11 = pneg %p10672_p10 }
 0xc3b   : > { %10933 = dma.done.wait (%p10673_p11), %s8435_s17, 3072  }
 0xc3c   : > { %10935 = vsyncadd (%p10673_p11), %s8435_s17, 4294964224  ;;  %p18_p12 = scmp.ge.s32.totalorder %s11018_s24, 4   ;;  %s15915_s18 = smov %s10942_s19 }
 0xc3d   : > { %s15916_s19 = smov %s10946_s20  ;;  %s15917_s20 = smov %s11029_s27 }
 0xc3e   : > { %s15918_s21 = smov %s11018_s24  ;;  %20 = sbr.rel (!%p18_p12) target bundleno = 9 (0x9), region = 92 }
 0xc43   :  { %8441 = vsyncpa [#allocation5], 1 }
 0xc44   :  { %8443 = vsyncpa [#allocation5 + $0x1], 1 }
 0xc45   :  { %8444 = vsyncpa [#allocation8], 1 }
 0xc46   :  { %8445 = vsyncpa [#allocation11], 1 }
 0xc47   :  { %8446 = vsyncpa [#allocation6], 1 }
 0xc48   :  { %8448 = vsyncpa [#allocation6 + $0x1], 1 }

</bundles_post_ra>
